<compile_context>
chip_gen: v7x
topology: tpu7x:2x2x1
jax: 0.10.0
libtpu: 0.0.40
codegen_flags: <defaults>
</compile_context>

<pallas_src>
import functools

import jax
import jax.numpy as jnp
from jax import lax
from jax.experimental import pallas as pl
from jax.experimental.pallas import tpu as pltpu

# constants.half_Hartree * constants.Bohr  (eV * Angstrom)
HALF_HARTREE = 0.5 * 27.211386245988
BOHR = 0.52917721092
FACTOR = HALF_HARTREE * BOHR

ISUB = 128                 # i sub-tile (sublane axis of the compute tile)
JSUB = 128                 # j sub-tile (lane axis) — accumulator lane width
NI = 2                     # i sub-tiles per grid step
NJ = 4                     # j sub-chunks per grid step
TI = NI * ISUB             # 256 i-rows per grid step
JT = NJ * JSUB             # 512 j-cols per grid step


def _make_lr_coulomb_kernel(rc: float):
    inv_rc2 = 1.0 / (float(rc) * float(rc))

    def kernel(ifeat_ref, jfeat_ref, o_ref, acc_ref):
        j_blk = pl.program_id(2)

        @pl.when(j_blk == 0)
        def _init():
            acc_ref[...] = jnp.zeros_like(acc_ref)

        # i-rows of this grid step, processed in ISUB-row sub-tiles so the
        # per-chunk vreg working set stays at (128, 128).
        for s in range(NI):
            r0, r1 = s * ISUB, (s + 1) * ISUB
            itile = ifeat_ref[0, r0:r1, :]            # (ISUB, 4) = [x y z q*mask]
            # per-i-tile unpacking hoisted out of the innermost j loop
            xi = itile[:, 0:1]                        # (ISUB, 1) columns; the lane
            yi = itile[:, 1:2]                        # broadcast against the j row
            zi = itile[:, 2:3]                        # vectors happens inside the
            qi = itile[:, 3:4]                        # binary ops below.

            acc = acc_ref[r0:r1, :]                   # (ISUB, JSUB), carried in vregs
            for c in range(NJ):                       # fully unrolled j sub-chunks
                c0, c1 = c * JSUB, (c + 1) * JSUB
                jt = jfeat_ref[0, :, c0:c1]           # (4, JSUB)
                xj, yj, zj, qj = jt[0:1], jt[1:2], jt[2:3], jt[3:4]

                # pairwise squared distance, accumulated to keep the live set small
                dx = xi - xj
                d2 = dx * dx
                dy = yi - yj
                d2 = d2 + dy * dy
                dz = zi - zj
                d2 = d2 + dz * dz                     # (ISUB, JSUB)

                # pair weight; padding mask already folded into q in the wrapper
                w = qi * qj

                # 1/d via rsqrt; d2 == 0 exactly for self pairs and padded-padded
                # pairs, so this single select replaces the iota diagonal mask.
                inv_d = jnp.where(d2 > 1e-12, lax.rsqrt(d2), 0.0)

                # fc_lr = 1 - exp_cutoff(d, rc), branch-free:
                #   exp(1 - 1/(1 - x2)) == exp(-x2 / (1 - x2)); clamping the
                #   denominator makes the exponent <= -1e6 for x2 >= 1, so the
                #   exp underflows to exactly 0 there (no compare / selects).
                # TODO(synk): analytic form of aimnet.ops.exp_cutoff reconstructed.
                x2 = d2 * inv_rc2
                denom = jnp.maximum(1.0 - x2, 1e-6)
                cutoff = jnp.exp(-x2 / denom)

                acc = acc + w * (1.0 - cutoff) * inv_d
            acc_ref[r0:r1, :] = acc                   # one acc RMW per i-subtile/step

        @pl.when(j_blk == pl.num_programs(2) - 1)
        def _finalize():
            # one cross-sublane reduce per (molecule, i-block), off the hot loop;
            # the final 128-lane reduce + FACTOR scale happen in the wrapper.
            o_ref[...] = jnp.sum(acc_ref[...], axis=0,
                                 keepdims=True).reshape(1, 1, 1, JSUB)

    return kernel


@functools.partial(jax.jit, static_argnames=("rc",))
def lr_coulomb_simple(coord, charges, mask, rc=4.6):
    """Pallas implementation of LRCoulomb.coul_simple (dense batched layout)."""
    coord = coord.astype(jnp.float32)
    charges = charges.astype(jnp.float32)
    mask = mask.astype(jnp.float32)
    B, N, _ = coord.shape

    # pad atom axis to a multiple of JT (JT is a multiple of TI, so this covers
    # both); padded atoms carry q*mask = 0 and contribute exactly zero.
    n_pad = ((N + JT - 1) // JT) * JT
    pad = n_pad - N
    if pad:
        coord = jnp.pad(coord, ((0, 0), (0, pad), (0, 0)))
        charges = jnp.pad(charges, ((0, 0), (0, pad)))
        mask = jnp.pad(mask, ((0, 0), (0, pad)))

    # packed feature streams: 2 DMAs per grid step instead of 10
    qm = charges * mask
    ifeat = jnp.concatenate([coord, qm[..., None]], axis=-1)   # (B, n_pad, 4)
    jfeat = jnp.swapaxes(ifeat, 1, 2)                          # (B, 4, n_pad)

    n_i = n_pad // TI
    grid = (B, n_i, n_pad // JT)

    out = pl.pallas_call(
        _make_lr_coulomb_kernel(rc),
        out_shape=jax.ShapeDtypeStruct((B, n_i, 1, JSUB), jnp.float32),
        grid_spec=pltpu.PrefetchScalarGridSpec(
            num_scalar_prefetch=0,
            grid=grid,
            in_specs=[
                pl.BlockSpec((1, TI, 4), lambda b, i, j: (b, i, 0)),
                pl.BlockSpec((1, 4, JT), lambda b, i, j: (b, 0, j)),
            ],
            out_specs=pl.BlockSpec((1, 1, 1, JSUB), lambda b, i, j: (b, i, 0, 0)),
            scratch_shapes=[pltpu.VMEM((TI, JSUB), jnp.float32)],
        ),
        compiler_params=pltpu.CompilerParams(
            dimension_semantics=("parallel", "parallel", "arbitrary")),
    )(ifeat, jfeat)

    # final lane reduce (per-i-block 128-lane partial sums) + unit conversion
    return FACTOR * jnp.sum(out, axis=(1, 2, 3))


def lr_coulomb_forward(data, key_in="charges", key_out="e_h", rc=4.6):
    """Mirrors LRCoulomb.forward with method='simple'."""
    # TODO(synk): 'dsf' and 'ewald' methods of LRCoulomb are not implemented here.
    e = lr_coulomb_simple(data["coord"], data[key_in], data["mask"], rc=rc)
    if key_out in data:
        data[key_out] = data[key_out] + e
    else:
        data[key_out] = e
    return data


# ----------------------------- pure-JAX reference -----------------------------

def _exp_cutoff_ref(d, rc):
    # TODO(synk): exact analytic form of aimnet.ops.exp_cutoff reconstructed here
    x = d / rc
    inside = x < 1.0
    denom = jnp.where(inside, 1.0 - x * x, 1.0)
    return jnp.where(inside, jnp.exp(1.0 - 1.0 / denom), 0.0)


def _reference(coord, charges, mask, rc=4.6):
    coord = coord.astype(jnp.float32)
    q = charges.astype(jnp.float32)
    m = mask.astype(jnp.float32)
    B, N, _ = coord.shape
    diff = coord[:, :, None, :] - coord[:, None, :, :]
    d2 = jnp.sum(diff * diff, axis=-1)
    eye = jnp.eye(N, dtype=jnp.float32)
    pair_mask = m[:, :, None] * m[:, None, :] * (1.0 - eye)[None]
    d = jnp.sqrt(jnp.where(pair_mask > 0.0, d2, 1.0))
    fc_lr = 1.0 - _exp_cutoff_ref(d, rc)
    q_ij = q[:, :, None] * q[:, None, :]
    e_ij = pair_mask * fc_lr * q_ij / d
    return FACTOR * jnp.sum(e_ij, axis=(-2, -1))


if __name__ == "__main__":
    key = jax.random.PRNGKey(0)
    k1, k2, k3, k4 = jax.random.split(key, 4)

    # --- small case: B=2, N=16, includes masked (padding) atoms ---
    B, N = 2, 16
    coord = jax.random.uniform(k1, (B, N, 3), jnp.float32, minval=0.0, maxval=8.0)
    charges = 0.3 * jax.random.normal(k2, (B, N), jnp.float32)
    mask = jnp.ones((B, N), jnp.float32).at[1, N - 3:].set(0.0)
    charges = charges * mask

    data = {"coord": coord, "charges": charges, "mask": mask}
    out = lr_coulomb_forward(data, rc=4.6)
    e = jax.block_until_ready(out["e_h"])
    e_ref = _reference(coord, charges, mask, rc=4.6)
    assert e.shape == (B,)
    assert bool(jnp.all(jnp.isfinite(e)))
    assert jnp.allclose(e, e_ref, rtol=1e-4, atol=1e-5), (e, e_ref)

    # --- larger case: exercises multiple i-blocks and j-block accumulation ---
    # positive charges avoid a cancellation-dominated total, so the f32
    # accumulation-order difference vs the dense reference stays negligible.
    B2, N2 = 1, 600
    coord2 = jax.random.uniform(k3, (B2, N2, 3), jnp.float32, minval=0.0, maxval=20.0)
    charges2 = 0.05 + 0.2 * jax.random.uniform(k4, (B2, N2), jnp.float32)
    mask2 = jnp.ones((B2, N2), jnp.float32).at[0, N2 - 37:].set(0.0)
    charges2 = charges2 * mask2

    e2 = jax.block_until_ready(lr_coulomb_simple(coord2, charges2, mask2, rc=4.6))
    e2_ref = _reference(coord2, charges2, mask2, rc=4.6)
    assert e2.shape == (B2,)
    assert bool(jnp.all(jnp.isfinite(e2)))
    assert jnp.allclose(e2, e2_ref, rtol=1e-4, atol=1e-5), (e2, e2_ref)

    print("KERNEL_OK")
</pallas_src>

<mosaic_0001>
module attributes {stable_mosaic.version = 11 : i64} {
  func.func @kernel(%arg0: i32, %arg1: i32, %arg2: i32, %arg3: memref<1x256x4xf32, #tpu.memory_space<vmem>>, %arg4: memref<1x4x512xf32, #tpu.memory_space<vmem>>, %arg5: memref<1x1x1x128xf32, #tpu.memory_space<vmem>>, %arg6: memref<256x128xf32, #tpu.memory_space<vmem>>) attributes {dimension_semantics = [#tpu.dimension_semantics<parallel>, #tpu.dimension_semantics<parallel>, #tpu.dimension_semantics<arbitrary>], iteration_bounds = array<i64: 2, 2, 1>, scalar_prefetch = 0 : i64, scratch_operands = 1 : i64, tpu.core_type = #tpu.core_type<tc>, window_params = [{transform_indices = @transform_0, window_bounds = array<i64: 1, 256, 4>}, {transform_indices = @transform_1, window_bounds = array<i64: 1, 4, 512>}, {transform_indices = @transform_2, window_bounds = array<i64: 1, 1, 1, 128>}]} {
    %c0_i32 = arith.constant 0 : i32
    %0 = arith.cmpi eq, %arg2, %c0_i32 : i32
    %1 = arith.extui %0 : i1 to i32
    %c0_i32_0 = arith.constant 0 : i32
    %2 = arith.cmpi ne, %1, %c0_i32_0 : i32
    scf.if %2 {
      %cst_92 = arith.constant 0.000000e+00 : f32
      %366 = vector.broadcast %cst_92 : f32 to vector<256x128xf32>
      %c0_93 = arith.constant 0 : index
      %c0_94 = arith.constant 0 : index
      %367 = vector.load %arg6[%c0_93, %c0_94] : memref<256x128xf32, #tpu.memory_space<vmem>>, vector<256x128xf32>
      tpu.vector_store %arg6[%c0_93, %c0_94], %366 {strides = array<i32>} : memref<256x128xf32, #tpu.memory_space<vmem>>, vector<256x128xf32>,
    } else {
    }
    %c0 = arith.constant 0 : index
    %c0_1 = arith.constant 0 : index
    %c0_2 = arith.constant 0 : index
    %3 = vector.load %arg3[%c0, %c0_1, %c0_2] : memref<1x256x4xf32, #tpu.memory_space<vmem>>, vector<1x128x4xf32>
    %4 = vector.shape_cast %3 : vector<1x128x4xf32> to vector<128x4xf32>
    %5 = vector.extract_strided_slice %4 {offsets = [0, 0], sizes = [128, 1], strides = [1, 1]} : vector<128x4xf32> to vector<128x1xf32>
    %6 = vector.extract_strided_slice %4 {offsets = [0, 1], sizes = [128, 1], strides = [1, 1]} : vector<128x4xf32> to vector<128x1xf32>
    %7 = vector.extract_strided_slice %4 {offsets = [0, 2], sizes = [128, 1], strides = [1, 1]} : vector<128x4xf32> to vector<128x1xf32>
    %8 = vector.extract_strided_slice %4 {offsets = [0, 3], sizes = [128, 1], strides = [1, 1]} : vector<128x4xf32> to vector<128x1xf32>
    %c0_3 = arith.constant 0 : index
    %c0_4 = arith.constant 0 : index
    %9 = vector.load %arg6[%c0_3, %c0_4] : memref<256x128xf32, #tpu.memory_space<vmem>>, vector<128x128xf32>
    %c0_5 = arith.constant 0 : index
    %c0_6 = arith.constant 0 : index
    %c0_7 = arith.constant 0 : index
    %10 = vector.load %arg4[%c0_5, %c0_6, %c0_7] : memref<1x4x512xf32, #tpu.memory_space<vmem>>, vector<1x4x128xf32>
    %11 = vector.shape_cast %10 : vector<1x4x128xf32> to vector<4x128xf32>
    %12 = vector.extract_strided_slice %11 {offsets = [0, 0], sizes = [1, 128], strides = [1, 1]} : vector<4x128xf32> to vector<1x128xf32>
    %13 = vector.extract_strided_slice %11 {offsets = [1, 0], sizes = [1, 128], strides = [1, 1]} : vector<4x128xf32> to vector<1x128xf32>
    %14 = vector.extract_strided_slice %11 {offsets = [2, 0], sizes = [1, 128], strides = [1, 1]} : vector<4x128xf32> to vector<1x128xf32>
    %15 = vector.extract_strided_slice %11 {offsets = [3, 0], sizes = [1, 128], strides = [1, 1]} : vector<4x128xf32> to vector<1x128xf32>
    %16 = vector.broadcast %5 : vector<128x1xf32> to vector<128x128xf32>
    %17 = vector.broadcast %12 : vector<1x128xf32> to vector<128x128xf32>
    %18 = arith.subf %16, %17 : vector<128x128xf32>
    %19 = arith.mulf %18, %18 : vector<128x128xf32>
    %20 = vector.broadcast %6 : vector<128x1xf32> to vector<128x128xf32>
    %21 = vector.broadcast %13 : vector<1x128xf32> to vector<128x128xf32>
    %22 = arith.subf %20, %21 : vector<128x128xf32>
    %23 = arith.mulf %22, %22 : vector<128x128xf32>
    %24 = arith.addf %19, %23 : vector<128x128xf32>
    %25 = vector.broadcast %7 : vector<128x1xf32> to vector<128x128xf32>
    %26 = vector.broadcast %14 : vector<1x128xf32> to vector<128x128xf32>
    %27 = arith.subf %25, %26 : vector<128x128xf32>
    %28 = arith.mulf %27, %27 : vector<128x128xf32>
    %29 = arith.addf %24, %28 : vector<128x128xf32>
    %30 = vector.broadcast %8 : vector<128x1xf32> to vector<128x128xf32>
    %31 = vector.broadcast %15 : vector<1x128xf32> to vector<128x128xf32>
    %32 = arith.mulf %30, %31 : vector<128x128xf32>
    %cst = arith.constant 9.99999996E-13 : f32
    %33 = vector.broadcast %cst : f32 to vector<128x128xf32>
    %34 = arith.cmpf ogt, %29, %33 : vector<128x128xf32>
    %35 = math.rsqrt %29 : vector<128x128xf32>
    %cst_8 = arith.constant 0.000000e+00 : f32
    %36 = vector.broadcast %cst_8 : f32 to vector<128x128xf32>
    %37 = arith.select %34, %35, %36 : vector<128x128xi1>, vector<128x128xf32>
    %cst_9 = arith.constant 0.0472589806 : f32
    %38 = vector.broadcast %cst_9 : f32 to vector<128x128xf32>
    %39 = arith.mulf %29, %38 : vector<128x128xf32>
    %cst_10 = arith.constant 1.000000e+00 : f32
    %40 = vector.broadcast %cst_10 : f32 to vector<128x128xf32>
    %41 = arith.subf %40, %39 : vector<128x128xf32>
    %cst_11 = arith.constant 9.99999997E-7 : f32
    %42 = vector.broadcast %cst_11 : f32 to vector<128x128xf32>
    %43 = arith.maximumf %41, %42 : vector<128x128xf32>
    %cst_12 = arith.constant 0.000000e+00 : f32
    %44 = vector.broadcast %cst_12 : f32 to vector<128x128xf32>
    %45 = arith.subf %44, %39 : vector<128x128xf32>
    %46 = arith.divf %45, %43 : vector<128x128xf32>
    %47 = math.exp %46 : vector<128x128xf32>
    %cst_13 = arith.constant 1.000000e+00 : f32
    %48 = vector.broadcast %cst_13 : f32 to vector<128x128xf32>
    %49 = arith.subf %48, %47 : vector<128x128xf32>
    %50 = arith.mulf %32, %49 : vector<128x128xf32>
    %51 = arith.mulf %50, %37 : vector<128x128xf32>
    %52 = arith.addf %9, %51 : vector<128x128xf32>
    %c0_14 = arith.constant 0 : index
    %c0_15 = arith.constant 0 : index
    %c128 = arith.constant 128 : index
    %53 = vector.load %arg4[%c0_14, %c0_15, %c128] : memref<1x4x512xf32, #tpu.memory_space<vmem>>, vector<1x4x128xf32>
    %54 = vector.shape_cast %53 : vector<1x4x128xf32> to vector<4x128xf32>
    %55 = vector.extract_strided_slice %54 {offsets = [0, 0], sizes = [1, 128], strides = [1, 1]} : vector<4x128xf32> to vector<1x128xf32>
    %56 = vector.extract_strided_slice %54 {offsets = [1, 0], sizes = [1, 128], strides = [1, 1]} : vector<4x128xf32> to vector<1x128xf32>
    %57 = vector.extract_strided_slice %54 {offsets = [2, 0], sizes = [1, 128], strides = [1, 1]} : vector<4x128xf32> to vector<1x128xf32>
    %58 = vector.extract_strided_slice %54 {offsets = [3, 0], sizes = [1, 128], strides = [1, 1]} : vector<4x128xf32> to vector<1x128xf32>
    %59 = vector.broadcast %5 : vector<128x1xf32> to vector<128x128xf32>
    %60 = vector.broadcast %55 : vector<1x128xf32> to vector<128x128xf32>
    %61 = arith.subf %59, %60 : vector<128x128xf32>
    %62 = arith.mulf %61, %61 : vector<128x128xf32>
    %63 = vector.broadcast %6 : vector<128x1xf32> to vector<128x128xf32>
    %64 = vector.broadcast %56 : vector<1x128xf32> to vector<128x128xf32>
    %65 = arith.subf %63, %64 : vector<128x128xf32>
    %66 = arith.mulf %65, %65 : vector<128x128xf32>
    %67 = arith.addf %62, %66 : vector<128x128xf32>
    %68 = vector.broadcast %7 : vector<128x1xf32> to vector<128x128xf32>
    %69 = vector.broadcast %57 : vector<1x128xf32> to vector<128x128xf32>
    %70 = arith.subf %68, %69 : vector<128x128xf32>
    %71 = arith.mulf %70, %70 : vector<128x128xf32>
    %72 = arith.addf %67, %71 : vector<128x128xf32>
    %73 = vector.broadcast %8 : vector<128x1xf32> to vector<128x128xf32>
    %74 = vector.broadcast %58 : vector<1x128xf32> to vector<128x128xf32>
    %75 = arith.mulf %73, %74 : vector<128x128xf32>
    %cst_16 = arith.constant 9.99999996E-13 : f32
    %76 = vector.broadcast %cst_16 : f32 to vector<128x128xf32>
    %77 = arith.cmpf ogt, %72, %76 : vector<128x128xf32>
    %78 = math.rsqrt %72 : vector<128x128xf32>
    %cst_17 = arith.constant 0.000000e+00 : f32
    %79 = vector.broadcast %cst_17 : f32 to vector<128x128xf32>
    %80 = arith.select %77, %78, %79 : vector<128x128xi1>, vector<128x128xf32>
    %cst_18 = arith.constant 0.0472589806 : f32
    %81 = vector.broadcast %cst_18 : f32 to vector<128x128xf32>
    %82 = arith.mulf %72, %81 : vector<128x128xf32>
    %cst_19 = arith.constant 1.000000e+00 : f32
    %83 = vector.broadcast %cst_19 : f32 to vector<128x128xf32>
    %84 = arith.subf %83, %82 : vector<128x128xf32>
    %cst_20 = arith.constant 9.99999997E-7 : f32
    %85 = vector.broadcast %cst_20 : f32 to vector<128x128xf32>
    %86 = arith.maximumf %84, %85 : vector<128x128xf32>
    %cst_21 = arith.constant 0.000000e+00 : f32
    %87 = vector.broadcast %cst_21 : f32 to vector<128x128xf32>
    %88 = arith.subf %87, %82 : vector<128x128xf32>
    %89 = arith.divf %88, %86 : vector<128x128xf32>
    %90 = math.exp %89 : vector<128x128xf32>
    %cst_22 = arith.constant 1.000000e+00 : f32
    %91 = vector.broadcast %cst_22 : f32 to vector<128x128xf32>
    %92 = arith.subf %91, %90 : vector<128x128xf32>
    %93 = arith.mulf %75, %92 : vector<128x128xf32>
    %94 = arith.mulf %93, %80 : vector<128x128xf32>
    %95 = arith.addf %52, %94 : vector<128x128xf32>
    %c0_23 = arith.constant 0 : index
    %c0_24 = arith.constant 0 : index
    %c256 = arith.constant 256 : index
    %96 = vector.load %arg4[%c0_23, %c0_24, %c256] : memref<1x4x512xf32, #tpu.memory_space<vmem>>, vector<1x4x128xf32>
    %97 = vector.shape_cast %96 : vector<1x4x128xf32> to vector<4x128xf32>
    %98 = vector.extract_strided_slice %97 {offsets = [0, 0], sizes = [1, 128], strides = [1, 1]} : vector<4x128xf32> to vector<1x128xf32>
    %99 = vector.extract_strided_slice %97 {offsets = [1, 0], sizes = [1, 128], strides = [1, 1]} : vector<4x128xf32> to vector<1x128xf32>
    %100 = vector.extract_strided_slice %97 {offsets = [2, 0], sizes = [1, 128], strides = [1, 1]} : vector<4x128xf32> to vector<1x128xf32>
    %101 = vector.extract_strided_slice %97 {offsets = [3, 0], sizes = [1, 128], strides = [1, 1]} : vector<4x128xf32> to vector<1x128xf32>
    %102 = vector.broadcast %5 : vector<128x1xf32> to vector<128x128xf32>
    %103 = vector.broadcast %98 : vector<1x128xf32> to vector<128x128xf32>
    %104 = arith.subf %102, %103 : vector<128x128xf32>
    %105 = arith.mulf %104, %104 : vector<128x128xf32>
    %106 = vector.broadcast %6 : vector<128x1xf32> to vector<128x128xf32>
    %107 = vector.broadcast %99 : vector<1x128xf32> to vector<128x128xf32>
    %108 = arith.subf %106, %107 : vector<128x128xf32>
    %109 = arith.mulf %108, %108 : vector<128x128xf32>
    %110 = arith.addf %105, %109 : vector<128x128xf32>
    %111 = vector.broadcast %7 : vector<128x1xf32> to vector<128x128xf32>
    %112 = vector.broadcast %100 : vector<1x128xf32> to vector<128x128xf32>
    %113 = arith.subf %111, %112 : vector<128x128xf32>
    %114 = arith.mulf %113, %113 : vector<128x128xf32>
    %115 = arith.addf %110, %114 : vector<128x128xf32>
    %116 = vector.broadcast %8 : vector<128x1xf32> to vector<128x128xf32>
    %117 = vector.broadcast %101 : vector<1x128xf32> to vector<128x128xf32>
    %118 = arith.mulf %116, %117 : vector<128x128xf32>
    %cst_25 = arith.constant 9.99999996E-13 : f32
    %119 = vector.broadcast %cst_25 : f32 to vector<128x128xf32>
    %120 = arith.cmpf ogt, %115, %119 : vector<128x128xf32>
    %121 = math.rsqrt %115 : vector<128x128xf32>
    %cst_26 = arith.constant 0.000000e+00 : f32
    %122 = vector.broadcast %cst_26 : f32 to vector<128x128xf32>
    %123 = arith.select %120, %121, %122 : vector<128x128xi1>, vector<128x128xf32>
    %cst_27 = arith.constant 0.0472589806 : f32
    %124 = vector.broadcast %cst_27 : f32 to vector<128x128xf32>
    %125 = arith.mulf %115, %124 : vector<128x128xf32>
    %cst_28 = arith.constant 1.000000e+00 : f32
    %126 = vector.broadcast %cst_28 : f32 to vector<128x128xf32>
    %127 = arith.subf %126, %125 : vector<128x128xf32>
    %cst_29 = arith.constant 9.99999997E-7 : f32
    %128 = vector.broadcast %cst_29 : f32 to vector<128x128xf32>
    %129 = arith.maximumf %127, %128 : vector<128x128xf32>
    %cst_30 = arith.constant 0.000000e+00 : f32
    %130 = vector.broadcast %cst_30 : f32 to vector<128x128xf32>
    %131 = arith.subf %130, %125 : vector<128x128xf32>
    %132 = arith.divf %131, %129 : vector<128x128xf32>
    %133 = math.exp %132 : vector<128x128xf32>
    %cst_31 = arith.constant 1.000000e+00 : f32
    %134 = vector.broadcast %cst_31 : f32 to vector<128x128xf32>
    %135 = arith.subf %134, %133 : vector<128x128xf32>
    %136 = arith.mulf %118, %135 : vector<128x128xf32>
    %137 = arith.mulf %136, %123 : vector<128x128xf32>
    %138 = arith.addf %95, %137 : vector<128x128xf32>
    %c0_32 = arith.constant 0 : index
    %c0_33 = arith.constant 0 : index
    %c384 = arith.constant 384 : index
    %139 = vector.load %arg4[%c0_32, %c0_33, %c384] : memref<1x4x512xf32, #tpu.memory_space<vmem>>, vector<1x4x128xf32>
    %140 = vector.shape_cast %139 : vector<1x4x128xf32> to vector<4x128xf32>
    %141 = vector.extract_strided_slice %140 {offsets = [0, 0], sizes = [1, 128], strides = [1, 1]} : vector<4x128xf32> to vector<1x128xf32>
    %142 = vector.extract_strided_slice %140 {offsets = [1, 0], sizes = [1, 128], strides = [1, 1]} : vector<4x128xf32> to vector<1x128xf32>
    %143 = vector.extract_strided_slice %140 {offsets = [2, 0], sizes = [1, 128], strides = [1, 1]} : vector<4x128xf32> to vector<1x128xf32>
    %144 = vector.extract_strided_slice %140 {offsets = [3, 0], sizes = [1, 128], strides = [1, 1]} : vector<4x128xf32> to vector<1x128xf32>
    %145 = vector.broadcast %5 : vector<128x1xf32> to vector<128x128xf32>
    %146 = vector.broadcast %141 : vector<1x128xf32> to vector<128x128xf32>
    %147 = arith.subf %145, %146 : vector<128x128xf32>
    %148 = arith.mulf %147, %147 : vector<128x128xf32>
    %149 = vector.broadcast %6 : vector<128x1xf32> to vector<128x128xf32>
    %150 = vector.broadcast %142 : vector<1x128xf32> to vector<128x128xf32>
    %151 = arith.subf %149, %150 : vector<128x128xf32>
    %152 = arith.mulf %151, %151 : vector<128x128xf32>
    %153 = arith.addf %148, %152 : vector<128x128xf32>
    %154 = vector.broadcast %7 : vector<128x1xf32> to vector<128x128xf32>
    %155 = vector.broadcast %143 : vector<1x128xf32> to vector<128x128xf32>
    %156 = arith.subf %154, %155 : vector<128x128xf32>
    %157 = arith.mulf %156, %156 : vector<128x128xf32>
    %158 = arith.addf %153, %157 : vector<128x128xf32>
    %159 = vector.broadcast %8 : vector<128x1xf32> to vector<128x128xf32>
    %160 = vector.broadcast %144 : vector<1x128xf32> to vector<128x128xf32>
    %161 = arith.mulf %159, %160 : vector<128x128xf32>
    %cst_34 = arith.constant 9.99999996E-13 : f32
    %162 = vector.broadcast %cst_34 : f32 to vector<128x128xf32>
    %163 = arith.cmpf ogt, %158, %162 : vector<128x128xf32>
    %164 = math.rsqrt %158 : vector<128x128xf32>
    %cst_35 = arith.constant 0.000000e+00 : f32
    %165 = vector.broadcast %cst_35 : f32 to vector<128x128xf32>
    %166 = arith.select %163, %164, %165 : vector<128x128xi1>, vector<128x128xf32>
    %cst_36 = arith.constant 0.0472589806 : f32
    %167 = vector.broadcast %cst_36 : f32 to vector<128x128xf32>
    %168 = arith.mulf %158, %167 : vector<128x128xf32>
    %cst_37 = arith.constant 1.000000e+00 : f32
    %169 = vector.broadcast %cst_37 : f32 to vector<128x128xf32>
    %170 = arith.subf %169, %168 : vector<128x128xf32>
    %cst_38 = arith.constant 9.99999997E-7 : f32
    %171 = vector.broadcast %cst_38 : f32 to vector<128x128xf32>
    %172 = arith.maximumf %170, %171 : vector<128x128xf32>
    %cst_39 = arith.constant 0.000000e+00 : f32
    %173 = vector.broadcast %cst_39 : f32 to vector<128x128xf32>
    %174 = arith.subf %173, %168 : vector<128x128xf32>
    %175 = arith.divf %174, %172 : vector<128x128xf32>
    %176 = math.exp %175 : vector<128x128xf32>
    %cst_40 = arith.constant 1.000000e+00 : f32
    %177 = vector.broadcast %cst_40 : f32 to vector<128x128xf32>
    %178 = arith.subf %177, %176 : vector<128x128xf32>
    %179 = arith.mulf %161, %178 : vector<128x128xf32>
    %180 = arith.mulf %179, %166 : vector<128x128xf32>
    %181 = arith.addf %138, %180 : vector<128x128xf32>
    %c0_41 = arith.constant 0 : index
    %c0_42 = arith.constant 0 : index
    %182 = vector.load %arg6[%c0_41, %c0_42] : memref<256x128xf32, #tpu.memory_space<vmem>>, vector<128x128xf32>
    tpu.vector_store %arg6[%c0_41, %c0_42], %181 {strides = array<i32>} : memref<256x128xf32, #tpu.memory_space<vmem>>, vector<128x128xf32>,
    %c0_43 = arith.constant 0 : index
    %c128_44 = arith.constant 128 : index
    %c0_45 = arith.constant 0 : index
    %183 = vector.load %arg3[%c0_43, %c128_44, %c0_45] : memref<1x256x4xf32, #tpu.memory_space<vmem>>, vector<1x128x4xf32>
    %184 = vector.shape_cast %183 : vector<1x128x4xf32> to vector<128x4xf32>
    %185 = vector.extract_strided_slice %184 {offsets = [0, 0], sizes = [128, 1], strides = [1, 1]} : vector<128x4xf32> to vector<128x1xf32>
    %186 = vector.extract_strided_slice %184 {offsets = [0, 1], sizes = [128, 1], strides = [1, 1]} : vector<128x4xf32> to vector<128x1xf32>
    %187 = vector.extract_strided_slice %184 {offsets = [0, 2], sizes = [128, 1], strides = [1, 1]} : vector<128x4xf32> to vector<128x1xf32>
    %188 = vector.extract_strided_slice %184 {offsets = [0, 3], sizes = [128, 1], strides = [1, 1]} : vector<128x4xf32> to vector<128x1xf32>
    %c128_46 = arith.constant 128 : index
    %c0_47 = arith.constant 0 : index
    %189 = vector.load %arg6[%c128_46, %c0_47] : memref<256x128xf32, #tpu.memory_space<vmem>>, vector<128x128xf32>
    %c0_48 = arith.constant 0 : index
    %c0_49 = arith.constant 0 : index
    %c0_50 = arith.constant 0 : index
    %190 = vector.load %arg4[%c0_48, %c0_49, %c0_50] : memref<1x4x512xf32, #tpu.memory_space<vmem>>, vector<1x4x128xf32>
    %191 = vector.shape_cast %190 : vector<1x4x128xf32> to vector<4x128xf32>
    %192 = vector.extract_strided_slice %191 {offsets = [0, 0], sizes = [1, 128], strides = [1, 1]} : vector<4x128xf32> to vector<1x128xf32>
    %193 = vector.extract_strided_slice %191 {offsets = [1, 0], sizes = [1, 128], strides = [1, 1]} : vector<4x128xf32> to vector<1x128xf32>
    %194 = vector.extract_strided_slice %191 {offsets = [2, 0], sizes = [1, 128], strides = [1, 1]} : vector<4x128xf32> to vector<1x128xf32>
    %195 = vector.extract_strided_slice %191 {offsets = [3, 0], sizes = [1, 128], strides = [1, 1]} : vector<4x128xf32> to vector<1x128xf32>
    %196 = vector.broadcast %185 : vector<128x1xf32> to vector<128x128xf32>
    %197 = vector.broadcast %192 : vector<1x128xf32> to vector<128x128xf32>
    %198 = arith.subf %196, %197 : vector<128x128xf32>
    %199 = arith.mulf %198, %198 : vector<128x128xf32>
    %200 = vector.broadcast %186 : vector<128x1xf32> to vector<128x128xf32>
    %201 = vector.broadcast %193 : vector<1x128xf32> to vector<128x128xf32>
    %202 = arith.subf %200, %201 : vector<128x128xf32>
    %203 = arith.mulf %202, %202 : vector<128x128xf32>
    %204 = arith.addf %199, %203 : vector<128x128xf32>
    %205 = vector.broadcast %187 : vector<128x1xf32> to vector<128x128xf32>
    %206 = vector.broadcast %194 : vector<1x128xf32> to vector<128x128xf32>
    %207 = arith.subf %205, %206 : vector<128x128xf32>
    %208 = arith.mulf %207, %207 : vector<128x128xf32>
    %209 = arith.addf %204, %208 : vector<128x128xf32>
    %210 = vector.broadcast %188 : vector<128x1xf32> to vector<128x128xf32>
    %211 = vector.broadcast %195 : vector<1x128xf32> to vector<128x128xf32>
    %212 = arith.mulf %210, %211 : vector<128x128xf32>
    %cst_51 = arith.constant 9.99999996E-13 : f32
    %213 = vector.broadcast %cst_51 : f32 to vector<128x128xf32>
    %214 = arith.cmpf ogt, %209, %213 : vector<128x128xf32>
    %215 = math.rsqrt %209 : vector<128x128xf32>
    %cst_52 = arith.constant 0.000000e+00 : f32
    %216 = vector.broadcast %cst_52 : f32 to vector<128x128xf32>
    %217 = arith.select %214, %215, %216 : vector<128x128xi1>, vector<128x128xf32>
    %cst_53 = arith.constant 0.0472589806 : f32
    %218 = vector.broadcast %cst_53 : f32 to vector<128x128xf32>
    %219 = arith.mulf %209, %218 : vector<128x128xf32>
    %cst_54 = arith.constant 1.000000e+00 : f32
    %220 = vector.broadcast %cst_54 : f32 to vector<128x128xf32>
    %221 = arith.subf %220, %219 : vector<128x128xf32>
    %cst_55 = arith.constant 9.99999997E-7 : f32
    %222 = vector.broadcast %cst_55 : f32 to vector<128x128xf32>
    %223 = arith.maximumf %221, %222 : vector<128x128xf32>
    %cst_56 = arith.constant 0.000000e+00 : f32
    %224 = vector.broadcast %cst_56 : f32 to vector<128x128xf32>
    %225 = arith.subf %224, %219 : vector<128x128xf32>
    %226 = arith.divf %225, %223 : vector<128x128xf32>
    %227 = math.exp %226 : vector<128x128xf32>
    %cst_57 = arith.constant 1.000000e+00 : f32
    %228 = vector.broadcast %cst_57 : f32 to vector<128x128xf32>
    %229 = arith.subf %228, %227 : vector<128x128xf32>
    %230 = arith.mulf %212, %229 : vector<128x128xf32>
    %231 = arith.mulf %230, %217 : vector<128x128xf32>
    %232 = arith.addf %189, %231 : vector<128x128xf32>
    %c0_58 = arith.constant 0 : index
    %c0_59 = arith.constant 0 : index
    %c128_60 = arith.constant 128 : index
    %233 = vector.load %arg4[%c0_58, %c0_59, %c128_60] : memref<1x4x512xf32, #tpu.memory_space<vmem>>, vector<1x4x128xf32>
    %234 = vector.shape_cast %233 : vector<1x4x128xf32> to vector<4x128xf32>
    %235 = vector.extract_strided_slice %234 {offsets = [0, 0], sizes = [1, 128], strides = [1, 1]} : vector<4x128xf32> to vector<1x128xf32>
    %236 = vector.extract_strided_slice %234 {offsets = [1, 0], sizes = [1, 128], strides = [1, 1]} : vector<4x128xf32> to vector<1x128xf32>
    %237 = vector.extract_strided_slice %234 {offsets = [2, 0], sizes = [1, 128], strides = [1, 1]} : vector<4x128xf32> to vector<1x128xf32>
    %238 = vector.extract_strided_slice %234 {offsets = [3, 0], sizes = [1, 128], strides = [1, 1]} : vector<4x128xf32> to vector<1x128xf32>
    %239 = vector.broadcast %185 : vector<128x1xf32> to vector<128x128xf32>
    %240 = vector.broadcast %235 : vector<1x128xf32> to vector<128x128xf32>
    %241 = arith.subf %239, %240 : vector<128x128xf32>
    %242 = arith.mulf %241, %241 : vector<128x128xf32>
    %243 = vector.broadcast %186 : vector<128x1xf32> to vector<128x128xf32>
    %244 = vector.broadcast %236 : vector<1x128xf32> to vector<128x128xf32>
    %245 = arith.subf %243, %244 : vector<128x128xf32>
    %246 = arith.mulf %245, %245 : vector<128x128xf32>
    %247 = arith.addf %242, %246 : vector<128x128xf32>
    %248 = vector.broadcast %187 : vector<128x1xf32> to vector<128x128xf32>
    %249 = vector.broadcast %237 : vector<1x128xf32> to vector<128x128xf32>
    %250 = arith.subf %248, %249 : vector<128x128xf32>
    %251 = arith.mulf %250, %250 : vector<128x128xf32>
    %252 = arith.addf %247, %251 : vector<128x128xf32>
    %253 = vector.broadcast %188 : vector<128x1xf32> to vector<128x128xf32>
    %254 = vector.broadcast %238 : vector<1x128xf32> to vector<128x128xf32>
    %255 = arith.mulf %253, %254 : vector<128x128xf32>
    %cst_61 = arith.constant 9.99999996E-13 : f32
    %256 = vector.broadcast %cst_61 : f32 to vector<128x128xf32>
    %257 = arith.cmpf ogt, %252, %256 : vector<128x128xf32>
    %258 = math.rsqrt %252 : vector<128x128xf32>
    %cst_62 = arith.constant 0.000000e+00 : f32
    %259 = vector.broadcast %cst_62 : f32 to vector<128x128xf32>
    %260 = arith.select %257, %258, %259 : vector<128x128xi1>, vector<128x128xf32>
    %cst_63 = arith.constant 0.0472589806 : f32
    %261 = vector.broadcast %cst_63 : f32 to vector<128x128xf32>
    %262 = arith.mulf %252, %261 : vector<128x128xf32>
    %cst_64 = arith.constant 1.000000e+00 : f32
    %263 = vector.broadcast %cst_64 : f32 to vector<128x128xf32>
    %264 = arith.subf %263, %262 : vector<128x128xf32>
    %cst_65 = arith.constant 9.99999997E-7 : f32
    %265 = vector.broadcast %cst_65 : f32 to vector<128x128xf32>
    %266 = arith.maximumf %264, %265 : vector<128x128xf32>
    %cst_66 = arith.constant 0.000000e+00 : f32
    %267 = vector.broadcast %cst_66 : f32 to vector<128x128xf32>
    %268 = arith.subf %267, %262 : vector<128x128xf32>
    %269 = arith.divf %268, %266 : vector<128x128xf32>
    %270 = math.exp %269 : vector<128x128xf32>
    %cst_67 = arith.constant 1.000000e+00 : f32
    %271 = vector.broadcast %cst_67 : f32 to vector<128x128xf32>
    %272 = arith.subf %271, %270 : vector<128x128xf32>
    %273 = arith.mulf %255, %272 : vector<128x128xf32>
    %274 = arith.mulf %273, %260 : vector<128x128xf32>
    %275 = arith.addf %232, %274 : vector<128x128xf32>
    %c0_68 = arith.constant 0 : index
    %c0_69 = arith.constant 0 : index
    %c256_70 = arith.constant 256 : index
    %276 = vector.load %arg4[%c0_68, %c0_69, %c256_70] : memref<1x4x512xf32, #tpu.memory_space<vmem>>, vector<1x4x128xf32>
    %277 = vector.shape_cast %276 : vector<1x4x128xf32> to vector<4x128xf32>
    %278 = vector.extract_strided_slice %277 {offsets = [0, 0], sizes = [1, 128], strides = [1, 1]} : vector<4x128xf32> to vector<1x128xf32>
    %279 = vector.extract_strided_slice %277 {offsets = [1, 0], sizes = [1, 128], strides = [1, 1]} : vector<4x128xf32> to vector<1x128xf32>
    %280 = vector.extract_strided_slice %277 {offsets = [2, 0], sizes = [1, 128], strides = [1, 1]} : vector<4x128xf32> to vector<1x128xf32>
    %281 = vector.extract_strided_slice %277 {offsets = [3, 0], sizes = [1, 128], strides = [1, 1]} : vector<4x128xf32> to vector<1x128xf32>
    %282 = vector.broadcast %185 : vector<128x1xf32> to vector<128x128xf32>
    %283 = vector.broadcast %278 : vector<1x128xf32> to vector<128x128xf32>
    %284 = arith.subf %282, %283 : vector<128x128xf32>
    %285 = arith.mulf %284, %284 : vector<128x128xf32>
    %286 = vector.broadcast %186 : vector<128x1xf32> to vector<128x128xf32>
    %287 = vector.broadcast %279 : vector<1x128xf32> to vector<128x128xf32>
    %288 = arith.subf %286, %287 : vector<128x128xf32>
    %289 = arith.mulf %288, %288 : vector<128x128xf32>
    %290 = arith.addf %285, %289 : vector<128x128xf32>
    %291 = vector.broadcast %187 : vector<128x1xf32> to vector<128x128xf32>
    %292 = vector.broadcast %280 : vector<1x128xf32> to vector<128x128xf32>
    %293 = arith.subf %291, %292 : vector<128x128xf32>
    %294 = arith.mulf %293, %293 : vector<128x128xf32>
    %295 = arith.addf %290, %294 : vector<128x128xf32>
    %296 = vector.broadcast %188 : vector<128x1xf32> to vector<128x128xf32>
    %297 = vector.broadcast %281 : vector<1x128xf32> to vector<128x128xf32>
    %298 = arith.mulf %296, %297 : vector<128x128xf32>
    %cst_71 = arith.constant 9.99999996E-13 : f32
    %299 = vector.broadcast %cst_71 : f32 to vector<128x128xf32>
    %300 = arith.cmpf ogt, %295, %299 : vector<128x128xf32>
    %301 = math.rsqrt %295 : vector<128x128xf32>
    %cst_72 = arith.constant 0.000000e+00 : f32
    %302 = vector.broadcast %cst_72 : f32 to vector<128x128xf32>
    %303 = arith.select %300, %301, %302 : vector<128x128xi1>, vector<128x128xf32>
    %cst_73 = arith.constant 0.0472589806 : f32
    %304 = vector.broadcast %cst_73 : f32 to vector<128x128xf32>
    %305 = arith.mulf %295, %304 : vector<128x128xf32>
    %cst_74 = arith.constant 1.000000e+00 : f32
    %306 = vector.broadcast %cst_74 : f32 to vector<128x128xf32>
    %307 = arith.subf %306, %305 : vector<128x128xf32>
    %cst_75 = arith.constant 9.99999997E-7 : f32
    %308 = vector.broadcast %cst_75 : f32 to vector<128x128xf32>
    %309 = arith.maximumf %307, %308 : vector<128x128xf32>
    %cst_76 = arith.constant 0.000000e+00 : f32
    %310 = vector.broadcast %cst_76 : f32 to vector<128x128xf32>
    %311 = arith.subf %310, %305 : vector<128x128xf32>
    %312 = arith.divf %311, %309 : vector<128x128xf32>
    %313 = math.exp %312 : vector<128x128xf32>
    %cst_77 = arith.constant 1.000000e+00 : f32
    %314 = vector.broadcast %cst_77 : f32 to vector<128x128xf32>
    %315 = arith.subf %314, %313 : vector<128x128xf32>
    %316 = arith.mulf %298, %315 : vector<128x128xf32>
    %317 = arith.mulf %316, %303 : vector<128x128xf32>
    %318 = arith.addf %275, %317 : vector<128x128xf32>
    %c0_78 = arith.constant 0 : index
    %c0_79 = arith.constant 0 : index
    %c384_80 = arith.constant 384 : index
    %319 = vector.load %arg4[%c0_78, %c0_79, %c384_80] : memref<1x4x512xf32, #tpu.memory_space<vmem>>, vector<1x4x128xf32>
    %320 = vector.shape_cast %319 : vector<1x4x128xf32> to vector<4x128xf32>
    %321 = vector.extract_strided_slice %320 {offsets = [0, 0], sizes = [1, 128], strides = [1, 1]} : vector<4x128xf32> to vector<1x128xf32>
    %322 = vector.extract_strided_slice %320 {offsets = [1, 0], sizes = [1, 128], strides = [1, 1]} : vector<4x128xf32> to vector<1x128xf32>
    %323 = vector.extract_strided_slice %320 {offsets = [2, 0], sizes = [1, 128], strides = [1, 1]} : vector<4x128xf32> to vector<1x128xf32>
    %324 = vector.extract_strided_slice %320 {offsets = [3, 0], sizes = [1, 128], strides = [1, 1]} : vector<4x128xf32> to vector<1x128xf32>
    %325 = vector.broadcast %185 : vector<128x1xf32> to vector<128x128xf32>
    %326 = vector.broadcast %321 : vector<1x128xf32> to vector<128x128xf32>
    %327 = arith.subf %325, %326 : vector<128x128xf32>
    %328 = arith.mulf %327, %327 : vector<128x128xf32>
    %329 = vector.broadcast %186 : vector<128x1xf32> to vector<128x128xf32>
    %330 = vector.broadcast %322 : vector<1x128xf32> to vector<128x128xf32>
    %331 = arith.subf %329, %330 : vector<128x128xf32>
    %332 = arith.mulf %331, %331 : vector<128x128xf32>
    %333 = arith.addf %328, %332 : vector<128x128xf32>
    %334 = vector.broadcast %187 : vector<128x1xf32> to vector<128x128xf32>
    %335 = vector.broadcast %323 : vector<1x128xf32> to vector<128x128xf32>
    %336 = arith.subf %334, %335 : vector<128x128xf32>
    %337 = arith.mulf %336, %336 : vector<128x128xf32>
    %338 = arith.addf %333, %337 : vector<128x128xf32>
    %339 = vector.broadcast %188 : vector<128x1xf32> to vector<128x128xf32>
    %340 = vector.broadcast %324 : vector<1x128xf32> to vector<128x128xf32>
    %341 = arith.mulf %339, %340 : vector<128x128xf32>
    %cst_81 = arith.constant 9.99999996E-13 : f32
    %342 = vector.broadcast %cst_81 : f32 to vector<128x128xf32>
    %343 = arith.cmpf ogt, %338, %342 : vector<128x128xf32>
    %344 = math.rsqrt %338 : vector<128x128xf32>
    %cst_82 = arith.constant 0.000000e+00 : f32
    %345 = vector.broadcast %cst_82 : f32 to vector<128x128xf32>
    %346 = arith.select %343, %344, %345 : vector<128x128xi1>, vector<128x128xf32>
    %cst_83 = arith.constant 0.0472589806 : f32
    %347 = vector.broadcast %cst_83 : f32 to vector<128x128xf32>
    %348 = arith.mulf %338, %347 : vector<128x128xf32>
    %cst_84 = arith.constant 1.000000e+00 : f32
    %349 = vector.broadcast %cst_84 : f32 to vector<128x128xf32>
    %350 = arith.subf %349, %348 : vector<128x128xf32>
    %cst_85 = arith.constant 9.99999997E-7 : f32
    %351 = vector.broadcast %cst_85 : f32 to vector<128x128xf32>
    %352 = arith.maximumf %350, %351 : vector<128x128xf32>
    %cst_86 = arith.constant 0.000000e+00 : f32
    %353 = vector.broadcast %cst_86 : f32 to vector<128x128xf32>
    %354 = arith.subf %353, %348 : vector<128x128xf32>
    %355 = arith.divf %354, %352 : vector<128x128xf32>
    %356 = math.exp %355 : vector<128x128xf32>
    %cst_87 = arith.constant 1.000000e+00 : f32
    %357 = vector.broadcast %cst_87 : f32 to vector<128x128xf32>
    %358 = arith.subf %357, %356 : vector<128x128xf32>
    %359 = arith.mulf %341, %358 : vector<128x128xf32>
    %360 = arith.mulf %359, %346 : vector<128x128xf32>
    %361 = arith.addf %318, %360 : vector<128x128xf32>
    %c128_88 = arith.constant 128 : index
    %c0_89 = arith.constant 0 : index
    %362 = vector.load %arg6[%c128_88, %c0_89] : memref<256x128xf32, #tpu.memory_space<vmem>>, vector<128x128xf32>
    tpu.vector_store %arg6[%c128_88, %c0_89], %361 {strides = array<i32>} : memref<256x128xf32, #tpu.memory_space<vmem>>, vector<128x128xf32>,
    %c0_i32_90 = arith.constant 0 : i32
    %363 = arith.cmpi eq, %arg2, %c0_i32_90 : i32
    %364 = arith.extui %363 : i1 to i32
    %c0_i32_91 = arith.constant 0 : i32
    %365 = arith.cmpi ne, %364, %c0_i32_91 : i32
    scf.if %365 {
      %c0_92 = arith.constant 0 : index
      %c0_93 = arith.constant 0 : index
      %366 = vector.load %arg6[%c0_92, %c0_93] : memref<256x128xf32, #tpu.memory_space<vmem>>, vector<256x128xf32>
      %cst_94 = arith.constant dense<0.000000e+00> : vector<128xf32>
      %367 = vector.multi_reduction <add>, %366, %cst_94 [0] : vector<256x128xf32> to vector<128xf32>
      %368 = vector.shape_cast %367 : vector<128xf32> to vector<1x128xf32>
      %369 = vector.shape_cast %368 : vector<1x128xf32> to vector<1x1x1x128xf32>
      %c0_95 = arith.constant 0 : index
      %c0_96 = arith.constant 0 : index
      %c0_97 = arith.constant 0 : index
      %c0_98 = arith.constant 0 : index
      %370 = vector.load %arg5[%c0_95, %c0_96, %c0_97, %c0_98] : memref<1x1x1x128xf32, #tpu.memory_space<vmem>>, vector<1x1x1x128xf32>
      tpu.vector_store %arg5[%c0_95, %c0_96, %c0_97, %c0_98], %369 {strides = array<i32>} : memref<1x1x1x128xf32, #tpu.memory_space<vmem>>, vector<1x1x1x128xf32>,
    } else {
    }
    return
  }
  func.func @transform_0(%arg0: i32, %arg1: i32, %arg2: i32) -> (i32, i32, i32) {
    %c0_i32 = arith.constant 0 : i32
    %c0_i32_0 = arith.constant 0 : i32
    return %arg0, %arg1, %c0_i32 : i32, i32, i32
  }
  func.func @transform_1(%arg0: i32, %arg1: i32, %arg2: i32) -> (i32, i32, i32) {
    %c0_i32 = arith.constant 0 : i32
    %c0_i32_0 = arith.constant 0 : i32
    return %arg0, %c0_i32, %arg2 : i32, i32, i32
  }
  func.func @transform_2(%arg0: i32, %arg1: i32, %arg2: i32) -> (i32, i32, i32, i32) {
    %c0_i32 = arith.constant 0 : i32
    %c0_i32_0 = arith.constant 0 : i32
    %c0_i32_1 = arith.constant 0 : i32
    return %arg0, %arg1, %c0_i32, %c0_i32_0 : i32, i32, i32, i32
  }
}

</mosaic_0001>

<bundles_post_ra>
// kernel: lr_coulomb_simple.1
= control target key start
LH: loop header
LB: loop body
LE: loop exit
PB: predicated region body
PF: predicated region fallthrough
CT: control target
= control target key end

     0   :  { %s5198_s9 = smov 0   ;;  %s5200_s10 = smov 0   ;;  %s9346_s0 = inlined_call_operand.vmem [shape: f32[2,512,4], index: 0, kind: input, shape index: {}]   ;;  %s9347_s1 = inlined_call_operand.vmem [shape: f32[2,4,512], index: 1, kind: input, shape index: {}]   ;;  %s9348_s2 = inlined_call_operand.vmem [shape: f32[2,2,1,128], index: 2, kind: output, shape index: {}]  }
   0x1   :  { %s5202_s11 = smov 0   ;;  %s5204_s12 = smov 0  }
   0x2   :  { %s5206_s13 = smov 0  }
   0x3 LB: > { %s27_s14 = sadd.s32 1, %s5169_s11  ;;  %s31_s15 = sadd.s32 1, %s5173_s12  ;;  %s5177_s13 = sphi %s5206_s13, %s12_s13   ;;  %s5173_s12 = sphi %s5204_s12, %s10741_s12   ;;  %s5169_s11 = sphi %s5202_s11, %s10740_s11   ;;  %s5165_s10 = sphi %s5200_s10, %s10739_s10   ;;  %s5161_s9 = sphi %s5198_s9, %s10738_s9  }
   0x4   : > { %p29_p0 = scmp.ge.s32.totalorder %s27_s14, 2  ;;  %p4283_p1 = scmp.ge.s32.totalorder %s5177_s13, 1 }
   0x5   : > { %p157_p2 = scmp.lt.s32.totalorder %s5177_s13, 5 }
   0x6   : > { %s10743_s14 = smov (%p29_p0, %s27_s14), 0  ;;  %s10745_s15 = smov (!%p29_p0, %s31_s15), %s5173_s12 }
   0x7   : > { %p158_p3 = pnand %p4283_p1, %p157_p2  ;;  %p33_p4 = scmp.ge.s32.totalorder %s10745_s15, 2 }
   0x9   : > { %s10747_s15 = smov (%p33_p4, %s10745_s15), 0  ;;  %161 = sbr.rel (%p158_p3) target bundleno = 969 (0x3c9), region = 28 }
  0x10   : > { %s4284_s16 = sshll.u32 %s5161_s9, 5  ;;  %p195_p5 = scmp.lt.s32.totalorder %s5165_s10, 1  ;;  %v5179_v0 = vmov 0   ;;  %v9353_v18 = vmov 1   ;;  %v9349_v25 = vmov 2   ;;  %v9351_v29 = vmov 3  }
  0x11   : > { %4338 = vset.pattern.permute.xlu1 %v5179_v0  ;;  %4337 = vset.pattern.permute.xlu0 %v5179_v0  ;;  %p197_p6 = scmp.lt.s32.totalorder %s4284_s16, 63  ;;  %v370_v31 = vlaneseq  ;;  %p216_p7 = scmp.lt.s32.totalorder %s5161_s9, 1 }
  0x12   : > { %s10749_s10 = smov (!%p195_p5, %s5165_s10), 1 }
  0x13   : > { %s10751_s16 = smov (!%p197_p6, %s4284_s16), 63  ;;  %s4285_s17 = sshll.u32 %s10749_s10, 6  ;;  %v5392_v34 = vshrl.u32 %v370_v31, 7 }
  0x14   : > { %s200_s18 = sadd.s32 %s4285_s17, %s10751_s16  ;;  %s4292_s23 = sshll.u32 %s10749_s10, 4 }
  0x15   : > { %s4286_s19 = sshll.u32 %s200_s18, 3  ;;  %9582 = vst [vmem:[#allocation10_spill] sm:$0xff] %v5392_v34  ;;  %s5401_s26 = scalar_lea.vmem %s9347_s1, %s4292_s23  ;;  %v372_v37 = vsub.s32 0, %v5392_v34  ;;  %v5419_v45 = vsub.s32 1, %v5392_v34  ;;  %v5447_v56 = vsub.s32 2, %v5392_v34 }
  0x16   : > { %s5239_s22 = scalar_lea.vmem %s9346_s0, %s4286_s19  ;;  %v289_v38 = vld [vmem:[%s5401_s26] sm:$0xf]  ;;  %v962_v39 = vld [vmem:[%s5401_s26 + $0x4] sm:$0xf]  ;;  %v1363_v40 = vld [vmem:[%s5401_s26 + $0x8] sm:$0xf] }
  0x17   : > { %v5242_v1 = vld [vmem:[%s5239_s22 + $0x10] sm:$0xff]  ;;  %v5245_v2 = vld [vmem:[%s5239_s22] sm:$0xff]  ;;  %v5250_v3 = vld [vmem:[%s5239_s22 + $0x18] sm:$0xff]  ;;  %v5430_v49 = vrot.slane %v289_v38, %v372_v37  ;;  %v5432_v50 = vrot.slane %v962_v39, %v372_v37  ;;  %v5434_v51 = vrot.slane %v1363_v40, %v372_v37  ;;  %9586 = vst [vmem:[#allocation14_spill] sm:$0xff] %v5447_v56  ;;  %v5463_v61 = vrot.slane %v289_v38, %v5419_v45  ;;  %s10753_s9 = smov (!%p216_p7, %s5161_s9), 1  ;;  %s4289_s27 = sshll.u32 %s10749_s10, 1 }
  0x18   : > { %302 = vperm.xlu1 %4338, %v5242_v1   ;;  %292 = vperm.xlu0 %4337, %v5245_v2   ;;  %v5253_v4 = vld [vmem:[%s5239_s22 + $0x8] sm:$0xff]  ;;  %v5261_v6 = vld [vmem:[%s5239_s22 + $0x20] sm:$0xff]  ;;  %v5266_v7 = vld [vmem:[%s5239_s22 + $0x38] sm:$0xff]  ;;  %v5466_v62 = vrot.slane %v962_v39, %v5419_v45  ;;  %v5469_v63 = vrot.slane %v1363_v40, %v5419_v45  ;;  %v5490_v31 = vrot.slane %v1363_v40, %v5447_v56  ;;  %s219_s28 = sadd.s32 %s4289_s27, %s10753_s9 }
  0x19   : > { %v5258_v5 = vld [vmem:[%s5239_s22 + $0x28] sm:$0xff]  ;;  %v5269_v8 = vld [vmem:[%s5239_s22 + $0x30] sm:$0xff]  ;;  %v5277_v10 = vld [vmem:[%s5239_s22 + $0x40] sm:$0xff]  ;;  %s220_s3 = scalar_lea.vmem %s9348_s2, %s219_s28 }
  0x1a   : > { %v5274_v9 = vld [vmem:[%s5239_s22 + $0x48] sm:$0xff]  ;;  %v5282_v11 = vld [vmem:[%s5239_s22 + $0x58] sm:$0xff]  ;;  %v5285_v12 = vld [vmem:[%s5239_s22 + $0x50] sm:$0xff]  ;;  %9592 = vst [vmem:[#allocation20_spill] sm:$0xff] %v5490_v31 }
  0x1b   : > { %v5290_v13 = vld [vmem:[%s5239_s22 + $0x68] sm:$0xff]  ;;  %v5293_v14 = vld [vmem:[%s5239_s22 + $0x60] sm:$0xff]  ;;  %v5298_v15 = vld [vmem:[%s5239_s22 + $0x78] sm:$0xff] }
  0x1c   : > { %307 = vperm.xlu1 %4338, %v5250_v3   ;;  %297 = vperm.xlu0 %4337, %v5253_v4   ;;  %9575 = vst [vmem:[#allocation3_spill] sm:$0xff] %v5290_v13  ;;  %9576 = vst [vmem:[#allocation4_spill] sm:$0xff] %v5298_v15  ;;  %v5301_v16 = vld [vmem:[%s5239_s22 + $0x70] sm:$0xff]  ;;  %v5306_v17 = vld [vmem:[%s5239_s22 + $0x88] sm:$0xff] }
  0x1d   : > { %v5312_v19 = vld [vmem:[%s5239_s22 + $0xa0] sm:$0xff]  ;;  %v5317_v20 = vld [vmem:[%s5239_s22 + $0xb0] sm:$0xff]  ;;  %v5365_v27 = vld [vmem:[%s5239_s22 + $0x98] sm:$0xff] }
  0x1e   : > { %v5322_v21 = vld [vmem:[%s5239_s22 + $0xc0] sm:$0xff]  ;;  %v5327_v22 = vld [vmem:[%s5239_s22 + $0xd0] sm:$0xff]  ;;  %9579 = vst [vmem:[#allocation7_spill] sm:$0xff] %v5365_v27  ;;  %v5370_v28 = vld [vmem:[%s5239_s22 + $0xa8] sm:$0xff] }
  0x1f   : > { %9577 = vst [vmem:[#allocation5_spill] sm:$0xff] %v5327_v22  ;;  %v5332_v23 = vld [vmem:[%s5239_s22 + $0xe0] sm:$0xff]  ;;  %v5337_v24 = vld [vmem:[%s5239_s22 + $0xf0] sm:$0xff]  ;;  %9580 = vst [vmem:[#allocation8_spill] sm:$0xff] %v5370_v28 }
  0x20   : > { %317 = vperm.xlu1 %4338, %v5258_v5   ;;  %312 = vperm.xlu0 %4337, %v5261_v6   ;;  %v5360_v26 = vld [vmem:[%s5239_s22 + $0x80] sm:$0xff]  ;;  %v5375_v30 = vld [vmem:[%s5239_s22 + $0xb8] sm:$0xff]  ;;  %v1764_v43 = vld [vmem:[%s5401_s26 + $0xc] sm:$0xf] }
  0x21   : > { %9578 = vst [vmem:[#allocation6_spill] sm:$0xff] %v5360_v26  ;;  %9581 = vst [vmem:[#allocation9_spill] sm:$0xff] %v5375_v30  ;;  %v5416_v44 = vld [vmem:[%s5239_s22 + $0x90] sm:$0xff]  ;;  %v5422_v46 = vld [vmem:[%s5401_s26] sm:$0xf]  ;;  %v5440_v53 = vrot.slane %v1764_v43, %v372_v37 }
  0x22   : > { %v5425_v47 = vld [vmem:[%s5401_s26 + $0x4] sm:$0xf]  ;;  %v5428_v48 = vld [vmem:[%s5401_s26 + $0x8] sm:$0xf]  ;;  %v5438_v52 = vld [vmem:[%s5401_s26 + $0xc] sm:$0xf]  ;;  %v5451_v57 = vrot.slane %v5422_v46, %v372_v37 }
  0x23   : > { %9583 = vst [vmem:[#allocation11_spill] sm:$0xff] %v5425_v47  ;;  %9584 = vst [vmem:[#allocation12_spill] sm:$0xff] %v5428_v48  ;;  %v5454_v58 = vrot.slane %v5425_v47, %v372_v37  ;;  %v5457_v59 = vrot.slane %v5428_v48, %v372_v37  ;;  %v5460_v60 = vrot.slane %v5438_v52, %v372_v37 }
  0x24   : > { %327 = vperm.xlu1 %4338, %v5266_v7   ;;  %322 = vperm.xlu0 %4337, %v5269_v8   ;;  %9585 = vst [vmem:[#allocation13_spill] sm:$0xff] %v5438_v52  ;;  %9587 = vst [vmem:[#allocation15_spill] sm:$0xff] %v5451_v57 }
  0x25   : > { %9588 = vst [vmem:[#allocation16_spill] sm:$0xff] %v5454_v58  ;;  %9589 = vst [vmem:[#allocation17_spill] sm:$0xff] %v5457_v59 }
  0x26   : > { %9590 = vst [vmem:[#allocation18_spill] sm:$0xff] %v5460_v60 }
  0x28   : > { %337 = vperm.xlu1 %4338, %v5274_v9   ;;  %332 = vperm.xlu0 %4337, %v5277_v10  }
  0x2c   : > { %347 = vperm.xlu1 %4338, %v5282_v11   ;;  %342 = vperm.xlu0 %4337, %v5285_v12  }
  0x30   : > { %357 = vperm.xlu1 %4338, %v5290_v13   ;;  %352 = vperm.xlu0 %4337, %v5293_v14  }
  0x34   : > { %367 = vperm.xlu1 %4338, %v5298_v15   ;;  %362 = vperm.xlu0 %4337, %v5301_v16  }
  0x38   : > { %4339 = vset.pattern.permute.xlu1 %v9353_v18  ;;  %2221 = vperm.xlu0 %4337, %v5306_v17  }
  0x39   : > { %411 = vperm.xlu1 %4339, %v5253_v4  }
  0x3c   : > { %2236 = vperm.xlu0 %4337, %v5312_v19  }
  0x3d   : > { %415 = vperm.xlu1 %4339, %v5242_v1  }
  0x40   : > { %2246 = vperm.xlu0 %4337, %v5317_v20  }
  0x41   : > { %423 = vperm.xlu1 %4339, %v5261_v6  }
  0x44   : > { %2256 = vperm.xlu0 %4337, %v5322_v21  }
  0x45   : > { %431 = vperm.xlu1 %4339, %v5269_v8  }
  0x48   : > { %2266 = vperm.xlu0 %4337, %v5327_v22  }
  0x49   : > { %439 = vperm.xlu1 %4339, %v5277_v10  }
  0x4c   : > { %2276 = vperm.xlu0 %4337, %v5332_v23  }
  0x4d   : > { %447 = vperm.xlu1 %4339, %v5285_v12  }
  0x50   : > { %2286 = vperm.xlu0 %4337, %v5337_v24  }
  0x51   : > { %455 = vperm.xlu1 %4339, %v5293_v14  }
  0x54   : > { %4343 = vset.pattern.permute.xlu0 %v9353_v18 }
  0x55   : > { %463 = vperm.xlu1 %4339, %v5301_v16   ;;  %407 = vperm.xlu0 %4343, %v5245_v2  }
  0x59   : > { %4340 = vset.pattern.permute.xlu1 %v9349_v25  ;;  %419 = vperm.xlu0 %4343, %v5250_v3  }
  0x5a   : > { %523 = vperm.xlu1 %4340, %v5245_v2  }
  0x5d   : > { %427 = vperm.xlu0 %4343, %v5258_v5  }
  0x5e   : > { %531 = vperm.xlu1 %4340, %v5242_v1  }
  0x61   : > { %435 = vperm.xlu0 %4343, %v5266_v7  }
  0x62   : > { %535 = vperm.xlu1 %4340, %v5250_v3  }
  0x65   : > { %443 = vperm.xlu0 %4343, %v5274_v9  }
  0x66   : > { %543 = vperm.xlu1 %4340, %v5258_v5  }
  0x69   : > { %451 = vperm.xlu0 %4343, %v5282_v11  }
  0x6a   : > { %551 = vperm.xlu1 %4340, %v5266_v7  }
  0x6d   : > { %459 = vperm.xlu0 %4343, %v5290_v13  }
  0x6e   : > { %559 = vperm.xlu1 %4340, %v5274_v9  }
  0x71   : > { %467 = vperm.xlu0 %4343, %v5298_v15  }
  0x72   : > { %567 = vperm.xlu1 %4340, %v5282_v11  }
  0x75   : > { %2331 = vperm.xlu0 %4343, %v5360_v26  }
  0x76   : > { %575 = vperm.xlu1 %4340, %v5290_v13  }
  0x79   : > { %2343 = vperm.xlu0 %4343, %v5365_v27  }
  0x7a   : > { %583 = vperm.xlu1 %4340, %v5298_v15  }
  0x7d   : > { %2351 = vperm.xlu0 %4343, %v5370_v28  }
  0x7e   : > { %4341 = vset.pattern.permute.xlu1 %v9351_v29 }
  0x7f   : > { %643 = vperm.xlu1 %4341, %v5253_v4  }
  0x81   : > { %2359 = vperm.xlu0 %4343, %v5375_v30  }
  0x83   : > { %647 = vperm.xlu1 %4341, %v5242_v1  }
  0x85   : > { %4345 = vset.pattern.permute.xlu0 %v9349_v25 }
  0x86   : > { %527 = vperm.xlu0 %4345, %v5253_v4  }
  0x87   : > { %655 = vperm.xlu1 %4341, %v5261_v6  }
  0x8a   : > { %539 = vperm.xlu0 %4345, %v5261_v6   ;;  %v5476_v6 = vrot.slane %v1764_v43, %v5419_v45 }
  0x8b   : > { %663 = vperm.xlu1 %4341, %v5269_v8  }
  0x8e   : > { %547 = vperm.xlu0 %4345, %v5269_v8  }
  0x8f   : > { %671 = vperm.xlu1 %4341, %v5277_v10  }
  0x92   : > { %555 = vperm.xlu0 %4345, %v5277_v10  }
  0x93   : > { %679 = vperm.xlu1 %4341, %v5285_v12  }
  0x96   : > { %563 = vperm.xlu0 %4345, %v5285_v12  }
  0x97   : > { %v303_v32 = vpop.permute.xlu1 %302  ;;  %687 = vperm.xlu1 %4341, %v5293_v14   ;;  %v293_v33 = vpop.permute.xlu0 %292 }
  0x98   : > { %v969_v1 = vsub.f32 %v303_v32, %v5432_v50  ;;  %v1370_v4 = vsub.f32 %v303_v32, %v5434_v51  ;;  %v1771_v8 = vsub.f32 %v303_v32, %v5440_v53  ;;  %v374_v37 = vsub.f32 %v293_v33, %v5430_v49 }
  0x99   : > { %v967_v25 = vsub.f32 %v293_v33, %v5432_v50  ;;  %v1368_v29 = vsub.f32 %v293_v33, %v5434_v51 }
  0x9a   : > { %571 = vperm.xlu0 %4345, %v5293_v14   ;;  %v5484_v14 = vrot.slane %v289_v38, %v5447_v56  ;;  %v1769_v38 = vsub.f32 %v293_v33, %v5440_v53  ;;  %v5507_v15 = vmul.f32 %v1370_v4, %v1370_v4  ;;  %v5523_v4 = vmul.f32 %v374_v37, %v374_v37 }
  0x9b   : > { %v308_v35 = vpop.permute.xlu1 %307  ;;  %695 = vperm.xlu1 %4341, %v5301_v16   ;;  %v5396_v36 = vpop.permute.xlu0 %297  ;;  %v5527_v13 = vmul.f32 %v1368_v29, %v1368_v29 }
  0x9c   : > { %v377_v18 = vsub.f32 %v308_v35, %v5430_v49  ;;  %v1371_v40 = vsub.f32 %v308_v35, %v5434_v51  ;;  %v1772_v52 = vsub.f32 %v308_v35, %v5440_v53  ;;  %v375_v33 = vsub.f32 %v5396_v36, %v5430_v49 }
  0x9d   : > { %9595 = vst [vmem:[#allocation23_spill] sm:$0xff] %v5527_v13 }
  0x9e   : > { %579 = vperm.xlu0 %4345, %v5301_v16   ;;  %v5487_v16 = vrot.slane %v962_v39, %v5447_v56  ;;  %v970_v39 = vsub.f32 %v308_v35, %v5432_v50  ;;  %v5525_v35 = vmul.f32 %v967_v25, %v967_v25  ;;  %v5534_v31 = vmul.f32 %v377_v18, %v377_v18 }
  0x9f   : > { %v5408_v41 = vpop.permute.xlu1 %317  ;;  %4342 = vset.pattern.permute.xlu1 %v5179_v0  ;;  %v5411_v42 = vpop.permute.xlu0 %312  ;;  %v376_v0 = vsub.f32 %v303_v32, %v5430_v49  ;;  %v5497_v32 = vrot.slane %v1764_v43, %v5447_v56  ;;  %v5511_v43 = vmul.f32 %v1771_v8, %v1771_v8  ;;  %v968_v56 = vsub.f32 %v5396_v36, %v5432_v50 }
  0xa0   : > { %2216 = vperm.xlu1 %4342, %v5360_v26   ;;  %9591 = vst [vmem:[#allocation19_spill] sm:$0xff] %v5487_v16  ;;  %9594 = vst [vmem:[#allocation22_spill] sm:$0xff] %v5525_v35  ;;  %v1770_v8 = vsub.f32 %v5396_v36, %v5440_v53  ;;  %v5536_v16 = vmul.f32 %v970_v39, %v970_v39  ;;  %v5538_v48 = vmul.f32 %v1371_v40, %v1371_v40  ;;  %v5620_v35 = vld [vmem:[%s5239_s22 + $0xd8] sm:$0xff] }
  0xa1   : > { %9593 = vst [vmem:[#allocation21_spill] sm:$0xff] %v5497_v32  ;;  %v5503_v34 = vmul.f32 %v376_v0, %v376_v0  ;;  %v1369_v0 = vsub.f32 %v5396_v36, %v5434_v51  ;;  %v5532_v32 = vmul.f32 %v1769_v38, %v1769_v38  ;;  %9597 = vst [vmem:[#allocation25_spill] sm:$0xff] %v5534_v31 }
  0xa2   : > { %2447 = vperm.xlu0 %4345, %v5360_v26   ;;  %v5505_v26 = vmul.f32 %v969_v1, %v969_v1  ;;  %9598 = vst [vmem:[#allocation26_spill] sm:$0xff] %v5536_v16  ;;  %9599 = vst [vmem:[#allocation27_spill] sm:$0xff] %v5538_v48  ;;  %v5540_v47 = vmul.f32 %v1772_v52, %v1772_v52  ;;  %v379_v25 = vsub.f32 %v5408_v41, %v5430_v49 }
  0xa3   : > { %v5442_v54 = vpop.permute.xlu1 %327  ;;  %v5444_v55 = vpop.permute.xlu0 %322  ;;  %9596 = vst [vmem:[#allocation24_spill] sm:$0xff] %v5532_v32  ;;  %v972_v29 = vsub.f32 %v5408_v41, %v5432_v50  ;;  %v1373_v36 = vsub.f32 %v5408_v41, %v5434_v51  ;;  %v5549_v18 = vmul.f32 %v375_v33, %v375_v33  ;;  %v5551_v37 = vmul.f32 %v968_v56, %v968_v56 }
  0xa4   : > { %2226 = vperm.xlu1 %4342, %v5416_v44   ;;  %9600 = vst [vmem:[#allocation28_spill] sm:$0xff] %v5540_v47  ;;  %v5553_v38 = vmul.f32 %v1369_v0, %v1369_v0  ;;  %v1774_v52 = vsub.f32 %v5408_v41, %v5440_v53  ;;  %v378_v47 = vsub.f32 %v5411_v42, %v5430_v49 }
  0xa5   : > { %9601 = vst [vmem:[#allocation29_spill] sm:$0xff] %v5549_v18  ;;  %9602 = vst [vmem:[#allocation30_spill] sm:$0xff] %v5551_v37  ;;  %v971_v33 = vsub.f32 %v5411_v42, %v5432_v50  ;;  %v1372_v56 = vsub.f32 %v5411_v42, %v5434_v51  ;;  %v1773_v41 = vsub.f32 %v5411_v42, %v5440_v53 }
  0xa6   : > { %2459 = vperm.xlu0 %4345, %v5365_v27   ;;  %9603 = vst [vmem:[#allocation31_spill] sm:$0xff] %v5553_v38  ;;  %v381_v0 = vsub.f32 %v5442_v54, %v5430_v49  ;;  %v5579_v38 = vld [vmem:[%s5239_s22 + $0xc8] sm:$0xff]  ;;  %v5581_v37 = vmul.f32 %v379_v25, %v379_v25  ;;  %v5583_v18 = vmul.f32 %v972_v29, %v972_v29 }
  0xa7   : > { %v5479_v10 = vpop.permute.xlu1 %337  ;;  %v5481_v12 = vpop.permute.xlu0 %332  ;;  %v5585_v48 = vmul.f32 %v1373_v36, %v1373_v36  ;;  %v1776_v42 = vsub.f32 %v5442_v54, %v5440_v53  ;;  %v380_v16 = vsub.f32 %v5444_v55, %v5430_v49  ;;  %v973_v31 = vsub.f32 %v5444_v55, %v5432_v50 }
  0xa8   : > { %2231 = vperm.xlu1 %4342, %v5365_v27   ;;  %9605 = vst [vmem:[#allocation33_spill] sm:$0xff] %v5581_v37  ;;  %9606 = vst [vmem:[#allocation34_spill] sm:$0xff] %v5583_v18  ;;  %v1374_v25 = vsub.f32 %v5444_v55, %v5434_v51  ;;  %v5606_v18 = vmul.f32 %v1372_v56, %v1372_v56  ;;  %v5613_v37 = vmul.f32 %v381_v0, %v381_v0 }
  0xa9   : > { %9607 = vst [vmem:[#allocation35_spill] sm:$0xff] %v5585_v48  ;;  %v5602_v48 = vmul.f32 %v378_v47, %v378_v47  ;;  %v5622_v47 = vmul.f32 %v1776_v42, %v1776_v42  ;;  %v1377_v56 = vsub.f32 %v5479_v10, %v5434_v51 }
  0xaa   : > { %2467 = vperm.xlu0 %4345, %v5370_v28   ;;  %9611 = vst [vmem:[#allocation39_spill] sm:$0xff] %v5606_v18  ;;  %9613 = vst [vmem:[#allocation41_spill] sm:$0xff] %v5613_v37  ;;  %v5635_v0 = vmul.f32 %v1374_v25, %v1374_v25  ;;  %v382_v18 = vsub.f32 %v5481_v12, %v5430_v49 }
  0xab   : > { %v5519_v27 = vpop.permute.xlu1 %347  ;;  %v5521_v1 = vpop.permute.xlu0 %342  ;;  %9609 = vst [vmem:[#allocation37_spill] sm:$0xff] %v5602_v48  ;;  %9616 = vst [vmem:[#allocation44_spill] sm:$0xff] %v5622_v47  ;;  %v5667_v48 = vmul.f32 %v1377_v56, %v1377_v56 }
  0xac   : > { %2241 = vperm.xlu1 %4342, %v5370_v28   ;;  %v5561_v28 = vmul.f32 %v1770_v8, %v1770_v8  ;;  %v974_v8 = vsub.f32 %v5442_v54, %v5432_v50  ;;  %9619 = vst [vmem:[#allocation47_spill] sm:$0xff] %v5635_v0  ;;  %v385_v25 = vsub.f32 %v5519_v27, %v5430_v49  ;;  %v5661_v0 = vld [vmem:[%s5239_s22 + $0xe8] sm:$0xff] }
  0xad   : > { %9623 = vst [vmem:[#allocation51_spill] sm:$0xff] %v5667_v48  ;;  %v5682_v56 = vmul.f32 %v382_v18, %v382_v18  ;;  %v5702_v18 = vld [vmem:[%s5239_s22 + $0xf8] sm:$0xff] }
  0xae   : > { %2475 = vperm.xlu0 %4345, %v5375_v30   ;;  %9604 = vst [vmem:[#allocation32_spill] sm:$0xff] %v5561_v28  ;;  %v1375_v28 = vsub.f32 %v5442_v54, %v5434_v51  ;;  %v5604_v54 = vmul.f32 %v971_v33, %v971_v33  ;;  %v5615_v32 = vmul.f32 %v974_v8, %v974_v8 }
  0xaf   : > { %v5557_v39 = vpop.permute.xlu1 %357  ;;  %v5559_v40 = vpop.permute.xlu0 %352  ;;  %v383_v33 = vsub.f32 %v5479_v10, %v5430_v49  ;;  %v1778_v8 = vsub.f32 %v5479_v10, %v5440_v53  ;;  %9625 = vst [vmem:[#allocation53_spill] sm:$0xff] %v5682_v56 }
  0xb0   : > { %2251 = vperm.xlu1 %4342, %v5375_v30   ;;  %v5590_v30 = vmul.f32 %v1774_v52, %v1774_v52  ;;  %9610 = vst [vmem:[#allocation38_spill] sm:$0xff] %v5604_v54  ;;  %v1775_v52 = vsub.f32 %v5444_v55, %v5440_v53  ;;  %9614 = vst [vmem:[#allocation42_spill] sm:$0xff] %v5615_v32  ;;  %v5617_v13 = vmul.f32 %v1375_v28, %v1375_v28 }
  0xb1   : > { %v976_v55 = vsub.f32 %v5479_v10, %v5432_v50  ;;  %v5633_v28 = vmul.f32 %v973_v31, %v973_v31  ;;  %v975_v54 = vsub.f32 %v5481_v12, %v5432_v50  ;;  %v1777_v10 = vsub.f32 %v5481_v12, %v5440_v53 }
  0xb2   : > { %2479 = vperm.xlu0 %4345, %v5322_v21   ;;  %9608 = vst [vmem:[#allocation36_spill] sm:$0xff] %v5590_v30  ;;  %v5611_v30 = vmul.f32 %v1773_v41, %v1773_v41  ;;  %9615 = vst [vmem:[#allocation43_spill] sm:$0xff] %v5617_v13  ;;  %v5631_v41 = vmul.f32 %v380_v16, %v380_v16  ;;  %v1376_v16 = vsub.f32 %v5481_v12, %v5434_v51 }
  0xb3   : > { %v5598_v29 = vpop.permute.xlu1 %367  ;;  %v5600_v36 = vpop.permute.xlu0 %362  ;;  %9618 = vst [vmem:[#allocation46_spill] sm:$0xff] %v5633_v28  ;;  %v5663_v28 = vmul.f32 %v383_v33, %v383_v33  ;;  %v1780_v12 = vsub.f32 %v5519_v27, %v5440_v53  ;;  %v5672_v47 = vmul.f32 %v1778_v8, %v1778_v8  ;;  %v384_v13 = vsub.f32 %v5521_v1, %v5430_v49 }
  0xb4   : > { %2261 = vperm.xlu1 %4342, %v5579_v38   ;;  %9612 = vst [vmem:[#allocation40_spill] sm:$0xff] %v5611_v30  ;;  %9617 = vst [vmem:[#allocation45_spill] sm:$0xff] %v5631_v41  ;;  %v5641_v30 = vmul.f32 %v1775_v52, %v1775_v52  ;;  %v978_v52 = vsub.f32 %v5519_v27, %v5432_v50  ;;  %v5665_v41 = vmul.f32 %v976_v55, %v976_v55 }
  0xb5   : > { %9621 = vst [vmem:[#allocation49_spill] sm:$0xff] %v5663_v28  ;;  %9624 = vst [vmem:[#allocation52_spill] sm:$0xff] %v5672_v47  ;;  %v977_v32 = vsub.f32 %v5521_v1, %v5432_v50  ;;  %v1378_v33 = vsub.f32 %v5521_v1, %v5434_v51  ;;  %v5684_v48 = vmul.f32 %v975_v54, %v975_v54 }
  0xb6   : > { %2483 = vperm.xlu0 %4345, %v5579_v38   ;;  %9620 = vst [vmem:[#allocation48_spill] sm:$0xff] %v5641_v30  ;;  %v1379_v30 = vsub.f32 %v5519_v27, %v5434_v51  ;;  %9622 = vst [vmem:[#allocation50_spill] sm:$0xff] %v5665_v41  ;;  %v5686_v27 = vmul.f32 %v1376_v16, %v1376_v16  ;;  %v1779_v8 = vsub.f32 %v5521_v1, %v5440_v53 }
  0xb7   : > { %v5639_v42 = vpop.permute.xlu0 %2221  ;;  %9626 = vst [vmem:[#allocation54_spill] sm:$0xff] %v5684_v48  ;;  %v5693_v41 = vmul.f32 %v1777_v10, %v1777_v10  ;;  %v5695_v28 = vmul.f32 %v385_v25, %v385_v25  ;;  %v5697_v37 = vmul.f32 %v978_v52, %v978_v52  ;;  %v5704_v54 = vmul.f32 %v1780_v12, %v1780_v12 }
  0xb8   : > { %v5649_v31 = vpop.permute.xlu1 %411  ;;  %2271 = vperm.xlu1 %4342, %v5620_v35   ;;  %9627 = vst [vmem:[#allocation55_spill] sm:$0xff] %v5686_v27  ;;  %v387_v16 = vsub.f32 %v5557_v39, %v5430_v49  ;;  %v980_v1 = vsub.f32 %v5557_v39, %v5432_v50  ;;  %v1381_v10 = vsub.f32 %v5557_v39, %v5434_v51 }
  0xb9   : > { %9628 = vst [vmem:[#allocation56_spill] sm:$0xff] %v5693_v41  ;;  %9629 = vst [vmem:[#allocation57_spill] sm:$0xff] %v5697_v37  ;;  %v5713_v25 = vmul.f32 %v384_v13, %v384_v13  ;;  %v5715_v52 = vmul.f32 %v977_v32, %v977_v32  ;;  %v1782_v12 = vsub.f32 %v5557_v39, %v5440_v53 }
  0xba   : > { %2487 = vperm.xlu0 %4345, %v5327_v22   ;;  %v5699_v22 = vmul.f32 %v1379_v30, %v1379_v30  ;;  %9631 = vst [vmem:[#allocation59_spill] sm:$0xff] %v5704_v54  ;;  %v5717_v30 = vmul.f32 %v1378_v33, %v1378_v33  ;;  %v5723_v27 = vmul.f32 %v1779_v8, %v1779_v8 }
  0xbb   : > { %v5680_v55 = vpop.permute.xlu0 %2236  ;;  %9632 = vst [vmem:[#allocation60_spill] sm:$0xff] %v5713_v25  ;;  %9633 = vst [vmem:[#allocation61_spill] sm:$0xff] %v5715_v52  ;;  %v386_v48 = vsub.f32 %v5559_v40, %v5430_v49  ;;  %v979_v56 = vsub.f32 %v5559_v40, %v5432_v50  ;;  %v1380_v13 = vsub.f32 %v5559_v40, %v5434_v51 }
  0xbc   : > { %v5690_v47 = vpop.permute.xlu1 %415  ;;  %2281 = vperm.xlu1 %4342, %v5661_v0   ;;  %9630 = vst [vmem:[#allocation58_spill] sm:$0xff] %v5699_v22  ;;  %9634 = vst [vmem:[#allocation62_spill] sm:$0xff] %v5717_v30  ;;  %v1781_v39 = vsub.f32 %v5559_v40, %v5440_v53  ;;  %v389_v33 = vsub.f32 %v5598_v29, %v5430_v49  ;;  %v982_v8 = vsub.f32 %v5598_v29, %v5432_v50 }
  0xbd   : > { %9635 = vst [vmem:[#allocation63_spill] sm:$0xff] %v5723_v27  ;;  %v1383_v27 = vsub.f32 %v5598_v29, %v5434_v51  ;;  %v5742_v30 = vmul.f32 %v387_v16, %v387_v16  ;;  %v5744_v52 = vmul.f32 %v980_v1, %v980_v1  ;;  %v5746_v25 = vmul.f32 %v1381_v10, %v1381_v10 }
  0xbe   : > { %2491 = vperm.xlu0 %4345, %v5620_v35   ;;  %v1784_v54 = vsub.f32 %v5598_v29, %v5440_v53  ;;  %v5751_v40 = vmul.f32 %v1782_v12, %v1782_v12  ;;  %v388_v22 = vsub.f32 %v5600_v36, %v5430_v49  ;;  %v981_v37 = vsub.f32 %v5600_v36, %v5432_v50 }
  0xbf   : > { %v5721_v41 = vpop.permute.xlu0 %2246  ;;  %9636 = vst [vmem:[#allocation64_spill] sm:$0xff] %v5744_v52  ;;  %9637 = vst [vmem:[#allocation65_spill] sm:$0xff] %v5746_v25  ;;  %v1382_v16 = vsub.f32 %v5600_v36, %v5434_v51  ;;  %v5759_v1 = vmul.f32 %v386_v48, %v386_v48  ;;  %v5761_v10 = vmul.f32 %v979_v56, %v979_v56 }
  0xc0   : > { %v5731_v32 = vpop.permute.xlu1 %423  ;;  %2291 = vperm.xlu1 %4342, %v5702_v18   ;;  %9638 = vst [vmem:[#allocation66_spill] sm:$0xff] %v5751_v40  ;;  %v5763_v25 = vmul.f32 %v1380_v13, %v1380_v13  ;;  %v1783_v29 = vsub.f32 %v5600_v36, %v5440_v53  ;;  %v9642_v40 = vmov 1   ;;  %v5770_v49 = vmul.f32 %v1781_v39, %v1781_v39 }
  0xc1   : > { %9639 = vst [vmem:[#allocation67_spill] sm:$0xff] %v5759_v1  ;;  %9640 = vst [vmem:[#allocation68_spill] sm:$0xff] %v5761_v10  ;;  %v5772_v52 = vmul.f32 %v389_v33, %v389_v33  ;;  %v5774_v50 = vmul.f32 %v982_v8, %v982_v8  ;;  %v5776_v51 = vmul.f32 %v1383_v27, %v1383_v27 }
  0xc2   : > { %2495 = vperm.xlu0 %4345, %v5332_v23   ;;  %9641 = vst [vmem:[#allocation69_spill] sm:$0xff] %v5763_v25  ;;  %9643 = vst [vmem:[#allocation70_spill] sm:$0xff] %v5770_v49  ;;  %v5781_v56 = vmul.f32 %v1784_v54, %v1784_v54  ;;  %v2299_v53 = vsub.f32 %v5639_v42, %v5451_v57  ;;  %v2892_v36 = vsub.f32 %v5639_v42, %v5454_v58 }
  0xc3   : > { %9644 = vst [vmem:[#allocation71_spill] sm:$0xff] %v5774_v50  ;;  %9645 = vst [vmem:[#allocation72_spill] sm:$0xff] %v5776_v51  ;;  %v5778_v48 = vpop.permute.xlu0 %2256  ;;  %v3293_v13 = vsub.f32 %v5639_v42, %v5457_v59  ;;  %v5790_v39 = vmul.f32 %v388_v22, %v388_v22  ;;  %v5792_v27 = vmul.f32 %v981_v37, %v981_v37 }
  0xc4   : > { %v5767_v12 = vpop.permute.xlu1 %431  ;;  %4344 = vset.pattern.permute.xlu1 %v9642_v40  ;;  %9646 = vst [vmem:[#allocation73_spill] sm:$0xff] %v5781_v56  ;;  %v5794_v33 = vmul.f32 %v1382_v16, %v1382_v16  ;;  %v3694_v54 = vsub.f32 %v5639_v42, %v5460_v60  ;;  %v5798_v8 = vmul.f32 %v1783_v29, %v1783_v29 }
  0xc5   : > { %2335 = vperm.xlu1 %4344, %v5306_v17   ;;  %9647 = vst [vmem:[#allocation74_spill] sm:$0xff] %v5790_v39  ;;  %9648 = vst [vmem:[#allocation75_spill] sm:$0xff] %v5792_v27  ;;  %v476_v49 = vsub.f32 %v5690_v47, %v5463_v61  ;;  %v1005_v25 = vsub.f32 %v5690_v47, %v5466_v62  ;;  %v1406_v10 = vsub.f32 %v5690_v47, %v5469_v63 }
  0xc6   : > { %2499 = vperm.xlu0 %4345, %v5661_v0   ;;  %9649 = vst [vmem:[#allocation76_spill] sm:$0xff] %v5794_v33  ;;  %9650 = vst [vmem:[#allocation77_spill] sm:$0xff] %v5798_v8  ;;  %v475_v37 = vsub.f32 %v5649_v31, %v5463_v61  ;;  %v1004_v16 = vsub.f32 %v5649_v31, %v5466_v62  ;;  %v1405_v42 = vsub.f32 %v5649_v31, %v5469_v63 }
  0xc7   : > { %v1807_v29 = vsub.f32 %v5690_v47, %v5476_v6  ;;  %v5817_v8 = vmul.f32 %v2299_v53, %v2299_v53  ;;  %v5819_v33 = vmul.f32 %v2892_v36, %v2892_v36  ;;  %v5821_v27 = vmul.f32 %v3293_v13, %v3293_v13  ;;  %v2267_v36 = vpop.permute.xlu0 %2266 }
  0xc8   : > { %v5806_v22 = vpop.permute.xlu1 %439  ;;  %v1806_v39 = vsub.f32 %v5649_v31, %v5476_v6  ;;  %v5826_v1 = vmul.f32 %v3694_v54, %v3694_v54  ;;  %v2302_v56 = vsub.f32 %v5680_v55, %v5451_v57  ;;  %v2895_v47 = vsub.f32 %v5680_v55, %v5454_v58 }
  0xc9   : > { %2339 = vperm.xlu1 %4344, %v5416_v44   ;;  %9651 = vst [vmem:[#allocation78_spill] sm:$0xff] %v5817_v8  ;;  %9652 = vst [vmem:[#allocation79_spill] sm:$0xff] %v5819_v33  ;;  %v3296_v53 = vsub.f32 %v5680_v55, %v5457_v59  ;;  %v3697_v13 = vsub.f32 %v5680_v55, %v5460_v60  ;;  %v1021_v33 = vmul.f32 %v1005_v25, %v1005_v25 }
  0xca   : > { %9653 = vst [vmem:[#allocation80_spill] sm:$0xff] %v5821_v27  ;;  %2503 = vperm.xlu0 %4345, %v5337_v24   ;;  %9654 = vst [vmem:[#allocation81_spill] sm:$0xff] %v5826_v1  ;;  %v492_v27 = vmul.f32 %v476_v49, %v476_v49  ;;  %v1422_v31 = vmul.f32 %v1406_v10, %v1406_v10  ;;  %v5836_v8 = vmul.f32 %v475_v37, %v475_v37  ;;  %v9658_v49 = vmov 3  }
  0xcb   : > { %v1823_v24 = vmul.f32 %v1807_v29, %v1807_v29  ;;  %v2304_v54 = vsub.f32 %v5721_v41, %v5451_v57  ;;  %v2897_v1 = vsub.f32 %v5721_v41, %v5454_v58  ;;  %v5843_v51 = vmul.f32 %v1004_v16, %v1004_v16 }
  0xcc   : > { %9655 = vst [vmem:[#allocation82_spill] sm:$0xff] %v5836_v8  ;;  %v5845_v50 = vmul.f32 %v1405_v42, %v1405_v42  ;;  %v3298_v55 = vsub.f32 %v5721_v41, %v5457_v59  ;;  %v3699_v25 = vsub.f32 %v5721_v41, %v5460_v60  ;;  %v5851_v10 = vpop.permute.xlu1 %447  ;;  %v5854_v37 = vmul.f32 %v1806_v39, %v1806_v39 }
  0xcd   : > { %2347 = vperm.xlu1 %4344, %v5312_v19   ;;  %9656 = vst [vmem:[#allocation83_spill] sm:$0xff] %v5843_v51  ;;  %v5856_v29 = vmul.f32 %v2302_v56, %v2302_v56  ;;  %v5858_v8 = vmul.f32 %v2895_v47, %v2895_v47  ;;  %v5860_v16 = vmul.f32 %v3296_v53, %v3296_v53  ;;  %v2277_v53 = vpop.permute.xlu0 %2276 }
  0xce   : > { %9657 = vst [vmem:[#allocation84_spill] sm:$0xff] %v5845_v50  ;;  %4348 = vset.pattern.permute.xlu0 %v9658_v49  ;;  %9659 = vst [vmem:[#allocation85_spill] sm:$0xff] %v5854_v37  ;;  %v5863_v42 = vmul.f32 %v3697_v13, %v3697_v13  ;;  %v5866_v50 = vadd.f32 %v492_v27, %v5503_v34  ;;  %v5869_v41 = vadd.f32 %v1021_v33, %v5505_v26 }
  0xcf   : > { %9660 = vst [vmem:[#allocation86_spill] sm:$0xff] %v5856_v29  ;;  %9661 = vst [vmem:[#allocation87_spill] sm:$0xff] %v5858_v8  ;;  %639 = vperm.xlu0 %4348, %v5245_v2   ;;  %v5872_v51 = vadd.f32 %v1422_v31, %v5507_v15  ;;  %v5875_v56 = vadd.f32 %v1823_v24, %v5511_v43  ;;  %v5877_v39 = vmul.f32 %v2304_v54, %v2304_v54 }
  0xd0   : > { %9662 = vst [vmem:[#allocation88_spill] sm:$0xff] %v5860_v16  ;;  %9663 = vst [vmem:[#allocation89_spill] sm:$0xff] %v5863_v42  ;;  %v5879_v47 = vmul.f32 %v2897_v1, %v2897_v1  ;;  %v478_v2 = vsub.f32 %v5731_v32, %v5463_v61  ;;  %v5884_v34 = vmul.f32 %v3298_v55, %v3298_v55  ;;  %v5909_v55 = vpop.permute.xlu1 %455 }
  0xd1   : > { %9664 = vst [vmem:[#allocation90_spill] sm:$0xff] %v5877_v39  ;;  %2355 = vperm.xlu1 %4344, %v5317_v20   ;;  %v5886_v26 = vmul.f32 %v3699_v25, %v3699_v25  ;;  %v1007_v15 = vsub.f32 %v5731_v32, %v5466_v62  ;;  %v1408_v43 = vsub.f32 %v5731_v32, %v5469_v63  ;;  %v2287_v29 = vpop.permute.xlu0 %2286 }
  0xd2   : > { %9665 = vst [vmem:[#allocation91_spill] sm:$0xff] %v5879_v47  ;;  %9666 = vst [vmem:[#allocation92_spill] sm:$0xff] %v5884_v34  ;;  %v1809_v1 = vsub.f32 %v5731_v32, %v5476_v6  ;;  %v2306_v27 = vsub.f32 %v5778_v48, %v5451_v57  ;;  %v2899_v33 = vsub.f32 %v5778_v48, %v5454_v58 }
  0xd3   : > { %9667 = vst [vmem:[#allocation93_spill] sm:$0xff] %v5886_v26  ;;  %v3300_v13 = vsub.f32 %v5778_v48, %v5457_v59  ;;  %651 = vperm.xlu0 %4348, %v5250_v3   ;;  %v3701_v31 = vsub.f32 %v5778_v48, %v5460_v60  ;;  %v480_v24 = vsub.f32 %v5767_v12, %v5463_v61 }
  0xd4   : > { %v1009_v32 = vsub.f32 %v5767_v12, %v5466_v62  ;;  %v1410_v54 = vsub.f32 %v5767_v12, %v5469_v63  ;;  %v5911_v25 = vmul.f32 %v478_v2, %v478_v2  ;;  %v1811_v26 = vsub.f32 %v5767_v12, %v5476_v6 }
  0xd5   : > { %v2308_v3 = vsub.f32 %v2267_v36, %v5451_v57  ;;  %v2901_v48 = vsub.f32 %v2267_v36, %v5454_v58  ;;  %2363 = vperm.xlu1 %4344, %v5322_v21   ;;  %v5918_v34 = vmul.f32 %v1007_v15, %v1007_v15  ;;  %v5920_v47 = vmul.f32 %v1408_v43, %v1408_v43 }
  0xd6   : > { %9668 = vst [vmem:[#allocation94_spill] sm:$0xff] %v5911_v25  ;;  %v3302_v39 = vsub.f32 %v2267_v36, %v5457_v59  ;;  %v3703_v42 = vsub.f32 %v2267_v36, %v5460_v60  ;;  %v5924_v16 = vmul.f32 %v1809_v1, %v1809_v1  ;;  %v5926_v2 = vmul.f32 %v2306_v27, %v2306_v27 }
  0xd7   : > { %9669 = vst [vmem:[#allocation95_spill] sm:$0xff] %v5918_v34  ;;  %9670 = vst [vmem:[#allocation96_spill] sm:$0xff] %v5920_v47  ;;  %v5928_v8 = vmul.f32 %v2899_v33, %v2899_v33  ;;  %v5930_v12 = vmul.f32 %v3300_v13, %v3300_v13  ;;  %659 = vperm.xlu0 %4348, %v5258_v5   ;;  %v5933_v21 = vmul.f32 %v3701_v31, %v3701_v31  ;;  %v9682_v13 = vmov 2  }
  0xd8   : > { %9671 = vst [vmem:[#allocation97_spill] sm:$0xff] %v5924_v16  ;;  %9672 = vst [vmem:[#allocation98_spill] sm:$0xff] %v5926_v2  ;;  %v5935_v15 = vmul.f32 %v480_v24, %v480_v24  ;;  %v5937_v43 = vmul.f32 %v1009_v32, %v1009_v32  ;;  %v5939_v47 = vmul.f32 %v1410_v54, %v1410_v54  ;;  %v5958_v32 = vpop.permute.xlu1 %463 }
  0xd9   : > { %9673 = vst [vmem:[#allocation99_spill] sm:$0xff] %v5928_v8  ;;  %9674 = vst [vmem:[#allocation100_spill] sm:$0xff] %v5930_v12  ;;  %v5941_v36 = vmul.f32 %v1811_v26, %v1811_v26  ;;  %v5943_v1 = vmul.f32 %v2308_v3, %v2308_v3  ;;  %v5945_v27 = vmul.f32 %v2901_v48, %v2901_v48  ;;  %4346 = vset.pattern.permute.xlu1 %v9682_v13 }
  0xda   : > { %9675 = vst [vmem:[#allocation101_spill] sm:$0xff] %v5933_v21  ;;  %9676 = vst [vmem:[#allocation102_spill] sm:$0xff] %v5935_v15  ;;  %v482_v33 = vsub.f32 %v5806_v22, %v5463_v61  ;;  %v5950_v5 = vmul.f32 %v3302_v39, %v3302_v39  ;;  %v5952_v31 = vmul.f32 %v3703_v42, %v3703_v42  ;;  %2451 = vperm.xlu1 %4346, %v5306_v17   ;;  %v408_v21 = vpop.permute.xlu0 %407 }
  0xdb   : > { %9677 = vst [vmem:[#allocation103_spill] sm:$0xff] %v5937_v43  ;;  %9678 = vst [vmem:[#allocation104_spill] sm:$0xff] %v5939_v47  ;;  %v1011_v24 = vsub.f32 %v5806_v22, %v5466_v62  ;;  %v1412_v26 = vsub.f32 %v5806_v22, %v5469_v63  ;;  %v1813_v54 = vsub.f32 %v5806_v22, %v5476_v6  ;;  %667 = vperm.xlu0 %4348, %v5266_v7   ;;  %v9715_v47 = vld [vmem:[#allocation22_spill] sm:$0xff]  ;;  %v9716_v43 = vld [vmem:[#allocation23_spill] sm:$0xff] }
  0xdc   : > { %9679 = vst [vmem:[#allocation105_spill] sm:$0xff] %v5941_v36  ;;  %9680 = vst [vmem:[#allocation106_spill] sm:$0xff] %v5943_v1  ;;  %v2310_v3 = vsub.f32 %v2277_v53, %v5451_v57  ;;  %v2903_v39 = vsub.f32 %v2277_v53, %v5454_v58  ;;  %v3304_v42 = vsub.f32 %v2277_v53, %v5457_v59 }
  0xdd   : > { %9681 = vst [vmem:[#allocation107_spill] sm:$0xff] %v5945_v27  ;;  %9683 = vst [vmem:[#allocation108_spill] sm:$0xff] %v5950_v5  ;;  %v3705_v48 = vsub.f32 %v2277_v53, %v5460_v60  ;;  %v1013_v5 = vsub.f32 %v5851_v10, %v5466_v62  ;;  %v1414_v17 = vsub.f32 %v5851_v10, %v5469_v63 }
  0xde   : > { %9684 = vst [vmem:[#allocation109_spill] sm:$0xff] %v5952_v31  ;;  %v484_v31 = vsub.f32 %v5851_v10, %v5463_v61  ;;  %v5974_v22 = vmul.f32 %v482_v33, %v482_v33  ;;  %v1815_v27 = vsub.f32 %v5851_v10, %v5476_v6  ;;  %v2312_v1 = vsub.f32 %v2287_v29, %v5451_v57 }
  0xdf   : > { %v2905_v7 = vsub.f32 %v2287_v29, %v5454_v58  ;;  %v5980_v53 = vmul.f32 %v1011_v24, %v1011_v24  ;;  %v5982_v12 = vmul.f32 %v1412_v26, %v1412_v26  ;;  %v3306_v8 = vsub.f32 %v2287_v29, %v5457_v59  ;;  %2455 = vperm.xlu1 %4346, %v5416_v44  }
  0xe0   : > { %9685 = vst [vmem:[#allocation110_spill] sm:$0xff] %v5974_v22  ;;  %v3707_v2 = vsub.f32 %v2287_v29, %v5460_v60  ;;  %v5987_v33 = vmul.f32 %v1813_v54, %v1813_v54  ;;  %v5989_v22 = vmul.f32 %v2310_v3, %v2310_v3  ;;  %v5991_v10 = vmul.f32 %v2903_v39, %v2903_v39  ;;  %v524_v29 = vpop.permute.xlu1 %523 }
  0xe1   : > { %9686 = vst [vmem:[#allocation111_spill] sm:$0xff] %v5980_v53  ;;  %9687 = vst [vmem:[#allocation112_spill] sm:$0xff] %v5982_v12  ;;  %v5993_v57 = vmul.f32 %v3304_v42, %v3304_v42  ;;  %675 = vperm.xlu0 %4348, %v5274_v9   ;;  %v5996_v24 = vmul.f32 %v3705_v48, %v3705_v48  ;;  %v5998_v26 = vmul.f32 %v484_v31, %v484_v31 }
  0xe2   : > { %9688 = vst [vmem:[#allocation113_spill] sm:$0xff] %v5987_v33  ;;  %9689 = vst [vmem:[#allocation114_spill] sm:$0xff] %v5989_v22  ;;  %v6000_v58 = vmul.f32 %v1013_v5, %v1013_v5  ;;  %v6002_v59 = vmul.f32 %v1414_v17, %v1414_v17  ;;  %v6004_v44 = vmul.f32 %v1815_v27, %v1815_v27  ;;  %v420_v17 = vpop.permute.xlu0 %419 }
  0xe3   : > { %9690 = vst [vmem:[#allocation115_spill] sm:$0xff] %v5991_v10  ;;  %9691 = vst [vmem:[#allocation116_spill] sm:$0xff] %v5993_v57  ;;  %v6006_v54 = vmul.f32 %v2312_v1, %v2312_v1  ;;  %v6008_v3 = vmul.f32 %v2905_v7, %v2905_v7  ;;  %v474_v39 = vsub.f32 %v408_v21, %v5463_v61  ;;  %2463 = vperm.xlu1 %4346, %v5312_v19   ;;  %v9702_v7 = vld [vmem:[#allocation11_spill] sm:$0xff]  ;;  %v9707_v10 = vld [vmem:[#allocation20_spill] sm:$0xff] }
  0xe4   : > { %9692 = vst [vmem:[#allocation117_spill] sm:$0xff] %v5996_v24  ;;  %9693 = vst [vmem:[#allocation118_spill] sm:$0xff] %v5998_v26  ;;  %v6011_v42 = vmul.f32 %v3306_v8, %v3306_v8  ;;  %v6013_v9 = vmul.f32 %v3707_v2, %v3707_v2  ;;  %v1003_v31 = vsub.f32 %v408_v21, %v5466_v62  ;;  %v9706_v57 = vld [vmem:[#allocation19_spill] sm:$0xff] }
  0xe5   : > { %9694 = vst [vmem:[#allocation119_spill] sm:$0xff] %v6000_v58  ;;  %9695 = vst [vmem:[#allocation120_spill] sm:$0xff] %v6002_v59  ;;  %v1404_v5 = vsub.f32 %v408_v21, %v5469_v63  ;;  %v486_v27 = vsub.f32 %v5909_v55, %v5463_v61  ;;  %v1015_v1 = vsub.f32 %v5909_v55, %v5466_v62  ;;  %683 = vperm.xlu0 %4348, %v5282_v11  }
  0xe6   : > { %9696 = vst [vmem:[#allocation121_spill] sm:$0xff] %v6004_v44  ;;  %9697 = vst [vmem:[#allocation122_spill] sm:$0xff] %v6006_v54  ;;  %v1416_v48 = vsub.f32 %v5909_v55, %v5469_v63  ;;  %v590_v8 = vsub.f32 %v524_v29, %v5484_v14  ;;  %v1817_v2 = vsub.f32 %v5909_v55, %v5476_v6 }
  0xe7   : > { %9698 = vst [vmem:[#allocation123_spill] sm:$0xff] %v6008_v3  ;;  %9699 = vst [vmem:[#allocation124_spill] sm:$0xff] %v6011_v42  ;;  %v6030_v19 = vrot.slane %v5422_v46, %v5419_v45  ;;  %v9704_v42 = vld [vmem:[#allocation12_spill] sm:$0xff]  ;;  %v490_v54 = vmul.f32 %v474_v39, %v474_v39  ;;  %v1805_v24 = vsub.f32 %v408_v21, %v5476_v6  ;;  %2471 = vperm.xlu1 %4346, %v5317_v20   ;;  %v9709_v39 = vld [vmem:[#allocation3_spill] sm:$0xff]  ;;  %v532_v20 = vpop.permute.xlu1 %531 }
  0xe8   : > { %9700 = vst [vmem:[#allocation125_spill] sm:$0xff] %v6013_v9  ;;  %v6034_v9 = vrot.slane %v9702_v7, %v5419_v45  ;;  %v6038_v3 = vrot.slane %v9704_v42, %v5419_v45  ;;  %v1055_v11 = vsub.f32 %v524_v29, %v9706_v57  ;;  %v1456_v22 = vsub.f32 %v524_v29, %v9707_v10  ;;  %v9708_v42 = vld [vmem:[#allocation21_spill] sm:$0xff] }
  0xe9   : > { %9701 = vst [vmem:[#allocation126_spill] sm:$0xff] %v6030_v19  ;;  %v1019_v55 = vmul.f32 %v1003_v31, %v1003_v31  ;;  %v1420_v60 = vmul.f32 %v1404_v5, %v1404_v5  ;;  %v477_v46 = vsub.f32 %v420_v17, %v5463_v61  ;;  %v1006_v44 = vsub.f32 %v420_v17, %v5466_v62  ;;  %v9710_v21 = vld [vmem:[#allocation13_spill] sm:$0xff] }
  0xea   : > { %9703 = vst [vmem:[#allocation11_spill] sm:$0xff] %v6034_v9  ;;  %9705 = vst [vmem:[#allocation12_spill] sm:$0xff] %v6038_v3  ;;  %v1407_v7 = vsub.f32 %v420_v17, %v5469_v63  ;;  %v606_v59 = vmul.f32 %v590_v8, %v590_v8  ;;  %v1857_v58 = vsub.f32 %v524_v29, %v9708_v42  ;;  %691 = vperm.xlu0 %4348, %v9709_v39  }
  0xeb   : > { %v6051_v26 = vrot.slane %v9710_v21, %v5419_v45  ;;  %v6053_v33 = vmul.f32 %v486_v27, %v486_v27  ;;  %v6055_v31 = vmul.f32 %v1015_v1, %v1015_v1  ;;  %v6057_v5 = vmul.f32 %v1416_v48, %v1416_v48  ;;  %4347 = vset.pattern.permute.xlu1 %v9642_v40 }
  0xec   : > { %v1808_v12 = vsub.f32 %v420_v17, %v5476_v6  ;;  %v506_v53 = vadd.f32 %v490_v54, %v5523_v4  ;;  %v1821_v8 = vmul.f32 %v1805_v24, %v1805_v24  ;;  %v1071_v36 = vmul.f32 %v1055_v11, %v1055_v11  ;;  %2367 = vperm.xlu1 %4347, %v5579_v38   ;;  %v9718_v17 = vld [vmem:[#allocation4_spill] sm:$0xff]  ;;  %v9723_v24 = vld [vmem:[#allocation25_spill] sm:$0xff]  ;;  %v9724_v54 = vld [vmem:[#allocation26_spill] sm:$0xff] }
  0xed   : > { %9711 = vst [vmem:[#allocation19_spill] sm:$0xff] %v6051_v26  ;;  %9712 = vst [vmem:[#allocation20_spill] sm:$0xff] %v6053_v33  ;;  %v1472_v29 = vmul.f32 %v1456_v22, %v1456_v22  ;;  %v1035_v39 = vadd.f32 %v1019_v55, %v9715_v47  ;;  %v1436_v15 = vadd.f32 %v1420_v60, %v9716_v43  ;;  %v9734_v33 = vld [vmem:[#allocation7_spill] sm:$0xff] }
  0xee   : > { %9713 = vst [vmem:[#allocation21_spill] sm:$0xff] %v6055_v31  ;;  %9714 = vst [vmem:[#allocation3_spill] sm:$0xff] %v6057_v5  ;;  %v493_v45 = vmul.f32 %v477_v46, %v477_v46  ;;  %v1022_v21 = vmul.f32 %v1006_v44, %v1006_v44  ;;  %v1423_v27 = vmul.f32 %v1407_v7, %v1407_v7  ;;  %v428_v5 = vpop.permute.xlu0 %427  ;;  %699 = vperm.xlu0 %4348, %v9718_v17   ;;  %v536_v46 = vpop.permute.xlu1 %535 }
  0xef   : > { %v6064_v1 = vadd.f32 %v606_v59, %v506_v53  ;;  %v1873_v48 = vmul.f32 %v1857_v58, %v1857_v58  ;;  %v6068_v4 = vmul.f32 %v1817_v2, %v1817_v2  ;;  %v6072_v47 = vsub.f32 %v5958_v32, %v5463_v61  ;;  %v9720_v58 = vld [vmem:[#allocation24_spill] sm:$0xff] }
  0xf0   : > { %v6076_v60 = vsub.f32 %v5958_v32, %v5466_v62  ;;  %v1824_v40 = vmul.f32 %v1808_v12, %v1808_v12  ;;  %v6080_v59 = vsub.f32 %v5958_v32, %v5469_v63  ;;  %v1837_v43 = vadd.f32 %v1821_v8, %v9720_v58  ;;  %v9725_v12 = vld [vmem:[#allocation27_spill] sm:$0xff]  ;;  %v9729_v8 = vld [vmem:[#allocation6_spill] sm:$0xff] }
  0xf1   : > { %9717 = vst [vmem:[#allocation13_spill] sm:$0xff] %v6064_v1  ;;  %9719 = vst [vmem:[#allocation22_spill] sm:$0xff] %v6068_v4  ;;  %v6083_v22 = vadd.f32 %v1071_v36, %v1035_v39  ;;  %v6085_v53 = vadd.f32 %v1472_v29, %v1436_v15  ;;  %v509_v44 = vadd.f32 %v493_v45, %v9723_v24  ;;  %v6093_v17 = vmul.f32 0.04725898, %v6064_v1  ;;  %v9728_v15 = vld [vmem:[#allocation5_spill] sm:$0xff]  ;;  %v9730_v29 = vld [vmem:[#allocation28_spill] sm:$0xff] }
  0xf2   : > { %v1038_v2 = vadd.f32 %v1022_v21, %v9724_v54  ;;  %v479_v11 = vsub.f32 %v428_v5, %v5463_v61  ;;  %v1008_v55 = vsub.f32 %v428_v5, %v5466_v62  ;;  %v1439_v7 = vadd.f32 %v1423_v27, %v9725_v12  ;;  %2371 = vperm.xlu1 %4347, %v9728_v15  }
  0xf3   : > { %9721 = vst [vmem:[#allocation23_spill] sm:$0xff] %v6083_v22  ;;  %9722 = vst [vmem:[#allocation4_spill] sm:$0xff] %v6085_v53  ;;  %v6095_v4 = vadd.f32 %v1873_v48, %v1837_v43  ;;  %v592_v36 = vsub.f32 %v532_v20, %v5484_v14  ;;  %2563 = vperm.xlu0 %4348, %v9729_v8   ;;  %v1840_v39 = vadd.f32 %v1824_v40, %v9730_v29 }
  0xf4   : > { %9726 = vst [vmem:[#allocation24_spill] sm:$0xff] %v6093_v17  ;;  %v1409_v45 = vsub.f32 %v428_v5, %v5469_v63  ;;  %v1810_v21 = vsub.f32 %v428_v5, %v5476_v6  ;;  %v1057_v58 = vsub.f32 %v532_v20, %v9706_v57  ;;  %v6105_v27 = vmul.f32 0.04725898, %v6083_v22 }
  0xf5   : > { %9727 = vst [vmem:[#allocation25_spill] sm:$0xff] %v6095_v4  ;;  %v6108_v48 = vmul.f32 0.04725898, %v6085_v53  ;;  %v1458_v43 = vsub.f32 %v532_v20, %v9707_v10  ;;  %v593_v24 = vsub.f32 %v536_v46, %v5484_v14  ;;  %v495_v54 = vmul.f32 %v479_v11, %v479_v11 }
  0xf6   : > { %9731 = vst [vmem:[#allocation26_spill] sm:$0xff] %v6105_v27  ;;  %v1024_v12 = vmul.f32 %v1008_v55, %v1008_v55  ;;  %v1859_v40 = vsub.f32 %v532_v20, %v9708_v42  ;;  %v1058_v15 = vsub.f32 %v536_v46, %v9706_v57  ;;  %v786_v5 = vsub.f32 1.0, %v6093_v17  ;;  %2375 = vperm.xlu1 %4347, %v5620_v35  }
  0xf7   : > { %9732 = vst [vmem:[#allocation27_spill] sm:$0xff] %v6108_v48  ;;  %v6116_v8 = vmul.f32 0.04725898, %v6095_v4  ;;  %v608_v29 = vmul.f32 %v592_v36, %v592_v36  ;;  %v609_v31 = vmul.f32 %v593_v24, %v593_v24  ;;  %2575 = vperm.xlu0 %4348, %v9734_v33   ;;  %v1073_v16 = vmul.f32 %v1057_v58, %v1057_v58 }
  0xf8   : > { %v1074_v34 = vmul.f32 %v1058_v15, %v1058_v15  ;;  %v1459_v11 = vsub.f32 %v536_v46, %v9707_v10  ;;  %v1860_v55 = vsub.f32 %v536_v46, %v9708_v42  ;;  %v1187_v20 = vsub.f32 1.0, %v6105_v27  ;;  %v436_v46 = vpop.permute.xlu0 %435  ;;  %v9737_v27 = vld [vmem:[#allocation8_spill] sm:$0xff] }
  0xf9   : > { %9733 = vst [vmem:[#allocation5_spill] sm:$0xff] %v6116_v8  ;;  %v1588_v25 = vsub.f32 1.0, %v6108_v48  ;;  %v1474_v17 = vmul.f32 %v1458_v43, %v1458_v43  ;;  %v6124_v37 = vadd.f32 %v609_v31, %v509_v44  ;;  %v1875_v26 = vmul.f32 %v1859_v40, %v1859_v40 }
  0xfa   : > { %v6126_v36 = vadd.f32 %v1074_v34, %v1038_v2  ;;  %v1475_v24 = vmul.f32 %v1459_v11, %v1459_v11  ;;  %v1876_v3 = vmul.f32 %v1860_v55, %v1860_v55  ;;  %4351 = vrsqrt.f32 %v6064_v1  ;;  %2379 = vperm.xlu1 %4347, %v5332_v23  }
  0xfb   : > { %9735 = vst [vmem:[#allocation6_spill] sm:$0xff] %v6124_v37  ;;  %v1425_v33 = vmul.f32 %v1409_v45, %v1409_v45  ;;  %v1826_v58 = vmul.f32 %v1810_v21, %v1810_v21  ;;  %v6130_v15 = vadd.f32 %v608_v29, %v5866_v50  ;;  %2583 = vperm.xlu0 %4348, %v9737_v27   ;;  %v802_v43 = vmax.f32 %v786_v5, 1e-06  ;;  %v544_v27 = vpop.permute.xlu1 %543  ;;  %v9746_v5 = vld [vmem:[#allocation36_spill] sm:$0xff] }
  0xfc   : > { %9736 = vst [vmem:[#allocation28_spill] sm:$0xff] %v6126_v36  ;;  %v6135_v31 = vadd.f32 %v1073_v16, %v5869_v41  ;;  %v6137_v34 = vadd.f32 %v1475_v24, %v1439_v7  ;;  %v6139_v44 = vadd.f32 %v1876_v3, %v1840_v39  ;;  %4353 = vrsqrt.f32 %v6083_v22  ;;  %v9742_v41 = vld [vmem:[#allocation33_spill] sm:$0xff] }
  0xfd   : > { %v1203_v2 = vmax.f32 %v1187_v20, 1e-06  ;;  %v1989_v45 = vsub.f32 1.0, %v6116_v8  ;;  %v6144_v50 = vadd.f32 %v1474_v17, %v5872_v51  ;;  %4355 = vrsqrt.f32 %v6085_v53  ;;  %v9743_v51 = vld [vmem:[#allocation9_spill] sm:$0xff] }
  0xfe   : > { %9738 = vst [vmem:[#allocation7_spill] sm:$0xff] %v6137_v34  ;;  %9739 = vst [vmem:[#allocation8_spill] sm:$0xff] %v6139_v44  ;;  %v1604_v23 = vmax.f32 %v1588_v25, 1e-06  ;;  %v6148_v21 = vadd.f32 %v1875_v26, %v5875_v56  ;;  %v481_v16 = vsub.f32 %v436_v46, %v5463_v61  ;;  %4357 = vrsqrt.f32 %v6095_v4  ;;  %2383 = vperm.xlu1 %4347, %v5661_v0   ;;  %v9744_v25 = vld [vmem:[#allocation34_spill] sm:$0xff]  ;;  %v9745_v26 = vld [vmem:[#allocation35_spill] sm:$0xff] }
  0xff   : > { %9740 = vst [vmem:[#allocation127_spill] sm:$0xff] %v6144_v50  ;;  %v511_v3 = vadd.f32 %v495_v54, %v9742_v41  ;;  %v6154_v7 = vmul.f32 0.04725898, %v6130_v15  ;;  %v1010_v39 = vsub.f32 %v436_v46, %v5466_v62  ;;  %2591 = vperm.xlu0 %4348, %v9743_v51   ;;  %4359 = vrcp.f32 %v802_v43 }
 0x100   : > { %9741 = vst [vmem:[#allocation128_spill] sm:$0xff] %v6148_v21  ;;  %v1040_v56 = vadd.f32 %v1024_v12, %v9744_v25  ;;  %v1441_v17 = vadd.f32 %v1425_v33, %v9745_v26  ;;  %v6162_v40 = vmul.f32 0.04725898, %v6135_v31  ;;  %4361 = vrcp.f32 %v1203_v2 }
 0x101   : > { %v2005_v54 = vmax.f32 %v1989_v45, 1e-06  ;;  %v1842_v29 = vadd.f32 %v1826_v58, %v9746_v5  ;;  %v6166_v11 = vmul.f32 0.04725898, %v6144_v50  ;;  %4363 = vrcp.f32 %v1604_v23  ;;  %v6176_v45 = vld [vmem:[%s5239_s22 + $0xf0] sm:$0xff] }
 0x102   : > { %v6169_v55 = vmul.f32 0.04725898, %v6148_v21  ;;  %v497_v20 = vmul.f32 %v481_v16, %v481_v16  ;;  %v595_v24 = vsub.f32 %v544_v27, %v5484_v14  ;;  %v788_v12 = vsub.f32 1.0, %v6154_v7  ;;  %2387 = vperm.xlu1 %4347, %v6176_v45  }
 0x103   : > { %v1026_v33 = vmul.f32 %v1010_v39, %v1010_v39  ;;  %v1060_v43 = vsub.f32 %v544_v27, %v9706_v57  ;;  %v1461_v2 = vsub.f32 %v544_v27, %v9707_v10  ;;  %2599 = vperm.xlu0 %4348, %v5579_v38   ;;  %v1189_v58 = vsub.f32 1.0, %v6162_v40 }
 0x104   : > { %v1411_v23 = vsub.f32 %v436_v46, %v5469_v63  ;;  %v611_v16 = vmul.f32 %v595_v24, %v595_v24  ;;  %v1862_v41 = vsub.f32 %v544_v27, %v9708_v42  ;;  %v6183_v51 = vpop.eup %4351  ;;  %v1590_v39 = vsub.f32 1.0, %v6166_v11 }
 0x105   : > { %9747 = vst [vmem:[#allocation33_spill] sm:$0xff] %v6183_v51  ;;  %v1812_v25 = vsub.f32 %v436_v46, %v5476_v6  ;;  %v1076_v26 = vmul.f32 %v1060_v43, %v1060_v43  ;;  %v1477_v5 = vmul.f32 %v1461_v2, %v1461_v2  ;;  %4365 = vrcp.f32 %v2005_v54 }
 0x106   : > { %v1991_v4 = vsub.f32 1.0, %v6169_v55  ;;  %v6188_v53 = vadd.f32 %v611_v16, %v511_v3  ;;  %v1878_v38 = vmul.f32 %v1862_v41, %v1862_v41  ;;  %v6190_v22 = vpop.eup %4353  ;;  %4367 = vrsqrt.f32 %v6130_v15  ;;  %2391 = vperm.xlu1 %4347, %v5702_v18  }
 0x107   : > { %9749 = vst [vmem:[#allocation34_spill] sm:$0xff] %v6190_v22  ;;  %v804_v24 = vmax.f32 %v788_v12, 1e-06  ;;  %v6193_v27 = vadd.f32 %v1076_v26, %v1040_v56  ;;  %v6195_v51 = vadd.f32 %v1477_v5, %v1441_v17  ;;  %v6198_v46 = vpop.eup %4355  ;;  %4369 = vrsqrt.f32 %v6135_v31  ;;  %2607 = vperm.xlu0 %4348, %v5620_v35   ;;  %v552_v26 = vpop.permute.xlu1 %551 }
 0x108   : > { %9748 = vst [vmem:[#allocation9_spill] sm:$0xff] %v6188_v53  ;;  %9752 = vst [vmem:[#allocation129_spill] sm:$0xff] %v6198_v46  ;;  %v1205_v54 = vmax.f32 %v1189_v58, 1e-06  ;;  %v1427_v43 = vmul.f32 %v1411_v23, %v1411_v23  ;;  %v6201_v3 = vadd.f32 %v1878_v38, %v1842_v29  ;;  %v6204_v2 = vpop.eup %4357  ;;  %v1819_v56 = vsub.f32 %v5958_v32, %v5476_v6  ;;  %v444_v58 = vpop.permute.xlu0 %443  ;;  %v9764_v38 = vld [vmem:[#allocation43_spill] sm:$0xff] }
 0x109   : > { %9750 = vst [vmem:[#allocation35_spill] sm:$0xff] %v6193_v27  ;;  %9751 = vst [vmem:[#allocation36_spill] sm:$0xff] %v6195_v51  ;;  %4371 = vrsqrt.f32 %v6144_v50  ;;  %v1606_v17 = vmax.f32 %v1590_v39, 1e-06  ;;  %v1828_v12 = vmul.f32 %v1812_v25, %v1812_v25  ;;  %v6209_v16 = vpop.eup %4359  ;;  %v6213_v41 = vmul.f32 %v6072_v47, %v6072_v47  ;;  %v9760_v39 = vld [vmem:[#allocation41_spill] sm:$0xff] }
 0x10a   : > { %9753 = vst [vmem:[#allocation130_spill] sm:$0xff] %v6201_v3  ;;  %9754 = vst [vmem:[#allocation131_spill] sm:$0xff] %v6204_v2  ;;  %v6217_v29 = vmul.f32 %v6076_v60, %v6076_v60  ;;  %4373 = vrsqrt.f32 %v6148_v21  ;;  %v2007_v35 = vmax.f32 %v1991_v4, 1e-06  ;;  %v6220_v23 = vpop.eup %4361  ;;  %v6224_v32 = vmul.f32 %v6080_v59, %v6080_v59  ;;  %4349 = vset.pattern.permute.xlu1 %v9682_v13  ;;  %v9763_v4 = vld [vmem:[#allocation42_spill] sm:$0xff]  ;;  %v9766_v59 = vld [vmem:[#allocation44_spill] sm:$0xff] }
 0x10b   : > { %9755 = vst [vmem:[#allocation132_spill] sm:$0xff] %v6209_v16  ;;  %9756 = vst [vmem:[#allocation133_spill] sm:$0xff] %v6213_v41  ;;  %4375 = vrcp.f32 %v804_v24  ;;  %v513_v25 = vadd.f32 %v497_v20, %v9760_v39  ;;  %v6228_v47 = vmul.f32 0.04725898, %v6124_v37  ;;  %v6231_v60 = vpop.eup %4363  ;;  %v1042_v5 = vadd.f32 %v1026_v33, %v9763_v4  ;;  %2615 = vperm.xlu0 %4348, %v5661_v0  }
 0x10c   : > { %9757 = vst [vmem:[#allocation134_spill] sm:$0xff] %v6217_v29  ;;  %9758 = vst [vmem:[#allocation135_spill] sm:$0xff] %v6220_v23  ;;  %4377 = vrcp.f32 %v1205_v54  ;;  %v1443_v2 = vadd.f32 %v1427_v43, %v9764_v38  ;;  %v6236_v46 = vmul.f32 0.04725898, %v6126_v36  ;;  %2507 = vperm.xlu1 %4349, %v5702_v18   ;;  %v1844_v20 = vadd.f32 %v1828_v12, %v9766_v59 }
 0x10d   : > { %9759 = vst [vmem:[#allocation136_spill] sm:$0xff] %v6224_v32  ;;  %9761 = vst [vmem:[#allocation41_spill] sm:$0xff] %v6228_v47  ;;  %4379 = vrcp.f32 %v1606_v17  ;;  %v6242_v24 = vmul.f32 0.04725898, %v6137_v34  ;;  %v483_v13 = vsub.f32 %v444_v58, %v5463_v61  ;;  %v6246_v33 = vmul.f32 0.04725898, %v6139_v44 }
 0x10e   : > { %9762 = vst [vmem:[#allocation137_spill] sm:$0xff] %v6231_v60  ;;  %9765 = vst [vmem:[#allocation42_spill] sm:$0xff] %v6236_v46  ;;  %4381 = vrcp.f32 %v2007_v35  ;;  %v1012_v54 = vsub.f32 %v444_v58, %v5466_v62  ;;  %v597_v43 = vsub.f32 %v552_v26, %v5484_v14  ;;  %v789_v0 = vsub.f32 1.0, %v6228_v47 }
 0x10f   : > { %9767 = vst [vmem:[#allocation43_spill] sm:$0xff] %v6242_v24  ;;  %9768 = vst [vmem:[#allocation44_spill] sm:$0xff] %v6246_v33  ;;  %4383 = vrsqrt.f32 %v6124_v37  ;;  %v1062_v17 = vsub.f32 %v552_v26, %v9706_v57  ;;  %v1463_v12 = vsub.f32 %v552_v26, %v9707_v10  ;;  %v6254_v39 = vpop.eup %4365  ;;  %v1190_v35 = vsub.f32 1.0, %v6236_v46  ;;  %2623 = vperm.xlu0 %4348, %v5702_v18  }
 0x110   : > { %9769 = vst [vmem:[#allocation138_spill] sm:$0xff] %v6254_v39  ;;  %v1413_v4 = vsub.f32 %v444_v58, %v5469_v63  ;;  %v613_v38 = vmul.f32 %v597_v43, %v597_v43  ;;  %v1864_v59 = vsub.f32 %v552_v26, %v9708_v42  ;;  %4350 = vset.pattern.permute.xlu1 %v9658_v49  ;;  %v6261_v37 = vpop.eup %4367  ;;  %v1591_v22 = vsub.f32 1.0, %v6242_v24  ;;  %v5120_v39 = vld [vmem:[%s5239_s22 + $0x88] sm:$0xff] }
 0x111   : > { %v1814_v1 = vsub.f32 %v444_v58, %v5476_v6  ;;  %v1078_v60 = vmul.f32 %v1062_v17, %v1062_v17  ;;  %v1479_v8 = vmul.f32 %v1463_v12, %v1463_v12  ;;  %2567 = vperm.xlu1 %4350, %v5120_v39   ;;  %v6266_v48 = vpop.eup %4369  ;;  %v1992_v43 = vsub.f32 1.0, %v6246_v33 }
 0x112   : > { %9770 = vst [vmem:[#allocation139_spill] sm:$0xff] %v6266_v48  ;;  %v499_v23 = vmul.f32 %v483_v13, %v483_v13  ;;  %v6269_v26 = vadd.f32 %v613_v38, %v513_v25  ;;  %v1880_v18 = vmul.f32 %v1864_v59, %v1864_v59  ;;  %v805_v16 = vmax.f32 %v789_v0, 1e-06  ;;  %v9783_v59 = vld [vmem:[#allocation51_spill] sm:$0xff] }
 0x113   : > { %v6271_v49 = vpop.eup %4371  ;;  %v1028_v32 = vmul.f32 %v1012_v54, %v1012_v54  ;;  %v6273_v29 = vadd.f32 %v1078_v60, %v1042_v5  ;;  %v6275_v58 = vadd.f32 %v1479_v8, %v1443_v2  ;;  %v6279_v12 = vmul.f32 %v1819_v56, %v1819_v56  ;;  %v5121_v60 = vld [vmem:[%s5239_s22 + $0x90] sm:$0xff] }
 0x114   : > { %9771 = vst [vmem:[#allocation140_spill] sm:$0xff] %v6269_v26  ;;  %9772 = vst [vmem:[#allocation141_spill] sm:$0xff] %v6271_v49  ;;  %v6277_v17 = vpop.eup %4373  ;;  %4385 = vrsqrt.f32 %v6126_v36  ;;  %v1206_v39 = vmax.f32 %v1190_v35, 1e-06  ;;  %v6282_v13 = vadd.f32 %v1880_v18, %v1844_v20  ;;  %v1607_v38 = vmax.f32 %v1591_v22, 1e-06  ;;  %v452_v18 = vpop.permute.xlu0 %451 }
 0x115   : > { %9773 = vst [vmem:[#allocation142_spill] sm:$0xff] %v6273_v29  ;;  %9774 = vst [vmem:[#allocation143_spill] sm:$0xff] %v6275_v58  ;;  %v6284_v25 = vpop.eup %4375  ;;  %4387 = vrsqrt.f32 %v6137_v34  ;;  %v1429_v0 = vmul.f32 %v1413_v4, %v1413_v4  ;;  %v1830_v54 = vmul.f32 %v1814_v1, %v1814_v1  ;;  %2571 = vperm.xlu1 %4350, %v5121_v60   ;;  %v2008_v56 = vmax.f32 %v1992_v43, 1e-06  ;;  %v9778_v5 = vld [vmem:[#allocation49_spill] sm:$0xff]  ;;  %v9779_v22 = vld [vmem:[#allocation50_spill] sm:$0xff]  ;;  %v560_v60 = vpop.permute.xlu1 %559 }
 0x116   : > { %9775 = vst [vmem:[#allocation144_spill] sm:$0xff] %v6277_v17  ;;  %9776 = vst [vmem:[#allocation145_spill] sm:$0xff] %v6279_v12  ;;  %v6288_v8 = vpop.eup %4377  ;;  %4389 = vrsqrt.f32 %v6139_v44  ;;  %v515_v35 = vadd.f32 %v499_v23, %v9778_v5  ;;  %v1044_v4 = vadd.f32 %v1028_v32, %v9779_v22  ;;  %v6298_v1 = vmul.f32 0.04725898, %v6188_v53  ;;  %v9784_v22 = vld [vmem:[#allocation52_spill] sm:$0xff]  ;;  %v5122_v36 = vld [vmem:[%s5239_s22 + $0xa0] sm:$0xff] }
 0x117   : > { %9777 = vst [vmem:[#allocation146_spill] sm:$0xff] %v6282_v13  ;;  %v6293_v20 = vpop.eup %4379  ;;  %4391 = vrcp.f32 %v805_v16  ;;  %v6305_v5 = vmul.f32 0.04725898, %v6193_v27  ;;  %v1445_v32 = vadd.f32 %v1429_v0, %v9783_v59  ;;  %v1846_v2 = vadd.f32 %v1830_v54, %v9784_v22  ;;  %v5123_v12 = vld [vmem:[%s5239_s22 + $0xb0] sm:$0xff] }
 0x118   : > { %9780 = vst [vmem:[#allocation49_spill] sm:$0xff] %v6298_v1  ;;  %v6300_v34 = vpop.eup %4381  ;;  %4393 = vrcp.f32 %v1206_v39  ;;  %v6312_v44 = vmul.f32 0.04725898, %v6195_v51  ;;  %v6316_v39 = vmul.f32 0.04725898, %v6201_v3  ;;  %v485_v23 = vsub.f32 %v452_v18, %v5463_v61 }
 0x119   : > { %9781 = vst [vmem:[#allocation50_spill] sm:$0xff] %v6305_v5  ;;  %v6307_v16 = vpop.eup %4383  ;;  %4395 = vrcp.f32 %v1607_v38  ;;  %2579 = vperm.xlu1 %4350, %v5122_v36   ;;  %v599_v43 = vsub.f32 %v560_v60, %v5484_v14  ;;  %v791_v38 = vsub.f32 1.0, %v6298_v1  ;;  %v1014_v0 = vsub.f32 %v452_v18, %v5466_v62  ;;  %v5126_v1 = vld [vmem:[%s5239_s22 + $0xe0] sm:$0xff] }
 0x11a   : > { %9782 = vst [vmem:[#allocation147_spill] sm:$0xff] %v6307_v16  ;;  %9785 = vst [vmem:[#allocation51_spill] sm:$0xff] %v6312_v44  ;;  %4397 = vrcp.f32 %v2008_v56  ;;  %v1064_v54 = vsub.f32 %v560_v60, %v9706_v57  ;;  %v1465_v59 = vsub.f32 %v560_v60, %v9707_v10  ;;  %v1192_v22 = vsub.f32 1.0, %v6305_v5 }
 0x11b   : > { %9786 = vst [vmem:[#allocation52_spill] sm:$0xff] %v6316_v39  ;;  %v1415_v36 = vsub.f32 %v452_v18, %v5469_v63  ;;  %v615_v56 = vmul.f32 %v599_v43, %v599_v43  ;;  %v1866_v16 = vsub.f32 %v560_v60, %v9708_v42  ;;  %v1593_v33 = vsub.f32 1.0, %v6312_v44 }
 0x11c   : > { %v1816_v24 = vsub.f32 %v452_v18, %v5476_v6  ;;  %v1080_v46 = vmul.f32 %v1064_v54, %v1064_v54  ;;  %v1481_v47 = vmul.f32 %v1465_v59, %v1465_v59  ;;  %v1994_v17 = vsub.f32 1.0, %v6316_v39 }
 0x11d   : > { %2587 = vperm.xlu1 %4350, %v5123_v12   ;;  %v501_v21 = vmul.f32 %v485_v23, %v485_v23  ;;  %v6333_v49 = vadd.f32 %v615_v56, %v515_v35  ;;  %v1882_v48 = vmul.f32 %v1866_v16, %v1866_v16  ;;  %4399 = vrsqrt.f32 %v6188_v53 }
 0x11e   : > { %v6330_v41 = vpop.eup %4385  ;;  %v807_v60 = vmax.f32 %v791_v38, 1e-06  ;;  %v6338_v43 = vadd.f32 %v1080_v46, %v1044_v4  ;;  %v6340_v18 = vadd.f32 %v1481_v47, %v1445_v32  ;;  %4401 = vrsqrt.f32 %v6193_v27  ;;  %v460_v38 = vpop.permute.xlu0 %459  ;;  %v5124_v46 = vld [vmem:[%s5239_s22 + $0xc0] sm:$0xff] }
 0x11f   : > { %9787 = vst [vmem:[#allocation148_spill] sm:$0xff] %v6330_v41  ;;  %9788 = vst [vmem:[#allocation149_spill] sm:$0xff] %v6333_v49  ;;  %v6335_v50 = vpop.eup %4387  ;;  %v1208_v12 = vmax.f32 %v1192_v22, 1e-06  ;;  %v1030_v59 = vmul.f32 %v1014_v0, %v1014_v0  ;;  %v6345_v23 = vadd.f32 %v1882_v48, %v1846_v2  ;;  %4403 = vrsqrt.f32 %v6195_v51  ;;  %v568_v22 = vpop.permute.xlu1 %567  ;;  %v5125_v51 = vld [vmem:[%s5239_s22 + $0xd0] sm:$0xff] }
 0x120   : > { %9789 = vst [vmem:[#allocation150_spill] sm:$0xff] %v6335_v50  ;;  %9790 = vst [vmem:[#allocation151_spill] sm:$0xff] %v6338_v43  ;;  %v6342_v54 = vpop.eup %4389  ;;  %v1609_v16 = vmax.f32 %v1593_v33, 1e-06  ;;  %v1431_v56 = vmul.f32 %v1415_v36, %v1415_v36  ;;  %v1832_v53 = vmul.f32 %v1816_v24, %v1816_v24  ;;  %4405 = vrsqrt.f32 %v6201_v3  ;;  %v9802_v33 = vld [vmem:[#allocation59_spill] sm:$0xff] }
 0x121   : > { %9791 = vst [vmem:[#allocation152_spill] sm:$0xff] %v6340_v18  ;;  %9792 = vst [vmem:[#allocation153_spill] sm:$0xff] %v6342_v54  ;;  %v6347_v35 = vpop.eup %4391  ;;  %2595 = vperm.xlu1 %4350, %v5124_v46   ;;  %v2010_v32 = vmax.f32 %v1994_v17, 1e-06  ;;  %v517_v48 = vadd.f32 %v501_v21, %v5695_v28  ;;  %4407 = vrcp.f32 %v807_v60  ;;  %v6361_v0 = vmul.f32 0.04725898, %v6269_v26 }
 0x122   : > { %9793 = vst [vmem:[#allocation154_spill] sm:$0xff] %v6345_v23  ;;  %9794 = vst [vmem:[#allocation155_spill] sm:$0xff] %v6347_v35  ;;  %v6351_v47 = vpop.eup %4393  ;;  %4409 = vrcp.f32 %v1208_v12  ;;  %v9799_v46 = vld [vmem:[#allocation57_spill] sm:$0xff]  ;;  %v6367_v17 = vmul.f32 0.04725898, %v6273_v29  ;;  %v487_v28 = vsub.f32 %v460_v38, %v5463_v61  ;;  %v9801_v21 = vld [vmem:[#allocation58_spill] sm:$0xff]  ;;  %v1848_v3 = vadd.f32 %v1832_v53, %v9802_v33 }
 0x123   : > { %9795 = vst [vmem:[#allocation156_spill] sm:$0xff] %v6351_v47  ;;  %v6356_v2 = vpop.eup %4395  ;;  %9797 = vst [vmem:[#allocation158_spill] sm:$0xff] %v6361_v0  ;;  %v1046_v4 = vadd.f32 %v1030_v59, %v9799_v46  ;;  %4411 = vrcp.f32 %v1609_v16  ;;  %v1447_v60 = vadd.f32 %v1431_v56, %v9801_v21  ;;  %v6373_v24 = vmul.f32 0.04725898, %v6275_v58 }
 0x124   : > { %9796 = vst [vmem:[#allocation157_spill] sm:$0xff] %v6356_v2  ;;  %v6363_v36 = vpop.eup %4397  ;;  %9800 = vst [vmem:[#allocation57_spill] sm:$0xff] %v6367_v17  ;;  %4413 = vrcp.f32 %v2010_v32  ;;  %v6377_v12 = vmul.f32 0.04725898, %v6282_v13  ;;  %v1016_v59 = vsub.f32 %v460_v38, %v5466_v62  ;;  %v601_v46 = vsub.f32 %v568_v22, %v5484_v14 }
 0x125   : > { %9798 = vst [vmem:[#allocation159_spill] sm:$0xff] %v6363_v36  ;;  %9803 = vst [vmem:[#allocation58_spill] sm:$0xff] %v6373_v24  ;;  %2603 = vperm.xlu1 %4350, %v5125_v51   ;;  %v793_v16 = vsub.f32 1.0, %v6361_v0  ;;  %v1417_v56 = vsub.f32 %v460_v38, %v5469_v63  ;;  %v1066_v53 = vsub.f32 %v568_v22, %v9706_v57  ;;  %v1194_v21 = vsub.f32 1.0, %v6367_v17 }
 0x126   : > { %9804 = vst [vmem:[#allocation59_spill] sm:$0xff] %v6377_v12  ;;  %v1467_v33 = vsub.f32 %v568_v22, %v9707_v10  ;;  %v503_v51 = vmul.f32 %v487_v28, %v487_v28  ;;  %v617_v32 = vmul.f32 %v601_v46, %v601_v46  ;;  %v1868_v27 = vsub.f32 %v568_v22, %v9708_v42 }
 0x127   : > { %v6387_v44 = vpop.eup %4399  ;;  %v1595_v5 = vsub.f32 1.0, %v6373_v24  ;;  %v1818_v54 = vsub.f32 %v460_v38, %v5476_v6  ;;  %v1082_v50 = vmul.f32 %v1066_v53, %v1066_v53  ;;  %4415 = vrsqrt.f32 %v6269_v26 }
 0x128   : > { %9805 = vst [vmem:[#allocation160_spill] sm:$0xff] %v6387_v44  ;;  %v1483_v41 = vmul.f32 %v1467_v33, %v1467_v33  ;;  %v6392_v36 = vpop.eup %4401  ;;  %v1996_v2 = vsub.f32 1.0, %v6377_v12  ;;  %v6396_v28 = vadd.f32 %v617_v32, %v517_v48  ;;  %v1884_v46 = vmul.f32 %v1868_v27, %v1868_v27  ;;  %v9818_v32 = vld [vmem:[#allocation64_spill] sm:$0xff] }
 0x129   : > { %2611 = vperm.xlu1 %4350, %v5126_v1   ;;  %9806 = vst [vmem:[#allocation161_spill] sm:$0xff] %v6392_v36  ;;  %v6398_v22 = vpop.eup %4403  ;;  %v809_v44 = vmax.f32 %v793_v16, 1e-06  ;;  %v1032_v47 = vmul.f32 %v1016_v59, %v1016_v59  ;;  %v6400_v35 = vadd.f32 %v1082_v50, %v1046_v4  ;;  %4417 = vrsqrt.f32 %v6273_v29  ;;  %v576_v16 = vpop.permute.xlu1 %575 }
 0x12a   : > { %9807 = vst [vmem:[#allocation162_spill] sm:$0xff] %v6396_v28  ;;  %9808 = vst [vmem:[#allocation163_spill] sm:$0xff] %v6398_v22  ;;  %v6402_v38 = vadd.f32 %v1483_v41, %v1447_v60  ;;  %v6404_v53 = vpop.eup %4405  ;;  %v1210_v1 = vmax.f32 %v1194_v21, 1e-06  ;;  %v1433_v33 = vmul.f32 %v1417_v56, %v1417_v56  ;;  %v6407_v26 = vadd.f32 %v1884_v46, %v1848_v3  ;;  %v468_v60 = vpop.permute.xlu0 %467 }
 0x12b   : > { %9809 = vst [vmem:[#allocation164_spill] sm:$0xff] %v6400_v35  ;;  %9811 = vst [vmem:[#allocation166_spill] sm:$0xff] %v6404_v53  ;;  %v6409_v36 = vpop.eup %4407  ;;  %4419 = vrsqrt.f32 %v6275_v58  ;;  %v1611_v48 = vmax.f32 %v1595_v5, 1e-06  ;;  %v1834_v59 = vmul.f32 %v1818_v54, %v1818_v54  ;;  %v2012_v4 = vmax.f32 %v1996_v2, 1e-06 }
 0x12c   : > { %9810 = vst [vmem:[#allocation165_spill] sm:$0xff] %v6402_v38  ;;  %9812 = vst [vmem:[#allocation167_spill] sm:$0xff] %v6407_v26  ;;  %v6414_v50 = vpop.eup %4409  ;;  %4421 = vrsqrt.f32 %v6282_v13  ;;  %v519_v3 = vadd.f32 %v503_v51, %v5742_v30  ;;  %v1048_v46 = vadd.f32 %v1032_v47, %v9818_v32  ;;  %v9819_v2 = vld [vmem:[#allocation65_spill] sm:$0xff]  ;;  %v6431_v30 = vmul.f32 0.04725898, %v6338_v43  ;;  %v9821_v51 = vld [vmem:[#allocation66_spill] sm:$0xff] }
 0x12d   : > { %9813 = vst [vmem:[#allocation168_spill] sm:$0xff] %v6409_v36  ;;  %2619 = vperm.xlu1 %4350, %v6176_v45   ;;  %9814 = vst [vmem:[#allocation169_spill] sm:$0xff] %v6414_v50  ;;  %v6419_v56 = vpop.eup %4411  ;;  %4423 = vrcp.f32 %v809_v44  ;;  %v6424_v45 = vmul.f32 0.04725898, %v6333_v49  ;;  %v1449_v41 = vadd.f32 %v1433_v33, %v9819_v2  ;;  %v1850_v44 = vadd.f32 %v1834_v59, %v9821_v51 }
 0x12e   : > { %9815 = vst [vmem:[#allocation170_spill] sm:$0xff] %v6419_v56  ;;  %v6426_v54 = vpop.eup %4413  ;;  %4425 = vrcp.f32 %v1210_v1  ;;  %9820 = vst [vmem:[#allocation64_spill] sm:$0xff] %v6431_v30  ;;  %v489_v21 = vsub.f32 %v468_v60, %v5463_v61  ;;  %v603_v5 = vsub.f32 %v576_v16, %v5484_v14  ;;  %v6437_v27 = vmul.f32 0.04725898, %v6340_v18 }
 0x12f   : > { %9816 = vst [vmem:[#allocation171_spill] sm:$0xff] %v6424_v45  ;;  %9817 = vst [vmem:[#allocation172_spill] sm:$0xff] %v6426_v54  ;;  %4427 = vrcp.f32 %v1611_v48  ;;  %v1068_v1 = vsub.f32 %v576_v16, %v9706_v57  ;;  %v1469_v47 = vsub.f32 %v576_v16, %v9707_v10  ;;  %v795_v33 = vsub.f32 1.0, %v6424_v45 }
 0x130   : > { %4429 = vrcp.f32 %v2012_v4  ;;  %9822 = vst [vmem:[#allocation65_spill] sm:$0xff] %v6437_v27  ;;  %v1018_v32 = vsub.f32 %v468_v60, %v5466_v62  ;;  %v619_v2 = vmul.f32 %v603_v5, %v603_v5  ;;  %v1870_v48 = vsub.f32 %v576_v16, %v9708_v42 }
 0x131   : > { %v6444_v59 = vpop.eup %4415  ;;  %v1196_v61 = vsub.f32 1.0, %v6431_v30  ;;  %v6448_v4 = vmul.f32 0.04725898, %v6345_v23  ;;  %v1084_v51 = vmul.f32 %v1068_v1, %v1068_v1  ;;  %v1485_v13 = vmul.f32 %v1469_v47, %v1469_v47 }
 0x132   : > { %9823 = vst [vmem:[#allocation66_spill] sm:$0xff] %v6444_v59  ;;  %v505_v58 = vmul.f32 %v489_v21, %v489_v21  ;;  %v1419_v29 = vsub.f32 %v468_v60, %v5469_v63  ;;  %v6451_v53 = vadd.f32 %v619_v2, %v519_v3  ;;  %v1886_v22 = vmul.f32 %v1870_v48, %v1870_v48 }
 0x133   : > { %9824 = vst [vmem:[#allocation173_spill] sm:$0xff] %v6448_v4  ;;  %v6453_v24 = vpop.eup %4417  ;;  %v1597_v62 = vsub.f32 1.0, %v6437_v27  ;;  %v1820_v16 = vsub.f32 %v468_v60, %v5476_v6  ;;  %v6457_v5 = vadd.f32 %v1084_v51, %v1048_v46  ;;  %v6459_v59 = vadd.f32 %v1485_v13, %v1449_v41  ;;  %v9836_v13 = vld [vmem:[#allocation71_spill] sm:$0xff] }
 0x134   : > { %9825 = vst [vmem:[#allocation174_spill] sm:$0xff] %v6451_v53  ;;  %9826 = vst [vmem:[#allocation175_spill] sm:$0xff] %v6453_v24  ;;  %4431 = vrsqrt.f32 %v6333_v49  ;;  %v811_v21 = vmax.f32 %v795_v33, 1e-06  ;;  %v1034_v1 = vmul.f32 %v1018_v32, %v1018_v32  ;;  %v6464_v63 = vadd.f32 %v1886_v22, %v1850_v44  ;;  %v6476_v22 = vpop.permute.xlu0 %2331  ;;  %v584_v44 = vpop.permute.xlu1 %583 }
 0x135   : > { %9827 = vst [vmem:[#allocation176_spill] sm:$0xff] %v6457_v5  ;;  %9828 = vst [vmem:[#allocation177_spill] sm:$0xff] %v6459_v59  ;;  %v6461_v17 = vpop.eup %4419  ;;  %4433 = vrsqrt.f32 %v6338_v43  ;;  %v1212_v2 = vmax.f32 %v1196_v61, 1e-06  ;;  %v1998_v6 = vsub.f32 1.0, %v6448_v4  ;;  %v521_v41 = vadd.f32 %v505_v58, %v5772_v52 }
 0x136   : > { %9829 = vst [vmem:[#allocation178_spill] sm:$0xff] %v6461_v17  ;;  %9830 = vst [vmem:[#allocation179_spill] sm:$0xff] %v6464_v63  ;;  %v6466_v3 = vpop.eup %4421  ;;  %4435 = vrsqrt.f32 %v6340_v18  ;;  %v1435_v46 = vmul.f32 %v1419_v29, %v1419_v29  ;;  %v1613_v48 = vmax.f32 %v1597_v62, 1e-06  ;;  %v6483_v61 = vmul.f32 0.04725898, %v6396_v28 }
 0x137   : > { %9831 = vst [vmem:[#allocation180_spill] sm:$0xff] %v6466_v3  ;;  %v6471_v60 = vpop.eup %4423  ;;  %4437 = vrsqrt.f32 %v6345_v23  ;;  %v1050_v47 = vadd.f32 %v1034_v1, %v9836_v13  ;;  %v1836_v52 = vmul.f32 %v1820_v16, %v1820_v16  ;;  %v6489_v29 = vmul.f32 0.04725898, %v6400_v35  ;;  %v9840_v23 = vld [vmem:[#allocation72_spill] sm:$0xff] }
 0x138   : > { %9832 = vst [vmem:[#allocation181_spill] sm:$0xff] %v6471_v60  ;;  %v6478_v33 = vpop.eup %4425  ;;  %9834 = vst [vmem:[#allocation183_spill] sm:$0xff] %v6483_v61  ;;  %4439 = vrcp.f32 %v811_v21  ;;  %v2014_v18 = vmax.f32 %v1998_v6, 1e-06  ;;  %v6494_v62 = vmul.f32 0.04725898, %v6402_v38  ;;  %v605_v32 = vsub.f32 %v584_v44, %v5484_v14  ;;  %v6507_v30 = vpop.permute.xlu0 %2343 }
 0x139   : > { %9833 = vst [vmem:[#allocation182_spill] sm:$0xff] %v6478_v33  ;;  %v6485_v51 = vpop.eup %4427  ;;  %9837 = vst [vmem:[#allocation71_spill] sm:$0xff] %v6489_v29  ;;  %4441 = vrcp.f32 %v1212_v2  ;;  %v1451_v43 = vadd.f32 %v1435_v46, %v9840_v23  ;;  %v6499_v49 = vmul.f32 0.04725898, %v6407_v26  ;;  %v1070_v21 = vsub.f32 %v584_v44, %v9706_v57  ;;  %v9842_v6 = vld [vmem:[#allocation73_spill] sm:$0xff] }
 0x13a   : > { %9835 = vst [vmem:[#allocation184_spill] sm:$0xff] %v6485_v51  ;;  %v6491_v58 = vpop.eup %4429  ;;  %9839 = vst [vmem:[#allocation186_spill] sm:$0xff] %v6494_v62  ;;  %v1471_v16 = vsub.f32 %v584_v44, %v9707_v10  ;;  %4443 = vrcp.f32 %v1613_v48  ;;  %v797_v1 = vsub.f32 1.0, %v6483_v61  ;;  %v621_v13 = vmul.f32 %v605_v32, %v605_v32 }
 0x13b   : > { %9838 = vst [vmem:[#allocation185_spill] sm:$0xff] %v6491_v58  ;;  %9841 = vst [vmem:[#allocation72_spill] sm:$0xff] %v6499_v49  ;;  %v1872_v2 = vsub.f32 %v584_v44, %v9708_v42  ;;  %v1852_v3 = vadd.f32 %v1836_v52, %v9842_v6  ;;  %v1198_v17 = vsub.f32 1.0, %v6489_v29  ;;  %v1086_v23 = vmul.f32 %v1070_v21, %v1070_v21 }
 0x13c   : > { %v1487_v46 = vmul.f32 %v1471_v16, %v1471_v16  ;;  %4445 = vrcp.f32 %v2014_v18  ;;  %v1599_v24 = vsub.f32 1.0, %v6494_v62  ;;  %v6510_v45 = vadd.f32 %v621_v13, %v521_v41 }
 0x13d   : > { %v1888_v58 = vmul.f32 %v1872_v2, %v1872_v2  ;;  %v2000_v32 = vsub.f32 1.0, %v6499_v49  ;;  %v2398_v44 = vsub.f32 %v6476_v22, %v6030_v19  ;;  %v6517_v52 = vadd.f32 %v1086_v23, %v1050_v47  ;;  %v9853_v23 = vld [vmem:[#allocation12_spill] sm:$0xff] }
 0x13e   : > { %9843 = vst [vmem:[#allocation73_spill] sm:$0xff] %v6510_v45  ;;  %v6512_v48 = vpop.eup %4431  ;;  %v6519_v6 = vadd.f32 %v1487_v46, %v1451_v43  ;;  %4447 = vrsqrt.f32 %v6396_v28  ;;  %v813_v18 = vmax.f32 %v797_v1, 1e-06  ;;  %v6525_v41 = vmul.f32 0.04725898, %v6451_v53 }
 0x13f   : > { %9844 = vst [vmem:[#allocation187_spill] sm:$0xff] %v6512_v48  ;;  %9845 = vst [vmem:[#allocation188_spill] sm:$0xff] %v6517_v52  ;;  %v6521_v12 = vpop.eup %4433  ;;  %v6527_v21 = vadd.f32 %v1888_v58, %v1852_v3  ;;  %4449 = vrsqrt.f32 %v6400_v35  ;;  %v1214_v13 = vmax.f32 %v1198_v17, 1e-06  ;;  %v2927_v47 = vsub.f32 %v6476_v22, %v6034_v9  ;;  %v9860_v17 = vld [vmem:[#allocation19_spill] sm:$0xff] }
 0x140   : > { %9846 = vst [vmem:[#allocation189_spill] sm:$0xff] %v6519_v6  ;;  %9847 = vst [vmem:[#allocation190_spill] sm:$0xff] %v6521_v12  ;;  %v6529_v16 = vpop.eup %4435  ;;  %v6535_v43 = vmul.f32 0.04725898, %v6457_v5  ;;  %4451 = vrsqrt.f32 %v6402_v38  ;;  %v1615_v1 = vmax.f32 %v1599_v24, 1e-06  ;;  %v3328_v3 = vsub.f32 %v6476_v22, %v9853_v23 }
 0x141   : > { %9848 = vst [vmem:[#allocation191_spill] sm:$0xff] %v6525_v41  ;;  %9849 = vst [vmem:[#allocation192_spill] sm:$0xff] %v6527_v21  ;;  %v6537_v2 = vpop.eup %4437  ;;  %v6543_v58 = vmul.f32 0.04725898, %v6459_v59  ;;  %4453 = vrsqrt.f32 %v6407_v26  ;;  %v2016_v35 = vmax.f32 %v2000_v32, 1e-06  ;;  %v6560_v48 = vmul.f32 %v2927_v47, %v2927_v47 }
 0x142   : > { %9850 = vst [vmem:[#allocation193_spill] sm:$0xff] %v6529_v16  ;;  %9851 = vst [vmem:[#allocation194_spill] sm:$0xff] %v6535_v43  ;;  %v6545_v46 = vpop.eup %4439  ;;  %v6550_v28 = vmul.f32 0.04725898, %v6464_v63  ;;  %4455 = vrcp.f32 %v813_v18  ;;  %v6557_v16 = vmul.f32 %v2398_v44, %v2398_v44  ;;  %v799_v12 = vsub.f32 1.0, %v6525_v41 }
 0x143   : > { %9852 = vst [vmem:[#allocation195_spill] sm:$0xff] %v6537_v2  ;;  %9854 = vst [vmem:[#allocation196_spill] sm:$0xff] %v6543_v58  ;;  %v6552_v2 = vpop.permute.xlu0 %2351  ;;  %v6554_v38 = vpop.eup %4441  ;;  %4457 = vrcp.f32 %v1214_v13  ;;  %v3729_v32 = vsub.f32 %v6476_v22, %v9860_v17  ;;  %v1200_v26 = vsub.f32 1.0, %v6535_v43  ;;  %v1601_v24 = vsub.f32 1.0, %v6543_v58 }
 0x144   : > { %9855 = vst [vmem:[#allocation197_spill] sm:$0xff] %v6545_v46  ;;  %9856 = vst [vmem:[#allocation198_spill] sm:$0xff] %v6550_v28  ;;  %v6565_v27 = vpop.eup %4443  ;;  %4459 = vrcp.f32 %v1615_v1  ;;  %v6567_v46 = vmul.f32 %v3328_v3, %v3328_v3  ;;  %v2401_v44 = vsub.f32 %v6507_v30, %v6030_v19  ;;  %v2002_v13 = vsub.f32 1.0, %v6550_v28 }
 0x145   : > { %9857 = vst [vmem:[#allocation199_spill] sm:$0xff] %v6554_v38  ;;  %9858 = vst [vmem:[#allocation200_spill] sm:$0xff] %v6557_v16  ;;  %4461 = vrcp.f32 %v2016_v35  ;;  %v2930_v22 = vsub.f32 %v6507_v30, %v6034_v9  ;;  %v815_v3 = vmax.f32 %v799_v12, 1e-06  ;;  %v1216_v18 = vmax.f32 %v1200_v26, 1e-06 }
 0x146   : > { %9859 = vst [vmem:[#allocation201_spill] sm:$0xff] %v6560_v48  ;;  %9861 = vst [vmem:[#allocation202_spill] sm:$0xff] %v6565_v27  ;;  %v6576_v47 = vpop.eup %4445  ;;  %4463 = vrsqrt.f32 %v6451_v53  ;;  %v3331_v35 = vsub.f32 %v6507_v30, %v9853_v23  ;;  %v1617_v1 = vmax.f32 %v1601_v24, 1e-06  ;;  %v6592_v4 = vmul.f32 %v2401_v44, %v2401_v44 }
 0x147   : > { %9862 = vst [vmem:[#allocation203_spill] sm:$0xff] %v6567_v46  ;;  %9863 = vst [vmem:[#allocation204_spill] sm:$0xff] %v6576_v47  ;;  %4465 = vrsqrt.f32 %v6457_v5  ;;  %v6585_v61 = vpop.permute.xlu0 %2359  ;;  %v6589_v47 = vmul.f32 %v3729_v32, %v3729_v32  ;;  %v2018_v27 = vmax.f32 %v2002_v13, 1e-06  ;;  %v6597_v26 = vmul.f32 %v2930_v22, %v2930_v22  ;;  %v9931_v46 = vld [vmem:[#allocation103_spill] sm:$0xff] }
 0x148   : > { %v6587_v38 = vpop.eup %4447  ;;  %4467 = vrsqrt.f32 %v6459_v59  ;;  %9866 = vst [vmem:[#allocation207_spill] sm:$0xff] %v6592_v4  ;;  %v3732_v5 = vsub.f32 %v6507_v30, %v9860_v17  ;;  %v6604_v32 = vmul.f32 0.04725898, %v6510_v45  ;;  %v2403_v24 = vsub.f32 %v6552_v2, %v6030_v19  ;;  %v9929_v4 = vld [vmem:[#allocation102_spill] sm:$0xff] }
 0x149   : > { %9864 = vst [vmem:[#allocation205_spill] sm:$0xff] %v6587_v38  ;;  %9865 = vst [vmem:[#allocation206_spill] sm:$0xff] %v6589_v47  ;;  %v6594_v12 = vpop.eup %4449  ;;  %4469 = vrsqrt.f32 %v6464_v63  ;;  %v2932_v44 = vsub.f32 %v6552_v2, %v6034_v9  ;;  %v6613_v22 = vmul.f32 %v3331_v35, %v3331_v35  ;;  %v3333_v30 = vsub.f32 %v6552_v2, %v9853_v23 }
 0x14a   : > { %9867 = vst [vmem:[#allocation208_spill] sm:$0xff] %v6594_v12  ;;  %9868 = vst [vmem:[#allocation209_spill] sm:$0xff] %v6597_v26  ;;  %v6601_v53 = vpop.eup %4451  ;;  %4471 = vrcp.f32 %v815_v3  ;;  %v6622_v12 = vmul.f32 0.04725898, %v6517_v52  ;;  %v6630_v35 = vmul.f32 0.04725898, %v6519_v6  ;;  %v3734_v13 = vsub.f32 %v6552_v2, %v9860_v17 }
 0x14b   : > { %9869 = vst [vmem:[#allocation210_spill] sm:$0xff] %v6601_v53  ;;  %9870 = vst [vmem:[#allocation211_spill] sm:$0xff] %v6604_v32  ;;  %v6610_v59 = vpop.eup %4453  ;;  %4473 = vrcp.f32 %v1216_v18  ;;  %v6627_v18 = vmul.f32 %v3732_v5, %v3732_v5  ;;  %v6636_v53 = vmul.f32 %v2403_v24, %v2403_v24  ;;  %v6638_v63 = vmul.f32 %v2932_v44, %v2932_v44 }
 0x14c   : > { %9871 = vst [vmem:[#allocation212_spill] sm:$0xff] %v6610_v59  ;;  %9872 = vst [vmem:[#allocation213_spill] sm:$0xff] %v6613_v22  ;;  %v6617_v3 = vpop.eup %4455  ;;  %4475 = vrcp.f32 %v1617_v1  ;;  %v528_v59 = vpop.permute.xlu0 %527  ;;  %v801_v1 = vsub.f32 1.0, %v6604_v32  ;;  %v6646_v5 = vmul.f32 %v3333_v30, %v3333_v30  ;;  %v1202_v24 = vsub.f32 1.0, %v6622_v12  ;;  %v9887_v32 = vld [vmem:[#allocation29_spill] sm:$0xff] }
 0x14d   : > { %9873 = vst [vmem:[#allocation214_spill] sm:$0xff] %v6617_v3  ;;  %9874 = vst [vmem:[#allocation215_spill] sm:$0xff] %v6622_v12  ;;  %v6624_v38 = vpop.eup %4457  ;;  %4477 = vrcp.f32 %v2018_v27  ;;  %v6644_v27 = vmul.f32 0.04725898, %v6527_v21  ;;  %v591_v44 = vsub.f32 %v528_v59, %v5484_v14  ;;  %v1603_v30 = vsub.f32 1.0, %v6630_v35  ;;  %v9890_v12 = vld [vmem:[#allocation30_spill] sm:$0xff] }
 0x14e   : > { %9875 = vst [vmem:[#allocation216_spill] sm:$0xff] %v6624_v38  ;;  %9876 = vst [vmem:[#allocation217_spill] sm:$0xff] %v6627_v18  ;;  %v6632_v41 = vpop.eup %4459  ;;  %4479 = vrsqrt.f32 %v6510_v45  ;;  %v1457_v2 = vsub.f32 %v528_v59, %v9707_v10  ;;  %v820_v45 = vsub.f32 0.0, %v6154_v7  ;;  %vm724_vm0 = vcmp.gt.f32.partialorder %v6130_v15, 1e-12 }
 0x14f   : > { %9877 = vst [vmem:[#allocation218_spill] sm:$0xff] %v6630_v35  ;;  %9878 = vst [vmem:[#allocation219_spill] sm:$0xff] %v6632_v41  ;;  %v6640_v58 = vpop.eup %4461  ;;  %4481 = vrsqrt.f32 %v6517_v52  ;;  %v9888_v41 = vld [vmem:[#allocation82_spill] sm:$0xff]  ;;  %v607_v62 = vmul.f32 %v591_v44, %v591_v44  ;;  %v2004_v52 = vsub.f32 1.0, %v6644_v27  ;;  %v1218_v44 = vmax.f32 %v1202_v24, 1e-06 }
 0x150   : > { %9879 = vst [vmem:[#allocation220_spill] sm:$0xff] %v6636_v53  ;;  %9880 = vst [vmem:[#allocation221_spill] sm:$0xff] %v6638_v63  ;;  %v6650_v28 = vpop.eup %4463  ;;  %4483 = vrsqrt.f32 %v6519_v6  ;;  %v507_v6 = vadd.f32 %v9888_v41, %v9887_v32  ;;  %v1858_v41 = vsub.f32 %v528_v59, %v9708_v42  ;;  %vm1125_vm1 = vcmp.gt.f32.partialorder %v6135_v31, 1e-12  ;;  %v9922_v31 = vld [vmem:[#allocation40_spill] sm:$0xff] }
 0x151   : > { %9881 = vst [vmem:[#allocation222_spill] sm:$0xff] %v6640_v58  ;;  %9882 = vst [vmem:[#allocation223_spill] sm:$0xff] %v6644_v27  ;;  %v6656_v43 = vpop.eup %4465  ;;  %v1056_v58 = vsub.f32 %v528_v59, %v9706_v57  ;;  %4485 = vrsqrt.f32 %v6527_v21  ;;  %v1221_v21 = vsub.f32 0.0, %v6162_v40  ;;  %v9897_v59 = vld [vmem:[#allocation10_spill] sm:$0xff]  ;;  %v540_v27 = vpop.permute.xlu0 %539 }
 0x152   : > { %9883 = vst [vmem:[#allocation224_spill] sm:$0xff] %v6646_v5  ;;  %9884 = vst [vmem:[#allocation225_spill] sm:$0xff] %v6650_v28  ;;  %v6662_v49 = vpop.eup %4467  ;;  %v817_v28 = vmax.f32 %v801_v1, 1e-06  ;;  %v6677_v35 = vadd.f32 %v607_v62, %v507_v6  ;;  %v839_v1 = vmul.f32 %v6284_v25, %v820_v45  ;;  %v6696_v6 = vsub.s32 3, %v9897_v59 }
 0x153   : > { %9885 = vst [vmem:[#allocation226_spill] sm:$0xff] %v6656_v43  ;;  %9886 = vst [vmem:[#allocation227_spill] sm:$0xff] %v6662_v49  ;;  %v6667_v38 = vpop.eup %4469  ;;  %v9891_v43 = vld [vmem:[#allocation83_spill] sm:$0xff]  ;;  %v1072_v3 = vmul.f32 %v1056_v58, %v1056_v58  ;;  %v1473_v49 = vmul.f32 %v1457_v2, %v1457_v2  ;;  %v1619_v58 = vmax.f32 %v1603_v30, 1e-06  ;;  %v1240_v40 = vmul.f32 %v6288_v8, %v1221_v21 }
 0x154   : > { %9889 = vst [vmem:[#allocation29_spill] sm:$0xff] %v6667_v38  ;;  %v1036_v29 = vadd.f32 %v9891_v43, %v9890_v12  ;;  %v6673_v51 = vpop.eup %4471  ;;  %v6687_v12 = vmul.f32 %v3734_v13, %v3734_v13  ;;  %v6691_v7 = vmul.f32 0.04725898, %v6677_v35  ;;  %9898 = vst [vmem:[#allocation10_spill] sm:$0xff] %v6696_v6  ;;  %4487 = vrcp.f32 %v817_v28 }
 0x155   : > { %9892 = vst [vmem:[#allocation82_spill] sm:$0xff] %v6673_v51  ;;  %v6680_v32 = vpop.eup %4473  ;;  %v2020_v25 = vmax.f32 %v2004_v52, 1e-06  ;;  %v2405_v45 = vsub.f32 %v6585_v61, %v6030_v19  ;;  %v1874_v30 = vmul.f32 %v1858_v41, %v1858_v41  ;;  %v2934_v8 = vsub.f32 %v6585_v61, %v6034_v9  ;;  %v9905_v41 = vld [vmem:[#allocation85_spill] sm:$0xff] }
 0x156   : > { %9893 = vst [vmem:[#allocation30_spill] sm:$0xff] %v6680_v32  ;;  %v6683_v38 = vadd.f32 %v1072_v3, %v1036_v29  ;;  %v6685_v43 = vpop.eup %4475  ;;  %9895 = vst [vmem:[#allocation228_spill] sm:$0xff] %v6687_v12  ;;  %v9899_v29 = vld [vmem:[#allocation31_spill] sm:$0xff]  ;;  %v9900_v3 = vld [vmem:[#allocation84_spill] sm:$0xff]  ;;  %v1622_v21 = vsub.f32 0.0, %v6166_v11  ;;  %4489 = vrcp.f32 %v1218_v44  ;;  %v1059_v0 = vsub.f32 %v540_v27, %v9706_v57 }
 0x157   : > { %9894 = vst [vmem:[#allocation83_spill] sm:$0xff] %v6685_v43  ;;  %v6693_v62 = vpop.eup %4477  ;;  %v1437_v24 = vadd.f32 %v9900_v3, %v9899_v29  ;;  %v787_v29 = vsub.f32 1.0, %v6691_v7  ;;  %v870_v52 = vmul.f32 1.442695, %v839_v1  ;;  %v5127_v43 = vld [vmem:[%s5401_s26] sm:$0xf]  ;;  %4491 = vrcp.f32 %v1619_v58 }
 0x158   : > { %9896 = vst [vmem:[#allocation229_spill] sm:$0xff] %v6693_v62  ;;  %v6702_v2 = vmul.f32 0.04725898, %v6683_v38  ;;  %v6704_v13 = vpop.eup %4479  ;;  %v6723_v32 = vrot.slane %v5127_v43, %v6696_v6  ;;  %v1271_v11 = vmul.f32 1.442695, %v1240_v40  ;;  %v1641_v51 = vmul.f32 %v6293_v20, %v1622_v21 }
 0x159   : > { %9901 = vst [vmem:[#allocation31_spill] sm:$0xff] %v6704_v13  ;;  %v6708_v59 = vpop.eup %4481  ;;  %v6714_v3 = vadd.f32 %v1473_v49, %v1437_v24  ;;  %v9904_v13 = vld [vmem:[#allocation32_spill] sm:$0xff]  ;;  %v594_v49 = vsub.f32 %v540_v27, %v5484_v14  ;;  %v5128_v24 = vld [vmem:[%s5401_s26 + $0x4] sm:$0xf]  ;;  %4493 = vrcp.f32 %v2020_v25  ;;  %v2023_v43 = vsub.f32 0.0, %v6169_v55 }
 0x15a   : > { %9902 = vst [vmem:[#allocation84_spill] sm:$0xff] %v6708_v59  ;;  %v6716_v28 = vpop.eup %4483  ;;  %v1838_v62 = vadd.f32 %v9905_v41, %v9904_v13  ;;  %v1188_v59 = vsub.f32 1.0, %v6702_v2  ;;  %v6729_v44 = vrot.slane %v5128_v24, %v6696_v6  ;;  %v5129_v1 = vld [vmem:[%s5401_s26 + $0x8] sm:$0xf]  ;;  %v803_v40 = vmax.f32 %v787_v29, 1e-06  ;;  %v644_v24 = vpop.permute.xlu1 %643 }
 0x15b   : > { %9903 = vst [vmem:[#allocation230_spill] sm:$0xff] %v6716_v28  ;;  %v6733_v13 = vrot.slane %v5129_v1, %v6696_v6  ;;  %v6737_v28 = vpop.eup %4485  ;;  %v6741_v20 = vmul.f32 0.04725898, %v6714_v3  ;;  %v5130_v58 = vld [vmem:[%s5401_s26 + $0xc] sm:$0xf]  ;;  %v6747_v33 = vmul.f32 %v2405_v45, %v2405_v45  ;;  %4495 = vpow2.f32 %v870_v52  ;;  %v9908_v29 = vld [vmem:[#allocation37_spill] sm:$0xff] }
 0x15c   : > { %v6735_v41 = vadd.f32 %v1874_v30, %v1838_v62  ;;  %9906 = vst [vmem:[#allocation32_spill] sm:$0xff] %v6737_v28  ;;  %v6745_v21 = vrot.slane %v5130_v58, %v6696_v6  ;;  %v1204_v1 = vmax.f32 %v1188_v59, 1e-06  ;;  %4497 = vpow2.f32 %v1271_v11  ;;  %v9909_v28 = vld [vmem:[#allocation94_spill] sm:$0xff]  ;;  %v9913_v6 = vld [vmem:[#allocation95_spill] sm:$0xff] }
 0x15d   : > { %9907 = vst [vmem:[#allocation85_spill] sm:$0xff] %v6747_v33  ;;  %v1672_v62 = vmul.f32 1.442695, %v1641_v51  ;;  %v2042_v30 = vmul.f32 %v6300_v34, %v2023_v43  ;;  %v610_v25 = vmul.f32 %v594_v49, %v594_v49  ;;  %v510_v60 = vadd.f32 %v9909_v28, %v9908_v29  ;;  %v9912_v29 = vld [vmem:[#allocation38_spill] sm:$0xff] }
 0x15e   : > { %v6751_v55 = vmul.f32 0.04725898, %v6735_v41  ;;  %v1460_v58 = vsub.f32 %v540_v27, %v9707_v10  ;;  %v6758_v45 = vmul.f32 %v6723_v32, %v644_v24  ;;  %v6760_v52 = vmul.f32 %v2934_v8, %v2934_v8  ;;  %v6763_v34 = vpop.eup %4487 }
 0x15f   : > { %4499 = vrcp.f32 %v803_v40  ;;  %v1589_v51 = vsub.f32 1.0, %v6741_v20  ;;  %9911 = vst [vmem:[#allocation94_spill] sm:$0xff] %v6763_v34  ;;  %v6766_v59 = vmul.f32 %v6729_v44, %v644_v24  ;;  %v6768_v11 = vadd.f32 %v610_v25, %v510_v60 }
 0x160   : > { %9910 = vst [vmem:[#allocation37_spill] sm:$0xff] %v6760_v52  ;;  %4501 = vrcp.f32 %v1204_v1  ;;  %v1075_v28 = vmul.f32 %v1059_v0, %v1059_v0  ;;  %v3335_v49 = vsub.f32 %v6585_v61, %v9853_v23  ;;  %v2073_v43 = vmul.f32 1.442695, %v2042_v30  ;;  %v6775_v54 = vpop.eup %4489  ;;  %v648_v1 = vpop.permute.xlu1 %647 }
 0x161   : > { %v1039_v8 = vadd.f32 %v9913_v6, %v9912_v29  ;;  %v1861_v40 = vsub.f32 %v540_v27, %v9708_v42  ;;  %9914 = vst [vmem:[#allocation38_spill] sm:$0xff] %v6775_v54  ;;  %4503 = vpow2.f32 %v1672_v62  ;;  %v1990_v34 = vsub.f32 1.0, %v6751_v55  ;;  %v6786_v6 = vpop.eup %4491  ;;  %v9917_v54 = vld [vmem:[#allocation96_spill] sm:$0xff]  ;;  %v548_v52 = vpop.permute.xlu0 %547 }
 0x162   : > { %v6779_v39 = vmul.f32 0.04725898, %v6768_v11  ;;  %v1476_v60 = vmul.f32 %v1460_v58, %v1460_v58  ;;  %v3736_v0 = vsub.f32 %v6585_v61, %v9860_v17  ;;  %v1605_v30 = vmax.f32 %v1589_v51, 1e-06  ;;  %9915 = vst [vmem:[#allocation95_spill] sm:$0xff] %v6786_v6  ;;  %v9916_v58 = vld [vmem:[#allocation39_spill] sm:$0xff] }
 0x163   : > { %v6784_v25 = vadd.f32 %v1075_v28, %v1039_v8  ;;  %v6789_v27 = vmul.f32 %v6733_v13, %v644_v24  ;;  %v6792_v62 = vmul.f32 %v6745_v21, %v644_v24  ;;  %v6795_v29 = vsel %vm724_vm0, %v6261_v37, 0.0  ;;  %v6799_v56 = vpop.eup %4493 }
 0x164   : > { %v1440_v61 = vadd.f32 %v9917_v54, %v9916_v58  ;;  %9918 = vst [vmem:[#allocation39_spill] sm:$0xff] %v6799_v56  ;;  %4505 = vpow2.f32 %v2073_v43  ;;  %v1877_v51 = vmul.f32 %v1861_v40, %v1861_v40  ;;  %v6805_v8 = vmul.f32 %v3335_v49, %v3335_v49  ;;  %v9921_v54 = vld [vmem:[#allocation127_spill] sm:$0xff]  ;;  %v9923_v43 = vld [vmem:[#allocation97_spill] sm:$0xff]  ;;  %v9926_v49 = vld [vmem:[#allocation128_spill] sm:$0xff] }
 0x165   : > { %v6803_v15 = vmul.f32 0.04725898, %v6784_v25  ;;  %v4496_v28 = vpop.eup %4495  ;;  %v2006_v24 = vmax.f32 %v1990_v34, 1e-06  ;;  %v790_v6 = vsub.f32 1.0, %v6779_v39  ;;  %v6810_v36 = vmul.f32 %v3736_v0, %v3736_v0  ;;  %v9924_v56 = vld [vmem:[#allocation139_spill] sm:$0xff] }
 0x166   : > { %9919 = vst [vmem:[#allocation96_spill] sm:$0xff] %v6805_v8  ;;  %v6808_v37 = vadd.f32 %v1476_v60, %v1440_v61  ;;  %v4498_v50 = vpop.eup %4497  ;;  %vm1526_vm2 = vcmp.gt.f32.partialorder %v9921_v54, 1e-12  ;;  %4507 = vrcp.f32 %v1605_v30  ;;  %v1841_v58 = vadd.f32 %v9923_v43, %v9922_v31  ;;  %v9925_v40 = vld [vmem:[#allocation141_spill] sm:$0xff]  ;;  %v9927_v61 = vld [vmem:[#allocation144_spill] sm:$0xff]  ;;  %v656_v54 = vpop.permute.xlu1 %655 }
 0x167   : > { %9920 = vst [vmem:[#allocation231_spill] sm:$0xff] %v6810_v36  ;;  %v1157_v17 = vsel %vm1125_vm1, %v9924_v56, 0.0  ;;  %v6817_v23 = vsel %vm1526_vm2, %v9925_v40, 0.0  ;;  %vm1927_vm3 = vcmp.gt.f32.partialorder %v9926_v49, 1e-12  ;;  %v1191_v34 = vsub.f32 1.0, %v6803_v15 }
 0x168   : > { %v6822_v9 = vsel %vm1927_vm3, %v9927_v61, 0.0  ;;  %v708_v0 = vmul.f32 %v6723_v32, %v648_v1  ;;  %v1109_v30 = vmul.f32 %v6729_v44, %v648_v1  ;;  %v6826_v19 = vadd.f32 %v1877_v51, %v1841_v58 }
 0x169   : > { %v4500_v60 = vpop.eup %4499  ;;  %v819_v56 = vsub.f32 0.0, %v6691_v7  ;;  %4509 = vrcp.f32 %v2006_v24  ;;  %v806_v43 = vmax.f32 %v790_v6, 1e-06  ;;  %v6830_v40 = vmul.f32 0.04725898, %v6808_v37 }
 0x16a   : > { %v4502_v31 = vpop.eup %4501  ;;  %v900_v49 = vsub.f32 1.0, %v4496_v28  ;;  %v1510_v36 = vmul.f32 %v6733_v13, %v648_v1  ;;  %v1911_v61 = vmul.f32 %v6745_v21, %v648_v1  ;;  %v1220_v8 = vsub.f32 0.0, %v6702_v2 }
 0x16b   : > { %v4504_v33 = vpop.eup %4503  ;;  %v837_v12 = vmul.f32 %v4500_v60, %v819_v56  ;;  %v6836_v51 = vmul.f32 %v6723_v32, %v656_v54  ;;  %v6839_v7 = vmul.f32 %v6729_v44, %v656_v54  ;;  %v1207_v6 = vmax.f32 %v1191_v34, 1e-06 }
 0x16c   : > { %v1301_v24 = vsub.f32 1.0, %v4498_v50  ;;  %4511 = vrsqrt.f32 %v6677_v35  ;;  %v1238_v28 = vmul.f32 %v4502_v31, %v1220_v8  ;;  %v6843_v58 = vmul.f32 0.04725898, %v6826_v19 }
 0x16d   : > { %v6846_v1 = vmul.f32 %v6733_v13, %v656_v54  ;;  %4513 = vrcp.f32 %v806_v43  ;;  %v1592_v2 = vsub.f32 1.0, %v6830_v40  ;;  %v596_v60 = vsub.f32 %v548_v52, %v5484_v14 }
 0x16e   : > { %v4506_v56 = vpop.eup %4505  ;;  %v1702_v5 = vsub.f32 1.0, %v4504_v33  ;;  %v916_v63 = vmul.f32 %v900_v49, %v708_v0  ;;  %4515 = vrsqrt.f32 %v6683_v38  ;;  %v1061_v50 = vsub.f32 %v548_v52, %v9706_v57  ;;  %v9928_v49 = vld [vmem:[#allocation45_spill] sm:$0xff] }
 0x16f   : > { %v868_v34 = vmul.f32 1.442695, %v837_v12  ;;  %v6853_v8 = vmul.f32 %v6745_v21, %v656_v54  ;;  %4517 = vrcp.f32 %v1207_v6  ;;  %v612_v31 = vmul.f32 %v596_v60, %v596_v60 }
 0x170   : > { %v4508_v53 = vpop.eup %4507  ;;  %v1317_v18 = vmul.f32 %v1301_v24, %v1109_v30  ;;  %v1269_v43 = vmul.f32 1.442695, %v1238_v28  ;;  %4519 = vrsqrt.f32 %v6714_v3  ;;  %v1993_v22 = vsub.f32 1.0, %v6843_v58 }
 0x171   : > { %v2103_v26 = vsub.f32 1.0, %v4506_v56  ;;  %v1621_v33 = vsub.f32 0.0, %v6741_v20  ;;  %v1608_v0 = vmax.f32 %v1592_v2, 1e-06  ;;  %v512_v47 = vadd.f32 %v9929_v4, %v9928_v49  ;;  %v9930_v2 = vld [vmem:[#allocation46_spill] sm:$0xff] }
 0x172   : > { %v932_v12 = vmul.f32 %v916_v63, %v6795_v29  ;;  %v1718_v54 = vmul.f32 %v1702_v5, %v1510_v36  ;;  %4521 = vrsqrt.f32 %v6735_v41  ;;  %v1077_v6 = vmul.f32 %v1061_v50, %v1061_v50 }
 0x173   : > { %v4510_v60 = vpop.eup %4509  ;;  %4523 = vpow2.f32 %v868_v34  ;;  %v1639_v30 = vmul.f32 %v4508_v53, %v1621_v33  ;;  %v2022_v24 = vsub.f32 0.0, %v6751_v55  ;;  %v6863_v28 = vadd.f32 %v612_v31, %v512_v47  ;;  %v6887_v33 = vpop.permute.xlu1 %663 }
 0x174   : > { %v1333_v56 = vmul.f32 %v1317_v18, %v1157_v17  ;;  %4525 = vpow2.f32 %v1269_v43  ;;  %v2009_v20 = vmax.f32 %v1993_v22, 1e-06  ;;  %v1041_v48 = vadd.f32 %v9931_v46, %v9930_v2 }
 0x175   : > { %v2119_v4 = vmul.f32 %v2103_v26, %v1911_v61  ;;  %vm723_vm4 = vcmp.gt.f32.partialorder %v6677_v35, 1e-12  ;;  %vm1124_vm5 = vcmp.gt.f32.partialorder %v6683_v38, 1e-12  ;;  %4527 = vrcp.f32 %v1608_v0 }
 0x176   : > { %v4512_v36 = vpop.eup %4511  ;;  %vm1525_vm6 = vcmp.gt.f32.partialorder %v6714_v3, 1e-12  ;;  %v2040_v53 = vmul.f32 %v4510_v60, %v2022_v24  ;;  %v6870_v63 = vadd.f32 %v1077_v6, %v1041_v48  ;;  %v1462_v47 = vsub.f32 %v548_v52, %v9707_v10  ;;  %v9933_v6 = vld [vmem:[#allocation104_spill] sm:$0xff] }
 0x177   : > { %v4514_v17 = vpop.eup %4513  ;;  %v1670_v18 = vmul.f32 1.442695, %v1639_v30  ;;  %vm1926_vm7 = vcmp.gt.f32.partialorder %v6735_v41, 1e-12  ;;  %v6875_v46 = vmul.f32 0.04725898, %v6863_v28  ;;  %v1863_v26 = vsub.f32 %v548_v52, %v9708_v42 }
 0x178   : > { %v4516_v22 = vpop.eup %4515  ;;  %v1349_v5 = vadd.f32 %v1333_v56, %v932_v12  ;;  %v1734_v55 = vmul.f32 %v1718_v54, %v6817_v23  ;;  %v822_v29 = vsub.f32 0.0, %v6779_v39  ;;  %4529 = vrcp.f32 %v2009_v20  ;;  %v9932_v54 = vld [vmem:[#allocation47_spill] sm:$0xff]  ;;  %v9934_v56 = vld [vmem:[#allocation48_spill] sm:$0xff]  ;;  %v9935_v20 = vld [vmem:[#allocation105_spill] sm:$0xff] }
 0x179   : > { %v4518_v48 = vpop.eup %4517  ;;  %v2135_v61 = vmul.f32 %v2119_v4, %v6822_v9  ;;  %v6883_v50 = vsel %vm723_vm4, %v4512_v36, 0.0  ;;  %4531 = vrsqrt.f32 %v6768_v11  ;;  %v1223_v34 = vsub.f32 0.0, %v6803_v15 }
 0x17a   : > { %v4520_v31 = vpop.eup %4519  ;;  %v2071_v52 = vmul.f32 1.442695, %v2040_v53  ;;  %v843_v43 = vmul.f32 %v4514_v17, %v822_v29  ;;  %v6890_v23 = vmul.f32 0.04725898, %v6870_v63  ;;  %v1478_v39 = vmul.f32 %v1462_v47, %v1462_v47  ;;  %v6914_v17 = vpop.permute.xlu0 %555 }
 0x17b   : > { %v6894_v9 = vsel %vm1124_vm5, %v4516_v22, 0.0  ;;  %4533 = vpow2.f32 %v1670_v18  ;;  %v792_v35 = vsub.f32 1.0, %v6875_v46  ;;  %v1879_v0 = vmul.f32 %v1863_v26, %v1863_v26 }
 0x17c   : > { %v4522_v49 = vpop.eup %4521  ;;  %v1750_v12 = vadd.f32 %v1734_v55, %v1349_v5  ;;  %4535 = vrsqrt.f32 %v6784_v25  ;;  %v1244_v15 = vmul.f32 %v4518_v48, %v1223_v34  ;;  %v1442_v60 = vadd.f32 %v9933_v6, %v9932_v54 }
 0x17d   : > { %v4524_v30 = vpop.eup %4523  ;;  %v6902_v24 = vsel %vm1525_vm6, %v4520_v31, 0.0  ;;  %4537 = vrsqrt.f32 %v6808_v37  ;;  %v6907_v38 = vmul.f32 %v6723_v32, %v6887_v33  ;;  %v1843_v2 = vadd.f32 %v9935_v20, %v9934_v56 }
 0x17e   : > { %v4526_v4 = vpop.eup %4525  ;;  %4539 = vpow2.f32 %v2071_v52  ;;  %v874_v36 = vmul.f32 1.442695, %v843_v43  ;;  %v1193_v53 = vsub.f32 1.0, %v6890_v23  ;;  %v6912_v47 = vadd.f32 %v1478_v39, %v1442_v60 }
 0x17f   : > { %v4528_v3 = vpop.eup %4527  ;;  %v6918_v18 = vsel %vm1926_vm7, %v4522_v49, 0.0  ;;  %vm726_vm8 = vcmp.gt.f32.partialorder %v6768_v11, 1e-12  ;;  %v808_v26 = vmax.f32 %v792_v35, 1e-06  ;;  %v6921_v22 = vadd.f32 %v1879_v0, %v1843_v2  ;;  %v9938_v0 = vld [vmem:[#allocation110_spill] sm:$0xff] }
 0x180   : > { %v6923_v5 = vadd.f32 %v2135_v61, %v1750_v12  ;;  %v1275_v55 = vmul.f32 1.442695, %v1244_v15  ;;  %v1624_v29 = vsub.f32 0.0, %v6830_v40  ;;  %v2025_v48 = vsub.f32 0.0, %v6843_v58  ;;  %v9937_v58 = vld [vmem:[#allocation53_spill] sm:$0xff] }
 0x181   : > { %v899_v34 = vsub.f32 1.0, %v4524_v30  ;;  %v1300_v31 = vsub.f32 1.0, %v4526_v4  ;;  %4541 = vrsqrt.f32 %v6826_v19  ;;  %v598_v41 = vsub.f32 %v6914_v17, %v5484_v14 }
 0x182   : > { %9936 = vst [vmem:[#allocation127_spill] sm:$0xff] %v6923_v5  ;;  %v4530_v52 = vpop.eup %4529  ;;  %4543 = vpow2.f32 %v874_v36  ;;  %v1645_v43 = vmul.f32 %v4528_v3, %v1624_v29  ;;  %v1209_v39 = vmax.f32 %v1193_v53, 1e-06  ;;  %v6931_v35 = vmul.f32 0.04725898, %v6912_v47  ;;  %v672_v36 = vpop.permute.xlu1 %671 }
 0x183   : > { %v4532_v61 = vpop.eup %4531  ;;  %4545 = vrcp.f32 %v808_v26  ;;  %v6934_v40 = vmul.f32 0.04725898, %v6921_v22  ;;  %v514_v49 = vadd.f32 %v9938_v0, %v9937_v58  ;;  %v614_v12 = vmul.f32 %v598_v41, %v598_v41  ;;  %v9940_v58 = vld [vmem:[#allocation111_spill] sm:$0xff] }
 0x184   : > { %4547 = vpow2.f32 %v1275_v55  ;;  %v6940_v15 = vmul.f32 %v6729_v44, %v6887_v33  ;;  %v6944_v54 = vmul.f32 %v6733_v13, %v6887_v33  ;;  %v1063_v6 = vsub.f32 %v6914_v17, %v9706_v57 }
 0x185   : > { %v4534_v60 = vpop.eup %4533  ;;  %vm1127_vm9 = vcmp.gt.f32.partialorder %v6784_v25, 1e-12  ;;  %v2046_v30 = vmul.f32 %v4530_v52, %v2025_v48  ;;  %4549 = vrsqrt.f32 %v6863_v28  ;;  %v6950_v56 = vadd.f32 %v614_v12, %v514_v49 }
 0x186   : > { %v4536_v20 = vpop.eup %4535  ;;  %vm1528_vm10 = vcmp.gt.f32.partialorder %v6808_v37, 1e-12  ;;  %v1676_v2 = vmul.f32 1.442695, %v1645_v43  ;;  %4551 = vrcp.f32 %v1209_v39  ;;  %v1594_v4 = vsub.f32 1.0, %v6931_v35 }
 0x187   : > { %v4538_v53 = vpop.eup %4537  ;;  %v915_v3 = vmul.f32 %v899_v34, %v6758_v45  ;;  %v1316_v26 = vmul.f32 %v1300_v31, %v6766_v59  ;;  %v6958_v55 = vmul.f32 %v6745_v21, %v6887_v33  ;;  %v1995_v29 = vsub.f32 1.0, %v6934_v40 }
 0x188   : > { %v4540_v48 = vpop.eup %4539  ;;  %v1701_v41 = vsub.f32 1.0, %v4534_v60  ;;  %v6963_v52 = vsel %vm726_vm8, %v4532_v61, 0.0  ;;  %v6966_v43 = vmul.f32 0.04725898, %v6950_v56  ;;  %v1079_v39 = vmul.f32 %v1063_v6, %v1063_v6  ;;  %v9939_v61 = vld [vmem:[#allocation54_spill] sm:$0xff] }
 0x189   : > { %v6970_v45 = vsel %vm1127_vm9, %v4536_v20, 0.0  ;;  %vm1929_vm11 = vcmp.gt.f32.partialorder %v6826_v19, 1e-12  ;;  %v2077_v59 = vmul.f32 1.442695, %v2046_v30  ;;  %v6974_v33 = vmul.f32 %v6723_v32, %v672_v36 }
 0x18a   : > { %v1464_v34 = vsub.f32 %v6914_v17, %v9707_v10  ;;  %v6980_v11 = vsel %vm1528_vm10, %v4538_v53, 0.0  ;;  %4553 = vpow2.f32 %v1676_v2  ;;  %v1610_v31 = vmax.f32 %v1594_v4, 1e-06 }
 0x18b   : > { %v1043_v25 = vadd.f32 %v9940_v58, %v9939_v61  ;;  %v4542_v0 = vpop.eup %4541  ;;  %v931_v49 = vmul.f32 %v915_v3, %v6883_v50  ;;  %v1332_v12 = vmul.f32 %v1316_v26, %v6894_v9  ;;  %v2102_v6 = vsub.f32 1.0, %v4540_v48  ;;  %v9943_v61 = vld [vmem:[#allocation112_spill] sm:$0xff] }
 0x18c   : > { %v2011_v60 = vmax.f32 %v1995_v29, 1e-06  ;;  %v4544_v30 = vpop.eup %4543  ;;  %v1717_v20 = vmul.f32 %v1701_v41, %v6789_v27  ;;  %4555 = vrsqrt.f32 %v6870_v63  ;;  %v794_v37 = vsub.f32 1.0, %v6966_v43 }
 0x18d   : > { %v6989_v53 = vadd.f32 %v1079_v39, %v1043_v25  ;;  %v4546_v2 = vpop.eup %4545  ;;  %4557 = vpow2.f32 %v2077_v59  ;;  %v6992_v4 = vmul.f32 %v6729_v44, %v672_v36  ;;  %v6995_v50 = vmul.f32 %v6733_v13, %v672_v36  ;;  %v9942_v59 = vld [vmem:[#allocation55_spill] sm:$0xff] }
 0x18e   : > { %v1480_v9 = vmul.f32 %v1464_v34, %v1464_v34  ;;  %v4548_v3 = vpop.eup %4547  ;;  %v824_v26 = vsub.f32 0.0, %v6875_v46  ;;  %4559 = vrcp.f32 %v1610_v31  ;;  %v6999_v27 = vmul.f32 %v6745_v21, %v672_v36 }
 0x18f   : > { %v1865_v29 = vsub.f32 %v6914_v17, %v9708_v42  ;;  %v4550_v48 = vpop.eup %4549  ;;  %v1348_v41 = vadd.f32 %v1332_v12, %v931_v49  ;;  %v2118_v39 = vmul.f32 %v2102_v6, %v6792_v62  ;;  %4561 = vrcp.f32 %v2011_v60  ;;  %v564_v60 = vpop.permute.xlu0 %563 }
 0x190   : > { %9941 = vst [vmem:[#allocation40_spill] sm:$0xff] %v6999_v27  ;;  %v1444_v58 = vadd.f32 %v9943_v61, %v9942_v59  ;;  %v4552_v25 = vpop.eup %4551  ;;  %v1733_v34 = vmul.f32 %v1717_v20, %v6902_v24  ;;  %v1225_v46 = vsub.f32 0.0, %v6890_v23  ;;  %v810_v31 = vmax.f32 %v794_v37, 1e-06  ;;  %v9947_v20 = vld [vmem:[#allocation113_spill] sm:$0xff]  ;;  %v9949_v61 = vld [vmem:[#allocation118_spill] sm:$0xff] }
 0x191   : > { %v7009_v36 = vmul.f32 0.04725898, %v6989_v53  ;;  %v902_v5 = vsub.f32 1.0, %v4544_v30  ;;  %v1303_v16 = vsub.f32 1.0, %v4548_v3  ;;  %v847_v17 = vmul.f32 %v4546_v2, %v824_v26 }
 0x192   : > { %v7011_v27 = vadd.f32 %v1480_v9, %v1444_v58  ;;  %v7015_v62 = vsel %vm1929_vm11, %v4542_v0, 0.0  ;;  %vm728_vm12 = vcmp.gt.f32.partialorder %v6863_v28, 1e-12  ;;  %4563 = vrsqrt.f32 %v6912_v47  ;;  %v9946_v0 = vld [vmem:[#allocation56_spill] sm:$0xff] }
 0x193   : > { %v1881_v24 = vmul.f32 %v1865_v29, %v1865_v29  ;;  %v7019_v49 = vadd.f32 %v1733_v34, %v1348_v41  ;;  %v7022_v23 = vmul.f32 %v2118_v39, %v6918_v18  ;;  %v7024_v12 = vsel %vm728_vm12, %v4550_v48, 0.0 }
 0x194   : > { %v1248_v6 = vmul.f32 %v4552_v25, %v1225_v46  ;;  %v4554_v30 = vpop.eup %4553  ;;  %vm1129_vm13 = vcmp.gt.f32.partialorder %v6870_v63, 1e-12  ;;  %v1626_v19 = vsub.f32 0.0, %v6931_v35  ;;  %v1845_v28 = vadd.f32 %v9947_v20, %v9946_v0  ;;  %v9950_v0 = vld [vmem:[#allocation61_spill] sm:$0xff]  ;;  %v9951_v20 = vld [vmem:[#allocation119_spill] sm:$0xff] }
 0x195   : > { %9944 = vst [vmem:[#allocation97_spill] sm:$0xff] %v7019_v49  ;;  %9945 = vst [vmem:[#allocation139_spill] sm:$0xff] %v7022_v23  ;;  %4565 = vrcp.f32 %v810_v31  ;;  %v1195_v37 = vsub.f32 1.0, %v7009_v36  ;;  %v918_v2 = vmul.f32 %v902_v5, %v6836_v51  ;;  %v1319_v18 = vmul.f32 %v1303_v16, %v6839_v7  ;;  %v9948_v5 = vld [vmem:[#allocation60_spill] sm:$0xff] }
 0x196   : > { %v878_v9 = vmul.f32 1.442695, %v847_v17  ;;  %v7034_v3 = vmul.f32 0.04725898, %v7011_v27  ;;  %v4556_v26 = vpop.eup %4555  ;;  %4567 = vrsqrt.f32 %v6921_v22  ;;  %v7037_v29 = vadd.f32 %v1881_v24, %v1845_v28 }
 0x197   : > { %v600_v35 = vsub.f32 %v564_v60, %v5484_v14  ;;  %v1065_v48 = vsub.f32 %v564_v60, %v9706_v57  ;;  %v4558_v41 = vpop.eup %4557  ;;  %v1704_v39 = vsub.f32 1.0, %v4554_v30  ;;  %v1279_v59 = vmul.f32 1.442695, %v1248_v6  ;;  %v7052_v30 = vpop.permute.xlu1 %679 }
 0x198   : > { %v2027_v51 = vsub.f32 0.0, %v6934_v40  ;;  %4569 = vrsqrt.f32 %v6950_v56  ;;  %v4560_v16 = vpop.eup %4559  ;;  %v1211_v7 = vmax.f32 %v1195_v37, 1e-06  ;;  %v516_v58 = vadd.f32 %v9949_v61, %v9948_v5 }
 0x199   : > { %v616_v25 = vmul.f32 %v600_v35, %v600_v35  ;;  %v1081_v34 = vmul.f32 %v1065_v48, %v1065_v48  ;;  %v4562_v46 = vpop.eup %4561  ;;  %v934_v31 = vmul.f32 %v918_v2, %v6963_v52  ;;  %v1335_v17 = vmul.f32 %v1319_v18, %v6970_v45 }
 0x19a   : > { %4571 = vpow2.f32 %v878_v9  ;;  %vm1530_vm14 = vcmp.gt.f32.partialorder %v6912_v47, 1e-12  ;;  %v1596_v24 = vsub.f32 1.0, %v7034_v3  ;;  %v2105_v40 = vsub.f32 1.0, %v4558_v41 }
 0x19b   : > { %v7050_v6 = vmul.f32 0.04725898, %v7037_v29  ;;  %v1045_v28 = vadd.f32 %v9951_v20, %v9950_v0  ;;  %v7056_v37 = vadd.f32 %v616_v25, %v516_v58  ;;  %v1720_v52 = vmul.f32 %v1704_v39, %v6846_v1  ;;  %v9954_v20 = vld [vmem:[#allocation63_spill] sm:$0xff] }
 0x19c   : > { %4573 = vpow2.f32 %v1279_v59  ;;  %vm1931_vm15 = vcmp.gt.f32.partialorder %v6921_v22, 1e-12  ;;  %v1466_v45 = vsub.f32 %v564_v60, %v9707_v10  ;;  %v1867_v2 = vsub.f32 %v564_v60, %v9708_v42  ;;  %v4564_v18 = vpop.eup %4563 }
 0x19d   : > { %v1649_v9 = vmul.f32 %v4560_v16, %v1626_v19  ;;  %v2050_v35 = vmul.f32 %v4562_v46, %v2027_v51  ;;  %4575 = vrcp.f32 %v1211_v7  ;;  %v7062_v48 = vadd.f32 %v1081_v34, %v1045_v28 }
 0x19e   : > { %v7066_v41 = vsel %vm1129_vm13, %v4556_v26, 0.0  ;;  %v1612_v5 = vmax.f32 %v1596_v24, 1e-06  ;;  %v7070_v1 = vmul.f32 %v6723_v32, %v7052_v30  ;;  %v7074_v39 = vmul.f32 %v6729_v44, %v7052_v30  ;;  %v9953_v24 = vld [vmem:[#allocation120_spill] sm:$0xff] }
 0x19f   : > { %v4566_v60 = vpop.eup %4565  ;;  %v1351_v59 = vadd.f32 %v1335_v17, %v934_v31  ;;  %v826_v19 = vsub.f32 0.0, %v6966_v43  ;;  %v1997_v51 = vsub.f32 1.0, %v7050_v6  ;;  %v7079_v16 = vmul.f32 0.04725898, %v7056_v37  ;;  %v9952_v17 = vld [vmem:[#allocation62_spill] sm:$0xff] }
 0x1a0   : > { %v2121_v63 = vmul.f32 %v2105_v40, %v6853_v8  ;;  %4577 = vrsqrt.f32 %v6989_v53  ;;  %v1482_v26 = vmul.f32 %v1466_v45, %v1466_v45  ;;  %v1883_v7 = vmul.f32 %v1867_v2, %v1867_v2  ;;  %v4568_v61 = vpop.eup %4567  ;;  %v9955_v8 = vld [vmem:[#allocation121_spill] sm:$0xff] }
 0x1a1   : > { %v1736_v58 = vmul.f32 %v1720_v52, %v6980_v11  ;;  %v1680_v25 = vmul.f32 1.442695, %v1649_v9  ;;  %v2081_v34 = vmul.f32 1.442695, %v2050_v35  ;;  %v7085_v46 = vmul.f32 0.04725898, %v7062_v48 }
 0x1a2   : > { %v4570_v43 = vpop.eup %4569  ;;  %v851_v31 = vmul.f32 %v4566_v60, %v826_v19  ;;  %4579 = vrcp.f32 %v1612_v5  ;;  %v1446_v0 = vadd.f32 %v9953_v24, %v9952_v17  ;;  %v1847_v40 = vadd.f32 %v9955_v8, %v9954_v20 }
 0x1a3   : > { %v1752_v28 = vadd.f32 %v1736_v58, %v1351_v59  ;;  %v7093_v45 = vsel %vm1530_vm14, %v4564_v18, 0.0  ;;  %v2013_v11 = vmax.f32 %v1997_v51, 1e-06  ;;  %v796_v52 = vsub.f32 1.0, %v7079_v16 }
 0x1a4   : > { %v4572_v2 = vpop.eup %4571  ;;  %vm730_vm0 = vcmp.gt.f32.partialorder %v6950_v56, 1e-12  ;;  %4581 = vrsqrt.f32 %v7011_v27  ;;  %v7098_v9 = vadd.f32 %v1482_v26, %v1446_v0  ;;  %v7100_v35 = vadd.f32 %v1883_v7, %v1847_v40  ;;  %v572_v7 = vpop.permute.xlu0 %571 }
 0x1a5   : > { %v2137_v5 = vmul.f32 %v2121_v63, %v7015_v62  ;;  %4583 = vpow2.f32 %v1680_v25  ;;  %v7105_v47 = vsel %vm1931_vm15, %v4568_v61, 0.0  ;;  %vm1131_vm1 = vcmp.gt.f32.partialorder %v6989_v53, 1e-12 }
 0x1a6   : > { %v1197_v18 = vsub.f32 1.0, %v7085_v46  ;;  %v4574_v60 = vpop.eup %4573  ;;  %4585 = vpow2.f32 %v2081_v34  ;;  %v882_v59 = vmul.f32 1.442695, %v851_v31  ;;  %v1227_v19 = vsub.f32 0.0, %v7009_v36 }
 0x1a7   : > { %v7112_v51 = vmul.f32 %v6733_v13, %v7052_v30  ;;  %v4576_v26 = vpop.eup %4575  ;;  %v7114_v62 = vadd.f32 %v2137_v5, %v1752_v28  ;;  %v904_v63 = vsub.f32 1.0, %v4572_v2  ;;  %4587 = vrcp.f32 %v2013_v11  ;;  %v9958_v28 = vld [vmem:[#allocation67_spill] sm:$0xff]  ;;  %v9959_v11 = vld [vmem:[#allocation20_spill] sm:$0xff]  ;;  %v688_v5 = vpop.permute.xlu1 %687 }
 0x1a8   : > { %v812_v22 = vmax.f32 %v796_v52, 1e-06  ;;  %v7118_v61 = vsel %vm730_vm0, %v4570_v43, 0.0  ;;  %v1628_v58 = vsub.f32 0.0, %v7034_v3  ;;  %v7122_v25 = vmul.f32 0.04725898, %v7098_v9 }
 0x1a9   : > { %9956 = vst [vmem:[#allocation141_spill] sm:$0xff] %v7114_v62  ;;  %v7125_v36 = vmul.f32 0.04725898, %v7100_v35  ;;  %4589 = vrsqrt.f32 %v7037_v29  ;;  %v2029_v34 = vsub.f32 0.0, %v7050_v6  ;;  %v7131_v31 = vmul.f32 %v6745_v21, %v7052_v30 }
 0x1aa   : > { %v1213_v17 = vmax.f32 %v1197_v18, 1e-06  ;;  %v4578_v56 = vpop.eup %4577  ;;  %v1305_v43 = vsub.f32 1.0, %v4574_v60  ;;  %4591 = vpow2.f32 %v882_v59  ;;  %v1252_v24 = vmul.f32 %v4576_v26, %v1227_v19  ;;  %v9960_v18 = vld [vmem:[#allocation68_spill] sm:$0xff] }
 0x1ab   : > { %9957 = vst [vmem:[#allocation128_spill] sm:$0xff] %v7131_v31  ;;  %v602_v3 = vsub.f32 %v572_v7, %v5484_v14  ;;  %v920_v0 = vmul.f32 %v904_v63, %v6907_v38  ;;  %4593 = vrcp.f32 %v812_v22  ;;  %v1067_v20 = vsub.f32 %v572_v7, %v9706_v57  ;;  %v9961_v38 = vld [vmem:[#allocation21_spill] sm:$0xff] }
 0x1ac   : > { %v1468_v8 = vsub.f32 %v572_v7, %v9707_v10  ;;  %v4580_v40 = vpop.eup %4579  ;;  %v1598_v6 = vsub.f32 1.0, %v7122_v25  ;;  %v1999_v30 = vsub.f32 1.0, %v7125_v36  ;;  %v518_v52 = vadd.f32 %v9959_v11, %v9958_v28 }
 0x1ad   : > { %v618_v2 = vmul.f32 %v602_v3, %v602_v3  ;;  %vm1532_vm2 = vcmp.gt.f32.partialorder %v7011_v27, 1e-12  ;;  %4595 = vrcp.f32 %v1213_v17  ;;  %v1047_v60 = vadd.f32 %v9961_v38, %v9960_v18 }
 0x1ae   : > { %v1083_v59 = vmul.f32 %v1067_v20, %v1067_v20  ;;  %v1869_v19 = vsub.f32 %v572_v7, %v9708_v42  ;;  %v4582_v26 = vpop.eup %4581  ;;  %v1321_v63 = vmul.f32 %v1305_v43, %v6940_v15  ;;  %v7148_v22 = vsel %vm1131_vm1, %v4578_v56, 0.0 }
 0x1af   : > { %v1283_v62 = vmul.f32 1.442695, %v1252_v24  ;;  %v7150_v28 = vadd.f32 %v618_v2, %v518_v52  ;;  %v4584_v3 = vpop.eup %4583  ;;  %v936_v17 = vmul.f32 %v920_v0, %v7024_v12  ;;  %v1653_v11 = vmul.f32 %v4580_v40, %v1628_v58  ;;  %v9964_v24 = vld [vmem:[#allocation69_spill] sm:$0xff]  ;;  %v9965_v52 = vld [vmem:[#allocation3_spill] sm:$0xff] }
 0x1b0   : > { %v7153_v23 = vadd.f32 %v1083_v59, %v1047_v60  ;;  %v1484_v18 = vmul.f32 %v1468_v8, %v1468_v8  ;;  %v4586_v20 = vpop.eup %4585  ;;  %v1614_v38 = vmax.f32 %v1598_v6, 1e-06  ;;  %v7156_v7 = vmul.f32 %v6723_v32, %v688_v5  ;;  %v9966_v59 = vld [vmem:[#allocation70_spill] sm:$0xff] }
 0x1b1   : > { %v7159_v15 = vmul.f32 %v6729_v44, %v688_v5  ;;  %v7162_v53 = vmul.f32 %v6733_v13, %v688_v5  ;;  %v4588_v56 = vpop.eup %4587  ;;  %v2015_v43 = vmax.f32 %v1999_v30, 1e-06  ;;  %v1448_v12 = vadd.f32 %v9965_v52, %v9964_v24  ;;  %v9967_v30 = vld [vmem:[#allocation22_spill] sm:$0xff] }
 0x1b2   : > { %v7167_v58 = vmul.f32 0.04725898, %v7150_v28  ;;  %v1885_v0 = vmul.f32 %v1869_v19, %v1869_v19  ;;  %v1337_v8 = vmul.f32 %v1321_v63, %v7066_v41  ;;  %v1706_v40 = vsub.f32 1.0, %v4584_v3 }
 0x1b3   : > { %9962 = vst [vmem:[#allocation144_spill] sm:$0xff] %v7159_v15  ;;  %9963 = vst [vmem:[#allocation45_spill] sm:$0xff] %v7162_v53  ;;  %4597 = vpow2.f32 %v1283_v62  ;;  %vm1933_vm3 = vcmp.gt.f32.partialorder %v7037_v29, 1e-12  ;;  %v7172_v6 = vmul.f32 0.04725898, %v7153_v23  ;;  %v4590_v2 = vpop.eup %4589  ;;  %v1849_v49 = vadd.f32 %v9967_v30, %v9966_v59 }
 0x1b4   : > { %v1684_v60 = vmul.f32 1.442695, %v1653_v11  ;;  %v798_v24 = vsub.f32 1.0, %v7167_v58  ;;  %v7177_v52 = vadd.f32 %v1484_v18, %v1448_v12  ;;  %v4592_v53 = vpop.eup %4591  ;;  %v2107_v19 = vsub.f32 1.0, %v4586_v20 }
 0x1b5   : > { %v2054_v31 = vmul.f32 %v4588_v56, %v2029_v34  ;;  %4599 = vrcp.f32 %v1614_v38  ;;  %v1199_v41 = vsub.f32 1.0, %v7172_v6  ;;  %v4594_v62 = vpop.eup %4593  ;;  %v7181_v63 = vmul.f32 %v6745_v21, %v688_v5 }
 0x1b6   : > { %4601 = vrcp.f32 %v2015_v43  ;;  %v814_v3 = vmax.f32 %v798_v24, 1e-06  ;;  %v7183_v11 = vadd.f32 %v1885_v0, %v1849_v49  ;;  %v1353_v15 = vadd.f32 %v1337_v8, %v936_v17  ;;  %v580_v0 = vpop.permute.xlu0 %579 }
 0x1b7   : > { %v1722_v59 = vmul.f32 %v1706_v40, %v6944_v54  ;;  %v7188_v18 = vsel %vm1532_vm2, %v4582_v26, 0.0  ;;  %4603 = vrsqrt.f32 %v7056_v37  ;;  %v4596_v34 = vpop.eup %4595  ;;  %v828_v20 = vsub.f32 0.0, %v7079_v16 }
 0x1b8   : > { %4605 = vpow2.f32 %v1684_v60  ;;  %v1215_v38 = vmax.f32 %v1199_v41, 1e-06  ;;  %v7193_v5 = vmul.f32 0.04725898, %v7177_v52  ;;  %v2123_v49 = vmul.f32 %v2107_v19, %v6958_v55 }
 0x1b9   : > { %v2085_v56 = vmul.f32 1.442695, %v2054_v31  ;;  %v1229_v17 = vsub.f32 0.0, %v7085_v46  ;;  %4607 = vrcp.f32 %v814_v3  ;;  %v855_v54 = vmul.f32 %v4594_v62, %v828_v20 }
 0x1ba   : > { %4609 = vrsqrt.f32 %v7062_v48  ;;  %v1600_v27 = vsub.f32 1.0, %v7193_v5  ;;  %v7200_v26 = vmul.f32 0.04725898, %v7183_v11  ;;  %v1738_v16 = vmul.f32 %v1722_v59, %v7093_v45  ;;  %v9968_v59 = vld [vmem:[#allocation74_spill] sm:$0xff] }
 0x1bb   : > { %v906_v43 = vsub.f32 1.0, %v4592_v53  ;;  %v1256_v12 = vmul.f32 %v4596_v34, %v1229_v17  ;;  %4611 = vrsqrt.f32 %v7098_v9  ;;  %v7206_v55 = vsel %vm1933_vm3, %v4590_v2, 0.0  ;;  %v9969_v34 = vld [vmem:[#allocation133_spill] sm:$0xff] }
 0x1bc   : > { %4613 = vrcp.f32 %v1215_v38  ;;  %v1616_v46 = vmax.f32 %v1600_v27, 1e-06  ;;  %v2001_v31 = vsub.f32 1.0, %v7200_v26  ;;  %v1754_v40 = vadd.f32 %v1738_v16, %v1353_v15 }
 0x1bd   : > { %v4598_v8 = vpop.eup %4597  ;;  %v2139_v60 = vmul.f32 %v2123_v49, %v7105_v47  ;;  %4615 = vpow2.f32 %v2085_v56  ;;  %v1630_v45 = vsub.f32 0.0, %v7122_v25  ;;  %v886_v53 = vmul.f32 1.442695, %v855_v54  ;;  %v9970_v49 = vld [vmem:[#allocation75_spill] sm:$0xff] }
 0x1be   : > { %4617 = vrcp.f32 %v1616_v46  ;;  %v2017_v30 = vmax.f32 %v2001_v31, 1e-06  ;;  %v604_v24 = vsub.f32 %v580_v0, %v5484_v14  ;;  %v922_v29 = vmul.f32 %v906_v43, %v6974_v33  ;;  %v9971_v14 = vld [vmem:[#allocation134_spill] sm:$0xff] }
 0x1bf   : > { %v4600_v19 = vpop.eup %4599  ;;  %v1287_v2 = vmul.f32 1.442695, %v1256_v12  ;;  %v2031_v41 = vsub.f32 0.0, %v7125_v36  ;;  %v1069_v62 = vsub.f32 %v580_v0, %v9706_v57  ;;  %v1307_v15 = vsub.f32 1.0, %v4598_v8 }
 0x1c0   : > { %v4602_v3 = vpop.eup %4601  ;;  %v830_v47 = vsub.f32 0.0, %v7167_v58  ;;  %v520_v25 = vadd.f32 %v9969_v34, %v9968_v59  ;;  %v620_v20 = vmul.f32 %v604_v24, %v604_v24  ;;  %4619 = vrcp.f32 %v2017_v30  ;;  %v9975_v59 = vld [vmem:[#allocation77_spill] sm:$0xff] }
 0x1c1   : > { %v4604_v38 = vpop.eup %4603  ;;  %v1049_v56 = vadd.f32 %v9971_v14, %v9970_v49  ;;  %v1085_v17 = vmul.f32 %v1069_v62, %v1069_v62  ;;  %v1470_v33 = vsub.f32 %v580_v0, %v9707_v10  ;;  %4621 = vpow2.f32 %v886_v53  ;;  %v9973_v62 = vld [vmem:[#allocation76_spill] sm:$0xff]  ;;  %v9976_v34 = vld [vmem:[#allocation145_spill] sm:$0xff] }
 0x1c2   : > { %v4606_v54 = vpop.eup %4605  ;;  %v1657_v36 = vmul.f32 %v4600_v19, %v1630_v45  ;;  %v7221_v57 = vadd.f32 %v620_v20, %v520_v25  ;;  %v1871_v27 = vsub.f32 %v580_v0, %v9708_v42  ;;  %vm732_vm4 = vcmp.gt.f32.partialorder %v7056_v37, 1e-12 }
 0x1c3   : > { %v4608_v58 = vpop.eup %4607  ;;  %vm1133_vm5 = vcmp.gt.f32.partialorder %v7062_v48, 1e-12  ;;  %4623 = vpow2.f32 %v1287_v2  ;;  %v2058_v16 = vmul.f32 %v4602_v3, %v2031_v41  ;;  %v7226_v43 = vadd.f32 %v1085_v17, %v1049_v56  ;;  %v9974_v3 = vld [vmem:[#allocation136_spill] sm:$0xff]  ;;  %v696_v56 = vpop.permute.xlu1 %695 }
 0x1c4   : > { %v4610_v12 = vpop.eup %4609  ;;  %v7228_v46 = vadd.f32 %v2139_v60, %v1754_v40  ;;  %v1323_v10 = vmul.f32 %v1307_v15, %v6992_v4  ;;  %4625 = vrsqrt.f32 %v7100_v35  ;;  %v859_v31 = vmul.f32 %v4608_v58, %v830_v47 }
 0x1c5   : > { %v4612_v8 = vpop.eup %4611  ;;  %v938_v42 = vmul.f32 %v922_v29, %v7118_v61  ;;  %v1231_v0 = vsub.f32 0.0, %v7172_v6  ;;  %v7235_v45 = vmul.f32 0.04725898, %v7221_v57  ;;  %v1486_v53 = vmul.f32 %v1470_v33, %v1470_v33 }
 0x1c6   : > { %9972 = vst [vmem:[#allocation102_spill] sm:$0xff] %v7228_v46  ;;  %v4614_v30 = vpop.eup %4613  ;;  %v1708_v24 = vsub.f32 1.0, %v4606_v54  ;;  %v1688_v19 = vmul.f32 1.442695, %v1657_v36  ;;  %v7238_v40 = vmul.f32 0.04725898, %v7226_v43  ;;  %v1887_v60 = vmul.f32 %v1871_v27, %v1871_v27 }
 0x1c7   : > { %v4616_v4 = vpop.eup %4615  ;;  %v2089_v2 = vmul.f32 1.442695, %v2058_v16  ;;  %v1260_v41 = vmul.f32 %v4614_v30, %v1231_v0  ;;  %v1450_v15 = vadd.f32 %v9974_v3, %v9973_v62  ;;  %v800_v61 = vsub.f32 1.0, %v7235_v45  ;;  %v7280_v3 = vpop.permute.xlu1 %2216 }
 0x1c8   : > { %v4618_v6 = vpop.eup %4617  ;;  %v1339_v29 = vmul.f32 %v1323_v10, %v7148_v22  ;;  %vm1534_vm6 = vcmp.gt.f32.partialorder %v7098_v9, 1e-12  ;;  %4627 = vrsqrt.f32 %v7150_v28  ;;  %v890_v47 = vmul.f32 1.442695, %v859_v31 }
 0x1c9   : > { %v1851_v25 = vadd.f32 %v9976_v34, %v9975_v59  ;;  %vm1935_vm7 = vcmp.gt.f32.partialorder %v7100_v35, 1e-12  ;;  %4629 = vrsqrt.f32 %v7153_v23  ;;  %v1291_v20 = vmul.f32 1.442695, %v1260_v41 }
 0x1ca   : > { %v1632_v49 = vsub.f32 0.0, %v7193_v5  ;;  %v7251_v14 = vadd.f32 %v1486_v53, %v1450_v15  ;;  %4631 = vpow2.f32 %v1688_v19  ;;  %v816_v22 = vmax.f32 %v800_v61, 1e-06  ;;  %v4620_v54 = vpop.eup %4619 }
 0x1cb   : > { %v1201_v17 = vsub.f32 1.0, %v7238_v40  ;;  %v7254_v33 = vadd.f32 %v1887_v60, %v1851_v25  ;;  %v1724_v36 = vmul.f32 %v1708_v24, %v6995_v50  ;;  %v2109_v27 = vsub.f32 1.0, %v4616_v4  ;;  %v4622_v16 = vpop.eup %4621 }
 0x1cc   : > { %4633 = vpow2.f32 %v2089_v2  ;;  %v1661_v58 = vmul.f32 %v4618_v6, %v1632_v49  ;;  %v764_v10 = vsel %vm732_vm4, %v4604_v38, 0.0  ;;  %v1165_v5 = vsel %vm1133_vm5, %v4610_v12, 0.0  ;;  %v9977_v38 = vld [vmem:[#allocation40_spill] sm:$0xff] }
 0x1cd   : > { %4635 = vpow2.f32 %v890_v47  ;;  %v2033_v31 = vsub.f32 0.0, %v7200_v26  ;;  %v4624_v0 = vpop.eup %4623  ;;  %v1355_v53 = vadd.f32 %v1339_v29, %v938_v42  ;;  %v1217_v30 = vmax.f32 %v1201_v17, 1e-06  ;;  %v9979_v17 = vld [vmem:[#allocation14_spill] sm:$0xff] }
 0x1ce   : > { %4637 = vpow2.f32 %v1291_v20  ;;  %v7263_v19 = vmul.f32 0.04725898, %v7251_v14  ;;  %v4626_v50 = vpop.eup %4625  ;;  %v7266_v60 = vmul.f32 %v6723_v32, %v696_v56  ;;  %v7269_v37 = vmul.f32 0.04725898, %v7254_v33 }
 0x1cf   : > { %v2062_v24 = vmul.f32 %v4620_v54, %v2033_v31  ;;  %4639 = vrcp.f32 %v816_v22  ;;  %v1740_v48 = vmul.f32 %v1724_v36, %v7188_v18  ;;  %v2125_v26 = vmul.f32 %v2109_v27, %v9977_v38  ;;  %v5131_v22 = vld [vmem:[%s5401_s26] sm:$0xf] }
 0x1d0   : > { %v1692_v12 = vmul.f32 1.442695, %v1661_v58  ;;  %v1602_v42 = vsub.f32 1.0, %v7263_v19  ;;  %v908_v4 = vsub.f32 1.0, %v4622_v16  ;;  %v1309_v2 = vsub.f32 1.0, %v4624_v0  ;;  %v9982_v0 = vld [vmem:[#allocation16_spill] sm:$0xff] }
 0x1d1   : > { %v7275_v41 = vmul.f32 %v6729_v44, %v696_v56  ;;  %v7278_v62 = vmul.f32 %v6733_v13, %v696_v56  ;;  %v1756_v15 = vadd.f32 %v1740_v48, %v1355_v53  ;;  %v7284_v61 = vsel %vm1534_vm6, %v4612_v8, 0.0  ;;  %v9978_v8 = vld [vmem:[#allocation15_spill] sm:$0xff] }
 0x1d2   : > { %vm734_vm8 = vcmp.gt.f32.partialorder %v7150_v28, 1e-12  ;;  %4641 = vrcp.f32 %v1217_v30  ;;  %v4628_v18 = vpop.eup %4627  ;;  %v7289_v6 = vsel %vm1935_vm7, %v4626_v50, 0.0  ;;  %vm1135_vm9 = vcmp.gt.f32.partialorder %v7153_v23, 1e-12 }
 0x1d3   : > { %v2093_v29 = vmul.f32 1.442695, %v2062_v24  ;;  %v2003_v47 = vsub.f32 1.0, %v7269_v37  ;;  %v4630_v59 = vpop.eup %4629  ;;  %v2141_v34 = vmul.f32 %v2125_v26, %v7206_v55  ;;  %4643 = vpow2.f32 %v1692_v12  ;;  %v5132_v24 = vld [vmem:[%s5401_s26 + $0x4] sm:$0xf] }
 0x1d4   : > { %v1618_v9 = vmax.f32 %v1602_v42, 1e-06  ;;  %v2298_v25 = vsub.f32 %v7280_v3, %v9978_v8  ;;  %v4632_v20 = vpop.eup %4631  ;;  %v924_v49 = vmul.f32 %v908_v4, %v7070_v1  ;;  %v1325_v35 = vmul.f32 %v1309_v2, %v7074_v39  ;;  %v7313_v39 = vpop.permute.xlu0 %2447  ;;  %v9984_v42 = vld [vmem:[#allocation17_spill] sm:$0xff]  ;;  %v5133_v2 = vld [vmem:[%s5401_s26 + $0x8] sm:$0xf] }
 0x1d5   : > { %4645 = vrsqrt.f32 %v7177_v52  ;;  %v7301_v54 = vrot.slane %v5131_v22, %v9979_v17  ;;  %v7303_v27 = vadd.f32 %v2141_v34, %v1756_v15  ;;  %v7307_v55 = vsel %vm734_vm8, %v4628_v18, 0.0 }
 0x1d6   : > { %v4634_v36 = vpop.eup %4633  ;;  %4647 = vrsqrt.f32 %v7183_v11  ;;  %v7311_v1 = vmul.f32 %v6745_v21, %v696_v56  ;;  %v7317_v16 = vsel %vm1135_vm9, %v4630_v59, 0.0  ;;  %v2019_v31 = vmax.f32 %v2003_v47, 1e-06 }
 0x1d7   : > { %9980 = vst [vmem:[#allocation46_spill] sm:$0xff] %v7301_v54  ;;  %9981 = vst [vmem:[#allocation103_spill] sm:$0xff] %v7303_v27  ;;  %v4636_v58 = vpop.eup %4635  ;;  %4649 = vpow2.f32 %v2093_v29  ;;  %v2891_v28 = vsub.f32 %v7280_v3, %v9982_v0  ;;  %v1710_v30 = vsub.f32 1.0, %v4632_v20  ;;  %v2314_v50 = vmul.f32 %v2298_v25, %v2298_v25  ;;  %v9986_v20 = vld [vmem:[#allocation200_spill] sm:$0xff] }
 0x1d8   : > { %v4638_v53 = vpop.eup %4637  ;;  %4651 = vrcp.f32 %v1618_v9  ;;  %v7323_v56 = vrot.slane %v5132_v24, %v9979_v17  ;;  %v940_v38 = vmul.f32 %v924_v49, %v764_v10  ;;  %v1341_v26 = vmul.f32 %v1325_v35, %v1165_v5 }
 0x1d9   : > { %v4640_v48 = vpop.eup %4639  ;;  %4653 = vrsqrt.f32 %v7221_v57  ;;  %v2514_v23 = vsub.f32 %v7313_v39, %v7301_v54  ;;  %v832_v12 = vsub.f32 0.0, %v7235_v45  ;;  %v3292_v4 = vsub.f32 %v7280_v3, %v9984_v42 }
 0x1da   : > { %9983 = vst [vmem:[#allocation47_spill] sm:$0xff] %v7323_v56  ;;  %4655 = vrsqrt.f32 %v7226_v43  ;;  %v7334_v15 = vrot.slane %v5133_v2, %v9979_v17  ;;  %v2111_v18 = vsub.f32 1.0, %v4634_v36  ;;  %v910_v29 = vsub.f32 1.0, %v4636_v58  ;;  %v9987_v58 = vld [vmem:[#allocation18_spill] sm:$0xff] }
 0x1db   : > { %v1311_v10 = vsub.f32 1.0, %v4638_v53  ;;  %vm1536_vm10 = vcmp.gt.f32.partialorder %v7177_v52, 1e-12  ;;  %4657 = vrcp.f32 %v2019_v31  ;;  %v1726_v47 = vmul.f32 %v1710_v30, %v7112_v51  ;;  %v9988_v30 = vld [vmem:[#allocation144_spill] sm:$0xff] }
 0x1dc   : > { %9985 = vst [vmem:[#allocation104_spill] sm:$0xff] %v7334_v15  ;;  %v4642_v5 = vpop.eup %4641  ;;  %v863_v59 = vmul.f32 %v4640_v48, %v832_v12  ;;  %v2907_v45 = vmul.f32 %v2891_v28, %v2891_v28  ;;  %v2979_v34 = vsub.f32 %v7313_v39, %v7323_v56  ;;  %v1357_v9 = vadd.f32 %v1341_v26, %v940_v38 }
 0x1dd   : > { %vm1937_vm11 = vcmp.gt.f32.partialorder %v7183_v11, 1e-12  ;;  %v1233_v25 = vsub.f32 0.0, %v7238_v40  ;;  %v2430_v49 = vadd.f32 %v9986_v20, %v2314_v50  ;;  %v2530_v35 = vmul.f32 %v2514_v23, %v2514_v23  ;;  %v4644_v22 = vpop.eup %4643  ;;  %v5134_v40 = vld [vmem:[%s5401_s26 + $0xc] sm:$0xf]  ;;  %v9990_v23 = vld [vmem:[#allocation201_spill] sm:$0xff] }
 0x1de   : > { %4659 = vrsqrt.f32 %v7251_v14  ;;  %v3308_v36 = vmul.f32 %v3292_v4, %v3292_v4  ;;  %v3693_v51 = vsub.f32 %v7280_v3, %v9987_v58  ;;  %v3380_v31 = vsub.f32 %v7313_v39, %v7334_v15  ;;  %v9991_v20 = vld [vmem:[#allocation128_spill] sm:$0xff] }
 0x1df   : > { %v4646_v28 = vpop.eup %4645  ;;  %v926_v53 = vmul.f32 %v910_v29, %v7156_v7  ;;  %v1327_v24 = vmul.f32 %v1311_v10, %v9988_v30  ;;  %v1264_v48 = vmul.f32 %v4642_v5, %v1233_v25  ;;  %v7352_v50 = vrot.slane %v5134_v40, %v9979_v17  ;;  %v7361_v10 = vpop.permute.xlu1 %2226 }
 0x1e0   : > { %v4648_v38 = vpop.eup %4647  ;;  %v894_v26 = vmul.f32 1.442695, %v863_v59  ;;  %4661 = vrsqrt.f32 %v7254_v33  ;;  %v2959_v12 = vadd.f32 %v9990_v23, %v2907_v45  ;;  %v2995_v3 = vmul.f32 %v2979_v34, %v2979_v34  ;;  %v9993_v59 = vld [vmem:[#allocation203_spill] sm:$0xff] }
 0x1e1   : > { %9989 = vst [vmem:[#allocation48_spill] sm:$0xff] %v7352_v50  ;;  %v4650_v4 = vpop.eup %4649  ;;  %v1742_v2 = vmul.f32 %v1726_v47, %v7284_v61  ;;  %v2127_v27 = vmul.f32 %v2111_v18, %v9991_v20  ;;  %v1712_v7 = vsub.f32 1.0, %v4644_v22  ;;  %vm736_vm12 = vcmp.gt.f32.partialorder %v7221_v57, 1e-12 }
 0x1e2   : > { %v7359_v29 = vadd.f32 %v2530_v35, %v2430_v49  ;;  %v4652_v17 = vpop.eup %4651  ;;  %vm1137_vm13 = vcmp.gt.f32.partialorder %v7226_v43, 1e-12  ;;  %v1634_v5 = vsub.f32 0.0, %v7263_v19  ;;  %v3360_v45 = vadd.f32 %v9993_v59, %v3308_v36 }
 0x1e3   : > { %v3709_v34 = vmul.f32 %v3693_v51, %v3693_v51  ;;  %v3396_v25 = vmul.f32 %v3380_v31, %v3380_v31  ;;  %v4654_v30 = vpop.eup %4653  ;;  %v942_v61 = vmul.f32 %v926_v53, %v7307_v55  ;;  %v1343_v18 = vmul.f32 %v1327_v24, %v7317_v16  ;;  %v9995_v51 = vld [vmem:[#allocation45_spill] sm:$0xff]  ;;  %v9998_v53 = vld [vmem:[#allocation206_spill] sm:$0xff] }
 0x1e4   : > { %9992 = vst [vmem:[#allocation105_spill] sm:$0xff] %v7359_v29  ;;  %v1295_v47 = vmul.f32 1.442695, %v1264_v48  ;;  %v3781_v49 = vsub.f32 %v7313_v39, %v7352_v50  ;;  %v4656_v35 = vpop.eup %4655  ;;  %v1758_v22 = vadd.f32 %v1742_v2, %v1357_v9  ;;  %v1568_v40 = vsel %vm1536_vm10, %v4646_v28, 0.0 }
 0x1e5   : > { %4663 = vpow2.f32 %v894_v26  ;;  %v7372_v19 = vadd.f32 %v2995_v3, %v2959_v12  ;;  %v4658_v36 = vpop.eup %4657  ;;  %v1728_v31 = vmul.f32 %v1712_v7, %v9995_v51  ;;  %v2113_v23 = vsub.f32 1.0, %v4650_v4  ;;  %v2232_v26 = vpop.permute.xlu1 %2231 }
 0x1e6   : > { %v1665_v20 = vmul.f32 %v4652_v17, %v1634_v5  ;;  %v7376_v55 = vmul.f32 0.04725898, %v7359_v29  ;;  %v2143_v16 = vmul.f32 %v2127_v27, %v7289_v6  ;;  %v1969_v39 = vsel %vm1937_vm11, %v4648_v38, 0.0 }
 0x1e7   : > { %9994 = vst [vmem:[#allocation53_spill] sm:$0xff] %v7372_v19  ;;  %v2035_v9 = vsub.f32 0.0, %v7269_v37  ;;  %v7382_v52 = vadd.f32 %v3396_v25, %v3360_v45  ;;  %v1359_v28 = vadd.f32 %v1343_v18, %v942_v61  ;;  %4665 = vpow2.f32 %v1295_v47  ;;  %v2460_v18 = vpop.permute.xlu0 %2459 }
 0x1e8   : > { %9996 = vst [vmem:[#allocation110_spill] sm:$0xff] %v7376_v55  ;;  %v3761_v24 = vadd.f32 %v9998_v53, %v3709_v34  ;;  %v3797_v48 = vmul.f32 %v3781_v49, %v3781_v49  ;;  %v4660_v12 = vpop.eup %4659  ;;  %v7385_v3 = vadd.f32 %v2143_v16, %v1758_v22  ;;  %vm1538_vm14 = vcmp.gt.f32.partialorder %v7251_v14, 1e-12 }
 0x1e9   : > { %9997 = vst [vmem:[#allocation54_spill] sm:$0xff] %v7382_v52  ;;  %v2066_v4 = vmul.f32 %v4658_v36, %v2035_v9  ;;  %v7389_v6 = vmul.f32 0.04725898, %v7372_v19  ;;  %v1744_v11 = vmul.f32 %v1728_v31, %v1568_v40  ;;  %v2129_v37 = vmul.f32 %v2113_v23, %v7181_v63 }
 0x1ea   : > { %9999 = vst [vmem:[#allocation111_spill] sm:$0xff] %v7385_v3  ;;  %v1696_v27 = vmul.f32 1.442695, %v1665_v20  ;;  %v2710_v38 = vsub.f32 1.0, %v7376_v55  ;;  %v4662_v2 = vpop.eup %4661  ;;  %v7395_v7 = vsel %vm736_vm12, %v4654_v30, 0.0  ;;  %v2301_v5 = vsub.f32 %v2232_v26, %v9978_v8 }
 0x1eb   : > { %10000 = vst [vmem:[#allocation55_spill] sm:$0xff] %v7389_v6  ;;  %vm1939_vm15 = vcmp.gt.f32.partialorder %v7254_v33, 1e-12  ;;  %v7399_v17 = vmul.f32 0.04725898, %v7382_v52  ;;  %v1760_v59 = vadd.f32 %v1744_v11, %v1359_v28  ;;  %v7404_v45 = vsel %vm1137_vm13, %v4656_v35, 0.0 }
 0x1ec   : > { %v7406_v63 = vadd.f32 %v3797_v48, %v3761_v24  ;;  %v2300_v34 = vsub.f32 %v7361_v10, %v9978_v8  ;;  %v7412_v57 = vsel %vm1538_vm14, %v4660_v12, 0.0  ;;  %v2097_v33 = vmul.f32 1.442695, %v2066_v4  ;;  %v10005_v24 = vld [vmem:[#allocation207_spill] sm:$0xff] }
 0x1ed   : > { %10001 = vst [vmem:[#allocation112_spill] sm:$0xff] %v7399_v17  ;;  %4667 = vrsqrt.f32 %v7359_v29  ;;  %v3111_v25 = vsub.f32 1.0, %v7389_v6  ;;  %v2145_v30 = vmul.f32 %v2129_v37, %v1969_v39  ;;  %v7416_v61 = vsel %vm1939_vm15, %v4662_v2, 0.0  ;;  %v10143_v6 = vld [vmem:[#allocation44_spill] sm:$0xff] }
 0x1ee   : > { %10002 = vst [vmem:[#allocation56_spill] sm:$0xff] %v7406_v63  ;;  %4669 = vpow2.f32 %v1696_v27  ;;  %v2726_v43 = vmax.f32 %v2710_v38, 1e-06  ;;  %v3512_v49 = vsub.f32 1.0, %v7399_v17  ;;  %v2317_v35 = vmul.f32 %v2301_v5, %v2301_v5  ;;  %v2242_v38 = vpop.permute.xlu1 %2241 }
 0x1ef   : > { %v4664_v47 = vpop.eup %4663  ;;  %4671 = vrsqrt.f32 %v7372_v19  ;;  %v2894_v14 = vsub.f32 %v2232_v26, %v9982_v0  ;;  %v7421_v22 = vadd.f32 %v2145_v30, %v1760_v59  ;;  %v7426_v36 = vmul.f32 0.04725898, %v7406_v63 }
 0x1f0   : > { %4673 = vrsqrt.f32 %v7382_v52  ;;  %v3127_v51 = vmax.f32 %v3111_v25, 1e-06  ;;  %v2517_v31 = vsub.f32 %v2460_v18, %v7301_v54  ;;  %v3295_v23 = vsub.f32 %v2232_v26, %v9984_v42 }
 0x1f1   : > { %10003 = vst [vmem:[#allocation113_spill] sm:$0xff] %v7421_v22  ;;  %10004 = vst [vmem:[#allocation60_spill] sm:$0xff] %v7426_v36  ;;  %4675 = vpow2.f32 %v2097_v33  ;;  %v4666_v20 = vpop.eup %4665  ;;  %v912_v16 = vsub.f32 1.0, %v4664_v47  ;;  %v3696_v9 = vsub.f32 %v2232_v26, %v9987_v58  ;;  %v3528_v28 = vmax.f32 %v3512_v49, 1e-06  ;;  %v2468_v49 = vpop.permute.xlu0 %2467 }
 0x1f2   : > { %4677 = vrcp.f32 %v2726_v43  ;;  %v7432_v53 = vmul.f32 %v2300_v34, %v2300_v34  ;;  %v2433_v48 = vadd.f32 %v10005_v24, %v2317_v35  ;;  %v2910_v12 = vmul.f32 %v2894_v14, %v2894_v14  ;;  %v10008_v43 = vld [vmem:[#allocation209_spill] sm:$0xff]  ;;  %v2252_v40 = vpop.permute.xlu1 %2251 }
 0x1f3   : > { %v3913_v4 = vsub.f32 1.0, %v7426_v36  ;;  %v7438_v11 = vsub.f32 %v7361_v10, %v9982_v0  ;;  %v2982_v37 = vsub.f32 %v2460_v18, %v7323_v56  ;;  %v3383_v27 = vsub.f32 %v2460_v18, %v7334_v15 }
 0x1f4   : > { %v1313_v2 = vsub.f32 1.0, %v4666_v20  ;;  %4679 = vrcp.f32 %v3127_v51  ;;  %v2533_v26 = vmul.f32 %v2517_v31, %v2517_v31  ;;  %v3311_v5 = vmul.f32 %v3295_v23, %v3295_v23 }
 0x1f5   : > { %v928_v59 = vmul.f32 %v912_v16, %v7266_v60  ;;  %4681 = vrsqrt.f32 %v7406_v63  ;;  %v3712_v33 = vmul.f32 %v3696_v9, %v3696_v9  ;;  %v2962_v47 = vadd.f32 %v10008_v43, %v2910_v12  ;;  %v10010_v9 = vld [vmem:[#allocation213_spill] sm:$0xff] }
 0x1f6   : > { %4683 = vrcp.f32 %v3528_v28  ;;  %v7447_v30 = vadd.f32 %v2533_v26, %v2433_v48  ;;  %v2303_v35 = vsub.f32 %v2242_v38, %v9978_v8  ;;  %v3929_v51 = vmax.f32 %v3913_v4, 1e-06  ;;  %v10012_v4 = vld [vmem:[#allocation217_spill] sm:$0xff] }
 0x1f7   : > { %v7445_v25 = vpop.eup %4667  ;;  %v2998_v31 = vmul.f32 %v2982_v37, %v2982_v37  ;;  %v3399_v23 = vmul.f32 %v3383_v27, %v3383_v27  ;;  %v3784_v60 = vsub.f32 %v2460_v18, %v7352_v50  ;;  %v1329_v16 = vmul.f32 %v1313_v2, %v7275_v41 }
 0x1f8   : > { %10006 = vst [vmem:[#allocation118_spill] sm:$0xff] %v7445_v25  ;;  %10007 = vst [vmem:[#allocation61_spill] sm:$0xff] %v7447_v30  ;;  %v4670_v14 = vpop.eup %4669  ;;  %v3363_v24 = vadd.f32 %v10010_v9, %v3311_v5  ;;  %v2896_v28 = vsub.f32 %v2242_v38, %v9982_v0  ;;  %v3297_v48 = vsub.f32 %v2242_v38, %v9984_v42  ;;  %v7469_v2 = vmul.f32 0.04725898, %v7447_v30 }
 0x1f9   : > { %v7452_v20 = vpop.eup %4671  ;;  %v7461_v26 = vmul.f32 %v928_v59, %v7395_v7  ;;  %v3764_v37 = vadd.f32 %v10012_v4, %v3712_v33  ;;  %v2519_v27 = vsub.f32 %v2468_v49, %v7301_v54  ;;  %v3698_v18 = vsub.f32 %v2242_v38, %v9987_v58 }
 0x1fa   : > { %10009 = vst [vmem:[#allocation119_spill] sm:$0xff] %v7452_v20  ;;  %v7458_v12 = vpop.eup %4673  ;;  %v1714_v41 = vsub.f32 1.0, %v4670_v14  ;;  %10013 = vst [vmem:[#allocation120_spill] sm:$0xff] %v7469_v2  ;;  %v7471_v5 = vadd.f32 %v2998_v31, %v2962_v47  ;;  %v2319_v9 = vmul.f32 %v2303_v35, %v2303_v35  ;;  %4685 = vrcp.f32 %v3929_v51 }
 0x1fb   : > { %10011 = vst [vmem:[#allocation62_spill] sm:$0xff] %v7458_v12  ;;  %v7466_v43 = vpop.eup %4675  ;;  %v3800_v7 = vmul.f32 %v3784_v60, %v3784_v60  ;;  %v2984_v59 = vsub.f32 %v2468_v49, %v7323_v56  ;;  %v2912_v33 = vmul.f32 %v2896_v28, %v2896_v28  ;;  %v7477_v4 = vmul.f32 %v1329_v16, %v7404_v45  ;;  %v10020_v16 = vld [vmem:[#allocation220_spill] sm:$0xff]  ;;  %v2476_v12 = vpop.permute.xlu0 %2475 }
 0x1fc   : > { %10014 = vst [vmem:[#allocation63_spill] sm:$0xff] %v7471_v5  ;;  %v7473_v34 = vpop.eup %4677  ;;  %v7479_v38 = vadd.f32 %v3399_v23, %v3363_v24  ;;  %v3385_v14 = vsub.f32 %v2468_v49, %v7334_v15  ;;  %v3313_v39 = vmul.f32 %v3297_v48, %v3297_v48  ;;  %v2535_v35 = vmul.f32 %v2519_v27, %v2519_v27 }
 0x1fd   : > { %10015 = vst [vmem:[#allocation121_spill] sm:$0xff] %v7473_v34  ;;  %v7483_v31 = vadd.f32 %v3800_v7, %v3764_v37  ;;  %v3714_v63 = vmul.f32 %v3698_v18, %v3698_v18  ;;  %v7488_v60 = vmul.f32 %v1714_v41, %v7278_v62  ;;  %v2713_v45 = vsub.f32 1.0, %v7469_v2  ;;  %v10022_v7 = vld [vmem:[#allocation221_spill] sm:$0xff]  ;;  %v10025_v41 = vld [vmem:[#allocation224_spill] sm:$0xff]  ;;  %v10145_v34 = vld [vmem:[#allocation159_spill] sm:$0xff] }
 0x1fe   : > { %10016 = vst [vmem:[#allocation67_spill] sm:$0xff] %v7479_v38  ;;  %v7485_v51 = vpop.eup %4679  ;;  %v7492_v23 = vmul.f32 0.04725898, %v7471_v5  ;;  %v2435_v24 = vadd.f32 %v10020_v16, %v2319_v9  ;;  %v3000_v48 = vmul.f32 %v2984_v59, %v2984_v59  ;;  %v3786_v37 = vsub.f32 %v2468_v49, %v7352_v50 }
 0x1ff   : > { %10017 = vst [vmem:[#allocation20_spill] sm:$0xff] %v7483_v31  ;;  %10018 = vst [vmem:[#allocation68_spill] sm:$0xff] %v7485_v51  ;;  %v7495_v28 = vpop.eup %4681  ;;  %v2964_v27 = vadd.f32 %v10022_v7, %v2912_v33  ;;  %v2305_v18 = vsub.f32 %v2252_v40, %v9978_v8  ;;  %4687 = vrsqrt.f32 %v7447_v30  ;;  %v7504_v62 = vmul.f32 0.04725898, %v7479_v38  ;;  %v10027_v33 = vld [vmem:[#allocation228_spill] sm:$0xff] }
 0x200   : > { %10019 = vst [vmem:[#allocation21_spill] sm:$0xff] %v7492_v23  ;;  %10021 = vst [vmem:[#allocation69_spill] sm:$0xff] %v7495_v28  ;;  %v7500_v47 = vpop.eup %4683  ;;  %v3365_v2 = vadd.f32 %v10025_v41, %v3313_v39  ;;  %v2898_v9 = vsub.f32 %v2252_v40, %v9982_v0  ;;  %4689 = vrsqrt.f32 %v7471_v5  ;;  %v7510_v59 = vmul.f32 0.04725898, %v7483_v31 }
 0x201   : > { %10023 = vst [vmem:[#allocation3_spill] sm:$0xff] %v7500_v47  ;;  %10024 = vst [vmem:[#allocation70_spill] sm:$0xff] %v7504_v62  ;;  %v3401_v49 = vmul.f32 %v3385_v14, %v3385_v14  ;;  %v3766_v16 = vadd.f32 %v10027_v33, %v3714_v63  ;;  %v2729_v7 = vmax.f32 %v2713_v45, 1e-06  ;;  %v3114_v28 = vsub.f32 1.0, %v7492_v23  ;;  %v10039_v23 = vld [vmem:[#allocation96_spill] sm:$0xff]  ;;  %v7553_v47 = vpop.permute.xlu1 %2261 }
 0x202   : > { %10026 = vst [vmem:[#allocation22_spill] sm:$0xff] %v7510_v59  ;;  %4691 = vrsqrt.f32 %v7479_v38  ;;  %v7515_v30 = vadd.f32 %v2535_v35, %v2435_v24  ;;  %v3802_v52 = vmul.f32 %v3786_v37, %v3786_v37  ;;  %v7517_v39 = vadd.f32 %v3000_v48, %v2964_v27 }
 0x203   : > { %v2321_v41 = vmul.f32 %v2305_v18, %v2305_v18  ;;  %v3299_v5 = vsub.f32 %v2252_v40, %v9984_v42  ;;  %v3515_v20 = vsub.f32 1.0, %v7504_v62  ;;  %v7521_v19 = vadd.f32 %v3401_v49, %v3365_v2  ;;  %v10035_v49 = vld [vmem:[#allocation85_spill] sm:$0xff] }
 0x204   : > { %10028 = vst [vmem:[#allocation74_spill] sm:$0xff] %v7515_v30  ;;  %10029 = vst [vmem:[#allocation133_spill] sm:$0xff] %v7517_v39  ;;  %v2914_v14 = vmul.f32 %v2898_v9, %v2898_v9  ;;  %v3700_v63 = vsub.f32 %v2252_v40, %v9987_v58  ;;  %v7524_v45 = vpop.eup %4685  ;;  %v3916_v33 = vsub.f32 1.0, %v7510_v59  ;;  %v7527_v35 = vadd.f32 %v3802_v52, %v3766_v16 }
 0x205   : > { %10030 = vst [vmem:[#allocation75_spill] sm:$0xff] %v7521_v19  ;;  %10031 = vst [vmem:[#allocation134_spill] sm:$0xff] %v7524_v45  ;;  %v2521_v24 = vsub.f32 %v2476_v12, %v7301_v54  ;;  %v3315_v48 = vmul.f32 %v3299_v5, %v3299_v5  ;;  %v3130_v37 = vmax.f32 %v3114_v28, 1e-06  ;;  %v7531_v27 = vmul.f32 0.04725898, %v7515_v30 }
 0x206   : > { %10032 = vst [vmem:[#allocation76_spill] sm:$0xff] %v7527_v35  ;;  %v2986_v18 = vsub.f32 %v2476_v12, %v7323_v56  ;;  %v3716_v2 = vmul.f32 %v3700_v63, %v3700_v63  ;;  %4693 = vrsqrt.f32 %v7483_v31  ;;  %v7536_v40 = vmul.f32 0.04725898, %v7517_v39  ;;  %v10037_v28 = vld [vmem:[#allocation37_spill] sm:$0xff] }
 0x207   : > { %10033 = vst [vmem:[#allocation136_spill] sm:$0xff] %v7531_v27  ;;  %v3387_v9 = vsub.f32 %v2476_v12, %v7334_v15  ;;  %v2437_v52 = vadd.f32 %v10035_v49, %v2321_v41  ;;  %v3531_v16 = vmax.f32 %v3515_v20, 1e-06  ;;  %v7541_v38 = vmul.f32 0.04725898, %v7521_v19  ;;  %v10041_v49 = vld [vmem:[#allocation231_spill] sm:$0xff] }
 0x208   : > { %10034 = vst [vmem:[#allocation77_spill] sm:$0xff] %v7536_v40  ;;  %v3788_v5 = vsub.f32 %v2476_v12, %v7352_v50  ;;  %v2966_v59 = vadd.f32 %v10037_v28, %v2914_v14  ;;  %v3932_v62 = vmax.f32 %v3916_v33, 1e-06  ;;  %v7546_v63 = vmul.f32 0.04725898, %v7527_v35 }
 0x209   : > { %10036 = vst [vmem:[#allocation145_spill] sm:$0xff] %v7541_v38  ;;  %v2537_v31 = vmul.f32 %v2521_v24, %v2521_v24  ;;  %v3367_v25 = vadd.f32 %v10039_v23, %v3315_v48  ;;  %v7549_v29 = vpop.eup %4687  ;;  %4695 = vrcp.f32 %v2729_v7  ;;  %v2715_v41 = vsub.f32 1.0, %v7531_v27  ;;  %v2480_v24 = vpop.permute.xlu0 %2479 }
 0x20a   : > { %10038 = vst [vmem:[#allocation40_spill] sm:$0xff] %v7546_v63  ;;  %10040 = vst [vmem:[#allocation15_spill] sm:$0xff] %v7549_v29  ;;  %v3002_v20 = vmul.f32 %v2986_v18, %v2986_v18  ;;  %v3768_v45 = vadd.f32 %v10041_v49, %v3716_v2  ;;  %v7555_v12 = vpop.eup %4689  ;;  %4697 = vrcp.f32 %v3130_v37  ;;  %v3116_v14 = vsub.f32 1.0, %v7536_v40 }
 0x20b   : > { %10042 = vst [vmem:[#allocation14_spill] sm:$0xff] %v7555_v12  ;;  %v3403_v33 = vmul.f32 %v3387_v9, %v3387_v9  ;;  %v7558_v28 = vadd.f32 %v2537_v31, %v2437_v52  ;;  %4699 = vrcp.f32 %v3531_v16  ;;  %v3517_v7 = vsub.f32 1.0, %v7541_v38 }
 0x20c   : > { %v7560_v23 = vpop.eup %4691  ;;  %v3804_v48 = vmul.f32 %v3788_v5, %v3788_v5  ;;  %v7563_v18 = vadd.f32 %v3002_v20, %v2966_v59  ;;  %v3294_v2 = vsub.f32 %v7361_v10, %v9984_v42  ;;  %4701 = vrcp.f32 %v3932_v62 }
 0x20d   : > { %10043 = vst [vmem:[#allocation16_spill] sm:$0xff] %v7558_v28  ;;  %10044 = vst [vmem:[#allocation17_spill] sm:$0xff] %v7560_v23  ;;  %v3918_v37 = vsub.f32 1.0, %v7546_v63  ;;  %v7568_v49 = vadd.f32 %v3403_v33, %v3367_v25  ;;  %v1361_v31 = vadd.f32 %v7477_v4, %v7461_v26  ;;  %4703 = vrsqrt.f32 %v7515_v30 }
 0x20e   : > { %10045 = vst [vmem:[#allocation200_spill] sm:$0xff] %v7563_v18  ;;  %v2731_v9 = vmax.f32 %v2715_v41, 1e-06  ;;  %v7573_v52 = vadd.f32 %v3804_v48, %v3768_v45  ;;  %v10048_v59 = vsub.f32 1.0, %v7466_v43  ;;  %4705 = vrsqrt.f32 %v7517_v39  ;;  %v7588_v45 = vpop.permute.xlu1 %2271 }
 0x20f   : > { %10046 = vst [vmem:[#allocation18_spill] sm:$0xff] %v7568_v49  ;;  %v3132_v5 = vmax.f32 %v3116_v14, 1e-06  ;;  %v7580_v62 = vmul.f32 0.04725898, %v7558_v28  ;;  %v1746_v25 = vmul.f32 %v7488_v60, %v7412_v57  ;;  %4707 = vrsqrt.f32 %v7521_v19  ;;  %v2484_v57 = vpop.permute.xlu0 %2483 }
 0x210   : > { %10047 = vst [vmem:[#allocation144_spill] sm:$0xff] %v7573_v52  ;;  %v2131_v16 = vmul.f32 %v10048_v59, %v7311_v1  ;;  %v3533_v26 = vmax.f32 %v3517_v7, 1e-06  ;;  %v7586_v4 = vmul.f32 0.04725898, %v7563_v18  ;;  %v7590_v41 = vpop.eup %4693  ;;  %v3695_v1 = vsub.f32 %v7361_v10, %v9987_v58 }
 0x211   : > { %10049 = vst [vmem:[#allocation201_spill] sm:$0xff] %v7580_v62  ;;  %10051 = vst [vmem:[#allocation203_spill] sm:$0xff] %v7590_v41  ;;  %4709 = vrsqrt.f32 %v7527_v35  ;;  %v3934_v43 = vmax.f32 %v3918_v37, 1e-06  ;;  %v7596_v20 = vmul.f32 0.04725898, %v7568_v49  ;;  %v1762_v60 = vadd.f32 %v1746_v25, %v1361_v31 }
 0x212   : > { %10050 = vst [vmem:[#allocation128_spill] sm:$0xff] %v7586_v4  ;;  %v7600_v14 = vmul.f32 %v7438_v11, %v7438_v11  ;;  %4711 = vrcp.f32 %v2731_v9  ;;  %v7603_v33 = vmul.f32 0.04725898, %v7573_v52  ;;  %v2147_v7 = vmul.f32 %v2131_v16, %v7416_v61 }
 0x213   : > { %10052 = vst [vmem:[#allocation45_spill] sm:$0xff] %v7596_v20  ;;  %v7606_v48 = vmul.f32 %v3294_v2, %v3294_v2  ;;  %4713 = vrcp.f32 %v3132_v5  ;;  %v2717_v10 = vsub.f32 1.0, %v7580_v62  ;;  %v7609_v37 = vpop.eup %4695  ;;  %v3118_v31 = vsub.f32 1.0, %v7586_v4  ;;  %v2282_v4 = vpop.permute.xlu1 %2281 }
 0x214   : > { %10053 = vst [vmem:[#allocation206_spill] sm:$0xff] %v7603_v33  ;;  %10054 = vst [vmem:[#allocation207_spill] sm:$0xff] %v7609_v37  ;;  %4715 = vrcp.f32 %v3533_v26  ;;  %v2522_v59 = vsub.f32 %v2480_v24, %v7301_v54  ;;  %v2987_v11 = vsub.f32 %v2480_v24, %v7323_v56  ;;  %v7614_v9 = vpop.eup %4697  ;;  %v7617_v35 = vmul.f32 %v3695_v1, %v3695_v1  ;;  %v2488_v25 = vpop.permute.xlu0 %2487 }
 0x215   : > { %10055 = vst [vmem:[#allocation209_spill] sm:$0xff] %v7614_v9  ;;  %4717 = vrcp.f32 %v3934_v43  ;;  %v3519_v61 = vsub.f32 1.0, %v7596_v20  ;;  %v7620_v2 = vpop.eup %4699  ;;  %v7622_v16 = vadd.f32 %v2147_v7, %v1762_v60  ;;  %v3920_v5 = vsub.f32 1.0, %v7603_v33 }
 0x216   : > { %10056 = vst [vmem:[#allocation213_spill] sm:$0xff] %v7620_v2  ;;  %4719 = vrsqrt.f32 %v7558_v28  ;;  %v3388_v26 = vsub.f32 %v2480_v24, %v7334_v15  ;;  %v7627_v62 = vpop.eup %4701  ;;  %v2733_v63 = vmax.f32 %v2717_v10, 1e-06  ;;  %v3789_v1 = vsub.f32 %v2480_v24, %v7352_v50 }
 0x217   : > { %10057 = vst [vmem:[#allocation217_spill] sm:$0xff] %v7622_v16  ;;  %10058 = vst [vmem:[#allocation220_spill] sm:$0xff] %v7627_v62  ;;  %4721 = vrsqrt.f32 %v7563_v18  ;;  %v2307_v43 = vsub.f32 %v7553_v47, %v9978_v8  ;;  %v7633_v60 = vpop.eup %4703  ;;  %v3134_v7 = vmax.f32 %v3118_v31, 1e-06  ;;  %v7636_v33 = vmul.f32 %v2522_v59, %v2522_v59  ;;  %v2292_v39 = vpop.permute.xlu1 %2291 }
 0x218   : > { %10059 = vst [vmem:[#allocation221_spill] sm:$0xff] %v7633_v60  ;;  %4723 = vrsqrt.f32 %v7568_v49  ;;  %v7638_v20 = vmul.f32 %v2987_v11, %v2987_v11  ;;  %v7640_v28 = vpop.eup %4705  ;;  %v3535_v10 = vmax.f32 %v3519_v61, 1e-06  ;;  %v2900_v24 = vsub.f32 %v7553_v47, %v9982_v0 }
 0x219   : > { %10060 = vst [vmem:[#allocation224_spill] sm:$0xff] %v7640_v28  ;;  %4725 = vrsqrt.f32 %v7573_v52  ;;  %v3301_v18 = vsub.f32 %v7553_v47, %v9984_v42  ;;  %v7647_v38 = vpop.eup %4707  ;;  %v3936_v31 = vmax.f32 %v3920_v5, 1e-06  ;;  %v3702_v59 = vsub.f32 %v7553_v47, %v9987_v58 }
 0x21a   : > { %10061 = vst [vmem:[#allocation228_spill] sm:$0xff] %v7647_v38  ;;  %v2523_v11 = vsub.f32 %v2484_v57, %v7301_v54  ;;  %v2988_v49 = vsub.f32 %v2484_v57, %v7323_v56  ;;  %4727 = vrcp.f32 %v2733_v63  ;;  %v7655_v61 = vmul.f32 %v3388_v26, %v3388_v26 }
 0x21b   : > { %v7653_v19 = vpop.eup %4709  ;;  %v7657_v52 = vmul.f32 %v3789_v1, %v3789_v1  ;;  %v7659_v28 = vmul.f32 %v2307_v43, %v2307_v43  ;;  %4729 = vrcp.f32 %v3134_v7  ;;  %v3389_v5 = vsub.f32 %v2484_v57, %v7334_v15  ;;  %v2492_v43 = vpop.permute.xlu0 %2491 }
 0x21c   : > { %10062 = vst [vmem:[#allocation85_spill] sm:$0xff] %v7653_v19  ;;  %v7661_v60 = vpop.eup %4711  ;;  %v3790_v47 = vsub.f32 %v2484_v57, %v7352_v50  ;;  %v2309_v38 = vsub.f32 %v7588_v45, %v9978_v8  ;;  %4731 = vrcp.f32 %v3535_v10  ;;  %v7669_v63 = vmul.f32 %v2900_v24, %v2900_v24  ;;  %v2336_v29 = vpop.permute.xlu1 %2335 }
 0x21d   : > { %10063 = vst [vmem:[#allocation37_spill] sm:$0xff] %v7659_v28  ;;  %10064 = vst [vmem:[#allocation96_spill] sm:$0xff] %v7661_v60  ;;  %v7667_v40 = vpop.eup %4713  ;;  %v7671_v26 = vmul.f32 %v3301_v18, %v3301_v18  ;;  %v2902_v1 = vsub.f32 %v7588_v45, %v9982_v0  ;;  %4733 = vrcp.f32 %v3936_v31  ;;  %v7677_v19 = vmul.f32 %v3702_v59, %v3702_v59 }
 0x21e   : > { %10065 = vst [vmem:[#allocation231_spill] sm:$0xff] %v7667_v40  ;;  %10066 = vst [vmem:[#allocation232_spill] sm:$0xff] %v7669_v63  ;;  %v7675_v7 = vpop.eup %4715  ;;  %v7679_v57 = vmul.f32 %v2523_v11, %v2523_v11  ;;  %v7681_v30 = vmul.f32 %v2988_v49, %v2988_v49  ;;  %v3303_v10 = vsub.f32 %v7588_v45, %v9984_v42 }
 0x21f   : > { %10067 = vst [vmem:[#allocation233_spill] sm:$0xff] %v7671_v26  ;;  %10068 = vst [vmem:[#allocation234_spill] sm:$0xff] %v7675_v7  ;;  %v7683_v41 = vpop.eup %4717  ;;  %v3704_v18 = vsub.f32 %v7588_v45, %v9987_v58  ;;  %v2524_v24 = vsub.f32 %v2488_v25, %v7301_v54  ;;  %v2989_v40 = vsub.f32 %v2488_v25, %v7323_v56 }
 0x220   : > { %10069 = vst [vmem:[#allocation235_spill] sm:$0xff] %v7677_v19  ;;  %10070 = vst [vmem:[#allocation236_spill] sm:$0xff] %v7679_v57  ;;  %v7691_v7 = vpop.eup %4719  ;;  %v7693_v31 = vmul.f32 %v3389_v5, %v3389_v5  ;;  %v7695_v59 = vmul.f32 %v3790_v47, %v3790_v47  ;;  %v7697_v49 = vmul.f32 %v2309_v38, %v2309_v38 }
 0x221   : > { %10071 = vst [vmem:[#allocation237_spill] sm:$0xff] %v7681_v30  ;;  %10072 = vst [vmem:[#allocation238_spill] sm:$0xff] %v7683_v41  ;;  %v3390_v11 = vsub.f32 %v2488_v25, %v7334_v15  ;;  %v7700_v41 = vpop.eup %4721  ;;  %v7702_v60 = vmul.f32 %v2902_v1, %v2902_v1  ;;  %v3791_v45 = vsub.f32 %v2488_v25, %v7352_v50  ;;  %v10152_v30 = vld [vmem:[#allocation139_spill] sm:$0xff] }
 0x222   : > { %10073 = vst [vmem:[#allocation239_spill] sm:$0xff] %v7691_v7  ;;  %10074 = vst [vmem:[#allocation240_spill] sm:$0xff] %v7693_v31  ;;  %v2311_v23 = vsub.f32 %v2282_v4, %v9978_v8  ;;  %v2904_v27 = vsub.f32 %v2282_v4, %v9982_v0  ;;  %v7707_v12 = vpop.eup %4723  ;;  %v3305_v5 = vsub.f32 %v2282_v4, %v9984_v42  ;;  %v10151_v31 = vld [vmem:[#allocation97_spill] sm:$0xff] }
 0x223   : > { %10075 = vst [vmem:[#allocation241_spill] sm:$0xff] %v7695_v59  ;;  %10076 = vst [vmem:[#allocation242_spill] sm:$0xff] %v7697_v49  ;;  %v3706_v47 = vsub.f32 %v2282_v4, %v9987_v58  ;;  %v2525_v38 = vsub.f32 %v2492_v43, %v7301_v54  ;;  %v2990_v7 = vsub.f32 %v2492_v43, %v7323_v56  ;;  %v10150_v59 = vld [vmem:[#allocation4_spill] sm:$0xff] }
 0x224   : > { %10077 = vst [vmem:[#allocation243_spill] sm:$0xff] %v7700_v41  ;;  %10078 = vst [vmem:[#allocation244_spill] sm:$0xff] %v7702_v60  ;;  %v7713_v41 = vpop.eup %4725  ;;  %v7715_v1 = vmul.f32 %v3303_v10, %v3303_v10  ;;  %v7717_v25 = vmul.f32 %v3704_v18, %v3704_v18  ;;  %v7719_v62 = vmul.f32 %v2524_v24, %v2524_v24  ;;  %vm1524_vm2 = vcmp.gt.f32.partialorder %v10150_v59, 1e-12  ;;  %v10155_v59 = vld [vmem:[#allocation131_spill] sm:$0xff] }
 0x225   : > { %10079 = vst [vmem:[#allocation245_spill] sm:$0xff] %v7707_v12  ;;  %10080 = vst [vmem:[#allocation246_spill] sm:$0xff] %v7713_v41  ;;  %v7721_v2 = vmul.f32 %v2989_v40, %v2989_v40  ;;  %v2496_v12 = vpop.permute.xlu0 %2495  ;;  %v7723_v9 = vmul.f32 %v3390_v11, %v3390_v11  ;;  %v3391_v4 = vsub.f32 %v2492_v43, %v7334_v15  ;;  %v7728_v49 = vpop.eup %4727 }
 0x226   : > { %10081 = vst [vmem:[#allocation247_spill] sm:$0xff] %v7715_v1  ;;  %10082 = vst [vmem:[#allocation248_spill] sm:$0xff] %v7717_v25  ;;  %v3792_v37 = vsub.f32 %v2492_v43, %v7352_v50  ;;  %v2313_v60 = vsub.f32 %v2292_v39, %v9978_v8  ;;  %v7730_v41 = vmul.f32 %v3791_v45, %v3791_v45  ;;  %v7737_v24 = vpop.eup %4729 }
 0x227   : > { %10083 = vst [vmem:[#allocation249_spill] sm:$0xff] %v7719_v62  ;;  %10084 = vst [vmem:[#allocation250_spill] sm:$0xff] %v7721_v2  ;;  %v7732_v10 = vmul.f32 %v2311_v23, %v2311_v23  ;;  %v7734_v18 = vmul.f32 %v2904_v27, %v2904_v27  ;;  %v2906_v40 = vsub.f32 %v2292_v39, %v9982_v0  ;;  %v7747_v8 = vpop.eup %4731  ;;  %v10111_v62 = vld [vmem:[#allocation135_spill] sm:$0xff] }
 0x228   : > { %10085 = vst [vmem:[#allocation251_spill] sm:$0xff] %v7723_v9  ;;  %10086 = vst [vmem:[#allocation252_spill] sm:$0xff] %v7728_v49  ;;  %v7739_v11 = vmul.f32 %v3305_v5, %v3305_v5  ;;  %v7741_v25 = vmul.f32 %v3706_v47, %v3706_v47  ;;  %v7743_v1 = vmul.f32 %v2525_v38, %v2525_v38  ;;  %v10096_v49 = vld [vmem:[#allocation126_spill] sm:$0xff] }
 0x229   : > { %10087 = vst [vmem:[#allocation253_spill] sm:$0xff] %v7730_v41  ;;  %10088 = vst [vmem:[#allocation254_spill] sm:$0xff] %v7732_v10  ;;  %v7745_v43 = vmul.f32 %v2990_v7, %v2990_v7  ;;  %v3307_v45 = vsub.f32 %v2292_v39, %v9984_v42  ;;  %v3708_v23 = vsub.f32 %v2292_v39, %v9987_v58  ;;  %v10101_v7 = vld [vmem:[#allocation11_spill] sm:$0xff]  ;;  %v10103_v10 = vld [vmem:[#allocation12_spill] sm:$0xff] }
 0x22a   : > { %10089 = vst [vmem:[#allocation255_spill] sm:$0xff] %v7734_v18  ;;  %10090 = vst [vmem:[#allocation256_spill] sm:$0xff] %v7737_v24  ;;  %v2526_v27 = vsub.f32 %v2496_v12, %v7301_v54  ;;  %v2399_v0 = vsub.f32 %v2336_v29, %v10096_v49  ;;  %v7753_v18 = vpop.eup %4733  ;;  %v7755_v5 = vmul.f32 %v3391_v4, %v3391_v4  ;;  %v10104_v4 = vld [vmem:[#allocation19_spill] sm:$0xff] }
 0x22b   : > { %10091 = vst [vmem:[#allocation257_spill] sm:$0xff] %v7739_v11  ;;  %10092 = vst [vmem:[#allocation258_spill] sm:$0xff] %v7741_v25  ;;  %v7757_v47 = vmul.f32 %v3792_v37, %v3792_v37  ;;  %v7759_v38 = vmul.f32 %v2313_v60, %v2313_v60  ;;  %v2928_v24 = vsub.f32 %v2336_v29, %v10101_v7  ;;  %v2340_v25 = vpop.permute.xlu1 %2339  ;;  %v2500_v11 = vpop.permute.xlu0 %2499  ;;  %v10105_v37 = vld [vmem:[#allocation24_spill] sm:$0xff]  ;;  %v10106_v60 = vld [vmem:[#allocation26_spill] sm:$0xff] }
 0x22c   : > { %10093 = vst [vmem:[#allocation259_spill] sm:$0xff] %v7743_v1  ;;  %10094 = vst [vmem:[#allocation260_spill] sm:$0xff] %v7745_v43  ;;  %v2991_v42 = vsub.f32 %v2496_v12, %v7323_v56  ;;  %v3392_v58 = vsub.f32 %v2496_v12, %v7334_v15  ;;  %v3793_v39 = vsub.f32 %v2496_v12, %v7352_v50  ;;  %v10110_v12 = vld [vmem:[#allocation132_spill] sm:$0xff] }
 0x22d   : > { %10095 = vst [vmem:[#allocation261_spill] sm:$0xff] %v7747_v8  ;;  %10097 = vst [vmem:[#allocation126_spill] sm:$0xff] %v7753_v18  ;;  %v7762_v8 = vmul.f32 %v2906_v40, %v2906_v40  ;;  %v3329_v18 = vsub.f32 %v2336_v29, %v10103_v10  ;;  %v7771_v43 = vmul.f32 %v3307_v45, %v3307_v45 }
 0x22e   : > { %10098 = vst [vmem:[#allocation262_spill] sm:$0xff] %v7755_v5  ;;  %10099 = vst [vmem:[#allocation263_spill] sm:$0xff] %v7757_v47  ;;  %v3730_v5 = vsub.f32 %v2336_v29, %v10104_v4  ;;  %v818_v47 = vsub.f32 0.0, %v10105_v37  ;;  %v7773_v1 = vmul.f32 %v3708_v23, %v3708_v23  ;;  %v7775_v40 = vmul.f32 %v2526_v27, %v2526_v27 }
 0x22f   : > { %10100 = vst [vmem:[#allocation264_spill] sm:$0xff] %v7759_v38  ;;  %10102 = vst [vmem:[#allocation265_spill] sm:$0xff] %v7762_v8  ;;  %v1219_v38 = vsub.f32 0.0, %v10106_v60  ;;  %v2415_v8 = vmul.f32 %v2399_v0, %v2399_v0  ;;  %v2944_v41 = vmul.f32 %v2928_v24, %v2928_v24  ;;  %v2527_v9 = vsub.f32 %v2500_v11, %v7301_v54  ;;  %v7787_v27 = vpop.permute.xlu1 %2347 }
 0x230   : > { %10107 = vst [vmem:[#allocation24_spill] sm:$0xff] %v7771_v43  ;;  %10108 = vst [vmem:[#allocation26_spill] sm:$0xff] %v7773_v1  ;;  %v835_v2 = vmul.f32 %v10110_v12, %v818_v47  ;;  %v7780_v17 = vmul.f32 %v2991_v42, %v2991_v42  ;;  %v7782_v29 = vmul.f32 %v3392_v58, %v3392_v58  ;;  %v10115_v12 = vld [vmem:[#allocation27_spill] sm:$0xff]  ;;  %v10117_v58 = vld [vmem:[#allocation78_spill] sm:$0xff] }
 0x231   : > { %10109 = vst [vmem:[#allocation266_spill] sm:$0xff] %v7775_v40  ;;  %v1236_v36 = vmul.f32 %v10111_v62, %v1219_v38  ;;  %v7784_v37 = vmul.f32 %v3793_v39, %v3793_v39  ;;  %v2992_v45 = vsub.f32 %v2500_v11, %v7323_v56  ;;  %v3345_v23 = vmul.f32 %v3329_v18, %v3329_v18  ;;  %v10116_v38 = vld [vmem:[#allocation5_spill] sm:$0xff]  ;;  %v10118_v39 = vld [vmem:[#allocation79_spill] sm:$0xff] }
 0x232   : > { %10112 = vst [vmem:[#allocation132_spill] sm:$0xff] %v7780_v17  ;;  %10113 = vst [vmem:[#allocation135_spill] sm:$0xff] %v7782_v29  ;;  %v3746_v60 = vmul.f32 %v3730_v5, %v3730_v5  ;;  %v866_v0 = vmul.f32 1.442695, %v835_v2  ;;  %v3393_v1 = vsub.f32 %v2500_v11, %v7334_v15  ;;  %v3794_v47 = vsub.f32 %v2500_v11, %v7352_v50  ;;  %v2504_v5 = vpop.permute.xlu0 %2503  ;;  %v10123_v11 = vld [vmem:[#allocation138_spill] sm:$0xff] }
 0x233   : > { %10114 = vst [vmem:[#allocation267_spill] sm:$0xff] %v7784_v37  ;;  %v1267_v24 = vmul.f32 1.442695, %v1236_v36  ;;  %v1620_v62 = vsub.f32 0.0, %v10115_v12  ;;  %v2021_v42 = vsub.f32 0.0, %v10116_v38  ;;  %v7794_v43 = vadd.f32 %v2415_v8, %v10117_v58  ;;  %v10122_v36 = vld [vmem:[#allocation137_spill] sm:$0xff] }
 0x234   : > { %v7797_v37 = vadd.f32 %v2944_v41, %v10118_v39  ;;  %v7799_v18 = vmul.f32 %v2527_v9, %v2527_v9  ;;  %4735 = vpow2.f32 %v866_v0  ;;  %v7801_v2 = vmul.f32 %v2992_v45, %v2992_v45  ;;  %v10124_v12 = vld [vmem:[#allocation80_spill] sm:$0xff] }
 0x235   : > { %4737 = vpow2.f32 %v1267_v24  ;;  %v1637_v29 = vmul.f32 %v10122_v36, %v1620_v62  ;;  %v2038_v17 = vmul.f32 %v10123_v11, %v2021_v42  ;;  %v7806_v40 = vadd.f32 %v3345_v23, %v10124_v12  ;;  %v10126_v24 = vld [vmem:[#allocation81_spill] sm:$0xff]  ;;  %v7820_v36 = vpop.permute.xlu1 %2355 }
 0x236   : > { %10119 = vst [vmem:[#allocation27_spill] sm:$0xff] %v7797_v37  ;;  %10120 = vst [vmem:[#allocation5_spill] sm:$0xff] %v7799_v18  ;;  %v2400_v8 = vsub.f32 %v2340_v25, %v10096_v49  ;;  %v2929_v38 = vsub.f32 %v2340_v25, %v10101_v7  ;;  %v3330_v41 = vsub.f32 %v2340_v25, %v10103_v10  ;;  %v10165_v37 = vld [vmem:[#allocation7_spill] sm:$0xff] }
 0x237   : > { %10121 = vst [vmem:[#allocation78_spill] sm:$0xff] %v7801_v2  ;;  %10125 = vst [vmem:[#allocation79_spill] sm:$0xff] %v7806_v40  ;;  %v3731_v9 = vsub.f32 %v2340_v25, %v10104_v4  ;;  %v2528_v0 = vsub.f32 %v2504_v5, %v7301_v54  ;;  %v1668_v45 = vmul.f32 1.442695, %v1637_v29  ;;  %v2069_v58 = vmul.f32 1.442695, %v2038_v17 }
 0x238   : > { %v7814_v39 = vadd.f32 %v3746_v60, %v10126_v24  ;;  %v7816_v62 = vmul.f32 %v3393_v1, %v3393_v1  ;;  %v2993_v23 = vsub.f32 %v2504_v5, %v7323_v56  ;;  %v3394_v42 = vsub.f32 %v2504_v5, %v7334_v15  ;;  %v10131_v25 = vld [vmem:[#allocation41_spill] sm:$0xff]  ;;  %v10133_v17 = vld [vmem:[#allocation155_spill] sm:$0xff] }
 0x239   : > { %v7822_v11 = vmul.f32 %v3794_v47, %v3794_v47  ;;  %v7825_v12 = vsub.f32 %v2504_v5, %v7352_v50  ;;  %4739 = vpow2.f32 %v1668_v45  ;;  %v10132_v29 = vsub.f32 0.0, %v10131_v25  ;;  %v10135_v5 = vld [vmem:[#allocation42_spill] sm:$0xff]  ;;  %v10137_v45 = vld [vmem:[#allocation156_spill] sm:$0xff]  ;;  %v10164_v40 = vld [vmem:[#allocation99_spill] sm:$0xff] }
 0x23a   : > { %10127 = vst [vmem:[#allocation137_spill] sm:$0xff] %v7814_v39  ;;  %10128 = vst [vmem:[#allocation138_spill] sm:$0xff] %v7816_v62  ;;  %v7830_v60 = vmul.f32 %v2400_v8, %v2400_v8  ;;  %v7832_v1 = vmul.f32 %v2929_v38, %v2929_v38  ;;  %v7834_v24 = vmul.f32 %v3330_v41, %v3330_v41  ;;  %4741 = vpow2.f32 %v2069_v58  ;;  %v640_v62 = vpop.permute.xlu0 %639  ;;  %v10140_v8 = vld [vmem:[#allocation43_spill] sm:$0xff] }
 0x23b   : > { %10129 = vst [vmem:[#allocation80_spill] sm:$0xff] %v7822_v11  ;;  %10130 = vst [vmem:[#allocation81_spill] sm:$0xff] %v7825_v12  ;;  %v841_v2 = vmul.f32 %v10133_v17, %v10132_v29  ;;  %v7836_v18 = vmul.f32 %v3731_v9, %v3731_v9  ;;  %v7838_v47 = vmul.f32 %v2528_v0, %v2528_v0  ;;  %v10136_v16 = vsub.f32 0.0, %v10135_v5  ;;  %v10142_v17 = vld [vmem:[#allocation157_spill] sm:$0xff]  ;;  %v10158_v12 = vld [vmem:[#allocation28_spill] sm:$0xff] }
 0x23c   : > { %v7843_v25 = vmul.f32 %v2993_v23, %v2993_v23  ;;  %v7845_v29 = vmul.f32 %v3394_v42, %v3394_v42  ;;  %v10141_v38 = vsub.f32 0.0, %v10140_v8  ;;  %v10144_v58 = vsub.f32 0.0, %v10143_v6  ;;  %v2364_v6 = vpop.permute.xlu1 %2363 }
 0x23d   : > { %10134 = vst [vmem:[#allocation41_spill] sm:$0xff] %v7838_v47  ;;  %v872_v11 = vmul.f32 1.442695, %v841_v2  ;;  %v1242_v51 = vmul.f32 %v10137_v45, %v10136_v16  ;;  %v7855_v0 = vsub.f32 %v7787_v27, %v10096_v49  ;;  %v706_v2 = vmul.f32 %v6723_v32, %v640_v62  ;;  %v10149_v47 = vld [vmem:[#allocation34_spill] sm:$0xff] }
 0x23e   : > { %10138 = vst [vmem:[#allocation155_spill] sm:$0xff] %v7843_v25  ;;  %10139 = vst [vmem:[#allocation42_spill] sm:$0xff] %v7845_v29  ;;  %v1643_v41 = vmul.f32 %v10142_v17, %v10141_v38  ;;  %v2044_v9 = vmul.f32 %v10145_v34, %v10144_v58  ;;  %v4736_v23 = vpop.eup %4735  ;;  %v7860_v42 = vsub.f32 %v7787_v27, %v10101_v7  ;;  %v10146_v17 = vld [vmem:[#allocation13_spill] sm:$0xff]  ;;  %v10148_v29 = vld [vmem:[#allocation23_spill] sm:$0xff]  ;;  %vm1126_vm5 = vcmp.gt.f32.partialorder %v10158_v12, 1e-12 }
 0x23f   : > { %4743 = vpow2.f32 %v872_v11  ;;  %v1273_v16 = vmul.f32 1.442695, %v1242_v51  ;;  %v1107_v5 = vmul.f32 %v6729_v44, %v640_v62  ;;  %v4738_v38 = vpop.eup %4737  ;;  %v7865_v34 = vsub.f32 %v7787_v27, %v10103_v10  ;;  %v10147_v51 = vld [vmem:[#allocation33_spill] sm:$0xff] }
 0x240   : > { %v1674_v45 = vmul.f32 1.442695, %v1643_v41  ;;  %v2075_v8 = vmul.f32 1.442695, %v2044_v9  ;;  %vm722_vm0 = vcmp.gt.f32.partialorder %v10146_v17, 1e-12  ;;  %v2406_v9 = vsub.f32 %v2364_v6, %v10096_v49 }
 0x241   : > { %v898_v58 = vsub.f32 1.0, %v4736_v23  ;;  %4745 = vpow2.f32 %v1273_v16  ;;  %v754_v11 = vsel %vm722_vm0, %v10147_v51, 0.0  ;;  %vm1123_vm1 = vcmp.gt.f32.partialorder %v10148_v29, 1e-12  ;;  %v10153_v51 = vld [vmem:[#allocation25_spill] sm:$0xff] }
 0x242   : > { %v1299_v25 = vsub.f32 1.0, %v4738_v38  ;;  %4747 = vpow2.f32 %v1674_v45  ;;  %v1155_v55 = vsel %vm1123_vm1, %v10149_v47, 0.0  ;;  %v2150_v19 = vadd.f32 %v10152_v30, %v10151_v31  ;;  %v652_v38 = vpop.permute.xlu0 %651  ;;  %v10156_v31 = vld [vmem:[#allocation6_spill] sm:$0xff] }
 0x243   : > { %v914_v41 = vmul.f32 %v898_v58, %v706_v2  ;;  %4749 = vpow2.f32 %v2075_v8  ;;  %v1508_v16 = vmul.f32 %v6733_v13, %v640_v62  ;;  %v4740_v23 = vpop.eup %4739  ;;  %vm1925_vm3 = vcmp.gt.f32.partialorder %v10153_v51, 1e-12  ;;  %v10154_v8 = vld [vmem:[#allocation129_spill] sm:$0xff] }
 0x244   : > { %v1315_v17 = vmul.f32 %v1299_v25, %v1107_v5  ;;  %v1909_v45 = vmul.f32 %v6745_v21, %v640_v62  ;;  %v2935_v47 = vsub.f32 %v2364_v6, %v10101_v7  ;;  %v4742_v2 = vpop.eup %4741  ;;  %v1556_v58 = vsel %vm1524_vm2, %v10154_v8, 0.0 }
 0x245   : > { %v930_v29 = vmul.f32 %v914_v41, %v754_v11  ;;  %v1700_v26 = vsub.f32 1.0, %v4740_v23  ;;  %v1957_v57 = vsel %vm1925_vm3, %v10155_v59, 0.0  ;;  %v2101_v30 = vsub.f32 1.0, %v4742_v2  ;;  %v10157_v41 = vld [vmem:[#allocation147_spill] sm:$0xff] }
 0x246   : > { %v1331_v63 = vmul.f32 %v1315_v17, %v1155_v55  ;;  %vm725_vm4 = vcmp.gt.f32.partialorder %v10156_v31, 1e-12  ;;  %v2422_v25 = vmul.f32 %v2406_v9, %v2406_v9  ;;  %v3336_v5 = vsub.f32 %v2364_v6, %v10103_v10  ;;  %v10160_v31 = vld [vmem:[#allocation49_spill] sm:$0xff] }
 0x247   : > { %v1716_v11 = vmul.f32 %v1700_v26, %v1508_v16  ;;  %v757_v62 = vsel %vm725_vm4, %v10157_v41, 0.0  ;;  %v709_v28 = vmul.f32 %v6723_v32, %v652_v38  ;;  %v2117_v3 = vmul.f32 %v2101_v30, %v1909_v45  ;;  %v10159_v26 = vld [vmem:[#allocation98_spill] sm:$0xff]  ;;  %v10162_v45 = vld [vmem:[#allocation168_spill] sm:$0xff] }
 0x248   : > { %v1347_v51 = vadd.f32 %v1331_v63, %v930_v29  ;;  %v2951_v23 = vmul.f32 %v2935_v47, %v2935_v47  ;;  %v3737_v8 = vsub.f32 %v2364_v6, %v10104_v4  ;;  %v1110_v2 = vmul.f32 %v6729_v44, %v652_v38 }
 0x249   : > { %v4744_v22 = vpop.eup %4743  ;;  %v1732_v55 = vmul.f32 %v1716_v11, %v1556_v58  ;;  %v1511_v9 = vmul.f32 %v6733_v13, %v652_v38  ;;  %v1912_v63 = vmul.f32 %v6745_v21, %v652_v38  ;;  %v2438_v16 = vadd.f32 %v2422_v25, %v10159_v26  ;;  %v10163_v11 = vld [vmem:[#allocation148_spill] sm:$0xff] }
 0x24a   : > { %v901_v17 = vsub.f32 1.0, %v4744_v22  ;;  %v3352_v29 = vmul.f32 %v3336_v5, %v3336_v5  ;;  %v10161_v41 = vsub.f32 0.0, %v10160_v31  ;;  %v2133_v10 = vmul.f32 %v2117_v3, %v1957_v57 }
 0x24b   : > { %v4746_v59 = vpop.eup %4745  ;;  %v1748_v47 = vadd.f32 %v1732_v55, %v1347_v51  ;;  %v1158_v39 = vsel %vm1126_vm5, %v10163_v11, 0.0  ;;  %v2967_v38 = vadd.f32 %v2951_v23, %v10164_v40  ;;  %v3753_v50 = vmul.f32 %v3737_v8, %v3737_v8  ;;  %v10168_v40 = vld [vmem:[#allocation150_spill] sm:$0xff]  ;;  %v10169_v23 = vld [vmem:[#allocation8_spill] sm:$0xff] }
 0x24c   : > { %v845_v30 = vmul.f32 %v10162_v45, %v10161_v41  ;;  %v4748_v46 = vpop.eup %4747  ;;  %v1302_v6 = vsub.f32 1.0, %v4746_v59  ;;  %v917_v58 = vmul.f32 %v901_v17, %v709_v28  ;;  %vm1527_vm6 = vcmp.gt.f32.partialorder %v10165_v37, 1e-12  ;;  %v10167_v28 = vld [vmem:[#allocation100_spill] sm:$0xff] }
 0x24d   : > { %v4750_v22 = vpop.eup %4749  ;;  %v1703_v7 = vsub.f32 1.0, %v4748_v46  ;;  %v2149_v25 = vadd.f32 %v2133_v10, %v1748_v47  ;;  %v7900_v3 = vadd.f32 %v7636_v33, %v2438_v16  ;;  %v3368_v57 = vadd.f32 %v3352_v29, %v10167_v28  ;;  %v10178_v29 = vld [vmem:[#allocation169_spill] sm:$0xff]  ;;  %v10179_v47 = vld [vmem:[#allocation51_spill] sm:$0xff] }
 0x24e   : > { %v2104_v5 = vsub.f32 1.0, %v4750_v22  ;;  %v933_v26 = vmul.f32 %v917_v58, %v757_v62  ;;  %v1318_v31 = vmul.f32 %v1302_v6, %v1110_v2  ;;  %v876_v17 = vmul.f32 1.442695, %v845_v30  ;;  %v10172_v2 = vld [vmem:[#allocation101_spill] sm:$0xff]  ;;  %v10181_v58 = vld [vmem:[#allocation170_spill] sm:$0xff] }
 0x24f   : > { %v1719_v41 = vmul.f32 %v1703_v7, %v1511_v9  ;;  %10166 = vst [vmem:[#allocation156_spill] sm:$0xff] %v7900_v3  ;;  %v4140_v51 = vadd.f32 %v2150_v19, %v2149_v25  ;;  %v3733_v46 = vsub.f32 %v7787_v27, %v10104_v4  ;;  %v1559_v10 = vsel %vm1527_vm6, %v10168_v40, 0.0  ;;  %v10171_v7 = vld [vmem:[#allocation153_spill] sm:$0xff]  ;;  %v10173_v19 = vld [vmem:[#allocation127_spill] sm:$0xff] }
 0x250   : > { %v1334_v55 = vmul.f32 %v1318_v31, %v1158_v39  ;;  %v2120_v12 = vmul.f32 %v2104_v5, %v1912_v63  ;;  %vm1928_vm7 = vcmp.gt.f32.partialorder %v10169_v23, 1e-12  ;;  %v7908_v62 = vadd.f32 %v7638_v20, %v2967_v38  ;;  %v10176_v63 = vld [vmem:[#allocation50_spill] sm:$0xff]  ;;  %v10185_v5 = vld [vmem:[#allocation172_spill] sm:$0xff] }
 0x251   : > { %v1960_v37 = vsel %vm1928_vm7, %v10171_v7, 0.0  ;;  %v1735_v8 = vmul.f32 %v1719_v41, %v1559_v10  ;;  %v3769_v9 = vadd.f32 %v3753_v50, %v10172_v2  ;;  %v4141_v39 = vadd.f32 %v4140_v51, %v10173_v19  ;;  %v2452_v10 = vpop.permute.xlu1 %2451  ;;  %v10189_v7 = vld [vmem:[#allocation87_spill] sm:$0xff] }
 0x252   : > { %10170 = vst [vmem:[#allocation43_spill] sm:$0xff] %v7908_v62  ;;  %v1350_v33 = vadd.f32 %v1334_v55, %v933_v26  ;;  %v7914_v59 = vmul.f32 0.04725898, %v7900_v3  ;;  %v7917_v27 = vadd.f32 %v7655_v61, %v3368_v57  ;;  %v10177_v16 = vsub.f32 0.0, %v10176_v63  ;;  %v10183_v61 = vld [vmem:[#allocation52_spill] sm:$0xff] }
 0x253   : > { %v2136_v30 = vmul.f32 %v2120_v12, %v1960_v37  ;;  %4751 = vpow2.f32 %v876_v17  ;;  %v10180_v6 = vsub.f32 0.0, %v10179_v47  ;;  %v2418_v50 = vmul.f32 %v7855_v0, %v7855_v0 }
 0x254   : > { %10174 = vst [vmem:[#allocation157_spill] sm:$0xff] %v7914_v59  ;;  %10175 = vst [vmem:[#allocation44_spill] sm:$0xff] %v7917_v27  ;;  %v1246_v45 = vmul.f32 %v10178_v29, %v10177_v16  ;;  %v1751_v20 = vadd.f32 %v1735_v8, %v1350_v33  ;;  %v7928_v11 = vmul.f32 0.04725898, %v7908_v62  ;;  %v10184_v25 = vsub.f32 0.0, %v10183_v61 }
 0x255   : > { %v1647_v22 = vmul.f32 %v10181_v58, %v10180_v6  ;;  %v2947_v31 = vmul.f32 %v7860_v42, %v7860_v42  ;;  %v3348_v41 = vmul.f32 %v7865_v34, %v7865_v34  ;;  %v3749_v51 = vmul.f32 %v3733_v46, %v3733_v46 }
 0x256   : > { %10182 = vst [vmem:[#allocation159_spill] sm:$0xff] %v7928_v11  ;;  %v1277_v38 = vmul.f32 1.442695, %v1246_v45  ;;  %v2048_v26 = vmul.f32 %v10185_v5, %v10184_v25  ;;  %v2152_v28 = vadd.f32 %v2136_v30, %v1751_v20  ;;  %v7938_v55 = vmul.f32 0.04725898, %v7917_v27  ;;  %v10194_v45 = vld [vmem:[#allocation160_spill] sm:$0xff] }
 0x257   : > { %v1678_v57 = vmul.f32 1.442695, %v1647_v22  ;;  %v7941_v0 = vadd.f32 %v7657_v52, %v3769_v9  ;;  %v7945_v17 = vadd.f32 %v7830_v60, %v7432_v53  ;;  %v2718_v42 = vsub.f32 1.0, %v7914_v59  ;;  %v10188_v60 = vld [vmem:[#allocation86_spill] sm:$0xff]  ;;  %v10195_v22 = vld [vmem:[#allocation35_spill] sm:$0xff] }
 0x258   : > { %10186 = vst [vmem:[#allocation13_spill] sm:$0xff] %v7938_v55  ;;  %v2079_v12 = vmul.f32 1.442695, %v2048_v26  ;;  %v7947_v40 = vadd.f32 %v4141_v39, %v2152_v28  ;;  %4753 = vpow2.f32 %v1277_v38  ;;  %v7952_v34 = vadd.f32 %v7832_v1, %v7600_v14  ;;  %v660_v14 = vpop.permute.xlu0 %659  ;;  %v10190_v1 = vld [vmem:[#allocation88_spill] sm:$0xff]  ;;  %v10193_v39 = vld [vmem:[#allocation9_spill] sm:$0xff]  ;;  %v10196_v5 = vld [vmem:[#allocation158_spill] sm:$0xff] }
 0x259   : > { %10187 = vst [vmem:[#allocation33_spill] sm:$0xff] %v7941_v0  ;;  %v7956_v46 = vadd.f32 %v7834_v24, %v7606_v48  ;;  %v3119_v52 = vsub.f32 1.0, %v7928_v11  ;;  %4755 = vpow2.f32 %v1678_v57  ;;  %v7961_v53 = vadd.f32 %v7836_v18, %v7617_v35  ;;  %v10191_v48 = vld [vmem:[#allocation89_spill] sm:$0xff] }
 0x25a   : > { %v7964_v23 = vadd.f32 %v2418_v50, %v10188_v60  ;;  %v7967_v37 = vadd.f32 %v2947_v31, %v10189_v7  ;;  %4757 = vpow2.f32 %v2079_v12  ;;  %v7970_v33 = vadd.f32 %v3348_v41, %v10190_v1  ;;  %v10198_v31 = vld [vmem:[#allocation181_spill] sm:$0xff]  ;;  %v10202_v7 = vld [vmem:[#allocation182_spill] sm:$0xff] }
 0x25b   : > { %v7973_v24 = vadd.f32 %v3749_v51, %v10191_v48  ;;  %v3520_v8 = vsub.f32 1.0, %v7938_v55  ;;  %v7977_v2 = vmul.f32 0.04725898, %v7941_v0  ;;  %4759 = vrsqrt.f32 %v7900_v3  ;;  %v10199_v57 = vld [vmem:[#allocation161_spill] sm:$0xff] }
 0x25c   : > { %v2734_v35 = vmax.f32 %v2718_v42, 1e-06  ;;  %v2515_v18 = vsub.f32 %v2452_v10, %v7301_v54  ;;  %v2980_v9 = vsub.f32 %v2452_v10, %v7323_v56  ;;  %4761 = vrsqrt.f32 %v7908_v62 }
 0x25d   : > { %10192 = vst [vmem:[#allocation23_spill] sm:$0xff] %v7977_v2  ;;  %v3135_v19 = vmax.f32 %v3119_v52, 1e-06  ;;  %vm727_vm8 = vcmp.gt.f32.partialorder %v10193_v39, 1e-12  ;;  %v711_v63 = vmul.f32 %v6723_v32, %v660_v14  ;;  %v4752_v16 = vpop.eup %4751  ;;  %v7987_v29 = vsub.f32 %v7820_v36, %v10096_v49  ;;  %v10200_v52 = vld [vmem:[#allocation57_spill] sm:$0xff] }
 0x25e   : > { %4763 = vrsqrt.f32 %v7917_v27  ;;  %v759_v20 = vsel %vm727_vm8, %v10194_v45, 0.0  ;;  %v3381_v30 = vsub.f32 %v2452_v10, %v7334_v15  ;;  %v3536_v47 = vmax.f32 %v3520_v8, 1e-06  ;;  %v10244_v27 = vld [vmem:[#allocation199_spill] sm:$0xff] }
 0x25f   : > { %4765 = vrsqrt.f32 %v7941_v0  ;;  %v3921_v6 = vsub.f32 1.0, %v7977_v2  ;;  %v903_v58 = vsub.f32 1.0, %v4752_v16  ;;  %vm1128_vm9 = vcmp.gt.f32.partialorder %v10195_v22, 1e-12  ;;  %v10205_v16 = vld [vmem:[#allocation27_spill] sm:$0xff]  ;;  %v10242_v0 = vld [vmem:[#allocation64_spill] sm:$0xff] }
 0x260   : > { %4767 = vrcp.f32 %v2734_v35  ;;  %v2531_v50 = vmul.f32 %v2515_v18, %v2515_v18  ;;  %v2996_v38 = vmul.f32 %v2980_v9, %v2980_v9  ;;  %v1112_v25 = vmul.f32 %v6729_v44, %v660_v14  ;;  %v10203_v18 = vld [vmem:[#allocation36_spill] sm:$0xff] }
 0x261   : > { %4769 = vrcp.f32 %v3135_v19  ;;  %v919_v61 = vmul.f32 %v903_v58, %v711_v63  ;;  %v10197_v26 = vsub.f32 0.0, %v10196_v5  ;;  %v1160_v51 = vsel %vm1128_vm9, %v10199_v57, 0.0  ;;  %v10209_v57 = vld [vmem:[#allocation79_spill] sm:$0xff] }
 0x262   : > { %v4754_v28 = vpop.eup %4753  ;;  %v1513_v12 = vmul.f32 %v6733_v13, %v660_v14  ;;  %v3397_v42 = vmul.f32 %v3381_v30, %v3381_v30  ;;  %v10201_v60 = vsub.f32 0.0, %v10200_v52  ;;  %v3937_v8 = vmax.f32 %v3921_v6, 1e-06  ;;  %v10207_v30 = vld [vmem:[#allocation48_spill] sm:$0xff] }
 0x263   : > { %v849_v41 = vmul.f32 %v10198_v31, %v10197_v26  ;;  %v4756_v48 = vpop.eup %4755  ;;  %v1304_v35 = vsub.f32 1.0, %v4754_v28  ;;  %vm1529_vm10 = vcmp.gt.f32.partialorder %v10203_v18, 1e-12  ;;  %v1914_v9 = vmul.f32 %v6745_v21, %v660_v14  ;;  %v10221_v18 = vld [vmem:[#allocation59_spill] sm:$0xff] }
 0x264   : > { %v1250_v1 = vmul.f32 %v10202_v7, %v10201_v60  ;;  %v4758_v19 = vpop.eup %4757  ;;  %v1705_v39 = vsub.f32 1.0, %v4756_v48  ;;  %v8007_v63 = vadd.f32 %v2531_v50, %v7794_v43  ;;  %v8010_v45 = vadd.f32 %v2996_v38, %v10205_v16  ;;  %v10211_v60 = vld [vmem:[#allocation58_spill] sm:$0xff]  ;;  %v10213_v43 = vld [vmem:[#allocation184_spill] sm:$0xff]  ;;  %v10215_v38 = vld [vmem:[#allocation163_spill] sm:$0xff] }
 0x265   : > { %v3782_v58 = vsub.f32 %v2452_v10, %v10207_v30  ;;  %v2106_v22 = vsub.f32 1.0, %v4758_v19  ;;  %v935_v5 = vmul.f32 %v919_v61, %v759_v20  ;;  %v1320_v26 = vmul.f32 %v1304_v35, %v1112_v25  ;;  %v8013_v6 = vpop.eup %4759  ;;  %v10216_v20 = vld [vmem:[#allocation130_spill] sm:$0xff] }
 0x266   : > { %10204 = vst [vmem:[#allocation34_spill] sm:$0xff] %v8007_v63  ;;  %10206 = vst [vmem:[#allocation4_spill] sm:$0xff] %v8010_v45  ;;  %v880_v31 = vmul.f32 1.442695, %v849_v41  ;;  %v1721_v28 = vmul.f32 %v1705_v39, %v1513_v12  ;;  %v8016_v52 = vadd.f32 %v3397_v42, %v10209_v57  ;;  %v1281_v14 = vmul.f32 1.442695, %v1250_v1  ;;  %v8021_v48 = vpop.eup %4761 }
 0x267   : > { %10208 = vst [vmem:[#allocation97_spill] sm:$0xff] %v8013_v6  ;;  %v10212_v7 = vsub.f32 0.0, %v10211_v60  ;;  %10214 = vst [vmem:[#allocation25_spill] sm:$0xff] %v8021_v48  ;;  %v1561_v10 = vsel %vm1529_vm10, %v10215_v38, 0.0  ;;  %vm1930_vm11 = vcmp.gt.f32.partialorder %v10216_v20, 1e-12  ;;  %v1336_v61 = vmul.f32 %v1320_v26, %v1160_v51 }
 0x268   : > { %10210 = vst [vmem:[#allocation139_spill] sm:$0xff] %v8016_v52  ;;  %v2122_v25 = vmul.f32 %v2106_v22, %v1914_v9  ;;  %v8027_v41 = vpop.eup %4763  ;;  %v10218_v12 = vld [vmem:[#allocation166_spill] sm:$0xff]  ;;  %v8031_v1 = vmul.f32 0.04725898, %v8007_v63  ;;  %v3798_v35 = vmul.f32 %v3782_v58, %v3782_v58  ;;  %v1737_v57 = vmul.f32 %v1721_v28, %v1561_v10  ;;  %v10225_v9 = vld [vmem:[#allocation141_spill] sm:$0xff]  ;;  %v10229_v38 = vld [vmem:[#allocation11_spill] sm:$0xff] }
 0x269   : > { %v1651_v50 = vmul.f32 %v10213_v43, %v10212_v7  ;;  %10217 = vst [vmem:[#allocation129_spill] sm:$0xff] %v8027_v41  ;;  %v1962_v42 = vsel %vm1930_vm11, %v10218_v12, 0.0  ;;  %v8033_v39 = vpop.eup %4765  ;;  %v1352_v16 = vadd.f32 %v1336_v61, %v935_v5  ;;  %4771 = vpow2.f32 %v880_v31  ;;  %v10223_v7 = vld [vmem:[#allocation185_spill] sm:$0xff] }
 0x26a   : > { %10219 = vst [vmem:[#allocation131_spill] sm:$0xff] %v8031_v1  ;;  %10220 = vst [vmem:[#allocation6_spill] sm:$0xff] %v8033_v39  ;;  %v10222_v60 = vsub.f32 0.0, %v10221_v18  ;;  %v8038_v51 = vpop.eup %4767  ;;  %v4143_v22 = vadd.f32 %v7947_v40, %v10225_v9  ;;  %v8043_v26 = vmul.f32 0.04725898, %v8010_v45  ;;  %4773 = vpow2.f32 %v1281_v14  ;;  %v10230_v20 = vld [vmem:[#allocation137_spill] sm:$0xff] }
 0x26b   : > { %v1682_v19 = vmul.f32 1.442695, %v1651_v50  ;;  %10224 = vst [vmem:[#allocation147_spill] sm:$0xff] %v8038_v51  ;;  %v8046_v58 = vmul.f32 0.04725898, %v8016_v52  ;;  %v8048_v50 = vpop.eup %4769  ;;  %v1753_v5 = vadd.f32 %v1737_v57, %v1352_v16  ;;  %v2138_v31 = vmul.f32 %v2122_v25, %v1962_v42  ;;  %v10232_v18 = vld [vmem:[#allocation140_spill] sm:$0xff] }
 0x26c   : > { %v2052_v43 = vmul.f32 %v10223_v7, %v10222_v60  ;;  %10226 = vst [vmem:[#allocation28_spill] sm:$0xff] %v8043_v26  ;;  %10228 = vst [vmem:[#allocation49_spill] sm:$0xff] %v8048_v50  ;;  %v8052_v10 = vsub.f32 %v7820_v36, %v10229_v38  ;;  %v2711_v40 = vsub.f32 1.0, %v8031_v1  ;;  %v8056_v61 = vadd.f32 %v3798_v35, %v10230_v20  ;;  %v10233_v14 = vld [vmem:[#allocation171_spill] sm:$0xff]  ;;  %v10235_v16 = vld [vmem:[#allocation197_spill] sm:$0xff] }
 0x26d   : > { %10227 = vst [vmem:[#allocation98_spill] sm:$0xff] %v8046_v58  ;;  %4775 = vpow2.f32 %v1682_v19  ;;  %v2154_v12 = vadd.f32 %v2138_v31, %v1753_v5  ;;  %vm729_vm12 = vcmp.gt.f32.partialorder %v10232_v18, 1e-12  ;;  %v10234_v60 = vsub.f32 0.0, %v10233_v14  ;;  %v10236_v42 = vld [vmem:[#allocation12_spill] sm:$0xff]  ;;  %v10237_v57 = vld [vmem:[#allocation66_spill] sm:$0xff]  ;;  %v668_v31 = vpop.permute.xlu0 %667 }
 0x26e   : > { %v2083_v28 = vmul.f32 1.442695, %v2052_v43  ;;  %4777 = vrcp.f32 %v3536_v47  ;;  %10231 = vst [vmem:[#allocation168_spill] sm:$0xff] %v8056_v61  ;;  %v8064_v19 = vsub.f32 %v7820_v36, %v10236_v42  ;;  %v3112_v47 = vsub.f32 1.0, %v8043_v26  ;;  %v2456_v43 = vpop.permute.xlu1 %2455  ;;  %v10238_v5 = vld [vmem:[#allocation142_spill] sm:$0xff]  ;;  %v10241_v14 = vld [vmem:[#allocation143_spill] sm:$0xff] }
 0x26f   : > { %v853_v25 = vmul.f32 %v10235_v16, %v10234_v60  ;;  %v761_v7 = vsel %vm729_vm12, %v10237_v57, 0.0  ;;  %v8068_v35 = vadd.f32 %v4143_v22, %v2154_v12  ;;  %v3513_v9 = vsub.f32 1.0, %v8046_v58 }
 0x270   : > { %4779 = vpow2.f32 %v2083_v28  ;;  %vm1130_vm13 = vcmp.gt.f32.partialorder %v10238_v5, 1e-12  ;;  %v2727_v28 = vmax.f32 %v2711_v40, 1e-06  ;;  %v8075_v20 = vmul.f32 0.04725898, %v8056_v61 }
 0x271   : > { %4781 = vrcp.f32 %v3937_v8  ;;  %v10240_v8 = vld [vmem:[#allocation175_spill] sm:$0xff]  ;;  %vm1531_vm14 = vcmp.gt.f32.partialorder %v10241_v14, 1e-12  ;;  %v2516_v22 = vsub.f32 %v2456_v43, %v7301_v54  ;;  %v884_v12 = vmul.f32 1.442695, %v853_v25  ;;  %v10251_v14 = vld [vmem:[#allocation146_spill] sm:$0xff] }
 0x272   : > { %4783 = vrsqrt.f32 %v8007_v63  ;;  %10239 = vst [vmem:[#allocation148_spill] sm:$0xff] %v8075_v20  ;;  %v1162_v18 = vsel %vm1130_vm13, %v10240_v8, 0.0  ;;  %v3128_v60 = vmax.f32 %v3112_v47, 1e-06  ;;  %v713_v16 = vmul.f32 %v6723_v32, %v668_v31 }
 0x273   : > { %4785 = vrsqrt.f32 %v8010_v45  ;;  %v2981_v57 = vsub.f32 %v2456_v43, %v7323_v56  ;;  %v3382_v40 = vsub.f32 %v2456_v43, %v7334_v15  ;;  %v4772_v5 = vpop.eup %4771  ;;  %v3529_v39 = vmax.f32 %v3513_v9, 1e-06 }
 0x274   : > { %4787 = vrsqrt.f32 %v8016_v52  ;;  %v1114_v8 = vmul.f32 %v6729_v44, %v668_v31  ;;  %v10243_v41 = vsub.f32 0.0, %v10242_v0  ;;  %v4774_v62 = vpop.eup %4773  ;;  %v3914_v25 = vsub.f32 1.0, %v8075_v20 }
 0x275   : > { %4789 = vrsqrt.f32 %v8056_v61  ;;  %v905_v47 = vsub.f32 1.0, %v4772_v5  ;;  %v1515_v6 = vmul.f32 %v6733_v13, %v668_v31  ;;  %v1306_v2 = vsub.f32 1.0, %v4774_v62 }
 0x276   : > { %v1254_v48 = vmul.f32 %v10244_v27, %v10243_v41  ;;  %4791 = vrcp.f32 %v2727_v28  ;;  %v1916_v50 = vmul.f32 %v6745_v21, %v668_v31  ;;  %v2532_v9 = vmul.f32 %v2516_v22, %v2516_v22  ;;  %v10246_v41 = vld [vmem:[#allocation178_spill] sm:$0xff] }
 0x277   : > { %v4776_v3 = vpop.eup %4775  ;;  %4793 = vpow2.f32 %v884_v12  ;;  %v921_v51 = vmul.f32 %v905_v47, %v713_v16  ;;  %v2997_v0 = vmul.f32 %v2981_v57, %v2981_v57  ;;  %v3398_v59 = vmul.f32 %v3382_v40, %v3382_v40  ;;  %v10258_v40 = vld [vmem:[#allocation180_spill] sm:$0xff] }
 0x278   : > { %v8092_v55 = vpop.eup %4777  ;;  %v1707_v11 = vsub.f32 1.0, %v4776_v3  ;;  %4795 = vrcp.f32 %v3128_v60  ;;  %v1563_v28 = vsel %vm1531_vm14, %v10246_v41, 0.0  ;;  %v1322_v5 = vmul.f32 %v1306_v2, %v1114_v8 }
 0x279   : > { %10245 = vst [vmem:[#allocation99_spill] sm:$0xff] %v8092_v55  ;;  %v1285_v61 = vmul.f32 1.442695, %v1254_v48  ;;  %v937_v31 = vmul.f32 %v921_v51, %v761_v7  ;;  %v3783_v12 = vsub.f32 %v2456_v43, %v10207_v30  ;;  %4797 = vrcp.f32 %v3529_v39  ;;  %v10255_v7 = vld [vmem:[#allocation65_spill] sm:$0xff] }
 0x27a   : > { %v4780_v27 = vpop.eup %4779  ;;  %v1723_v22 = vmul.f32 %v1707_v11, %v1515_v6  ;;  %v3930_v3 = vmax.f32 %v3914_v25, 1e-06  ;;  %v1338_v16 = vmul.f32 %v1322_v5, %v1162_v18  ;;  %v8103_v60 = vadd.f32 %v2532_v9, %v7945_v17  ;;  %v10257_v17 = vld [vmem:[#allocation202_spill] sm:$0xff]  ;;  %v676_v5 = vpop.permute.xlu0 %675 }
 0x27b   : > { %v8097_v52 = vpop.eup %4781  ;;  %v2108_v62 = vsub.f32 1.0, %v4780_v27  ;;  %vm1932_vm15 = vcmp.gt.f32.partialorder %v10251_v14, 1e-12  ;;  %v8109_v48 = vadd.f32 %v2997_v0, %v7952_v34  ;;  %v8112_v11 = vadd.f32 %v3398_v59, %v7956_v46  ;;  %v10259_v25 = vld [vmem:[#allocation102_spill] sm:$0xff]  ;;  %v10260_v34 = vld [vmem:[#allocation173_spill] sm:$0xff]  ;;  %v10262_v0 = vld [vmem:[#allocation204_spill] sm:$0xff] }
 0x27c   : > { %10247 = vst [vmem:[#allocation7_spill] sm:$0xff] %v8097_v52  ;;  %v8100_v55 = vpop.eup %4783  ;;  %10249 = vst [vmem:[#allocation150_spill] sm:$0xff] %v8103_v60  ;;  %v1354_v51 = vadd.f32 %v1338_v16, %v937_v31  ;;  %v1739_v39 = vmul.f32 %v1723_v22, %v1563_v28  ;;  %4799 = vpow2.f32 %v1285_v61  ;;  %v10256_v43 = vsub.f32 0.0, %v10255_v7 }
 0x27d   : > { %10248 = vst [vmem:[#allocation100_spill] sm:$0xff] %v8100_v55  ;;  %v8105_v57 = vpop.eup %4785  ;;  %v2124_v2 = vmul.f32 %v2108_v62, %v1916_v50  ;;  %10252 = vst [vmem:[#allocation153_spill] sm:$0xff] %v8109_v48  ;;  %v1964_v8 = vsel %vm1932_vm15, %v10258_v40, 0.0  ;;  %v4145_v50 = vadd.f32 %v8068_v35, %v10259_v25  ;;  %v3799_v47 = vmul.f32 %v3783_v12, %v3783_v12  ;;  %v2464_v12 = vpop.permute.xlu1 %2463 }
 0x27e   : > { %10250 = vst [vmem:[#allocation8_spill] sm:$0xff] %v8105_v57  ;;  %10253 = vst [vmem:[#allocation101_spill] sm:$0xff] %v8112_v11  ;;  %v8114_v6 = vpop.eup %4787  ;;  %v1655_v18 = vmul.f32 %v10257_v17, %v10256_v43  ;;  %v10261_v9 = vsub.f32 0.0, %v10260_v34  ;;  %v1755_v27 = vadd.f32 %v1739_v39, %v1354_v51  ;;  %v8128_v61 = vmul.f32 0.04725898, %v8103_v60  ;;  %v10272_v34 = vld [vmem:[#allocation151_spill] sm:$0xff] }
 0x27f   : > { %10254 = vst [vmem:[#allocation127_spill] sm:$0xff] %v8114_v6  ;;  %v8125_v46 = vpop.eup %4789  ;;  %v2140_v41 = vmul.f32 %v2124_v2, %v1964_v8  ;;  %v8134_v31 = vsub.f32 %v7820_v36, %v10104_v4  ;;  %4801 = vrcp.f32 %v3930_v3  ;;  %v8137_v35 = vmul.f32 0.04725898, %v8109_v48  ;;  %v10269_v36 = vld [vmem:[#allocation149_spill] sm:$0xff] }
 0x280   : > { %v2056_v59 = vmul.f32 %v10262_v0, %v10261_v9  ;;  %10263 = vst [vmem:[#allocation50_spill] sm:$0xff] %v8125_v46  ;;  %10264 = vst [vmem:[#allocation169_spill] sm:$0xff] %v8128_v61  ;;  %v1686_v28 = vmul.f32 1.442695, %v1655_v18  ;;  %v8130_v62 = vpop.eup %4791  ;;  %v8141_v14 = vmul.f32 %v7987_v29, %v7987_v29  ;;  %v8144_v51 = vmul.f32 0.04725898, %v8112_v11 }
 0x281   : > { %10265 = vst [vmem:[#allocation51_spill] sm:$0xff] %v8130_v62  ;;  %10266 = vst [vmem:[#allocation170_spill] sm:$0xff] %v8137_v35  ;;  %v4794_v16 = vpop.eup %4793  ;;  %v2156_v2 = vadd.f32 %v2140_v41, %v1755_v27  ;;  %v8147_v39 = vadd.f32 %v3799_v47, %v7961_v53  ;;  %vm731_vm0 = vcmp.gt.f32.partialorder %v10269_v36, 1e-12  ;;  %v715_v3 = vmul.f32 %v6723_v32, %v676_v5  ;;  %v10271_v29 = vld [vmem:[#allocation187_spill] sm:$0xff]  ;;  %v10277_v36 = vld [vmem:[#allocation152_spill] sm:$0xff] }
 0x282   : > { %v2087_v22 = vmul.f32 1.442695, %v2056_v59  ;;  %10267 = vst [vmem:[#allocation52_spill] sm:$0xff] %v8144_v51  ;;  %4803 = vpow2.f32 %v1686_v28  ;;  %v8151_v7 = vpop.eup %4795  ;;  %v2712_v17 = vsub.f32 1.0, %v8128_v61  ;;  %v763_v18 = vsel %vm731_vm0, %v10271_v29, 0.0  ;;  %v10275_v59 = vld [vmem:[#allocation103_spill] sm:$0xff] }
 0x283   : > { %10268 = vst [vmem:[#allocation172_spill] sm:$0xff] %v8147_v39  ;;  %10270 = vst [vmem:[#allocation86_spill] sm:$0xff] %v8151_v7  ;;  %v4146_v43 = vadd.f32 %v4145_v50, %v2156_v2  ;;  %v2518_v40 = vsub.f32 %v2464_v12, %v7301_v54  ;;  %v3113_v8 = vsub.f32 1.0, %v8137_v35  ;;  %v907_v25 = vsub.f32 1.0, %v4794_v16  ;;  %v8159_v47 = vpop.eup %4797  ;;  %v10274_v50 = vld [vmem:[#allocation190_spill] sm:$0xff] }
 0x284   : > { %4805 = vpow2.f32 %v2087_v22  ;;  %vm1132_vm1 = vcmp.gt.f32.partialorder %v10272_v34, 1e-12  ;;  %v2983_v53 = vsub.f32 %v2464_v12, %v7323_v56  ;;  %10273 = vst [vmem:[#allocation87_spill] sm:$0xff] %v8159_v47  ;;  %v3514_v9 = vsub.f32 1.0, %v8144_v51 }
 0x285   : > { %4807 = vrsqrt.f32 %v8103_v60  ;;  %v1164_v0 = vsel %vm1132_vm1, %v10274_v50, 0.0  ;;  %v8165_v27 = vadd.f32 %v4146_v43, %v10275_v59  ;;  %v8169_v41 = vmul.f32 0.04725898, %v8147_v39  ;;  %v10280_v60 = vld [vmem:[#allocation214_spill] sm:$0xff] }
 0x286   : > { %4809 = vrsqrt.f32 %v8109_v48  ;;  %v923_v28 = vmul.f32 %v907_v25, %v715_v3  ;;  %v1116_v22 = vmul.f32 %v6729_v44, %v676_v5  ;;  %v4800_v16 = vpop.eup %4799  ;;  %v2728_v2 = vmax.f32 %v2712_v17, 1e-06  ;;  %v10278_v3 = vld [vmem:[#allocation183_spill] sm:$0xff] }
 0x287   : > { %10276 = vst [vmem:[#allocation88_spill] sm:$0xff] %v8169_v41  ;;  %4811 = vrsqrt.f32 %v8112_v11  ;;  %vm1533_vm2 = vcmp.gt.f32.partialorder %v10277_v36, 1e-12  ;;  %v2534_v29 = vmul.f32 %v2518_v40, %v2518_v40  ;;  %v3129_v34 = vmax.f32 %v3113_v8, 1e-06  ;;  %v10296_v36 = vld [vmem:[#allocation219_spill] sm:$0xff] }
 0x288   : > { %v1308_v50 = vsub.f32 1.0, %v4800_v16  ;;  %v2999_v52 = vmul.f32 %v2983_v53, %v2983_v53  ;;  %v3384_v43 = vsub.f32 %v2464_v12, %v7334_v15  ;;  %v3530_v59 = vmax.f32 %v3514_v9, 1e-06 }
 0x289   : > { %4813 = vrsqrt.f32 %v8147_v39  ;;  %v3785_v48 = vsub.f32 %v2464_v12, %v10207_v30  ;;  %v10279_v25 = vsub.f32 0.0, %v10278_v3  ;;  %v8180_v17 = vpop.eup %4801  ;;  %v3915_v11 = vsub.f32 1.0, %v8169_v41  ;;  %v10283_v12 = vld [vmem:[#allocation71_spill] sm:$0xff]  ;;  %v10285_v3 = vld [vmem:[#allocation216_spill] sm:$0xff] }
 0x28a   : > { %10281 = vst [vmem:[#allocation89_spill] sm:$0xff] %v8180_v17  ;;  %v939_v6 = vmul.f32 %v923_v28, %v763_v18  ;;  %v1324_v40 = vmul.f32 %v1308_v50, %v1116_v22  ;;  %v1517_v8 = vmul.f32 %v6733_v13, %v676_v5  ;;  %4815 = vrcp.f32 %v2728_v2 }
 0x28b   : > { %v857_v46 = vmul.f32 %v10280_v60, %v10279_v25  ;;  %v1918_v9 = vmul.f32 %v6745_v21, %v676_v5  ;;  %v8186_v16 = vadd.f32 %v2534_v29, %v7964_v23  ;;  %v10284_v39 = vsub.f32 0.0, %v10283_v12  ;;  %v10287_v5 = vld [vmem:[#allocation193_spill] sm:$0xff] }
 0x28c   : > { %v4804_v53 = vpop.eup %4803  ;;  %v1340_v55 = vmul.f32 %v1324_v40, %v1164_v0  ;;  %v8192_v45 = vadd.f32 %v2999_v52, %v7967_v37  ;;  %v3400_v18 = vmul.f32 %v3384_v43, %v3384_v43  ;;  %4817 = vrcp.f32 %v3129_v34 }
 0x28d   : > { %10282 = vst [vmem:[#allocation9_spill] sm:$0xff] %v8186_v16  ;;  %v1258_v57 = vmul.f32 %v10285_v3, %v10284_v39  ;;  %v1709_v25 = vsub.f32 1.0, %v4804_v53  ;;  %v3801_v22 = vmul.f32 %v3785_v48, %v3785_v48  ;;  %v888_v2 = vmul.f32 1.442695, %v857_v46  ;;  %v10289_v39 = vld [vmem:[#allocation154_spill] sm:$0xff] }
 0x28e   : > { %v4806_v60 = vpop.eup %4805  ;;  %10286 = vst [vmem:[#allocation160_spill] sm:$0xff] %v8192_v45  ;;  %v3931_v50 = vmax.f32 %v3915_v11, 1e-06  ;;  %v1565_v23 = vsel %vm1533_vm2, %v10287_v5, 0.0  ;;  %v1356_v29 = vadd.f32 %v1340_v55, %v939_v6  ;;  %vm1934_vm3 = vcmp.gt.f32.partialorder %v10289_v39, 1e-12 }
 0x28f   : > { %v2110_v28 = vsub.f32 1.0, %v4806_v60  ;;  %v1725_v12 = vmul.f32 %v1709_v25, %v1517_v8  ;;  %v8197_v63 = vpop.eup %4807  ;;  %v8201_v37 = vmul.f32 0.04725898, %v8186_v16  ;;  %v1289_v52 = vmul.f32 1.442695, %v1258_v57  ;;  %v10294_v55 = vld [vmem:[#allocation186_spill] sm:$0xff] }
 0x290   : > { %10288 = vst [vmem:[#allocation35_spill] sm:$0xff] %v8197_v63  ;;  %v8203_v34 = vpop.eup %4809  ;;  %v8206_v11 = vmul.f32 0.04725898, %v8192_v45  ;;  %v8209_v46 = vadd.f32 %v3400_v18, %v7970_v33  ;;  %v10295_v6 = vsub.f32 0.0, %v10294_v55  ;;  %v10298_v8 = vld [vmem:[#allocation195_spill] sm:$0xff]  ;;  %4819 = vpow2.f32 %v888_v2  ;;  %v10300_v57 = vld [vmem:[#allocation72_spill] sm:$0xff] }
 0x291   : > { %v2126_v0 = vmul.f32 %v2110_v28, %v1918_v9  ;;  %10290 = vst [vmem:[#allocation158_spill] sm:$0xff] %v8201_v37  ;;  %10291 = vst [vmem:[#allocation181_spill] sm:$0xff] %v8203_v34  ;;  %v1741_v48 = vmul.f32 %v1725_v12, %v1565_v23  ;;  %v8214_v40 = vpop.eup %4811  ;;  %v1966_v53 = vsel %vm1934_vm3, %v10298_v8, 0.0  ;;  %v8218_v9 = vadd.f32 %v3801_v22, %v7973_v24  ;;  %v10302_v60 = vld [vmem:[#allocation222_spill] sm:$0xff] }
 0x292   : > { %10292 = vst [vmem:[#allocation161_spill] sm:$0xff] %v8206_v11  ;;  %10293 = vst [vmem:[#allocation57_spill] sm:$0xff] %v8209_v46  ;;  %v1659_v43 = vmul.f32 %v10296_v36, %v10295_v6  ;;  %v10301_v3 = vsub.f32 0.0, %v10300_v57  ;;  %4821 = vpow2.f32 %v1289_v52  ;;  %v2949_v23 = vmul.f32 %v8052_v10, %v8052_v10  ;;  %v10307_v55 = vld [vmem:[#allocation90_spill] sm:$0xff] }
 0x293   : > { %10297 = vst [vmem:[#allocation182_spill] sm:$0xff] %v8214_v40  ;;  %10299 = vst [vmem:[#allocation36_spill] sm:$0xff] %v8218_v9  ;;  %v1757_v28 = vadd.f32 %v1741_v48, %v1356_v29  ;;  %v2142_v5 = vmul.f32 %v2126_v0, %v1966_v53  ;;  %v8223_v18 = vpop.eup %4813  ;;  %4823 = vrcp.f32 %v3530_v59  ;;  %v2714_v12 = vsub.f32 1.0, %v8201_v37  ;;  %v10306_v0 = vld [vmem:[#allocation81_spill] sm:$0xff]  ;;  %v2472_v48 = vpop.permute.xlu1 %2471  ;;  %v10310_v53 = vld [vmem:[#allocation91_spill] sm:$0xff] }
 0x294   : > { %v2060_v25 = vmul.f32 %v10302_v60, %v10301_v3  ;;  %v1690_v33 = vmul.f32 1.442695, %v1659_v43  ;;  %10303 = vst [vmem:[#allocation27_spill] sm:$0xff] %v8223_v18  ;;  %v3115_v22 = vsub.f32 1.0, %v8206_v11  ;;  %v8230_v2 = vmul.f32 0.04725898, %v8209_v46  ;;  %v8232_v29 = vpop.eup %4815  ;;  %v684_v3 = vpop.permute.xlu0 %683 }
 0x295   : > { %v2158_v24 = vadd.f32 %v2142_v5, %v1757_v28  ;;  %10305 = vst [vmem:[#allocation58_spill] sm:$0xff] %v8232_v29  ;;  %v8236_v52 = vmul.f32 %v10306_v0, %v10306_v0  ;;  %v3350_v10 = vmul.f32 %v8064_v19, %v8064_v19  ;;  %v8242_v59 = vmul.f32 %v8134_v31, %v8134_v31  ;;  %v10311_v57 = vld [vmem:[#allocation162_spill] sm:$0xff]  ;;  %v10312_v60 = vld [vmem:[#allocation92_spill] sm:$0xff]  ;;  %v10313_v28 = vld [vmem:[#allocation205_spill] sm:$0xff] }
 0x296   : > { %v2091_v39 = vmul.f32 1.442695, %v2060_v25  ;;  %10304 = vst [vmem:[#allocation79_spill] sm:$0xff] %v8230_v2  ;;  %4825 = vpow2.f32 %v1690_v33  ;;  %v2436_v6 = vadd.f32 %v8141_v14, %v10307_v55  ;;  %v8250_v43 = vmul.f32 0.04725898, %v8218_v9  ;;  %v8252_v8 = vpop.eup %4817  ;;  %v10314_v33 = vld [vmem:[#allocation164_spill] sm:$0xff] }
 0x297   : > { %v8247_v36 = vadd.f32 %v8165_v27, %v2158_v24  ;;  %10309 = vst [vmem:[#allocation163_spill] sm:$0xff] %v8252_v8  ;;  %v2965_v19 = vadd.f32 %v2949_v23, %v10310_v53  ;;  %v2730_v31 = vmax.f32 %v2714_v12, 1e-06  ;;  %vm733_vm4 = vcmp.gt.f32.partialorder %v10311_v57, 1e-12  ;;  %v10317_v53 = vld [vmem:[#allocation82_spill] sm:$0xff] }
 0x298   : > { %4827 = vpow2.f32 %v2091_v39  ;;  %10308 = vst [vmem:[#allocation184_spill] sm:$0xff] %v8250_v43  ;;  %v3131_v14 = vmax.f32 %v3115_v22, 1e-06  ;;  %v2520_v27 = vsub.f32 %v2472_v48, %v7301_v54  ;;  %v3366_v25 = vadd.f32 %v3350_v10, %v10312_v60  ;;  %v10315_v10 = vld [vmem:[#allocation191_spill] sm:$0xff]  ;;  %v10320_v40 = vld [vmem:[#allocation165_spill] sm:$0xff] }
 0x299   : > { %4829 = vrcp.f32 %v3931_v50  ;;  %v3516_v50 = vsub.f32 1.0, %v8230_v2  ;;  %v765_v5 = vsel %vm733_vm4, %v10313_v28, 0.0  ;;  %vm1134_vm5 = vcmp.gt.f32.partialorder %v10314_v33, 1e-12  ;;  %v10442_v54 = vld [vmem:[#allocation69_spill] sm:$0xff] }
 0x29a   : > { %4831 = vrsqrt.f32 %v8186_v16  ;;  %v3917_v23 = vsub.f32 1.0, %v8250_v43  ;;  %v717_v12 = vmul.f32 %v6723_v32, %v684_v3  ;;  %v2985_v39 = vsub.f32 %v2472_v48, %v7323_v56  ;;  %v4820_v24 = vpop.eup %4819  ;;  %v10319_v16 = vld [vmem:[#allocation208_spill] sm:$0xff] }
 0x29b   : > { %4833 = vrsqrt.f32 %v8192_v45  ;;  %v1118_v22 = vmul.f32 %v6729_v44, %v684_v3  ;;  %v3386_v0 = vsub.f32 %v2472_v48, %v7334_v15  ;;  %v10316_v55 = vsub.f32 0.0, %v10315_v10 }
 0x29c   : > { %4835 = vrsqrt.f32 %v8209_v46  ;;  %v4822_v60 = vpop.eup %4821  ;;  %v3532_v28 = vmax.f32 %v3516_v50, 1e-06  ;;  %v2536_v46 = vmul.f32 %v2520_v27, %v2520_v27  ;;  %v1166_v18 = vsel %vm1134_vm5, %v10319_v16, 0.0 }
 0x29d   : > { %4837 = vrsqrt.f32 %v8218_v9  ;;  %v861_v57 = vmul.f32 %v10317_v53, %v10316_v55  ;;  %v909_v9 = vsub.f32 1.0, %v4820_v24  ;;  %v8273_v45 = vpop.eup %4823  ;;  %vm1535_vm6 = vcmp.gt.f32.partialorder %v10320_v40, 1e-12  ;;  %v10323_v24 = vld [vmem:[#allocation30_spill] sm:$0xff] }
 0x29e   : > { %4839 = vrcp.f32 %v2730_v31  ;;  %10318 = vst [vmem:[#allocation130_spill] sm:$0xff] %v8273_v45  ;;  %v1310_v31 = vsub.f32 1.0, %v4822_v60  ;;  %v1519_v34 = vmul.f32 %v6733_v13, %v684_v3  ;;  %v1920_v55 = vmul.f32 %v6745_v21, %v684_v3  ;;  %v10327_v3 = vld [vmem:[#allocation210_spill] sm:$0xff] }
 0x29f   : > { %4841 = vrcp.f32 %v3131_v14  ;;  %v925_v10 = vmul.f32 %v909_v9, %v717_v12  ;;  %v3001_v53 = vmul.f32 %v2985_v39, %v2985_v39  ;;  %v10321_v14 = vld [vmem:[#allocation194_spill] sm:$0xff]  ;;  %v3402_v17 = vmul.f32 %v3386_v0, %v3386_v0 }
 0x2a0   : > { %v4826_v63 = vpop.eup %4825  ;;  %v10322_v50 = vsub.f32 0.0, %v10321_v14  ;;  %v1326_v29 = vmul.f32 %v1310_v31, %v1118_v22  ;;  %v892_v33 = vmul.f32 1.442695, %v861_v57  ;;  %v8286_v7 = vadd.f32 %v2536_v46, %v2436_v6  ;;  %v10328_v14 = vld [vmem:[#allocation167_spill] sm:$0xff]  ;;  %v10330_v57 = vld [vmem:[#allocation212_spill] sm:$0xff] }
 0x2a1   : > { %v1711_v45 = vsub.f32 1.0, %v4826_v63  ;;  %v941_v47 = vmul.f32 %v925_v10, %v765_v5  ;;  %v3787_v9 = vsub.f32 %v2472_v48, %v10207_v30  ;;  %v1567_v39 = vsel %vm1535_vm6, %v10327_v3, 0.0 }
 0x2a2   : > { %v1262_v27 = vmul.f32 %v10323_v24, %v10322_v50  ;;  %v4828_v8 = vpop.eup %4827  ;;  %10325 = vst [vmem:[#allocation59_spill] sm:$0xff] %v8286_v7  ;;  %vm1936_vm7 = vcmp.gt.f32.partialorder %v10328_v14, 1e-12  ;;  %v1342_v63 = vmul.f32 %v1326_v29, %v1166_v18  ;;  %v8298_v5 = vadd.f32 %v3001_v53, %v2965_v19  ;;  %v10335_v24 = vld [vmem:[#allocation111_spill] sm:$0xff]  ;;  %v10337_v29 = vld [vmem:[#allocation196_spill] sm:$0xff] }
 0x2a3   : > { %v8284_v16 = vpop.eup %4829  ;;  %v2112_v60 = vsub.f32 1.0, %v4828_v8  ;;  %v1727_v22 = vmul.f32 %v1711_v45, %v1519_v34  ;;  %v1968_v31 = vsel %vm1936_vm7, %v10330_v57, 0.0  ;;  %v8302_v50 = vadd.f32 %v3402_v17, %v3366_v25  ;;  %v10341_v17 = vld [vmem:[#allocation198_spill] sm:$0xff] }
 0x2a4   : > { %10324 = vst [vmem:[#allocation166_spill] sm:$0xff] %v8284_v16  ;;  %v8289_v12 = vpop.eup %4831  ;;  %10331 = vst [vmem:[#allocation11_spill] sm:$0xff] %v8298_v5  ;;  %v1293_v46 = vmul.f32 1.442695, %v1262_v27  ;;  %v1358_v48 = vadd.f32 %v1342_v63, %v941_v47  ;;  %4843 = vpow2.f32 %v892_v33  ;;  %v4149_v45 = vadd.f32 %v8247_v36, %v10335_v24  ;;  %v10343_v33 = vld [vmem:[#allocation229_spill] sm:$0xff] }
 0x2a5   : > { %10326 = vst [vmem:[#allocation185_spill] sm:$0xff] %v8289_v12  ;;  %v8295_v0 = vpop.eup %4833  ;;  %v2128_v8 = vmul.f32 %v2112_v60, %v1920_v55  ;;  %v1743_v10 = vmul.f32 %v1727_v22, %v1567_v39  ;;  %10333 = vst [vmem:[#allocation140_spill] sm:$0xff] %v8302_v50  ;;  %v8309_v34 = vmul.f32 0.04725898, %v8286_v7  ;;  %v3803_v18 = vmul.f32 %v3787_v9, %v3787_v9  ;;  %v10339_v55 = vld [vmem:[#allocation83_spill] sm:$0xff]  ;;  %v10345_v36 = vld [vmem:[#allocation93_spill] sm:$0xff] }
 0x2a6   : > { %10329 = vst [vmem:[#allocation141_spill] sm:$0xff] %v8295_v0  ;;  %v8300_v6 = vpop.eup %4835  ;;  %v10338_v19 = vsub.f32 0.0, %v10337_v29  ;;  %4845 = vpow2.f32 %v1293_v46  ;;  %v10342_v25 = vsub.f32 0.0, %v10341_v17  ;;  %v3767_v14 = vadd.f32 %v8242_v59, %v10345_v36  ;;  %v2368_v29 = vpop.permute.xlu1 %2367  ;;  %v10352_v17 = vld [vmem:[#allocation113_spill] sm:$0xff] }
 0x2a7   : > { %10332 = vst [vmem:[#allocation137_spill] sm:$0xff] %v8300_v6  ;;  %v8304_v40 = vpop.eup %4837  ;;  %10336 = vst [vmem:[#allocation197_spill] sm:$0xff] %v8309_v34  ;;  %v1759_v47 = vadd.f32 %v1743_v10, %v1358_v48  ;;  %v2144_v60 = vmul.f32 %v2128_v8, %v1968_v31  ;;  %4847 = vrcp.f32 %v3532_v28  ;;  %v3933_v9 = vmax.f32 %v3917_v23, 1e-06  ;;  %v10348_v10 = vld [vmem:[#allocation174_spill] sm:$0xff]  ;;  %v692_v28 = vpop.permute.xlu0 %691  ;;  %v10364_v16 = vld [vmem:[#allocation37_spill] sm:$0xff] }
 0x2a8   : > { %10334 = vst [vmem:[#allocation171_spill] sm:$0xff] %v8304_v40  ;;  %v1663_v53 = vmul.f32 %v10339_v55, %v10338_v19  ;;  %v8314_v27 = vpop.eup %4839  ;;  %v2064_v3 = vmul.f32 %v10343_v33, %v10342_v25  ;;  %v8324_v57 = vmul.f32 0.04725898, %v8298_v5  ;;  %v8327_v48 = vmul.f32 0.04725898, %v8302_v50  ;;  %v10350_v55 = vld [vmem:[#allocation225_spill] sm:$0xff] }
 0x2a9   : > { %10340 = vst [vmem:[#allocation66_spill] sm:$0xff] %v8314_v27  ;;  %v8319_v39 = vpop.eup %4841  ;;  %v2160_v22 = vadd.f32 %v2144_v60, %v1759_v47  ;;  %vm735_vm8 = vcmp.gt.f32.partialorder %v10348_v10, 1e-12  ;;  %v2716_v59 = vsub.f32 1.0, %v8309_v34  ;;  %v8333_v23 = vadd.f32 %v3803_v18, %v3767_v14  ;;  %v10351_v47 = vld [vmem:[#allocation176_spill] sm:$0xff]  ;;  %v10355_v14 = vld [vmem:[#allocation94_spill] sm:$0xff] }
 0x2aa   : > { %10344 = vst [vmem:[#allocation142_spill] sm:$0xff] %v8319_v39  ;;  %v1694_v63 = vmul.f32 1.442695, %v1663_v53  ;;  %10346 = vst [vmem:[#allocation175_spill] sm:$0xff] %v8324_v57  ;;  %v2095_v31 = vmul.f32 1.442695, %v2064_v3  ;;  %v719_v18 = vmul.f32 %v6723_v32, %v692_v28  ;;  %v2407_v33 = vsub.f32 %v2368_v29, %v10096_v49 }
 0x2ab   : > { %10347 = vst [vmem:[#allocation143_spill] sm:$0xff] %v8327_v48  ;;  %v4150_v24 = vadd.f32 %v4149_v45, %v2160_v22  ;;  %10349 = vst [vmem:[#allocation64_spill] sm:$0xff] %v8333_v23  ;;  %v767_v53 = vsel %vm735_vm8, %v10350_v55, 0.0  ;;  %vm1136_vm9 = vcmp.gt.f32.partialorder %v10351_v47, 1e-12  ;;  %v3117_v60 = vsub.f32 1.0, %v8324_v57 }
 0x2ac   : > { %4849 = vpow2.f32 %v1694_v63  ;;  %v3518_v45 = vsub.f32 1.0, %v8327_v48  ;;  %v10353_v3 = vld [vmem:[#allocation211_spill] sm:$0xff]  ;;  %v2732_v22 = vmax.f32 %v2716_v59, 1e-06  ;;  %v10357_v10 = vld [vmem:[#allocation226_spill] sm:$0xff]  ;;  %v10358_v47 = vld [vmem:[#allocation177_spill] sm:$0xff]  ;;  %v3337_v59 = vsub.f32 %v2368_v29, %v10236_v42 }
 0x2ad   : > { %4851 = vpow2.f32 %v2095_v31  ;;  %v8342_v25 = vadd.f32 %v4150_v24, %v10352_v17  ;;  %v10354_v36 = vsub.f32 0.0, %v10353_v3  ;;  %v8352_v31 = vmul.f32 0.04725898, %v8333_v23  ;;  %v10362_v6 = vld [vmem:[#allocation38_spill] sm:$0xff] }
 0x2ae   : > { %4853 = vrcp.f32 %v3933_v9  ;;  %v4844_v63 = vpop.eup %4843  ;;  %v1168_v24 = vsel %vm1136_vm9, %v10357_v10, 0.0  ;;  %vm1537_vm10 = vcmp.gt.f32.partialorder %v10358_v47, 1e-12  ;;  %v1120_v17 = vmul.f32 %v6729_v44, %v692_v28  ;;  %v10374_v47 = vld [vmem:[#allocation223_spill] sm:$0xff] }
 0x2af   : > { %4855 = vrsqrt.f32 %v8286_v7  ;;  %v865_v9 = vmul.f32 %v10355_v14, %v10354_v36  ;;  %10356 = vst [vmem:[#allocation199_spill] sm:$0xff] %v8352_v31  ;;  %v911_v55 = vsub.f32 1.0, %v4844_v63  ;;  %v3133_v3 = vmax.f32 %v3117_v60, 1e-06  ;;  %v10360_v7 = vld [vmem:[#allocation215_spill] sm:$0xff] }
 0x2b0   : > { %4857 = vrsqrt.f32 %v8298_v5  ;;  %v4846_v19 = vpop.eup %4845  ;;  %v3534_v46 = vmax.f32 %v3518_v45, 1e-06  ;;  %v2936_v36 = vsub.f32 %v2368_v29, %v10229_v38  ;;  %v2423_v5 = vmul.f32 %v2407_v33, %v2407_v33 }
 0x2b1   : > { %4859 = vrsqrt.f32 %v8302_v50  ;;  %v8360_v14 = vpop.eup %4847  ;;  %v1312_v8 = vsub.f32 1.0, %v4846_v19  ;;  %v927_v50 = vmul.f32 %v911_v55, %v719_v18  ;;  %v896_v10 = vmul.f32 1.442695, %v865_v9 }
 0x2b2   : > { %4861 = vrsqrt.f32 %v8333_v23  ;;  %10359 = vst [vmem:[#allocation178_spill] sm:$0xff] %v8360_v14  ;;  %v3919_v63 = vsub.f32 1.0, %v8352_v31  ;;  %v1521_v23 = vmul.f32 %v6733_v13, %v692_v28  ;;  %v10361_v40 = vsub.f32 0.0, %v10360_v7 }
 0x2b3   : > { %4863 = vrcp.f32 %v2732_v22  ;;  %v943_v0 = vmul.f32 %v927_v50, %v767_v53  ;;  %v1328_v12 = vmul.f32 %v1312_v8, %v1120_v17  ;;  %v1922_v39 = vmul.f32 %v6745_v21, %v692_v28 }
 0x2b4   : > { %v1266_v60 = vmul.f32 %v10362_v6, %v10361_v40  ;;  %v3738_v14 = vsub.f32 %v2368_v29, %v10104_v4  ;;  %4865 = vrcp.f32 %v3133_v3  ;;  %v2952_v33 = vmul.f32 %v2936_v36, %v2936_v36  ;;  %v10366_v40 = vld [vmem:[#allocation227_spill] sm:$0xff] }
 0x2b5   : > { %v3353_v9 = vmul.f32 %v3337_v59, %v3337_v59  ;;  %v1344_v27 = vmul.f32 %v1328_v12, %v1168_v24  ;;  %v2439_v7 = vadd.f32 %v2423_v5, %v10364_v16  ;;  %4867 = vpow2.f32 %v896_v10  ;;  %v10368_v59 = vld [vmem:[#allocation218_spill] sm:$0xff]  ;;  %v10370_v12 = vld [vmem:[#allocation95_spill] sm:$0xff] }
 0x2b6   : > { %v4850_v45 = vpop.eup %4849  ;;  %v3935_v50 = vmax.f32 %v3919_v63, 1e-06  ;;  %v1569_v8 = vsel %vm1537_vm10, %v10366_v40, 0.0  ;;  %v1297_v29 = vmul.f32 1.442695, %v1266_v60  ;;  %v3754_v36 = vmul.f32 %v3738_v14, %v3738_v14  ;;  %v10372_v5 = vld [vmem:[#allocation179_spill] sm:$0xff] }
 0x2b7   : > { %v4852_v19 = vpop.eup %4851  ;;  %v1713_v18 = vsub.f32 1.0, %v4850_v45  ;;  %v1360_v17 = vadd.f32 %v1344_v27, %v943_v0  ;;  %v10369_v45 = vsub.f32 0.0, %v10368_v59  ;;  %vm1938_vm11 = vcmp.gt.f32.partialorder %v10372_v5, 1e-12  ;;  %v10373_v63 = vld [vmem:[#allocation232_spill] sm:$0xff]  ;;  %v10378_v0 = vld [vmem:[#allocation29_spill] sm:$0xff] }
 0x2b8   : > { %v8369_v22 = vpop.eup %4853  ;;  %v2114_v55 = vsub.f32 1.0, %v4852_v19  ;;  %v2968_v19 = vadd.f32 %v2952_v33, %v10373_v63  ;;  %v10375_v40 = vsub.f32 0.0, %v10374_v47  ;;  %v1970_v27 = vsel %vm1938_vm11, %v10378_v0, 0.0  ;;  %v10381_v5 = vld [vmem:[#allocation235_spill] sm:$0xff] }
 0x2b9   : > { %10363 = vst [vmem:[#allocation146_spill] sm:$0xff] %v8369_v22  ;;  %v8372_v6 = vpop.eup %4855  ;;  %v1729_v28 = vmul.f32 %v1713_v18, %v1521_v23  ;;  %v1667_v24 = vmul.f32 %v10370_v12, %v10369_v45  ;;  %v10376_v23 = vld [vmem:[#allocation39_spill] sm:$0xff]  ;;  %4869 = vpow2.f32 %v1297_v29  ;;  %v3770_v63 = vadd.f32 %v3754_v36, %v10381_v5 }
 0x2ba   : > { %10365 = vst [vmem:[#allocation65_spill] sm:$0xff] %v8372_v6  ;;  %v8377_v53 = vpop.eup %4857  ;;  %v2130_v3 = vmul.f32 %v2114_v55, %v1922_v39  ;;  %v2068_v60 = vmul.f32 %v10376_v23, %v10375_v40  ;;  %v10379_v39 = vld [vmem:[#allocation236_spill] sm:$0xff]  ;;  %v10380_v55 = vld [vmem:[#allocation233_spill] sm:$0xff] }
 0x2bb   : > { %10367 = vst [vmem:[#allocation202_spill] sm:$0xff] %v8377_v53  ;;  %v8382_v16 = vpop.eup %4859  ;;  %v1745_v10 = vmul.f32 %v1729_v28, %v1569_v8  ;;  %v8393_v14 = vadd.f32 %v10379_v39, %v2439_v7  ;;  %v3369_v59 = vadd.f32 %v3353_v9, %v10380_v55  ;;  %v1698_v45 = vmul.f32 1.442695, %v1667_v24  ;;  %v10383_v23 = vld [vmem:[#allocation237_spill] sm:$0xff]  ;;  %v700_v9 = vpop.permute.xlu0 %699  ;;  %v10397_v53 = vld [vmem:[#allocation55_spill] sm:$0xff] }
 0x2bc   : > { %10371 = vst [vmem:[#allocation180_spill] sm:$0xff] %v8382_v16  ;;  %v8389_v18 = vpop.eup %4861  ;;  %v2146_v16 = vmul.f32 %v2130_v3, %v1970_v27  ;;  %v2099_v8 = vmul.f32 1.442695, %v2068_v60  ;;  %v8403_v0 = vadd.f32 %v10383_v23, %v2968_v19  ;;  %v10386_v27 = vld [vmem:[#allocation241_spill] sm:$0xff]  ;;  %v1122_v24 = vmul.f32 %v6729_v44, %v700_v9 }
 0x2bd   : > { %10377 = vst [vmem:[#allocation102_spill] sm:$0xff] %v8389_v18  ;;  %v1761_v12 = vadd.f32 %v1745_v10, %v1360_v17  ;;  %4871 = vpow2.f32 %v1698_v45  ;;  %v8399_v47 = vpop.eup %4863  ;;  %v8408_v3 = vmul.f32 0.04725898, %v8393_v14  ;;  %v10385_v10 = vld [vmem:[#allocation240_spill] sm:$0xff]  ;;  %v8420_v39 = vadd.f32 %v10386_v27, %v3770_v63  ;;  %v10388_v55 = vld [vmem:[#allocation73_spill] sm:$0xff]  ;;  %v10389_v45 = vld [vmem:[#allocation110_spill] sm:$0xff] }
 0x2be   : > { %10382 = vst [vmem:[#allocation173_spill] sm:$0xff] %v8399_v47  ;;  %4873 = vpow2.f32 %v2099_v8  ;;  %v8410_v36 = vpop.eup %4865  ;;  %v8417_v19 = vadd.f32 %v10385_v10, %v3369_v59  ;;  %vm737_vm12 = vcmp.gt.f32.partialorder %v10388_v55, 1e-12  ;;  %v10391_v8 = vld [vmem:[#allocation121_spill] sm:$0xff]  ;;  %v10395_v55 = vld [vmem:[#allocation84_spill] sm:$0xff]  ;;  %v1523_v29 = vmul.f32 %v6733_v13, %v700_v9 }
 0x2bf   : > { %v2162_v7 = vadd.f32 %v2146_v16, %v1761_v12  ;;  %4875 = vrcp.f32 %v3534_v46  ;;  %10384 = vst [vmem:[#allocation204_spill] sm:$0xff] %v8410_v36  ;;  %v4868_v60 = vpop.eup %4867  ;;  %10387 = vst [vmem:[#allocation149_spill] sm:$0xff] %v8420_v39  ;;  %v721_v46 = vmul.f32 %v6723_v32, %v700_v9  ;;  %v10390_v12 = vsub.f32 0.0, %v10389_v45  ;;  %v10394_v10 = vld [vmem:[#allocation189_spill] sm:$0xff]  ;;  %v2372_v32 = vpop.permute.xlu1 %2371  ;;  %v10399_v36 = vld [vmem:[#allocation68_spill] sm:$0xff] }
 0x2c0   : > { %4877 = vrcp.f32 %v3935_v50  ;;  %v10392_v50 = vld [vmem:[#allocation31_spill] sm:$0xff]  ;;  %v2719_v63 = vsub.f32 1.0, %v8408_v3  ;;  %v913_v23 = vsub.f32 1.0, %v4868_v60  ;;  %vm1539_vm14 = vcmp.gt.f32.partialorder %v10394_v10, 1e-12 }
 0x2c1   : > { %v8414_v16 = vadd.f32 %v8342_v25, %v2162_v7  ;;  %v2759_v5 = vmul.f32 %v10391_v8, %v10390_v12  ;;  %4879 = vrsqrt.f32 %v8393_v14  ;;  %v8429_v25 = vmul.f32 0.04725898, %v8403_v0  ;;  %v10393_v7 = vld [vmem:[#allocation188_spill] sm:$0xff]  ;;  %v10396_v12 = vld [vmem:[#allocation230_spill] sm:$0xff] }
 0x2c2   : > { %v769_v59 = vsel %vm737_vm12, %v10392_v50, 0.0  ;;  %vm1138_vm13 = vcmp.gt.f32.partialorder %v10393_v7, 1e-12  ;;  %4881 = vrsqrt.f32 %v8403_v0  ;;  %v8438_v27 = vmul.f32 0.04725898, %v8417_v19 }
 0x2c3   : > { %4883 = vrsqrt.f32 %v8417_v19  ;;  %v1170_v45 = vsel %vm1138_vm13, %v10395_v55, 0.0  ;;  %v1571_v8 = vsel %vm1539_vm14, %v10396_v12, 0.0  ;;  %v8443_v50 = vmul.f32 0.04725898, %v8420_v39  ;;  %v4870_v60 = vpop.eup %4869 }
 0x2c4   : > { %v929_v7 = vmul.f32 %v913_v23, %v721_v46  ;;  %v2790_v17 = vmul.f32 1.442695, %v2759_v5  ;;  %v3120_v10 = vsub.f32 1.0, %v8429_v25  ;;  %4885 = vrsqrt.f32 %v8420_v39 }
 0x2c5   : > { %v2408_v40 = vsub.f32 %v2372_v32, %v10096_v49  ;;  %v2735_v55 = vmax.f32 %v2719_v63, 1e-06  ;;  %v1314_v33 = vsub.f32 1.0, %v4870_v60  ;;  %v1924_v12 = vmul.f32 %v6745_v21, %v700_v9 }
 0x2c6   : > { %v2937_v18 = vsub.f32 %v2372_v32, %v10229_v38  ;;  %v3521_v44 = vsub.f32 1.0, %v8438_v27  ;;  %v3338_v23 = vsub.f32 %v2372_v32, %v10236_v42  ;;  %v10398_v6 = vsub.f32 0.0, %v10397_v53 }
 0x2c7   : > { %v4872_v28 = vpop.eup %4871  ;;  %v945_v37 = vmul.f32 %v929_v7, %v769_v59  ;;  %v1330_v63 = vmul.f32 %v1314_v33, %v1122_v24  ;;  %4887 = vpow2.f32 %v2790_v17  ;;  %v3922_v21 = vsub.f32 1.0, %v8443_v50  ;;  %v10403_v59 = vld [vmem:[#allocation32_spill] sm:$0xff] }
 0x2c8   : > { %v4874_v46 = vpop.eup %4873  ;;  %v1715_v5 = vsub.f32 1.0, %v4872_v28  ;;  %v3160_v47 = vmul.f32 %v10399_v36, %v10398_v6  ;;  %v2424_v41 = vmul.f32 %v2408_v40, %v2408_v40  ;;  %v3739_v28 = vsub.f32 %v2372_v32, %v10104_v4  ;;  %v10402_v6 = vld [vmem:[#allocation192_spill] sm:$0xff] }
 0x2c9   : > { %v8457_v13 = vpop.eup %4875  ;;  %v2116_v22 = vsub.f32 1.0, %v4874_v46  ;;  %v3136_v51 = vmax.f32 %v3120_v10, 1e-06  ;;  %v1346_v35 = vmul.f32 %v1330_v63, %v1170_v45  ;;  %v2953_v53 = vmul.f32 %v2937_v18, %v2937_v18  ;;  %v10404_v45 = vld [vmem:[#allocation217_spill] sm:$0xff]  ;;  %v10405_v18 = vld [vmem:[#allocation106_spill] sm:$0xff] }
 0x2ca   : > { %10400 = vst [vmem:[#allocation187_spill] sm:$0xff] %v8457_v13  ;;  %v8459_v60 = vpop.eup %4877  ;;  %v1731_v9 = vmul.f32 %v1715_v5, %v1523_v29  ;;  %4889 = vrcp.f32 %v2735_v55  ;;  %vm1940_vm15 = vcmp.gt.f32.partialorder %v10402_v6, 1e-12  ;;  %v3354_v36 = vmul.f32 %v3338_v23, %v3338_v23  ;;  %v10408_v5 = vld [vmem:[#allocation3_spill] sm:$0xff] }
 0x2cb   : > { %10401 = vst [vmem:[#allocation151_spill] sm:$0xff] %v8459_v60  ;;  %v2132_v61 = vmul.f32 %v2116_v22, %v1924_v12  ;;  %v8463_v20 = vpop.eup %4879  ;;  %v3191_v33 = vmul.f32 1.442695, %v3160_v47  ;;  %v3537_v24 = vmax.f32 %v3521_v44, 1e-06  ;;  %v1972_v29 = vsel %vm1940_vm15, %v10403_v59, 0.0 }
 0x2cc   : > { %v8466_v17 = vpop.eup %4881  ;;  %v1362_v40 = vadd.f32 %v1346_v35, %v945_v37  ;;  %v1747_v7 = vmul.f32 %v1731_v9, %v1571_v8  ;;  %v4153_v22 = vadd.f32 %v8414_v16, %v10404_v45  ;;  %v2440_v10 = vadd.f32 %v2424_v41, %v10405_v18  ;;  %v10406_v12 = vld [vmem:[#allocation112_spill] sm:$0xff]  ;;  %v10409_v6 = vld [vmem:[#allocation107_spill] sm:$0xff]  ;;  %v10412_v35 = vld [vmem:[#allocation134_spill] sm:$0xff] }
 0x2cd   : > { %v8469_v32 = vpop.eup %4883  ;;  %v3755_v55 = vmul.f32 %v3739_v28, %v3739_v28  ;;  %v10407_v46 = vsub.f32 0.0, %v10406_v12  ;;  %v2148_v63 = vmul.f32 %v2132_v61, %v1972_v29  ;;  %v2969_v44 = vadd.f32 %v2953_v53, %v10409_v6  ;;  %v10410_v60 = vld [vmem:[#allocation60_spill] sm:$0xff]  ;;  %v5135_v16 = vld [vmem:[%s5401_s26] sm:$0xf]  ;;  %v10415_v45 = vld [vmem:[#allocation10_spill] sm:$0xff]  ;;  %v2564_v29 = vpop.permute.xlu0 %2563 }
 0x2ce   : > { %v1763_v23 = vadd.f32 %v1747_v7, %v1362_v40  ;;  %v10411_v59 = vsub.f32 0.0, %v10410_v60  ;;  %v8481_v8 = vpop.eup %4885  ;;  %v10414_v9 = vld [vmem:[#allocation108_spill] sm:$0xff]  ;;  %v8486_v41 = vrot.slane %v5135_v16, %v10415_v45  ;;  %4891 = vpow2.f32 %v3191_v33  ;;  %v10416_v60 = vld [vmem:[#allocation249_spill] sm:$0xff] }
 0x2cf   : > { %v3561_v47 = vmul.f32 %v10408_v5, %v10407_v46  ;;  %10413 = vst [vmem:[#allocation190_spill] sm:$0xff] %v8481_v8  ;;  %v3370_v13 = vadd.f32 %v3354_v36, %v10414_v9  ;;  %4893 = vrcp.f32 %v3136_v51  ;;  %v3938_v18 = vmax.f32 %v3922_v21, 1e-06  ;;  %v10418_v12 = vld [vmem:[#allocation109_spill] sm:$0xff]  ;;  %v2376_v36 = vpop.permute.xlu1 %2375  ;;  %v10419_v51 = vld [vmem:[#allocation250_spill] sm:$0xff] }
 0x2d0   : > { %v3962_v37 = vmul.f32 %v10412_v35, %v10411_v59  ;;  %v2164_v40 = vadd.f32 %v2148_v63, %v1763_v23  ;;  %v8490_v7 = vadd.f32 %v10416_v60, %v2440_v10  ;;  %v3771_v46 = vadd.f32 %v3755_v55, %v10418_v12  ;;  %v10421_v23 = vld [vmem:[#allocation251_spill] sm:$0xff]  ;;  %v10423_v63 = vld [vmem:[#allocation105_spill] sm:$0xff]  ;;  %v10427_v9 = vld [vmem:[#allocation118_spill] sm:$0xff] }
 0x2d1   : > { %v3592_v28 = vmul.f32 1.442695, %v3561_v47  ;;  %v4888_v5 = vpop.eup %4887  ;;  %v8497_v21 = vadd.f32 %v10419_v51, %v2969_v44  ;;  %v8501_v10 = vadd.f32 %v10421_v23, %v3370_v13  ;;  %v2630_v55 = vmul.f32 %v8486_v41, %v2564_v29  ;;  %v5136_v59 = vld [vmem:[%s5401_s26 + $0x4] sm:$0xf] }
 0x2d2   : > { %v3993_v61 = vmul.f32 1.442695, %v3962_v37  ;;  %10417 = vst [vmem:[#allocation103_spill] sm:$0xff] %v8490_v7  ;;  %v8494_v33 = vadd.f32 %v4153_v22, %v2164_v40  ;;  %vm2646_vm0 = vcmp.gt.f32.partialorder %v10423_v63, 1e-12  ;;  %v8507_v22 = vrot.slane %v5136_v59, %v10415_v45  ;;  %v10429_v40 = vld [vmem:[#allocation53_spill] sm:$0xff] }
 0x2d3   : > { %4895 = vpow2.f32 %v3592_v28  ;;  %10420 = vst [vmem:[#allocation152_spill] sm:$0xff] %v8497_v21  ;;  %10422 = vst [vmem:[#allocation183_spill] sm:$0xff] %v8501_v10  ;;  %v2409_v44 = vsub.f32 %v2376_v36, %v10096_v49  ;;  %v8513_v37 = vmul.f32 0.04725898, %v8490_v7  ;;  %v2678_v16 = vsel %vm2646_vm0, %v10427_v9, 0.0  ;;  %v10431_v23 = vld [vmem:[#allocation119_spill] sm:$0xff] }
 0x2d4   : > { %4897 = vpow2.f32 %v3993_v61  ;;  %v8510_v35 = vpop.eup %4889  ;;  %v2822_v28 = vsub.f32 1.0, %v4888_v5  ;;  %vm3047_vm1 = vcmp.gt.f32.partialorder %v10429_v40, 1e-12  ;;  %v5137_v61 = vld [vmem:[%s5401_s26 + $0x8] sm:$0xf]  ;;  %v2938_v12 = vsub.f32 %v2376_v36, %v10229_v38 }
 0x2d5   : > { %4899 = vrcp.f32 %v3537_v24  ;;  %10424 = vst [vmem:[#allocation214_spill] sm:$0xff] %v8513_v37  ;;  %v10425_v24 = vld [vmem:[#allocation253_spill] sm:$0xff]  ;;  %v8525_v60 = vrot.slane %v5137_v61, %v10415_v45  ;;  %v8529_v51 = vmul.f32 0.04725898, %v8501_v10  ;;  %v5138_v63 = vld [vmem:[%s5401_s26 + $0xc] sm:$0xf]  ;;  %v2425_v9 = vmul.f32 %v2409_v44, %v2409_v44 }
 0x2d6   : > { %4901 = vrcp.f32 %v3938_v18  ;;  %v8516_v13 = vadd.f32 %v10425_v24, %v3771_v46  ;;  %v8520_v18 = vmul.f32 0.04725898, %v8497_v21  ;;  %v3079_v46 = vsel %vm3047_vm1, %v10431_v23, 0.0 }
 0x2d7   : > { %10430 = vst [vmem:[#allocation193_spill] sm:$0xff] %v8529_v51  ;;  %v8534_v59 = vrot.slane %v5138_v63, %v10415_v45  ;;  %v2838_v5 = vmul.f32 %v2822_v28, %v2630_v55  ;;  %4903 = vrsqrt.f32 %v8490_v7  ;;  %v3031_v24 = vmul.f32 %v8507_v22, %v2564_v29 }
 0x2d8   : > { %10426 = vst [vmem:[#allocation71_spill] sm:$0xff] %v8516_v13  ;;  %10428 = vst [vmem:[#allocation216_spill] sm:$0xff] %v8520_v18  ;;  %v3339_v40 = vsub.f32 %v2376_v36, %v10236_v42  ;;  %v4892_v61 = vpop.eup %4891  ;;  %v2720_v47 = vsub.f32 1.0, %v8513_v37  ;;  %4905 = vrsqrt.f32 %v8497_v21  ;;  %v8542_v6 = vmul.f32 0.04725898, %v8516_v13 }
 0x2d9   : > { %v3740_v23 = vsub.f32 %v2376_v36, %v10104_v4  ;;  %v8545_v45 = vpop.eup %4893  ;;  %v3121_v55 = vsub.f32 1.0, %v8520_v18  ;;  %v3223_v28 = vsub.f32 1.0, %v4892_v61  ;;  %v3432_v63 = vmul.f32 %v8525_v60, %v2564_v29  ;;  %v10433_v36 = vld [vmem:[#allocation242_spill] sm:$0xff] }
 0x2da   : > { %10432 = vst [vmem:[#allocation154_spill] sm:$0xff] %v8542_v6  ;;  %v2954_v44 = vmul.f32 %v2938_v12, %v2938_v12  ;;  %4907 = vrsqrt.f32 %v8501_v10  ;;  %v3522_v7 = vsub.f32 1.0, %v8529_v51  ;;  %v2854_v37 = vmul.f32 %v2838_v5, %v2678_v16  ;;  %v10434_v10 = vld [vmem:[#allocation54_spill] sm:$0xff] }
 0x2db   : > { %v3833_v21 = vmul.f32 %v8534_v59, %v2564_v29  ;;  %v3239_v11 = vmul.f32 %v3223_v28, %v3031_v24  ;;  %v2441_v58 = vadd.f32 %v2425_v9, %v10433_v36  ;;  %v3355_v26 = vmul.f32 %v3339_v40, %v3339_v40  ;;  %v10435_v29 = vld [vmem:[#allocation244_spill] sm:$0xff] }
 0x2dc   : > { %v2736_v61 = vmax.f32 %v2720_v47, 1e-06  ;;  %v3923_v18 = vsub.f32 1.0, %v8542_v6  ;;  %v3756_v1 = vmul.f32 %v3740_v23, %v3740_v23  ;;  %vm3448_vm2 = vcmp.gt.f32.partialorder %v10434_v10, 1e-12  ;;  %v10437_v28 = vld [vmem:[#allocation56_spill] sm:$0xff] }
 0x2dd   : > { %v4896_v53 = vpop.eup %4895  ;;  %v3255_v16 = vmul.f32 %v3239_v11, %v3079_v46  ;;  %v2970_v51 = vadd.f32 %v2954_v44, %v10435_v29  ;;  %vm3849_vm3 = vcmp.gt.f32.partialorder %v10437_v28, 1e-12  ;;  %v10438_v40 = vld [vmem:[#allocation120_spill] sm:$0xff]  ;;  %v10439_v6 = vld [vmem:[#allocation259_spill] sm:$0xff]  ;;  %v10445_v44 = vld [vmem:[#allocation21_spill] sm:$0xff]  ;;  %4909 = vrsqrt.f32 %v8516_v13 }
 0x2de   : > { %v4898_v43 = vpop.eup %4897  ;;  %v3624_v2 = vsub.f32 1.0, %v4896_v53  ;;  %v10436_v53 = vld [vmem:[#allocation62_spill] sm:$0xff]  ;;  %v2745_v36 = vsub.f32 0.0, %v10438_v40  ;;  %v10441_v23 = vld [vmem:[#allocation247_spill] sm:$0xff]  ;;  %v3881_v10 = vsel %vm3849_vm3, %v10442_v54, 0.0  ;;  %v10443_v11 = vld [vmem:[#allocation248_spill] sm:$0xff]  ;;  %4911 = vrcp.f32 %v2736_v61 }
 0x2df   : > { %v8553_v62 = vpop.eup %4899  ;;  %v4025_v12 = vsub.f32 1.0, %v4898_v43  ;;  %v3480_v24 = vsel %vm3448_vm2, %v10436_v53, 0.0  ;;  %v3271_v47 = vadd.f32 %v3255_v16, %v2854_v37  ;;  %v8564_v43 = vadd.f32 %v10439_v6, %v2441_v58  ;;  %v10444_v46 = vld [vmem:[#allocation207_spill] sm:$0xff]  ;;  %v10447_v37 = vld [vmem:[#allocation260_spill] sm:$0xff] }
 0x2e0   : > { %v8556_v30 = vpop.eup %4901  ;;  %v3640_v5 = vmul.f32 %v3624_v2, %v3432_v63  ;;  %v3371_v56 = vadd.f32 %v3355_v26, %v10441_v23  ;;  %v3772_v2 = vadd.f32 %v3756_v1, %v10443_v11  ;;  %v2765_v63 = vmul.f32 %v10444_v46, %v2745_v36  ;;  %v10450_v1 = vld [vmem:[#allocation209_spill] sm:$0xff]  ;;  %v10468_v26 = vld [vmem:[#allocation116_spill] sm:$0xff] }
 0x2e1   : > { %v4041_v9 = vmul.f32 %v4025_v12, %v3833_v21  ;;  %10440 = vst [vmem:[#allocation186_spill] sm:$0xff] %v8564_v43  ;;  %v3146_v29 = vsub.f32 0.0, %v10445_v44  ;;  %v8571_v53 = vpop.eup %4903  ;;  %v3137_v21 = vmax.f32 %v3121_v55, 1e-06  ;;  %v8574_v16 = vadd.f32 %v10447_v37, %v2970_v51 }
 0x2e2   : > { %v3656_v15 = vmul.f32 %v3640_v5, %v3480_v24  ;;  %10446 = vst [vmem:[#allocation219_spill] sm:$0xff] %v8571_v53  ;;  %v8576_v58 = vpop.eup %4905  ;;  %v2380_v5 = vpop.permute.xlu1 %2379  ;;  %v3538_v24 = vmax.f32 %v3522_v7, 1e-06  ;;  %v8583_v55 = vmul.f32 0.04725898, %v8564_v43 }
 0x2e3   : > { %v4057_v28 = vmul.f32 %v4041_v9, %v3881_v10  ;;  %10448 = vst [vmem:[#allocation195_spill] sm:$0xff] %v8574_v16  ;;  %10449 = vst [vmem:[#allocation72_spill] sm:$0xff] %v8576_v58  ;;  %v3166_v6 = vmul.f32 %v10450_v1, %v3146_v29  ;;  %v3939_v36 = vmax.f32 %v3923_v18, 1e-06  ;;  %v2796_v10 = vmul.f32 1.442695, %v2765_v63 }
 0x2e4   : > { %v3672_v12 = vadd.f32 %v3656_v15, %v3271_v47  ;;  %v10451_v15 = vld [vmem:[#allocation262_spill] sm:$0xff]  ;;  %v8588_v51 = vpop.eup %4907  ;;  %v10454_v47 = vld [vmem:[#allocation263_spill] sm:$0xff]  ;;  %4913 = vrcp.f32 %v3137_v21  ;;  %v8597_v7 = vmul.f32 0.04725898, %v8574_v16  ;;  %v2410_v46 = vsub.f32 %v2380_v5, %v10096_v49 }
 0x2e5   : > { %v8586_v9 = vadd.f32 %v10451_v15, %v3371_v56  ;;  %10453 = vst [vmem:[#allocation81_spill] sm:$0xff] %v8588_v51  ;;  %v8591_v23 = vadd.f32 %v10454_v47, %v3772_v2  ;;  %v3197_v44 = vmul.f32 1.442695, %v3166_v6  ;;  %v10457_v56 = vld [vmem:[#allocation70_spill] sm:$0xff]  ;;  %v3340_v18 = vsub.f32 %v2380_v5, %v10236_v42  ;;  %v10471_v58 = vld [vmem:[#allocation63_spill] sm:$0xff] }
 0x2e6   : > { %v4073_v40 = vadd.f32 %v4057_v28, %v3672_v12  ;;  %v3547_v29 = vsub.f32 0.0, %v10457_v56  ;;  %v2939_v12 = vsub.f32 %v2380_v5, %v10229_v38  ;;  %4915 = vrcp.f32 %v3538_v24  ;;  %v10461_v28 = vld [vmem:[#allocation213_spill] sm:$0xff] }
 0x2e7   : > { %10452 = vst [vmem:[#allocation222_spill] sm:$0xff] %v8586_v9  ;;  %10455 = vst [vmem:[#allocation90_spill] sm:$0xff] %v8591_v23  ;;  %v2721_v61 = vsub.f32 1.0, %v8583_v55  ;;  %v8605_v2 = vmul.f32 0.04725898, %v8586_v9  ;;  %4917 = vpow2.f32 %v2796_v10  ;;  %v3741_v1 = vsub.f32 %v2380_v5, %v10104_v4 }
 0x2e8   : > { %v8594_v11 = vadd.f32 %v8494_v33, %v4073_v40  ;;  %v10459_v33 = vld [vmem:[#allocation22_spill] sm:$0xff]  ;;  %v8609_v21 = vmul.f32 0.04725898, %v8591_v23  ;;  %v3567_v37 = vmul.f32 %v10461_v28, %v3547_v29  ;;  %4919 = vrcp.f32 %v3939_v36  ;;  %v10462_v40 = vld [vmem:[#allocation220_spill] sm:$0xff]  ;;  %v8619_v28 = vpop.eup %4909 }
 0x2e9   : > { %10458 = vst [vmem:[#allocation162_spill] sm:$0xff] %v8605_v2  ;;  %v3948_v63 = vsub.f32 0.0, %v10459_v33  ;;  %v2426_v15 = vmul.f32 %v2410_v46, %v2410_v46  ;;  %v3122_v47 = vsub.f32 1.0, %v8597_v7  ;;  %4921 = vpow2.f32 %v3197_v44  ;;  %10463 = vst [vmem:[#allocation205_spill] sm:$0xff] %v8619_v28  ;;  %v10464_v44 = vld [vmem:[#allocation61_spill] sm:$0xff]  ;;  %v10467_v33 = vld [vmem:[#allocation115_spill] sm:$0xff] }
 0x2ea   : > { %10456 = vst [vmem:[#allocation91_spill] sm:$0xff] %v8594_v11  ;;  %10460 = vst [vmem:[#allocation92_spill] sm:$0xff] %v8609_v21  ;;  %v2955_v56 = vmul.f32 %v2939_v12, %v2939_v12  ;;  %v3356_v54 = vmul.f32 %v3340_v18, %v3340_v18  ;;  %4923 = vrsqrt.f32 %v8564_v43  ;;  %v2737_v10 = vmax.f32 %v2721_v61, 1e-06  ;;  %v10465_v18 = vld [vmem:[#allocation114_spill] sm:$0xff] }
 0x2eb   : > { %v3968_v24 = vmul.f32 %v10462_v40, %v3948_v63  ;;  %v3523_v29 = vsub.f32 1.0, %v8605_v2  ;;  %4925 = vrsqrt.f32 %v8574_v16  ;;  %v3924_v5 = vsub.f32 1.0, %v8609_v21  ;;  %v8626_v40 = vpop.eup %4911 }
 0x2ec   : > { %v3598_v36 = vmul.f32 1.442695, %v3567_v37  ;;  %v3757_v46 = vmul.f32 %v3741_v1, %v3741_v1  ;;  %4927 = vrsqrt.f32 %v8586_v9  ;;  %vm2649_vm4 = vcmp.gt.f32.partialorder %v10464_v44, 1e-12  ;;  %10466 = vst [vmem:[#allocation164_spill] sm:$0xff] %v8626_v40  ;;  %v10470_v1 = vld [vmem:[#allocation15_spill] sm:$0xff] }
 0x2ed   : > { %v3999_v12 = vmul.f32 1.442695, %v3968_v24  ;;  %v2442_v63 = vadd.f32 %v2426_v15, %v10465_v18  ;;  %v3138_v61 = vmax.f32 %v3122_v47, 1e-06  ;;  %4929 = vrsqrt.f32 %v8591_v23  ;;  %v10472_v44 = vld [vmem:[#allocation14_spill] sm:$0xff]  ;;  %v2576_v47 = vpop.permute.xlu0 %2575  ;;  %v10473_v18 = vld [vmem:[#allocation117_spill] sm:$0xff] }
 0x2ee   : > { %v2971_v6 = vadd.f32 %v2955_v56, %v10467_v33  ;;  %v3372_v28 = vadd.f32 %v3356_v54, %v10468_v26  ;;  %v8631_v13 = vpop.eup %4913  ;;  %4931 = vrcp.f32 %v2737_v10  ;;  %v3539_v37 = vmax.f32 %v3523_v29, 1e-06  ;;  %v10475_v56 = vld [vmem:[#allocation67_spill] sm:$0xff]  ;;  %v10476_v26 = vld [vmem:[#allocation266_spill] sm:$0xff]  ;;  %v10478_v33 = vld [vmem:[#allocation136_spill] sm:$0xff] }
 0x2ef   : > { %10469 = vst [vmem:[#allocation191_spill] sm:$0xff] %v8631_v13  ;;  %v2681_v51 = vsel %vm2649_vm4, %v10470_v1, 0.0  ;;  %vm3050_vm5 = vcmp.gt.f32.partialorder %v10471_v58, 1e-12  ;;  %v3940_v24 = vmax.f32 %v3924_v5, 1e-06  ;;  %4933 = vpow2.f32 %v3598_v36 }
 0x2f0   : > { %v8636_v15 = vsel %vm3050_vm5, %v10472_v44, 0.0  ;;  %v3773_v53 = vadd.f32 %v3757_v46, %v10473_v18  ;;  %v8639_v40 = vpop.eup %4915  ;;  %vm3451_vm6 = vcmp.gt.f32.partialorder %v10475_v56, 1e-12  ;;  %4935 = vpow2.f32 %v3999_v12  ;;  %v10479_v58 = vld [vmem:[#allocation17_spill] sm:$0xff]  ;;  %v10480_v1 = vld [vmem:[#allocation132_spill] sm:$0xff]  ;;  %v10482_v44 = vld [vmem:[#allocation135_spill] sm:$0xff] }
 0x2f1   : > { %10474 = vst [vmem:[#allocation82_spill] sm:$0xff] %v8639_v40  ;;  %v8643_v54 = vadd.f32 %v10476_v26, %v2442_v63  ;;  %v2747_v10 = vsub.f32 0.0, %v10478_v33  ;;  %v4918_v29 = vpop.eup %4917  ;;  %4937 = vrcp.f32 %v3138_v61  ;;  %v8647_v5 = vsel %vm3451_vm6, %v10479_v58, 0.0  ;;  %v10485_v12 = vld [vmem:[#allocation20_spill] sm:$0xff]  ;;  %v10487_v61 = vld [vmem:[#allocation203_spill] sm:$0xff]  ;;  %v10502_v23 = vld [vmem:[#allocation221_spill] sm:$0xff] }
 0x2f2   : > { %v8650_v36 = vadd.f32 %v10480_v1, %v2971_v6  ;;  %v8653_v46 = vadd.f32 %v10482_v44, %v3372_v28  ;;  %v8655_v18 = vpop.eup %4919  ;;  %4939 = vrcp.f32 %v3539_v37  ;;  %vm3852_vm7 = vcmp.gt.f32.partialorder %v10485_v12, 1e-12  ;;  %v10486_v56 = vld [vmem:[#allocation96_spill] sm:$0xff]  ;;  %v10488_v1 = vld [vmem:[#allocation267_spill] sm:$0xff]  ;;  %v10492_v12 = vld [vmem:[#allocation74_spill] sm:$0xff] }
 0x2f3   : > { %10477 = vst [vmem:[#allocation208_spill] sm:$0xff] %v8643_v54  ;;  %10484 = vst [vmem:[#allocation30_spill] sm:$0xff] %v8655_v18  ;;  %v2633_v63 = vmul.f32 %v8486_v41, %v2576_v47  ;;  %v2769_v26 = vmul.f32 %v10486_v56, %v2747_v10  ;;  %v4922_v33 = vpop.eup %4921  ;;  %4941 = vrcp.f32 %v3940_v24  ;;  %v8661_v58 = vsel %vm3852_vm7, %v10487_v61, 0.0  ;;  %v10493_v18 = vld [vmem:[#allocation77_spill] sm:$0xff] }
 0x2f4   : > { %10481 = vst [vmem:[#allocation165_spill] sm:$0xff] %v8650_v36  ;;  %10483 = vst [vmem:[#allocation194_spill] sm:$0xff] %v8653_v46  ;;  %v3034_v6 = vmul.f32 %v8507_v22, %v2576_v47  ;;  %v8665_v40 = vadd.f32 %v10488_v1, %v3773_v53  ;;  %v8667_v28 = vpop.eup %4923  ;;  %v2825_v44 = vsub.f32 1.0, %v4918_v29  ;;  %v8670_v37 = vmul.f32 0.04725898, %v8643_v54  ;;  %v10497_v1 = vld [vmem:[#allocation133_spill] sm:$0xff] }
 0x2f5   : > { %10490 = vst [vmem:[#allocation167_spill] sm:$0xff] %v8667_v28  ;;  %vm2651_vm8 = vcmp.gt.f32.partialorder %v10492_v12, 1e-12  ;;  %v3148_v10 = vsub.f32 0.0, %v10493_v18  ;;  %v8674_v56 = vpop.eup %4925  ;;  %v3435_v24 = vmul.f32 %v8525_v60, %v2576_v47  ;;  %v8678_v61 = vmul.f32 0.04725898, %v8650_v36 }
 0x2f6   : > { %10489 = vst [vmem:[#allocation210_spill] sm:$0xff] %v8665_v40  ;;  %10491 = vst [vmem:[#allocation212_spill] sm:$0xff] %v8670_v37  ;;  %v8681_v53 = vmul.f32 0.04725898, %v8653_v46  ;;  %vm3052_vm9 = vcmp.gt.f32.partialorder %v10497_v1, 1e-12  ;;  %v8684_v29 = vpop.eup %4927  ;;  %v2841_v31 = vmul.f32 %v2825_v44, %v2633_v63  ;;  %v3836_v11 = vmul.f32 %v8534_v59, %v2576_v47  ;;  %v2384_v1 = vpop.permute.xlu1 %2383 }
 0x2f7   : > { %10494 = vst [vmem:[#allocation111_spill] sm:$0xff] %v8674_v56  ;;  %10495 = vst [vmem:[#allocation196_spill] sm:$0xff] %v8678_v61  ;;  %v3226_v13 = vsub.f32 1.0, %v4922_v33  ;;  %v2800_v48 = vmul.f32 1.442695, %v2769_v26  ;;  %v10499_v12 = vld [vmem:[#allocation231_spill] sm:$0xff]  ;;  %v8687_v18 = vpop.eup %4929  ;;  %4943 = vrsqrt.f32 %v8643_v54 }
 0x2f8   : > { %10496 = vst [vmem:[#allocation83_spill] sm:$0xff] %v8681_v53  ;;  %10498 = vst [vmem:[#allocation198_spill] sm:$0xff] %v8684_v29  ;;  %v3170_v57 = vmul.f32 %v10499_v12, %v3148_v10  ;;  %v8691_v34 = vmul.f32 0.04725898, %v8665_v40  ;;  %v8694_v9 = vsel %vm2651_vm8, %v10502_v23, 0.0  ;;  %v10503_v56 = vld [vmem:[#allocation224_spill] sm:$0xff]  ;;  %v8699_v29 = vpop.eup %4931  ;;  %4945 = vrsqrt.f32 %v8650_v36 }
 0x2f9   : > { %10500 = vst [vmem:[#allocation229_spill] sm:$0xff] %v8687_v18  ;;  %v8697_v16 = vsel %vm3052_vm9, %v10503_v56, 0.0  ;;  %v3242_v63 = vmul.f32 %v3226_v13, %v3034_v6  ;;  %v2722_v26 = vsub.f32 1.0, %v8670_v37  ;;  %v10504_v33 = vld [vmem:[#allocation75_spill] sm:$0xff]  ;;  %v4934_v47 = vpop.eup %4933  ;;  %v3123_v44 = vsub.f32 1.0, %v8678_v61  ;;  %v10505_v10 = vld [vmem:[#allocation145_spill] sm:$0xff] }
 0x2fa   : > { %10501 = vst [vmem:[#allocation93_spill] sm:$0xff] %v8691_v34  ;;  %vm3453_vm10 = vcmp.gt.f32.partialorder %v10504_v33, 1e-12  ;;  %v3524_v23 = vsub.f32 1.0, %v8681_v53  ;;  %v3549_v56 = vsub.f32 0.0, %v10505_v10  ;;  %v4936_v12 = vpop.eup %4935  ;;  %v2857_v18 = vmul.f32 %v2841_v31, %v2681_v51  ;;  %v10506_v37 = vld [vmem:[#allocation234_spill] sm:$0xff] }
 0x2fb   : > { %4947 = vpow2.f32 %v2800_v48  ;;  %v3201_v28 = vmul.f32 1.442695, %v3170_v57  ;;  %v2411_v13 = vsub.f32 %v2384_v1, %v10096_v49  ;;  %v8709_v6 = vpop.eup %4937  ;;  %v3925_v54 = vsub.f32 1.0, %v8691_v34 }
 0x2fc   : > { %4949 = vrsqrt.f32 %v8653_v46  ;;  %v3571_v36 = vmul.f32 %v10506_v37, %v3549_v56  ;;  %v2940_v61 = vsub.f32 %v2384_v1, %v10229_v38  ;;  %v8715_v43 = vpop.eup %4939  ;;  %v3627_v53 = vsub.f32 1.0, %v4934_v47  ;;  %v10509_v47 = vld [vmem:[#allocation40_spill] sm:$0xff] }
 0x2fd   : > { %10507 = vst [vmem:[#allocation174_spill] sm:$0xff] %v8715_v43  ;;  %v3258_v10 = vmul.f32 %v3242_v63, %v8636_v15  ;;  %v2738_v31 = vmax.f32 %v2722_v26, 1e-06  ;;  %v3341_v57 = vsub.f32 %v2384_v1, %v10236_v42  ;;  %v8719_v48 = vpop.eup %4941  ;;  %v4028_v51 = vsub.f32 1.0, %v4936_v12  ;;  %v10510_v12 = vld [vmem:[#allocation228_spill] sm:$0xff] }
 0x2fe   : > { %10508 = vst [vmem:[#allocation225_spill] sm:$0xff] %v8719_v48  ;;  %v3139_v21 = vmax.f32 %v3123_v44, 1e-06  ;;  %v3540_v8 = vmax.f32 %v3524_v23, 1e-06  ;;  %4951 = vrsqrt.f32 %v8665_v40  ;;  %v3643_v46 = vmul.f32 %v3627_v53, %v3435_v24  ;;  %v10511_v24 = vld [vmem:[#allocation76_spill] sm:$0xff] }
 0x2ff   : > { %4953 = vpow2.f32 %v3201_v28  ;;  %v2427_v37 = vmul.f32 %v2411_v13, %v2411_v13  ;;  %v3742_v56 = vsub.f32 %v2384_v1, %v10104_v4  ;;  %v3941_v34 = vmax.f32 %v3925_v54, 1e-06  ;;  %v10512_v28 = vld [vmem:[#allocation238_spill] sm:$0xff]  ;;  %v10517_v13 = vld [vmem:[#allocation255_spill] sm:$0xff]  ;;  %v10533_v40 = vld [vmem:[#allocation200_spill] sm:$0xff] }
 0x300   : > { %v3602_v43 = vmul.f32 1.442695, %v3571_v36  ;;  %v3950_v2 = vsub.f32 0.0, %v10509_v47  ;;  %v2956_v15 = vmul.f32 %v2940_v61, %v2940_v61  ;;  %v3274_v63 = vadd.f32 %v3258_v10, %v2857_v18  ;;  %v2584_v36 = vpop.permute.xlu0 %2583  ;;  %v10514_v61 = vld [vmem:[#allocation254_spill] sm:$0xff] }
 0x301   : > { %v4044_v26 = vmul.f32 %v4028_v51, %v3836_v11  ;;  %4955 = vrcp.f32 %v2738_v31  ;;  %v3357_v39 = vmul.f32 %v3341_v57, %v3341_v57  ;;  %v8727_v44 = vsel %vm3453_vm10, %v10510_v12, 0.0  ;;  %v8731_v1 = vpop.eup %4943  ;;  %v10518_v31 = vld [vmem:[#allocation201_spill] sm:$0xff]  ;;  %v10521_v12 = vld [vmem:[#allocation252_spill] sm:$0xff] }
 0x302   : > { %4957 = vrcp.f32 %v3139_v21  ;;  %vm3854_vm11 = vcmp.gt.f32.partialorder %v10511_v24, 1e-12  ;;  %v3972_v53 = vmul.f32 %v10512_v28, %v3950_v2  ;;  %10513 = vst [vmem:[#allocation176_spill] sm:$0xff] %v8731_v1  ;;  %v3659_v54 = vmul.f32 %v3643_v46, %v8647_v5  ;;  %v8735_v23 = vpop.eup %4945  ;;  %v10516_v21 = vld [vmem:[#allocation85_spill] sm:$0xff] }
 0x303   : > { %4959 = vrcp.f32 %v3540_v8  ;;  %v2443_v11 = vadd.f32 %v2427_v37, %v10514_v61  ;;  %v3758_v18 = vmul.f32 %v3742_v56, %v3742_v56  ;;  %10515 = vst [vmem:[#allocation113_spill] sm:$0xff] %v8735_v23  ;;  %v8738_v33 = vsel %vm3854_vm11, %v10516_v21, 0.0  ;;  %v10519_v8 = vld [vmem:[#allocation257_spill] sm:$0xff]  ;;  %v10527_v21 = vld [vmem:[#allocation78_spill] sm:$0xff] }
 0x304   : > { %4961 = vpow2.f32 %v3602_v43  ;;  %v2972_v10 = vadd.f32 %v2956_v15, %v10517_v13  ;;  %v2749_v57 = vsub.f32 0.0, %v10518_v31  ;;  %v3675_v51 = vadd.f32 %v3659_v54, %v3274_v63  ;;  %v10522_v28 = vld [vmem:[#allocation5_spill] sm:$0xff]  ;;  %v10524_v63 = vld [vmem:[#allocation258_spill] sm:$0xff]  ;;  %v10528_v31 = vld [vmem:[#allocation16_spill] sm:$0xff] }
 0x305   : > { %v4948_v2 = vpop.eup %4947  ;;  %v4060_v47 = vmul.f32 %v4044_v26, %v8661_v58  ;;  %4963 = vrcp.f32 %v3941_v34  ;;  %v3373_v5 = vadd.f32 %v3357_v39, %v10519_v8  ;;  %v4003_v37 = vmul.f32 1.442695, %v3972_v53  ;;  %v10525_v58 = vld [vmem:[#allocation128_spill] sm:$0xff] }
 0x306   : > { %v8744_v46 = vpop.eup %4949  ;;  %v2635_v56 = vmul.f32 %v8486_v41, %v2584_v36  ;;  %v3036_v43 = vmul.f32 %v8507_v22, %v2584_v36  ;;  %v2773_v24 = vmul.f32 %v10521_v12, %v2749_v57  ;;  %v3437_v15 = vmul.f32 %v8525_v60, %v2584_v36  ;;  %v2388_v57 = vpop.permute.xlu1 %2387 }
 0x307   : > { %10520 = vst [vmem:[#allocation211_spill] sm:$0xff] %v8744_v46  ;;  %v8751_v61 = vadd.f32 %v10522_v28, %v2443_v11  ;;  %v3774_v54 = vadd.f32 %v3758_v18, %v10524_v63  ;;  %v3150_v34 = vsub.f32 0.0, %v10525_v58  ;;  %v2827_v39 = vsub.f32 1.0, %v4948_v2  ;;  %v10530_v11 = vld [vmem:[#allocation138_spill] sm:$0xff]  ;;  %v10531_v18 = vld [vmem:[#allocation239_spill] sm:$0xff]  ;;  %v10532_v58 = vld [vmem:[#allocation256_spill] sm:$0xff] }
 0x308   : > { %v8755_v26 = vpop.eup %4951  ;;  %v8758_v53 = vmul.f32 %v8534_v59, %v2584_v36  ;;  %v8761_v13 = vadd.f32 %v10527_v21, %v2972_v10  ;;  %vm2653_vm12 = vcmp.gt.f32.partialorder %v10528_v31, 1e-12  ;;  %v8764_v12 = vadd.f32 %v4060_v47, %v3675_v51  ;;  %v10536_v51 = vld [vmem:[#allocation80_spill] sm:$0xff] }
 0x309   : > { %10523 = vst [vmem:[#allocation94_spill] sm:$0xff] %v8751_v61  ;;  %10526 = vst [vmem:[#allocation226_spill] sm:$0xff] %v8755_v26  ;;  %v4954_v8 = vpop.eup %4953  ;;  %v8767_v28 = vadd.f32 %v10530_v11, %v3373_v5  ;;  %v8770_v63 = vsel %vm2653_vm12, %v10531_v18, 0.0  ;;  %v3174_v2 = vmul.f32 %v10532_v58, %v3150_v34  ;;  %4965 = vpow2.f32 %v4003_v37 }
 0x30a   : > { %10529 = vst [vmem:[#allocation177_spill] sm:$0xff] %v8764_v12  ;;  %v2843_v36 = vmul.f32 %v2827_v39, %v2635_v56  ;;  %v2804_v26 = vmul.f32 1.442695, %v2773_v24  ;;  %vm3054_vm13 = vcmp.gt.f32.partialorder %v10533_v40, 1e-12  ;;  %v8780_v47 = vadd.f32 %v10536_v51, %v3774_v54  ;;  %v10539_v56 = vld [vmem:[#allocation45_spill] sm:$0xff] }
 0x30b   : > { %v8774_v10 = vpop.eup %4955  ;;  %v8777_v21 = vmul.f32 0.04725898, %v8751_v61  ;;  %v2412_v5 = vsub.f32 %v2388_v57, %v10096_v49  ;;  %v2941_v31 = vsub.f32 %v2388_v57, %v10229_v38  ;;  %v3228_v34 = vsub.f32 1.0, %v4954_v8  ;;  %v10541_v54 = vld [vmem:[#allocation243_spill] sm:$0xff] }
 0x30c   : > { %10534 = vst [vmem:[#allocation215_spill] sm:$0xff] %v8774_v10  ;;  %v8784_v11 = vpop.eup %4957  ;;  %v8787_v37 = vmul.f32 0.04725898, %v8761_v13  ;;  %v3551_v40 = vsub.f32 0.0, %v10539_v56  ;;  %v3342_v24 = vsub.f32 %v2388_v57, %v10236_v42  ;;  %v8794_v18 = vmul.f32 0.04725898, %v8767_v28 }
 0x30d   : > { %10535 = vst [vmem:[#allocation38_spill] sm:$0xff] %v8777_v21  ;;  %10537 = vst [vmem:[#allocation37_spill] sm:$0xff] %v8784_v11  ;;  %v8791_v39 = vpop.eup %4959  ;;  %v8797_v58 = vsel %vm3054_vm13, %v10541_v54, 0.0  ;;  %v3205_v51 = vmul.f32 1.442695, %v3174_v2  ;;  %v3743_v46 = vsub.f32 %v2388_v57, %v10104_v4  ;;  %v2859_v8 = vmul.f32 %v2843_v36, %v8694_v9  ;;  %v10542_v11 = vld [vmem:[#allocation261_spill] sm:$0xff] }
 0x30e   : > { %10538 = vst [vmem:[#allocation227_spill] sm:$0xff] %v8787_v37  ;;  %10540 = vst [vmem:[#allocation218_spill] sm:$0xff] %v8791_v39  ;;  %v4962_v23 = vpop.eup %4961  ;;  %v3244_v1 = vmul.f32 %v3228_v34, %v3036_v43  ;;  %v3575_v10 = vmul.f32 %v10542_v11, %v3551_v40  ;;  %v2428_v56 = vmul.f32 %v2412_v5, %v2412_v5  ;;  %4967 = vrsqrt.f32 %v8751_v61  ;;  %v10544_v57 = vld [vmem:[#allocation206_spill] sm:$0xff] }
 0x30f   : > { %v8802_v12 = vpop.eup %4963  ;;  %v2723_v39 = vsub.f32 1.0, %v8777_v21  ;;  %v8807_v48 = vmul.f32 0.04725898, %v8780_v47  ;;  %v2957_v54 = vmul.f32 %v2941_v31, %v2941_v31  ;;  %v3124_v2 = vsub.f32 1.0, %v8787_v37  ;;  %v10545_v40 = vld [vmem:[#allocation126_spill] sm:$0xff]  ;;  %v10547_v31 = vld [vmem:[#allocation123_spill] sm:$0xff] }
 0x310   : > { %10543 = vst [vmem:[#allocation95_spill] sm:$0xff] %v8802_v12  ;;  %4969 = vpow2.f32 %v2804_v26  ;;  %v3952_v4 = vsub.f32 0.0, %v10544_v57  ;;  %v3358_v9 = vmul.f32 %v3342_v24, %v3342_v24  ;;  %v3629_v43 = vsub.f32 1.0, %v4962_v23  ;;  %v10546_v61 = vld [vmem:[#allocation122_spill] sm:$0xff] }
 0x311   : > { %v3525_v36 = vsub.f32 1.0, %v8794_v18  ;;  %4971 = vpow2.f32 %v3205_v51  ;;  %v3759_v5 = vmul.f32 %v3743_v46, %v3743_v46  ;;  %v3260_v11 = vmul.f32 %v3244_v1, %v8697_v16  ;;  %v10548_v46 = vld [vmem:[#allocation124_spill] sm:$0xff]  ;;  %v10550_v1 = vld [vmem:[#allocation125_spill] sm:$0xff] }
 0x312   : > { %v3606_v34 = vmul.f32 1.442695, %v3575_v10  ;;  %v3976_v12 = vmul.f32 %v10545_v40, %v3952_v4  ;;  %v2444_v21 = vadd.f32 %v2428_v56, %v10546_v61  ;;  %v2739_v42 = vmax.f32 %v2723_v39, 1e-06  ;;  %v10549_v4 = vld [vmem:[#allocation18_spill] sm:$0xff]  ;;  %v10551_v56 = vld [vmem:[#allocation41_spill] sm:$0xff] }
 0x313   : > { %4973 = vrsqrt.f32 %v8761_v13  ;;  %v3926_v26 = vsub.f32 1.0, %v8807_v48  ;;  %v2973_v57 = vadd.f32 %v2957_v54, %v10547_v31  ;;  %v4966_v24 = vpop.eup %4965  ;;  %v3645_v23 = vmul.f32 %v3629_v43, %v3437_v15 }
 0x314   : > { %v3140_v37 = vmax.f32 %v3124_v2, 1e-06  ;;  %4975 = vrsqrt.f32 %v8767_v28  ;;  %v3374_v51 = vadd.f32 %v3358_v9, %v10548_v46  ;;  %v3541_v16 = vmax.f32 %v3525_v36, 1e-06  ;;  %v10552_v2 = vld [vmem:[#allocation155_spill] sm:$0xff]  ;;  %v10554_v36 = vld [vmem:[#allocation245_spill] sm:$0xff]  ;;  %v2592_v46 = vpop.permute.xlu0 %2591 }
 0x315   : > { %4977 = vrsqrt.f32 %v8780_v47  ;;  %vm3455_vm14 = vcmp.gt.f32.partialorder %v10549_v4, 1e-12  ;;  %v3775_v61 = vadd.f32 %v3759_v5, %v10550_v1  ;;  %v3276_v10 = vadd.f32 %v3260_v11, %v2859_v8  ;;  %v10555_v5 = vld [vmem:[#allocation42_spill] sm:$0xff] }
 0x316   : > { %4979 = vpow2.f32 %v3606_v34  ;;  %v4007_v39 = vmul.f32 1.442695, %v3976_v12  ;;  %v8824_v40 = vadd.f32 %v10551_v56, %v2444_v21  ;;  %v4030_v54 = vsub.f32 1.0, %v4966_v24 }
 0x317   : > { %4981 = vrcp.f32 %v2739_v42  ;;  %v3942_v15 = vmax.f32 %v3926_v26, 1e-06  ;;  %v8827_v43 = vadd.f32 %v10552_v2, %v2973_v57  ;;  %v3661_v9 = vmul.f32 %v3645_v23, %v8727_v44 }
 0x318   : > { %4983 = vrcp.f32 %v3140_v37  ;;  %v8831_v31 = vsel %vm3455_vm14, %v10554_v36, 0.0  ;;  %v8834_v8 = vadd.f32 %v10555_v5, %v3374_v51  ;;  %v8836_v12 = vpop.eup %4967  ;;  %v4046_v21 = vmul.f32 %v4030_v54, %v8758_v53  ;;  %v10558_v37 = vld [vmem:[#allocation144_spill] sm:$0xff] }
 0x319   : > { %10553 = vst [vmem:[#allocation179_spill] sm:$0xff] %v8827_v43  ;;  %4985 = vrcp.f32 %v3541_v16  ;;  %v8840_v42 = vadd.f32 %v8236_v52, %v3775_v61  ;;  %v2751_v11 = vsub.f32 0.0, %v8408_v3  ;;  %v3677_v44 = vadd.f32 %v3661_v9, %v3276_v10  ;;  %v10559_v3 = vld [vmem:[#allocation246_spill] sm:$0xff] }
 0x31a   : > { %10556 = vst [vmem:[#allocation232_spill] sm:$0xff] %v8834_v8  ;;  %v4970_v34 = vpop.eup %4969  ;;  %vm3856_vm15 = vcmp.gt.f32.partialorder %v10558_v37, 1e-12  ;;  %4987 = vpow2.f32 %v4007_v39  ;;  %v8845_v26 = vmul.f32 0.04725898, %v8824_v40  ;;  %v2637_v24 = vmul.f32 %v8486_v41, %v2592_v46 }
 0x31b   : > { %10557 = vst [vmem:[#allocation223_spill] sm:$0xff] %v8840_v42  ;;  %v4972_v57 = vpop.eup %4971  ;;  %v8849_v23 = vmul.f32 0.04725898, %v8827_v43  ;;  %v2777_v53 = vmul.f32 %v8510_v35, %v2751_v11  ;;  %v3152_v52 = vsub.f32 0.0, %v8429_v25  ;;  %4989 = vrcp.f32 %v3942_v15 }
 0x31c   : > { %v8854_v51 = vsel %vm3856_vm15, %v10559_v3, 0.0  ;;  %v3038_v16 = vmul.f32 %v8507_v22, %v2592_v46  ;;  %v8858_v4 = vmul.f32 0.04725898, %v8834_v8  ;;  %v4062_v61 = vmul.f32 %v4046_v21, %v8738_v33 }
 0x31d   : > { %v8860_v1 = vpop.eup %4973  ;;  %v2829_v10 = vsub.f32 1.0, %v4970_v34  ;;  %v8864_v39 = vmul.f32 0.04725898, %v8840_v42  ;;  %v3178_v35 = vmul.f32 %v8545_v45, %v3152_v52  ;;  %v3230_v56 = vsub.f32 1.0, %v4972_v57 }
 0x31e   : > { %v8867_v25 = vpop.eup %4975  ;;  %v3439_v54 = vmul.f32 %v8525_v60, %v2592_v46  ;;  %v3840_v15 = vmul.f32 %v8534_v59, %v2592_v46  ;;  %v2724_v2 = vsub.f32 1.0, %v8845_v26  ;;  %v8874_v36 = vadd.f32 %v4062_v61, %v3677_v44 }
 0x31f   : > { %v8872_v9 = vpop.eup %4977  ;;  %v2845_v33 = vmul.f32 %v2829_v10, %v2637_v24  ;;  %v3125_v5 = vsub.f32 1.0, %v8849_v23  ;;  %v2808_v21 = vmul.f32 1.442695, %v2777_v53  ;;  %v3246_v34 = vmul.f32 %v3230_v56, %v3038_v16 }
 0x320   : > { %v4980_v11 = vpop.eup %4979  ;;  %4991 = vrsqrt.f32 %v8824_v40  ;;  %v3526_v45 = vsub.f32 1.0, %v8858_v4  ;;  %v3553_v37 = vsub.f32 0.0, %v8438_v27  ;;  %v3927_v46 = vsub.f32 1.0, %v8864_v39 }
 0x321   : > { %v8880_v57 = vpop.eup %4981  ;;  %4993 = vrsqrt.f32 %v8827_v43  ;;  %vm2655_vm0 = vcmp.gt.f32.partialorder %v8393_v14, 1e-12  ;;  %v3209_v44 = vmul.f32 1.442695, %v3178_v35  ;;  %v2740_v53 = vmax.f32 %v2724_v2, 1e-06 }
 0x322   : > { %v8885_v24 = vpop.eup %4983  ;;  %4995 = vrsqrt.f32 %v8834_v8  ;;  %v8889_v52 = vsel %vm2655_vm0, %v8463_v20, 0.0  ;;  %v3579_v3 = vmul.f32 %v8553_v62, %v3553_v37  ;;  %v3631_v16 = vsub.f32 1.0, %v4980_v11 }
 0x323   : > { %v8892_v27 = vpop.eup %4985  ;;  %v2861_v61 = vmul.f32 %v2845_v33, %v8770_v63  ;;  %v3141_v10 = vmax.f32 %v3125_v5, 1e-06  ;;  %4997 = vpow2.f32 %v2808_v21  ;;  %v3262_v14 = vmul.f32 %v3246_v34, %v8797_v58 }
 0x324   : > { %v4988_v56 = vpop.eup %4987  ;;  %v3542_v35 = vmax.f32 %v3526_v45, 1e-06  ;;  %4999 = vrsqrt.f32 %v8840_v42  ;;  %v3954_v2 = vsub.f32 0.0, %v8443_v50  ;;  %v3647_v8 = vmul.f32 %v3631_v16, %v3439_v54  ;;  %v2600_v45 = vpop.permute.xlu0 %2599 }
 0x325   : > { %v3943_v20 = vmax.f32 %v3927_v46, 1e-06  ;;  %5001 = vpow2.f32 %v3209_v44  ;;  %v2753_v62 = vsub.f32 0.0, %v8583_v55  ;;  %v8899_v37 = vpop.eup %4989  ;;  %v3610_v11 = vmul.f32 1.442695, %v3579_v3  ;;  %v2392_v55 = vpop.permute.xlu1 %2391  ;;  %v10563_v44 = vld [vmem:[#allocation162_spill] sm:$0xff] }
 0x326   : > { %5003 = vrcp.f32 %v2740_v53  ;;  %v3980_v63 = vmul.f32 %v8556_v30, %v3954_v2  ;;  %v3154_v33 = vsub.f32 0.0, %v8597_v7  ;;  %v4032_v5 = vsub.f32 1.0, %v4988_v56  ;;  %v10565_v3 = vld [vmem:[#allocation190_spill] sm:$0xff] }
 0x327   : > { %5005 = vrcp.f32 %v3141_v10  ;;  %vm3056_vm1 = vcmp.gt.f32.partialorder %v8403_v0, 1e-12  ;;  %v2781_v58 = vmul.f32 %v8699_v29, %v2753_v62  ;;  %vm3457_vm2 = vcmp.gt.f32.partialorder %v8417_v19, 1e-12  ;;  %v10561_v29 = vld [vmem:[#allocation149_spill] sm:$0xff]  ;;  %v10567_v10 = vld [vmem:[#allocation92_spill] sm:$0xff] }
 0x328   : > { %5007 = vrcp.f32 %v3542_v35  ;;  %v8906_v50 = vsel %vm3056_vm1, %v8466_v17, 0.0  ;;  %v3182_v54 = vmul.f32 %v8709_v6, %v3154_v33  ;;  %v3278_v21 = vadd.f32 %v3262_v14, %v2861_v61 }
 0x329   : > { %v4048_v34 = vmul.f32 %v4032_v5, %v3840_v15  ;;  %5009 = vrcp.f32 %v3943_v20  ;;  %v8911_v30 = vsel %vm3457_vm2, %v8469_v32, 0.0  ;;  %v3663_v0 = vmul.f32 %v3647_v8, %v8831_v31  ;;  %v10566_v31 = vld [vmem:[#allocation12_spill] sm:$0xff]  ;;  %v10571_v5 = vld [vmem:[#allocation225_spill] sm:$0xff] }
 0x32a   : > { %v8913_v7 = vpop.eup %4991  ;;  %5011 = vpow2.f32 %v3610_v11  ;;  %vm3858_vm3 = vcmp.gt.f32.partialorder %v10561_v29, 1e-12  ;;  %v4011_v17 = vmul.f32 1.442695, %v3980_v63  ;;  %v2413_v19 = vsub.f32 %v2392_v55, %v10096_v49  ;;  %v10570_v63 = vld [vmem:[#allocation19_spill] sm:$0xff] }
 0x32b   : > { %10560 = vst [vmem:[#allocation39_spill] sm:$0xff] %v8913_v7  ;;  %v8917_v46 = vpop.eup %4993  ;;  %v2942_v6 = vsub.f32 %v2392_v55, %v10229_v38  ;;  %v2812_v15 = vmul.f32 1.442695, %v2781_v58  ;;  %v3555_v53 = vsub.f32 0.0, %v10563_v44  ;;  %v8925_v16 = vsel %vm3858_vm3, %v10565_v3, 0.0  ;;  %v10568_v38 = vld [vmem:[#allocation174_spill] sm:$0xff] }
 0x32c   : > { %10562 = vst [vmem:[#allocation29_spill] sm:$0xff] %v8917_v46  ;;  %v8922_v32 = vpop.eup %4995  ;;  %v3343_v8 = vsub.f32 %v2392_v55, %v10566_v31  ;;  %v3213_v61 = vmul.f32 1.442695, %v3182_v54  ;;  %v3956_v56 = vsub.f32 0.0, %v10567_v10  ;;  %v3679_v35 = vadd.f32 %v3663_v0, %v3278_v21  ;;  %v10572_v3 = vld [vmem:[#allocation186_spill] sm:$0xff] }
 0x32d   : > { %10564 = vst [vmem:[#allocation236_spill] sm:$0xff] %v8922_v32  ;;  %v4998_v14 = vpop.eup %4997  ;;  %v4064_v2 = vmul.f32 %v4048_v34, %v8854_v51  ;;  %v2639_v49 = vmul.f32 %v8486_v41, %v2600_v45  ;;  %v3583_v20 = vmul.f32 %v10568_v38, %v3555_v53  ;;  %5013 = vpow2.f32 %v4011_v17  ;;  %v10573_v10 = vld [vmem:[#allocation38_spill] sm:$0xff]  ;;  %v10578_v32 = vld [vmem:[#allocation24_spill] sm:$0xff] }
 0x32e   : > { %v8932_v62 = vpop.eup %4999  ;;  %v3040_v11 = vmul.f32 %v8507_v22, %v2600_v45  ;;  %v3744_v33 = vsub.f32 %v2392_v55, %v10570_v63  ;;  %v3984_v58 = vmul.f32 %v10571_v5, %v3956_v56  ;;  %v8938_v29 = vmul.f32 %v8525_v60, %v2600_v45  ;;  %v10582_v46 = vld [vmem:[#allocation26_spill] sm:$0xff] }
 0x32f   : > { %10569 = vst [vmem:[#allocation233_spill] sm:$0xff] %v8932_v62  ;;  %v5002_v54 = vpop.eup %5001  ;;  %v2429_v21 = vmul.f32 %v2413_v19, %v2413_v19  ;;  %v2958_v0 = vmul.f32 %v2942_v6, %v2942_v6  ;;  %5015 = vpow2.f32 %v2812_v15  ;;  %v2831_v34 = vsub.f32 1.0, %v4998_v14  ;;  %v10574_v14 = vld [vmem:[#allocation227_spill] sm:$0xff]  ;;  %v10576_v62 = vld [vmem:[#allocation265_spill] sm:$0xff] }
 0x330   : > { %v8940_v51 = vpop.eup %5003  ;;  %v8943_v44 = vmul.f32 %v8534_v59, %v2600_v45  ;;  %v3359_v17 = vmul.f32 %v3343_v8, %v3343_v8  ;;  %5017 = vpow2.f32 %v3213_v61  ;;  %v8947_v55 = vadd.f32 %v4064_v2, %v3679_v35  ;;  %v2508_v45 = vpop.permute.xlu1 %2507  ;;  %v10575_v8 = vld [vmem:[#allocation264_spill] sm:$0xff]  ;;  %v10577_v2 = vld [vmem:[#allocation167_spill] sm:$0xff] }
 0x331   : > { %v8945_v53 = vpop.eup %5005  ;;  %vm2657_vm4 = vcmp.gt.f32.partialorder %v10572_v3, 1e-12  ;;  %v3614_v31 = vmul.f32 1.442695, %v3583_v20  ;;  %v2755_v56 = vsub.f32 0.0, %v10573_v10  ;;  %v3232_v6 = vsub.f32 1.0, %v5002_v54 }
 0x332   : > { %v8951_v19 = vpop.eup %5007  ;;  %v3760_v15 = vmul.f32 %v3744_v33, %v3744_v33  ;;  %v4015_v38 = vmul.f32 1.442695, %v3984_v58  ;;  %v3156_v63 = vsub.f32 0.0, %v10574_v14  ;;  %v2445_v61 = vadd.f32 %v2429_v21, %v10575_v8  ;;  %v10579_v33 = vld [vmem:[#allocation195_spill] sm:$0xff]  ;;  %v10580_v21 = vld [vmem:[#allocation46_spill] sm:$0xff] }
 0x333   : > { %v8954_v5 = vpop.eup %5009  ;;  %v2974_v35 = vadd.f32 %v2958_v0, %v10576_v62  ;;  %v8959_v42 = vsel %vm2657_vm4, %v10577_v2, 0.0  ;;  %v2785_v20 = vmul.f32 %v8880_v57, %v2755_v56  ;;  %v2847_v10 = vmul.f32 %v2831_v34, %v2639_v49  ;;  %v10581_v62 = vld [vmem:[#allocation47_spill] sm:$0xff] }
 0x334   : > { %v5012_v3 = vpop.eup %5011  ;;  %v8963_v54 = vadd.f32 %v3359_v17, %v10578_v32  ;;  %vm3058_vm5 = vcmp.gt.f32.partialorder %v10579_v33, 1e-12  ;;  %v3186_v58 = vmul.f32 %v8885_v24, %v3156_v63  ;;  %5019 = vpow2.f32 %v3614_v31  ;;  %v10583_v57 = vld [vmem:[#allocation111_spill] sm:$0xff]  ;;  %v2608_v32 = vpop.permute.xlu0 %2607  ;;  %v10584_v33 = vld [vmem:[#allocation222_spill] sm:$0xff] }
 0x335   : > { %v3557_v14 = vsub.f32 0.0, %v8794_v18  ;;  %v2529_v8 = vsub.f32 %v2508_v45, %v10580_v21  ;;  %v2994_v0 = vsub.f32 %v2508_v45, %v10581_v62  ;;  %v3248_v2 = vmul.f32 %v3232_v6, %v3040_v11  ;;  %v10586_v21 = vld [vmem:[#allocation90_spill] sm:$0xff] }
 0x336   : > { %v3776_v43 = vadd.f32 %v3760_v15, %v10582_v46  ;;  %v8972_v56 = vsel %vm3058_vm5, %v10583_v57, 0.0  ;;  %5021 = vpow2.f32 %v4015_v38  ;;  %v2816_v49 = vmul.f32 1.442695, %v2785_v20  ;;  %v10585_v46 = vld [vmem:[#allocation198_spill] sm:$0xff]  ;;  %v10589_v57 = vld [vmem:[#allocation48_spill] sm:$0xff] }
 0x337   : > { %v3587_v34 = vmul.f32 %v8892_v27, %v3557_v14  ;;  %v3958_v24 = vsub.f32 0.0, %v8807_v48  ;;  %v2545_v17 = vmul.f32 %v2529_v8, %v2529_v8  ;;  %v5014_v31 = vpop.eup %5013  ;;  %v3633_v18 = vsub.f32 1.0, %v5012_v3  ;;  %v10587_v14 = vld [vmem:[#allocation229_spill] sm:$0xff]  ;;  %v10588_v3 = vld [vmem:[#allocation104_spill] sm:$0xff] }
 0x338   : > { %v2863_v63 = vmul.f32 %v2847_v10, %v8889_v52  ;;  %vm3459_vm6 = vcmp.gt.f32.partialorder %v10584_v33, 1e-12  ;;  %v3217_v11 = vmul.f32 1.442695, %v3186_v58  ;;  %vm3860_vm7 = vcmp.gt.f32.partialorder %v10586_v21, 1e-12 }
 0x339   : > { %v5016_v6 = vpop.eup %5015  ;;  %v8979_v15 = vsel %vm3459_vm6, %v10585_v46, 0.0  ;;  %v3988_v38 = vmul.f32 %v8899_v37, %v3958_v24  ;;  %v3010_v20 = vmul.f32 %v2994_v0, %v2994_v0  ;;  %v3264_v48 = vmul.f32 %v3248_v2, %v8906_v50 }
 0x33a   : > { %v5018_v27 = vpop.eup %5017  ;;  %v8985_v8 = vsel %vm3860_vm7, %v10587_v14, 0.0  ;;  %v2641_v52 = vmul.f32 %v8486_v41, %v2608_v32  ;;  %v3395_v10 = vsub.f32 %v2508_v45, %v10588_v3  ;;  %5023 = vpow2.f32 %v2816_v49 }
 0x33b   : > { %v3618_v58 = vmul.f32 1.442695, %v3587_v34  ;;  %v8989_v62 = vadd.f32 %v2545_v17, %v2445_v61  ;;  %v3796_v33 = vsub.f32 %v2508_v45, %v10589_v57  ;;  %v4034_v46 = vsub.f32 1.0, %v5014_v31  ;;  %v10590_v17 = vld [vmem:[#allocation94_spill] sm:$0xff]  ;;  %v2616_v45 = vpop.permute.xlu0 %2615 }
 0x33c   : > { %v3649_v37 = vmul.f32 %v3633_v18, %v8938_v29  ;;  %v3042_v0 = vmul.f32 %v8507_v22, %v2608_v32  ;;  %5025 = vpow2.f32 %v3217_v11  ;;  %v2833_v50 = vsub.f32 1.0, %v5016_v6 }
 0x33d   : > { %v3234_v2 = vsub.f32 1.0, %v5018_v27  ;;  %v4019_v24 = vmul.f32 1.442695, %v3988_v38  ;;  %v8994_v21 = vadd.f32 %v3010_v20, %v2974_v35  ;;  %v3280_v14 = vadd.f32 %v3264_v48, %v2863_v63 }
 0x33e   : > { %v3443_v3 = vmul.f32 %v8525_v60, %v2608_v32  ;;  %v3844_v49 = vmul.f32 %v8534_v59, %v2608_v32  ;;  %v3411_v61 = vmul.f32 %v3395_v10, %v3395_v10  ;;  %v5020_v34 = vpop.eup %5019  ;;  %vm2659_vm8 = vcmp.gt.f32.partialorder %v10590_v17, 1e-12 }
 0x33f   : > { %5027 = vpow2.f32 %v3618_v58  ;;  %v9000_v29 = vmul.f32 0.04725898, %v8989_v62  ;;  %v3812_v31 = vmul.f32 %v3796_v33, %v3796_v33  ;;  %v3665_v11 = vmul.f32 %v3649_v37, %v8911_v30 }
 0x340   : > { %v5022_v18 = vpop.eup %5021  ;;  %v4050_v35 = vmul.f32 %v4034_v46, %v8943_v44  ;;  %v9005_v63 = vsel %vm2659_vm8, %v8836_v12, 0.0  ;;  %vm3060_vm9 = vcmp.gt.f32.partialorder %v8761_v13, 1e-12  ;;  %v2849_v32 = vmul.f32 %v2833_v50, %v2641_v52 }
 0x341   : > { %v3250_v6 = vmul.f32 %v3234_v2, %v3042_v0  ;;  %5029 = vpow2.f32 %v4019_v24  ;;  %v9009_v38 = vmul.f32 0.04725898, %v8994_v21  ;;  %v3681_v20 = vadd.f32 %v3665_v11, %v3280_v14  ;;  %v10592_v14 = vld [vmem:[#allocation131_spill] sm:$0xff] }
 0x342   : > { %v9012_v27 = vsel %vm3060_vm9, %v8860_v1, 0.0  ;;  %vm3461_vm10 = vcmp.gt.f32.partialorder %v8767_v28, 1e-12  ;;  %v9016_v30 = vadd.f32 %v3411_v61, %v8963_v54  ;;  %v3635_v44 = vsub.f32 1.0, %v5020_v34  ;;  %v10594_v34 = vld [vmem:[#allocation51_spill] sm:$0xff] }
 0x343   : > { %vm3862_vm11 = vcmp.gt.f32.partialorder %v8780_v47, 1e-12  ;;  %v2725_v13 = vsub.f32 1.0, %v9000_v29  ;;  %v9020_v12 = vadd.f32 %v3812_v31, %v3776_v43  ;;  %v4066_v48 = vmul.f32 %v4050_v35, %v8925_v16  ;;  %v9033_v43 = vpop.permute.xlu0 %2623  ;;  %v10595_v35 = vld [vmem:[#allocation28_spill] sm:$0xff] }
 0x344   : > { %v4036_v52 = vsub.f32 1.0, %v5022_v18  ;;  %v9024_v10 = vsel %vm3461_vm10, %v8867_v25, 0.0  ;;  %v9027_v1 = vsel %vm3862_vm11, %v8872_v9, 0.0  ;;  %v5024_v28 = vpop.eup %5023  ;;  %v2865_v54 = vmul.f32 %v2849_v32, %v8959_v42 }
 0x345   : > { %10591 = vst [vmem:[#allocation235_spill] sm:$0xff] %v9020_v12  ;;  %v3266_v58 = vmul.f32 %v3250_v6, %v8972_v56  ;;  %v2643_v47 = vmul.f32 %v8486_v41, %v2616_v45  ;;  %v3126_v57 = vsub.f32 1.0, %v9009_v38  ;;  %v9035_v16 = vadd.f32 %v4066_v48, %v3681_v20  ;;  %v10597_v6 = vld [vmem:[#allocation86_spill] sm:$0xff] }
 0x346   : > { %v5026_v33 = vpop.eup %5025  ;;  %v3044_v25 = vmul.f32 %v8507_v22, %v2616_v45  ;;  %v3445_v46 = vmul.f32 %v8525_v60, %v2616_v45  ;;  %v9040_v9 = vmul.f32 0.04725898, %v9016_v30  ;;  %v3651_v37 = vmul.f32 %v3635_v44, %v3443_v3 }
 0x347   : > { %v3846_v42 = vmul.f32 %v8534_v59, %v2616_v45  ;;  %v2741_v56 = vmax.f32 %v2725_v13, 1e-06  ;;  %v9044_v0 = vmul.f32 0.04725898, %v9020_v12  ;;  %v4052_v50 = vmul.f32 %v4036_v52, %v3844_v49  ;;  %v10598_v52 = vld [vmem:[#allocation98_spill] sm:$0xff] }
 0x348   : > { %v2835_v2 = vsub.f32 1.0, %v5024_v28  ;;  %v9048_v24 = vmul.f32 %v8486_v41, %v9033_v43  ;;  %v10593_v61 = vsub.f32 0.0, %v10592_v14  ;;  %v3282_v18 = vadd.f32 %v3266_v58, %v2865_v54  ;;  %v10600_v54 = vld [vmem:[#allocation87_spill] sm:$0xff] }
 0x349   : > { %v5028_v31 = vpop.eup %5027  ;;  %v3236_v11 = vsub.f32 1.0, %v5026_v33  ;;  %5031 = vrsqrt.f32 %v8989_v62  ;;  %v3142_v3 = vmax.f32 %v3126_v57, 1e-06  ;;  %v3527_v45 = vsub.f32 1.0, %v9040_v9 }
 0x34a   : > { %v2761_v17 = vmul.f32 %v10594_v34, %v10593_v61  ;;  %5033 = vrsqrt.f32 %v8994_v21  ;;  %v10596_v32 = vsub.f32 0.0, %v10595_v35  ;;  %v3667_v13 = vmul.f32 %v3651_v37, %v8979_v15 }
 0x34b   : > { %v5030_v44 = vpop.eup %5029  ;;  %5035 = vrcp.f32 %v2741_v56  ;;  %v3928_v48 = vsub.f32 1.0, %v9044_v0  ;;  %v10599_v28 = vsub.f32 0.0, %v10598_v52  ;;  %v3637_v57 = vsub.f32 1.0, %v5028_v31 }
 0x34c   : > { %v2792_v49 = vmul.f32 1.442695, %v2761_v17  ;;  %v3162_v20 = vmul.f32 %v10597_v6, %v10596_v32  ;;  %v2851_v33 = vmul.f32 %v2835_v2, %v2643_v47  ;;  %v3252_v61 = vmul.f32 %v3236_v11, %v3044_v25  ;;  %v10601_v17 = vld [vmem:[#allocation148_spill] sm:$0xff]  ;;  %v10603_v32 = vld [vmem:[#allocation89_spill] sm:$0xff] }
 0x34d   : > { %v3563_v58 = vmul.f32 %v10600_v54, %v10599_v28  ;;  %v10602_v35 = vsub.f32 0.0, %v10601_v17  ;;  %v3683_v7 = vadd.f32 %v3667_v13, %v3282_v18  ;;  %v4038_v15 = vsub.f32 1.0, %v5030_v44  ;;  %v10604_v2 = vld [vmem:[#allocation169_spill] sm:$0xff] }
 0x34e   : > { %5037 = vpow2.f32 %v2792_v49  ;;  %v3193_v14 = vmul.f32 1.442695, %v3162_v20  ;;  %v3543_v37 = vmax.f32 %v3527_v45, 1e-06  ;;  %v4068_v56 = vmul.f32 %v4052_v50, %v8985_v8  ;;  %v10607_v8 = vld [vmem:[#allocation170_spill] sm:$0xff]  ;;  %v10609_v20 = vld [vmem:[#allocation163_spill] sm:$0xff] }
 0x34f   : > { %5039 = vrcp.f32 %v3142_v3  ;;  %v3594_v34 = vmul.f32 1.442695, %v3563_v58  ;;  %v3964_v6 = vmul.f32 %v10603_v32, %v10602_v35  ;;  %v3944_v52 = vmax.f32 %v3928_v48, 1e-06  ;;  %v10606_v3 = vld [vmem:[#allocation58_spill] sm:$0xff]  ;;  %v2568_v48 = vpop.permute.xlu1 %2567 }
 0x350   : > { %5041 = vpow2.f32 %v3193_v14  ;;  %v9070_v31 = vmul.f32 %v8507_v22, %v9033_v43  ;;  %v3653_v47 = vmul.f32 %v3637_v57, %v3445_v46  ;;  %v10605_v11 = vsub.f32 0.0, %v10604_v2  ;;  %v10610_v57 = vld [vmem:[#allocation52_spill] sm:$0xff]  ;;  %v10615_v35 = vld [vmem:[#allocation166_spill] sm:$0xff] }
 0x351   : > { %5043 = vpow2.f32 %v3594_v34  ;;  %v3995_v25 = vmul.f32 1.442695, %v3964_v6  ;;  %v2867_v18 = vmul.f32 %v2851_v33, %v9005_v63  ;;  %v3268_v45 = vmul.f32 %v3252_v61, %v9012_v27  ;;  %v10612_v33 = vld [vmem:[#allocation130_spill] sm:$0xff] }
 0x352   : > { %5045 = vrsqrt.f32 %v9016_v30  ;;  %v2763_v49 = vmul.f32 %v10606_v3, %v10605_v11  ;;  %v10608_v50 = vsub.f32 0.0, %v10607_v8  ;;  %v9082_v13 = vadd.f32 %v4068_v56, %v3683_v7  ;;  %v10621_v8 = vld [vmem:[#allocation66_spill] sm:$0xff] }
 0x353   : > { %5047 = vrsqrt.f32 %v9020_v12  ;;  %v4054_v46 = vmul.f32 %v4038_v15, %v3846_v42  ;;  %v9084_v54 = vpop.eup %5031  ;;  %v2757_v58 = vsub.f32 0.0, %v9000_v29  ;;  %v10611_v27 = vsub.f32 0.0, %v10610_v57  ;;  %v10613_v42 = vld [vmem:[#allocation88_spill] sm:$0xff] }
 0x354   : > { %v3164_v44 = vmul.f32 %v10609_v20, %v10608_v50  ;;  %5049 = vrcp.f32 %v3543_v37  ;;  %v2794_v28 = vmul.f32 1.442695, %v2763_v49  ;;  %v9090_v61 = vpop.eup %5033  ;;  %v9093_v34 = vmul.f32 %v3653_v47, %v9024_v10  ;;  %v10617_v49 = vld [vmem:[#allocation34_spill] sm:$0xff]  ;;  %v10638_v10 = vld [vmem:[#allocation153_spill] sm:$0xff] }
 0x355   : > { %5051 = vrcp.f32 %v3944_v52  ;;  %v3565_v14 = vmul.f32 %v10612_v33, %v10611_v27  ;;  %v3158_v7 = vsub.f32 0.0, %v9009_v38  ;;  %v10614_v17 = vsub.f32 0.0, %v10613_v42  ;;  %v5036_v6 = vpop.eup %5035  ;;  %v10624_v27 = vld [vmem:[#allocation142_spill] sm:$0xff] }
 0x356   : > { %v3195_v63 = vmul.f32 1.442695, %v3164_v44  ;;  %5053 = vpow2.f32 %v3995_v25  ;;  %v9099_v15 = vadd.f32 %v3268_v45, %v2867_v18  ;;  %v2631_v29 = vmul.f32 %v8486_v41, %v2568_v48  ;;  %v10618_v18 = vld [vmem:[#allocation4_spill] sm:$0xff]  ;;  %v10619_v45 = vld [vmem:[#allocation158_spill] sm:$0xff] }
 0x357   : > { %v3966_v32 = vmul.f32 %v10615_v35, %v10614_v17  ;;  %5055 = vpow2.f32 %v2794_v28  ;;  %v3596_v37 = vmul.f32 1.442695, %v3565_v14  ;;  %v9103_v52 = vmul.f32 %v4054_v46, %v9027_v1  ;;  %v10626_v17 = vld [vmem:[#allocation100_spill] sm:$0xff] }
 0x358   : > { %v5038_v56 = vpop.eup %5037  ;;  %5057 = vpow2.f32 %v3195_v63  ;;  %v3032_v11 = vmul.f32 %v8507_v22, %v2568_v48  ;;  %vm2647_vm12 = vcmp.gt.f32.partialorder %v10617_v49, 1e-12  ;;  %vm3048_vm13 = vcmp.gt.f32.partialorder %v10618_v18, 1e-12  ;;  %v10622_v63 = vld [vmem:[#allocation161_spill] sm:$0xff] }
 0x359   : > { %10616 = vst [vmem:[#allocation237_spill] sm:$0xff] %v9103_v52  ;;  %v3997_v38 = vmul.f32 1.442695, %v3966_v32  ;;  %v5040_v47 = vpop.eup %5039  ;;  %v2823_v2 = vsub.f32 1.0, %v5038_v56  ;;  %5059 = vpow2.f32 %v3596_v37  ;;  %v10620_v1 = vsub.f32 0.0, %v10619_v45  ;;  %v10627_v32 = vld [vmem:[#allocation8_spill] sm:$0xff] }
 0x35a   : > { %v5042_v3 = vpop.eup %5041  ;;  %v3433_v28 = vmul.f32 %v8525_v60, %v2568_v48  ;;  %v10623_v57 = vsub.f32 0.0, %v10622_v63  ;;  %v2789_v42 = vmul.f32 %v5036_v6, %v2757_v58  ;;  %v2679_v35 = vsel %vm2647_vm12, %v10626_v17, 0.0 }
 0x35b   : > { %5061 = vpow2.f32 %v3997_v38  ;;  %v2767_v50 = vmul.f32 %v10621_v8, %v10620_v1  ;;  %v5044_v20 = vpop.eup %5043  ;;  %v2839_v44 = vmul.f32 %v2823_v2, %v2631_v29  ;;  %v3224_v46 = vsub.f32 1.0, %v5042_v3  ;;  %v2572_v2 = vpop.permute.xlu1 %2571  ;;  %v10629_v8 = vld [vmem:[#allocation139_spill] sm:$0xff] }
 0x35c   : > { %v3168_v33 = vmul.f32 %v10624_v27, %v10623_v57  ;;  %v9117_v14 = vpop.eup %5045  ;;  %v3080_v37 = vsel %vm3048_vm13, %v10627_v32, 0.0  ;;  %v3625_v29 = vsub.f32 1.0, %v5044_v20  ;;  %v3190_v1 = vmul.f32 %v5040_v47, %v3158_v7  ;;  %v10631_v20 = vld [vmem:[#allocation127_spill] sm:$0xff]  ;;  %v10632_v27 = vld [vmem:[#allocation50_spill] sm:$0xff] }
 0x35d   : > { %10625 = vst [vmem:[#allocation240_spill] sm:$0xff] %v9117_v14  ;;  %v2798_v56 = vmul.f32 1.442695, %v2767_v50  ;;  %v9121_v38 = vpop.eup %5047  ;;  %v2855_v49 = vmul.f32 %v2839_v44, %v2679_v35  ;;  %v3240_v18 = vmul.f32 %v3224_v46, %v3032_v11  ;;  %vm3449_vm14 = vcmp.gt.f32.partialorder %v10629_v8, 1e-12  ;;  %v10630_v50 = vld [vmem:[#allocation168_spill] sm:$0xff] }
 0x35e   : > { %10628 = vst [vmem:[#allocation241_spill] sm:$0xff] %v9121_v38  ;;  %v3199_v3 = vmul.f32 1.442695, %v3168_v33  ;;  %v9123_v45 = vpop.eup %5049  ;;  %v3834_v63 = vmul.f32 %v8534_v59, %v2568_v48  ;;  %v3641_v57 = vmul.f32 %v3625_v29, %v3433_v28  ;;  %vm3850_vm15 = vcmp.gt.f32.partialorder %v10630_v50, 1e-12  ;;  %v10633_v48 = vld [vmem:[#allocation150_spill] sm:$0xff] }
 0x35f   : > { %5063 = vpow2.f32 %v2798_v56  ;;  %v9127_v58 = vpop.eup %5051  ;;  %v3256_v6 = vmul.f32 %v3240_v18, %v3080_v37  ;;  %v2820_v11 = vmul.f32 1.442695, %v2789_v42  ;;  %v3481_v46 = vsel %vm3449_vm14, %v10631_v20, 0.0  ;;  %v10634_v29 = vld [vmem:[#allocation79_spill] sm:$0xff]  ;;  %v9142_v14 = vpop.permute.xlu1 %2579 }
 0x360   : > { %5065 = vpow2.f32 %v3199_v3  ;;  %v5054_v44 = vpop.eup %5053  ;;  %v3882_v33 = vsel %vm3850_vm15, %v10632_v27, 0.0  ;;  %v2632_v7 = vmul.f32 %v8486_v41, %v2572_v2  ;;  %vm2648_vm0 = vcmp.gt.f32.partialorder %v10633_v48, 1e-12  ;;  %v10636_v3 = vld [vmem:[#allocation178_spill] sm:$0xff] }
 0x361   : > { %v5056_v47 = vpop.eup %5055  ;;  %v3272_v17 = vadd.f32 %v3256_v6, %v2855_v49  ;;  %v4026_v35 = vsub.f32 1.0, %v5054_v44  ;;  %v3033_v32 = vmul.f32 %v8507_v22, %v2572_v2  ;;  %v3221_v28 = vmul.f32 1.442695, %v3190_v1  ;;  %v10637_v44 = vld [vmem:[#allocation35_spill] sm:$0xff] }
 0x362   : > { %v5058_v37 = vpop.eup %5057  ;;  %v2824_v56 = vsub.f32 1.0, %v5056_v47  ;;  %v3434_v18 = vmul.f32 %v8525_v60, %v2572_v2  ;;  %v10635_v42 = vsub.f32 0.0, %v10634_v29  ;;  %v3657_v20 = vmul.f32 %v3641_v57, %v3481_v46  ;;  %v10640_v57 = vld [vmem:[#allocation101_spill] sm:$0xff] }
 0x363   : > { %v5060_v50 = vpop.eup %5059  ;;  %v4042_v27 = vmul.f32 %v4026_v35, %v3834_v63  ;;  %v3225_v25 = vsub.f32 1.0, %v5058_v37  ;;  %v3835_v49 = vmul.f32 %v8534_v59, %v2572_v2  ;;  %v2680_v48 = vsel %vm2648_vm0, %v10637_v44, 0.0 }
 0x364   : > { %v3569_v8 = vmul.f32 %v10636_v3, %v10635_v42  ;;  %vm3049_vm1 = vcmp.gt.f32.partialorder %v10638_v10, 1e-12  ;;  %v3626_v38 = vsub.f32 1.0, %v5060_v50  ;;  %v2840_v1 = vmul.f32 %v2824_v56, %v2632_v7  ;;  %v10639_v42 = vld [vmem:[#allocation181_spill] sm:$0xff]  ;;  %v10641_v10 = vld [vmem:[#allocation182_spill] sm:$0xff]  ;;  %v10642_v7 = vld [vmem:[#allocation172_spill] sm:$0xff] }
 0x365   : > { %v5062_v6 = vpop.eup %5061  ;;  %v3673_v47 = vadd.f32 %v3657_v20, %v3272_v17  ;;  %v3241_v12 = vmul.f32 %v3225_v25, %v3033_v32  ;;  %v3081_v3 = vsel %vm3049_vm1, %v10639_v42, 0.0  ;;  %vm3450_vm2 = vcmp.gt.f32.partialorder %v10640_v57, 1e-12  ;;  %v10643_v17 = vld [vmem:[#allocation184_spill] sm:$0xff]  ;;  %v10645_v56 = vld [vmem:[#allocation146_spill] sm:$0xff]  ;;  %v10647_v42 = vld [vmem:[#allocation197_spill] sm:$0xff] }
 0x366   : > { %v4027_v52 = vsub.f32 1.0, %v5062_v6  ;;  %v3600_v29 = vmul.f32 1.442695, %v3569_v8  ;;  %v2856_v63 = vmul.f32 %v2840_v1, %v2680_v48  ;;  %v3642_v46 = vmul.f32 %v3626_v38, %v3434_v18  ;;  %v10649_v57 = vld [vmem:[#allocation173_spill] sm:$0xff] }
 0x367   : > { %v4058_v2 = vmul.f32 %v4042_v27, %v3882_v33  ;;  %v3257_v35 = vmul.f32 %v3241_v12, %v3081_v3  ;;  %v3482_v50 = vsel %vm3450_vm2, %v10641_v10, 0.0  ;;  %vm3851_vm3 = vcmp.gt.f32.partialorder %v10642_v7, 1e-12 }
 0x368   : > { %v4043_v37 = vmul.f32 %v4027_v52, %v3835_v49  ;;  %5067 = vpow2.f32 %v3600_v29  ;;  %v2634_v25 = vmul.f32 %v8486_v41, %v9142_v14  ;;  %v10644_v32 = vsub.f32 0.0, %v10643_v17  ;;  %v10646_v52 = vld [vmem:[#allocation27_spill] sm:$0xff] }
 0x369   : > { %v5064_v44 = vpop.eup %5063  ;;  %v4074_v6 = vadd.f32 %v4058_v2, %v3673_v47  ;;  %v3273_v48 = vadd.f32 %v3257_v35, %v2856_v63  ;;  %v3658_v38 = vmul.f32 %v3642_v46, %v3482_v50  ;;  %v3035_v12 = vmul.f32 %v8507_v22, %v9142_v14  ;;  %v10651_v63 = vld [vmem:[#allocation9_spill] sm:$0xff] }
 0x36a   : > { %v3970_v8 = vmul.f32 %v10645_v56, %v10644_v32  ;;  %v5066_v20 = vpop.eup %5065  ;;  %5069 = vpow2.f32 %v2820_v11  ;;  %v3883_v33 = vsel %vm3851_vm3, %v10646_v52, 0.0  ;;  %v2826_v18 = vsub.f32 1.0, %v5064_v44  ;;  %v10652_v11 = vld [vmem:[#allocation91_spill] sm:$0xff]  ;;  %v10654_v32 = vld [vmem:[#allocation185_spill] sm:$0xff] }
 0x36b   : > { %v3674_v49 = vadd.f32 %v3658_v38, %v3273_v48  ;;  %v4059_v1 = vmul.f32 %v4043_v37, %v3883_v33  ;;  %v3227_v29 = vsub.f32 1.0, %v5066_v20  ;;  %v10648_v3 = vsub.f32 0.0, %v10647_v42  ;;  %v10657_v20 = vld [vmem:[#allocation204_spill] sm:$0xff]  ;;  %v10661_v52 = vld [vmem:[#allocation187_spill] sm:$0xff] }
 0x36c   : > { %v4001_v27 = vmul.f32 1.442695, %v3970_v8  ;;  %v10650_v7 = vsub.f32 0.0, %v9040_v9  ;;  %vm2650_vm4 = vcmp.gt.f32.partialorder %v10651_v63, 1e-12  ;;  %v2842_v46 = vmul.f32 %v2826_v18, %v2634_v25  ;;  %v10655_v8 = vld [vmem:[#allocation175_spill] sm:$0xff] }
 0x36d   : > { %v2771_v10 = vmul.f32 %v10649_v57, %v10648_v3  ;;  %v4156_v2 = vadd.f32 %v10652_v11, %v4074_v6  ;;  %v4075_v35 = vadd.f32 %v4059_v1, %v3674_v49  ;;  %v3243_v44 = vmul.f32 %v3227_v29, %v3035_v12  ;;  %v10658_v38 = vld [vmem:[#allocation160_spill] sm:$0xff]  ;;  %v10659_v25 = vld [vmem:[#allocation143_spill] sm:$0xff]  ;;  %v10663_v1 = vld [vmem:[#allocation177_spill] sm:$0xff] }
 0x36e   : > { %v3591_v47 = vmul.f32 %v9123_v45, %v10650_v7  ;;  %5071 = vpow2.f32 %v4001_v27  ;;  %v10653_v37 = vsub.f32 0.0, %v9044_v0  ;;  %v2682_v56 = vsel %vm2650_vm4, %v10654_v32, 0.0  ;;  %v10664_v3 = vld [vmem:[#allocation199_spill] sm:$0xff] }
 0x36f   : > { %v2802_v50 = vmul.f32 1.442695, %v2771_v10  ;;  %5073 = vpow2.f32 %v3221_v28  ;;  %v10656_v9 = vsub.f32 0.0, %v10655_v8  ;;  %v4157_v48 = vadd.f32 %v4156_v2, %v4075_v35  ;;  %v10662_v28 = vld [vmem:[#allocation141_spill] sm:$0xff]  ;;  %v10666_v10 = vld [vmem:[#allocation151_spill] sm:$0xff]  ;;  %v2588_v35 = vpop.permute.xlu1 %2587 }
 0x370   : > { %v3992_v17 = vmul.f32 %v9127_v58, %v10653_v37  ;;  %vm3051_vm5 = vcmp.gt.f32.partialorder %v10658_v38, 1e-12  ;;  %v10660_v6 = vsub.f32 0.0, %v10659_v25  ;;  %v2858_v33 = vmul.f32 %v2842_v46, %v2682_v56  ;;  %v10667_v2 = vld [vmem:[#allocation57_spill] sm:$0xff]  ;;  %v10672_v38 = vld [vmem:[#allocation159_spill] sm:$0xff] }
 0x371   : > { %v3172_v45 = vmul.f32 %v10657_v20, %v10656_v9  ;;  %5075 = vpow2.f32 %v2802_v50  ;;  %v3083_v18 = vsel %vm3051_vm5, %v10662_v28, 0.0  ;;  %v3436_v0 = vmul.f32 %v8525_v60, %v9142_v14  ;;  %v10669_v56 = vld [vmem:[#allocation137_spill] sm:$0xff]  ;;  %v10670_v20 = vld [vmem:[#allocation36_spill] sm:$0xff] }
 0x372   : > { %v3573_v12 = vmul.f32 %v10661_v52, %v10660_v6  ;;  %v5068_v27 = vpop.eup %5067  ;;  %v3259_v49 = vmul.f32 %v3243_v44, %v3083_v18  ;;  %v9179_v29 = vadd.f32 %v4157_v48, %v10663_v1  ;;  %v10665_v57 = vsub.f32 0.0, %v10664_v3  ;;  %v10668_v44 = vld [vmem:[#allocation157_spill] sm:$0xff]  ;;  %v10673_v52 = vld [vmem:[#allocation171_spill] sm:$0xff] }
 0x373   : > { %v3203_v58 = vmul.f32 1.442695, %v3172_v45  ;;  %v9184_v63 = vmul.f32 1.442695, %v3591_v47  ;;  %v9186_v11 = vmul.f32 1.442695, %v3992_v17  ;;  %v3837_v47 = vmul.f32 %v8534_v59, %v9142_v14 }
 0x374   : > { %v3604_v42 = vmul.f32 1.442695, %v3573_v12  ;;  %v3974_v7 = vmul.f32 %v10666_v10, %v10665_v57  ;;  %v3628_v46 = vsub.f32 1.0, %v5068_v27  ;;  %vm3452_vm6 = vcmp.gt.f32.partialorder %v10667_v2, 1e-12  ;;  %v9190_v32 = vpop.eup %5069  ;;  %v10671_v45 = vld [vmem:[#allocation147_spill] sm:$0xff] }
 0x375   : > { %5077 = vpow2.f32 %v3203_v58  ;;  %v2750_v37 = vsub.f32 0.0, %v10668_v44  ;;  %v3484_v8 = vsel %vm3452_vm6, %v10669_v56, 0.0  ;;  %vm3853_vm7 = vcmp.gt.f32.partialorder %v10670_v20, 1e-12  ;;  %v10674_v18 = vld [vmem:[#allocation59_spill] sm:$0xff]  ;;  %v10675_v58 = vld [vmem:[#allocation13_spill] sm:$0xff] }
 0x376   : > { %5079 = vpow2.f32 %v3604_v42  ;;  %v4005_v50 = vmul.f32 1.442695, %v3974_v7  ;;  %v3644_v9 = vmul.f32 %v3628_v46, %v3436_v0  ;;  %v3275_v17 = vadd.f32 %v3259_v49, %v2858_v33  ;;  %v10676_v42 = vld [vmem:[#allocation49_spill] sm:$0xff]  ;;  %v10678_v7 = vld [vmem:[#allocation11_spill] sm:$0xff] }
 0x377   : > { %v2775_v48 = vmul.f32 %v10671_v45, %v2750_v37  ;;  %v3151_v25 = vsub.f32 0.0, %v10672_v38  ;;  %v3885_v12 = vsel %vm3853_vm7, %v10673_v52, 0.0  ;;  %v2636_v28 = vmul.f32 %v8486_v41, %v2588_v35  ;;  %v10677_v49 = vld [vmem:[#allocation65_spill] sm:$0xff]  ;;  %v10679_v46 = vld [vmem:[#allocation99_spill] sm:$0xff]  ;;  %v10682_v52 = vld [vmem:[#allocation214_spill] sm:$0xff] }
 0x378   : > { %5081 = vpow2.f32 %v4005_v50  ;;  %v5072_v6 = vpop.eup %5071  ;;  %vm2652_vm8 = vcmp.gt.f32.partialorder %v10674_v18, 1e-12  ;;  %v3552_v0 = vsub.f32 0.0, %v10675_v58  ;;  %v3660_v27 = vmul.f32 %v3644_v9, %v3484_v8  ;;  %v10680_v9 = vld [vmem:[#allocation202_spill] sm:$0xff] }
 0x379   : > { %v4029_v1 = vsub.f32 1.0, %v5072_v6  ;;  %v2806_v14 = vmul.f32 1.442695, %v2775_v48  ;;  %v3176_v3 = vmul.f32 %v10676_v42, %v3151_v25  ;;  %v9203_v33 = vpop.eup %5073  ;;  %v2684_v57 = vsel %vm2652_vm8, %v10677_v49, 0.0  ;;  %v10681_v48 = vld [vmem:[#allocation23_spill] sm:$0xff] }
 0x37a   : > { %v3037_v10 = vmul.f32 %v8507_v22, %v2588_v35  ;;  %vm3053_vm9 = vcmp.gt.f32.partialorder %v10678_v7, 1e-12  ;;  %v3577_v2 = vmul.f32 %v10679_v46, %v3552_v0  ;;  %v3676_v44 = vadd.f32 %v3660_v27, %v3275_v17  ;;  %v10683_v0 = vld [vmem:[#allocation140_spill] sm:$0xff] }
 0x37b   : > { %v5076_v50 = vpop.eup %5075  ;;  %v4045_v37 = vmul.f32 %v4029_v1, %v3837_v47  ;;  %5083 = vpow2.f32 %v2806_v14  ;;  %v3207_v56 = vmul.f32 1.442695, %v3176_v3  ;;  %v3085_v20 = vsel %vm3053_vm9, %v10680_v9, 0.0  ;;  %v10684_v47 = vld [vmem:[#allocation7_spill] sm:$0xff]  ;;  %v10685_v3 = vld [vmem:[#allocation180_spill] sm:$0xff] }
 0x37c   : > { %v2828_v8 = vsub.f32 1.0, %v5076_v50  ;;  %v3608_v45 = vmul.f32 1.442695, %v3577_v2  ;;  %v3953_v38 = vsub.f32 0.0, %v10681_v48  ;;  %v3438_v6 = vmul.f32 %v8525_v60, %v2588_v35  ;;  %v10686_v7 = vld [vmem:[#allocation164_spill] sm:$0xff] }
 0x37d   : > { %v4061_v25 = vmul.f32 %v4045_v37, %v3885_v12  ;;  %5085 = vpow2.f32 %v3207_v56  ;;  %v2752_v18 = vsub.f32 0.0, %v10682_v52  ;;  %vm3454_vm10 = vcmp.gt.f32.partialorder %v10683_v0, 1e-12  ;;  %v10687_v50 = vld [vmem:[#allocation64_spill] sm:$0xff] }
 0x37e   : > { %v2844_v42 = vmul.f32 %v2828_v8, %v2636_v28  ;;  %5087 = vpow2.f32 %v3608_v45  ;;  %v3978_v17 = vmul.f32 %v10684_v47, %v3953_v38  ;;  %v3486_v49 = vsel %vm3454_vm10, %v10685_v3, 0.0  ;;  %v2596_v45 = vpop.permute.xlu1 %2595  ;;  %v10693_v3 = vld [vmem:[#allocation193_spill] sm:$0xff] }
 0x37f   : > { %v5078_v58 = vpop.eup %5077  ;;  %v4077_v1 = vadd.f32 %v4061_v25, %v3676_v44  ;;  %v2779_v46 = vmul.f32 %v10686_v7, %v2752_v18  ;;  %v3839_v2 = vmul.f32 %v8534_v59, %v2588_v35  ;;  %vm3855_vm11 = vcmp.gt.f32.partialorder %v10687_v50, 1e-12  ;;  %v10688_v25 = vld [vmem:[#allocation216_spill] sm:$0xff]  ;;  %v10689_v18 = vld [vmem:[#allocation102_spill] sm:$0xff] }
 0x380   : > { %v5080_v27 = vpop.eup %5079  ;;  %v3229_v14 = vsub.f32 1.0, %v5078_v58  ;;  %v4009_v37 = vmul.f32 1.442695, %v3978_v17  ;;  %v2860_v8 = vmul.f32 %v2844_v42, %v2684_v57  ;;  %v3153_v52 = vsub.f32 0.0, %v10688_v25  ;;  %v10697_v25 = vld [vmem:[#allocation25_spill] sm:$0xff] }
 0x381   : > { %v3630_v12 = vsub.f32 1.0, %v5080_v27  ;;  %v4159_v28 = vadd.f32 %v9179_v29, %v4077_v1  ;;  %v2810_v48 = vmul.f32 1.442695, %v2779_v46  ;;  %v3887_v0 = vsel %vm3855_vm11, %v10689_v18, 0.0  ;;  %v10690_v27 = vld [vmem:[#allocation156_spill] sm:$0xff]  ;;  %v10691_v29 = vld [vmem:[#allocation191_spill] sm:$0xff] }
 0x382   : > { %v5082_v56 = vpop.eup %5081  ;;  %v3245_v9 = vmul.f32 %v3229_v14, %v3037_v10  ;;  %5089 = vpow2.f32 %v4009_v37  ;;  %v2638_v17 = vmul.f32 %v8486_v41, %v2596_v45  ;;  %vm2654_vm12 = vcmp.gt.f32.partialorder %v10690_v27, 1e-12  ;;  %v10692_v1 = vld [vmem:[#allocation97_spill] sm:$0xff]  ;;  %v10698_v27 = vld [vmem:[#allocation30_spill] sm:$0xff] }
 0x383   : > { %v3646_v38 = vmul.f32 %v3630_v12, %v3438_v6  ;;  %v4031_v44 = vsub.f32 1.0, %v5082_v56  ;;  %v4160_v35 = vadd.f32 %v4159_v28, %v8874_v36  ;;  %5091 = vpow2.f32 %v2810_v48  ;;  %v10694_v12 = vld [vmem:[#allocation43_spill] sm:$0xff]  ;;  %v10695_v56 = vld [vmem:[#allocation82_spill] sm:$0xff] }
 0x384   : > { %v3261_v58 = vmul.f32 %v3245_v9, %v3085_v20  ;;  %v3180_v57 = vmul.f32 %v10691_v29, %v3153_v52  ;;  %v2686_v14 = vsel %vm2654_vm12, %v10692_v1, 0.0  ;;  %v3554_v7 = vsub.f32 0.0, %v10693_v3  ;;  %v10696_v9 = vld [vmem:[#allocation154_spill] sm:$0xff]  ;;  %v10699_v1 = vld [vmem:[#allocation212_spill] sm:$0xff] }
 0x385   : > { %v4047_v47 = vmul.f32 %v4031_v44, %v3839_v2  ;;  %v5084_v10 = vpop.eup %5083  ;;  %v3662_v6 = vmul.f32 %v3646_v38, %v3486_v49  ;;  %v3039_v46 = vmul.f32 %v8507_v22, %v2596_v45  ;;  %vm3055_vm13 = vcmp.gt.f32.partialorder %v10694_v12, 1e-12 }
 0x386   : > { %v3277_v42 = vadd.f32 %v3261_v58, %v2860_v8  ;;  %v2830_v20 = vsub.f32 1.0, %v5084_v10  ;;  %v3211_v36 = vmul.f32 1.442695, %v3180_v57  ;;  %v3440_v37 = vmul.f32 %v8525_v60, %v2596_v45 }
 0x387   : > { %v5086_v2 = vpop.eup %5085  ;;  %v3581_v28 = vmul.f32 %v10695_v56, %v3554_v7  ;;  %v3955_v48 = vsub.f32 0.0, %v10696_v9  ;;  %v4063_v49 = vmul.f32 %v4047_v47, %v3887_v0  ;;  %v3087_v52 = vsel %vm3055_vm13, %v10697_v25, 0.0 }
 0x388   : > { %v3678_v50 = vadd.f32 %v3662_v6, %v3277_v42  ;;  %v5088_v8 = vpop.eup %5087  ;;  %v2846_v38 = vmul.f32 %v2830_v20, %v2638_v17  ;;  %v3231_v44 = vsub.f32 1.0, %v5086_v2  ;;  %5093 = vpow2.f32 %v3211_v36  ;;  %v2604_v6 = vpop.permute.xlu1 %2603  ;;  %v10700_v20 = vld [vmem:[#allocation44_spill] sm:$0xff]  ;;  %v10701_v36 = vld [vmem:[#allocation215_spill] sm:$0xff] }
 0x389   : > { %v3632_v58 = vsub.f32 1.0, %v5088_v8  ;;  %v3612_v18 = vmul.f32 1.442695, %v3581_v28  ;;  %v3982_v29 = vmul.f32 %v10698_v27, %v3955_v48  ;;  %v2754_v3 = vsub.f32 0.0, %v10699_v1  ;;  %v10703_v8 = vld [vmem:[#allocation33_spill] sm:$0xff] }
 0x38a   : > { %v4079_v57 = vadd.f32 %v4063_v49, %v3678_v50  ;;  %v2862_v10 = vmul.f32 %v2846_v38, %v2686_v14  ;;  %v3247_v42 = vmul.f32 %v3231_v44, %v3039_v46  ;;  %v3841_v12 = vmul.f32 %v8534_v59, %v2596_v45  ;;  %v10702_v50 = vld [vmem:[#allocation129_spill] sm:$0xff]  ;;  %v10704_v38 = vld [vmem:[#allocation196_spill] sm:$0xff] }
 0x38b   : > { %v3648_v7 = vmul.f32 %v3632_v58, %v3440_v37  ;;  %5095 = vpow2.f32 %v3612_v18  ;;  %v4013_v0 = vmul.f32 1.442695, %v3982_v29  ;;  %vm3456_vm14 = vcmp.gt.f32.partialorder %v10700_v20, 1e-12 }
 0x38c   : > { %v5090_v47 = vpop.eup %5089  ;;  %5097 = vpow2.f32 %v9184_v63  ;;  %v3263_v17 = vmul.f32 %v3247_v42, %v3087_v52  ;;  %v2783_v2 = vmul.f32 %v10701_v36, %v2754_v3  ;;  %v3488_v14 = vsel %vm3456_vm14, %v10702_v50, 0.0  ;;  %v10705_v52 = vld [vmem:[#allocation6_spill] sm:$0xff]  ;;  %v10706_v42 = vld [vmem:[#allocation37_spill] sm:$0xff]  ;;  %v10712_v50 = vld [vmem:[#allocation219_spill] sm:$0xff] }
 0x38d   : > { %v5092_v56 = vpop.eup %5091  ;;  %v4033_v46 = vsub.f32 1.0, %v5090_v47  ;;  %v2640_v28 = vmul.f32 %v8486_v41, %v2604_v6  ;;  %5099 = vpow2.f32 %v4013_v0  ;;  %v4161_v37 = vadd.f32 %v4160_v35, %v4079_v57  ;;  %v10707_v35 = vld [vmem:[#allocation83_spill] sm:$0xff]  ;;  %v10710_v0 = vld [vmem:[#allocation93_spill] sm:$0xff] }
 0x38e   : > { %v3279_v9 = vadd.f32 %v3263_v17, %v2862_v10  ;;  %v3664_v45 = vmul.f32 %v3648_v7, %v3488_v14  ;;  %v2814_v48 = vmul.f32 1.442695, %v2783_v2  ;;  %vm3857_vm15 = vcmp.gt.f32.partialorder %v10703_v8, 1e-12  ;;  %v10708_v7 = vld [vmem:[#allocation103_spill] sm:$0xff]  ;;  %v10711_v2 = vld [vmem:[#allocation218_spill] sm:$0xff] }
 0x38f   : > { %v4049_v49 = vmul.f32 %v4033_v46, %v3841_v12  ;;  %v2832_v63 = vsub.f32 1.0, %v5092_v56  ;;  %v3155_v44 = vsub.f32 0.0, %v10704_v38  ;;  %v3889_v58 = vsel %vm3857_vm15, %v10705_v52, 0.0  ;;  %v10709_v12 = vld [vmem:[#allocation152_spill] sm:$0xff] }
 0x390   : > { %v3680_v25 = vadd.f32 %v3664_v45, %v3279_v9  ;;  %v3041_v18 = vmul.f32 %v8507_v22, %v2604_v6  ;;  %5101 = vpow2.f32 %v2814_v48  ;;  %v3556_v57 = vsub.f32 0.0, %v10707_v35  ;;  %v10713_v46 = vld [vmem:[#allocation72_spill] sm:$0xff]  ;;  %v10714_v45 = vld [vmem:[#allocation95_spill] sm:$0xff]  ;;  %v2612_v35 = vpop.permute.xlu1 %2611 }
 0x391   : > { %v4065_v27 = vmul.f32 %v4049_v49, %v3889_v58  ;;  %v2848_v29 = vmul.f32 %v2832_v63, %v2640_v28  ;;  %v3184_v1 = vmul.f32 %v10706_v42, %v3155_v44  ;;  %v4162_v3 = vadd.f32 %v4161_v37, %v8947_v55 }
 0x392   : > { %v5094_v10 = vpop.eup %5093  ;;  %vm2656_vm0 = vcmp.gt.f32.partialorder %v10708_v7, 1e-12  ;;  %vm3057_vm1 = vcmp.gt.f32.partialorder %v10709_v12, 1e-12  ;;  %v3957_v47 = vsub.f32 0.0, %v10710_v0  ;;  %v3585_v56 = vmul.f32 %v10711_v2, %v3556_v57  ;;  %v10716_v7 = vld [vmem:[#allocation81_spill] sm:$0xff] }
 0x393   : > { %v4081_v17 = vadd.f32 %v4065_v27, %v3680_v25  ;;  %v3233_v20 = vsub.f32 1.0, %v5094_v10  ;;  %v3215_v36 = vmul.f32 1.442695, %v3184_v1  ;;  %v2688_v14 = vsel %vm2656_vm0, %v10712_v50, 0.0  ;;  %v10715_v1 = vld [vmem:[#allocation183_spill] sm:$0xff] }
 0x394   : > { %v3089_v28 = vsel %vm3057_vm1, %v10713_v46, 0.0  ;;  %v3442_v9 = vmul.f32 %v8525_v60, %v2604_v6  ;;  %v3986_v48 = vmul.f32 %v10714_v45, %v3957_v47  ;;  %v2864_v37 = vmul.f32 %v2848_v29, %v2688_v14  ;;  %v10717_v0 = vld [vmem:[#allocation71_spill] sm:$0xff] }
 0x395   : > { %v5096_v55 = vpop.eup %5095  ;;  %v3249_v8 = vmul.f32 %v3233_v20, %v3041_v18  ;;  %5103 = vpow2.f32 %v3215_v36  ;;  %v3616_v49 = vmul.f32 1.442695, %v3585_v56  ;;  %v3843_v44 = vmul.f32 %v8534_v59, %v2604_v6  ;;  %v10718_v36 = vld [vmem:[#allocation205_spill] sm:$0xff] }
 0x396   : > { %v9257_v63 = vpop.eup %5097  ;;  %v3634_v38 = vsub.f32 1.0, %v5096_v55  ;;  %v4017_v25 = vmul.f32 1.442695, %v3986_v48  ;;  %v2756_v52 = vsub.f32 0.0, %v8845_v26  ;;  %v4163_v27 = vadd.f32 %v4162_v3, %v4081_v17 }
 0x397   : > { %v5100_v58 = vpop.eup %5099  ;;  %v3265_v42 = vmul.f32 %v3249_v8, %v3089_v28  ;;  %vm3458_vm2 = vcmp.gt.f32.partialorder %v10715_v1, 1e-12  ;;  %5105 = vpow2.f32 %v3616_v49  ;;  %vm3859_vm3 = vcmp.gt.f32.partialorder %v10717_v0, 1e-12  ;;  %v10719_v8 = vld [vmem:[#allocation208_spill] sm:$0xff] }
 0x398   : > { %v3650_v57 = vmul.f32 %v3634_v38, %v3442_v9  ;;  %v4035_v29 = vsub.f32 1.0, %v5100_v58  ;;  %5107 = vpow2.f32 %v4017_v25  ;;  %v2787_v18 = vmul.f32 %v8940_v51, %v2756_v52  ;;  %v10720_v25 = vld [vmem:[#allocation176_spill] sm:$0xff]  ;;  %v10721_v58 = vld [vmem:[#allocation165_spill] sm:$0xff] }
 0x399   : > { %v3281_v10 = vadd.f32 %v3265_v42, %v2864_v37  ;;  %v3490_v12 = vsel %vm3458_vm2, %v10716_v7, 0.0  ;;  %v3157_v6 = vsub.f32 0.0, %v8849_v23  ;;  %vm2661_vm4 = vcmp.gt.f32.partialorder %v8989_v62, 1e-12 }
 0x39a   : > { %v5102_v26 = vpop.eup %5101  ;;  %v3666_v3 = vmul.f32 %v3650_v57, %v3490_v12  ;;  %v4051_v47 = vmul.f32 %v4035_v29, %v3843_v44  ;;  %v2642_v17 = vmul.f32 %v8486_v41, %v2612_v35  ;;  %v2818_v20 = vmul.f32 1.442695, %v2787_v18  ;;  %v2620_v57 = vpop.permute.xlu1 %2619 }
 0x39b   : > { %v3891_v2 = vsel %vm3859_vm3, %v10718_v36, 0.0  ;;  %v4164_v56 = vadd.f32 %v4163_v27, %v9035_v16  ;;  %v3188_v51 = vmul.f32 %v8945_v53, %v3157_v6  ;;  %v3558_v50 = vsub.f32 0.0, %v8858_v4  ;;  %v10723_v6 = vld [vmem:[#allocation194_spill] sm:$0xff] }
 0x39c   : > { %v3682_v14 = vadd.f32 %v3666_v3, %v3281_v10  ;;  %v4067_v46 = vmul.f32 %v4051_v47, %v3891_v2  ;;  %v2834_v28 = vsub.f32 1.0, %v5102_v26  ;;  %5109 = vpow2.f32 %v2818_v20  ;;  %v10722_v10 = vld [vmem:[#allocation113_spill] sm:$0xff]  ;;  %v10724_v3 = vld [vmem:[#allocation211_spill] sm:$0xff]  ;;  %v10725_v2 = vld [vmem:[#allocation210_spill] sm:$0xff] }
 0x39d   : > { %v2837_v23 = vsub.f32 1.0, %v9190_v32  ;;  %5111 = vpow2.f32 %v9186_v11  ;;  %v3219_v9 = vmul.f32 1.442695, %v3188_v51  ;;  %v3589_v45 = vmul.f32 %v8951_v19, %v3558_v50  ;;  %v10726_v50 = vld [vmem:[#allocation226_spill] sm:$0xff] }
 0x39e   : > { %vm3062_vm5 = vcmp.gt.f32.partialorder %v8994_v21, 1e-12  ;;  %v4083_v48 = vadd.f32 %v4067_v46, %v3682_v14  ;;  %v2850_v55 = vmul.f32 %v2834_v28, %v2642_v17  ;;  %v3043_v16 = vmul.f32 %v8507_v22, %v2612_v35 }
 0x39f   : > { %v3959_v53 = vsub.f32 0.0, %v8864_v39  ;;  %v5104_v4 = vpop.eup %5103  ;;  %v3238_v37 = vsub.f32 1.0, %v9203_v33  ;;  %vm2658_vm6 = vcmp.gt.f32.partialorder %v10719_v8, 1e-12  ;;  %5113 = vpow2.f32 %v3219_v9 }
 0x3a0   : > { %v3620_v32 = vmul.f32 1.442695, %v3589_v45  ;;  %v4165_v49 = vadd.f32 %v4164_v56, %v4083_v48  ;;  %v3235_v11 = vsub.f32 1.0, %v5104_v4  ;;  %v3444_v38 = vmul.f32 %v8525_v60, %v2612_v35 }
 0x3a1   : > { %v3990_v19 = vmul.f32 %v8954_v5, %v3959_v53  ;;  %v5106_v44 = vpop.eup %5105  ;;  %v2690_v52 = vsel %vm2658_vm6, %v10720_v25, 0.0  ;;  %vm3059_vm7 = vcmp.gt.f32.partialorder %v10721_v58, 1e-12  ;;  %v3845_v39 = vmul.f32 %v8534_v59, %v2612_v35 }
 0x3a2   : > { %5115 = vpow2.f32 %v3620_v32  ;;  %v5108_v27 = vpop.eup %5107  ;;  %v2866_v33 = vmul.f32 %v2850_v55, %v2690_v52  ;;  %v3251_v42 = vmul.f32 %v3235_v11, %v3043_v16  ;;  %v3636_v1 = vsub.f32 1.0, %v5106_v44  ;;  %v10727_v32 = vld [vmem:[#allocation39_spill] sm:$0xff]  ;;  %v10729_v44 = vld [vmem:[#allocation29_spill] sm:$0xff]  ;;  %v10730_v52 = vld [vmem:[#allocation240_spill] sm:$0xff] }
 0x3a3   : > { %v4021_v29 = vmul.f32 1.442695, %v3990_v19  ;;  %v2693_v18 = vsel %vm2661_vm4, %v9084_v54, 0.0  ;;  %v2853_v5 = vmul.f32 %v2837_v23, %v9048_v24  ;;  %v3091_v7 = vsel %vm3059_vm7, %v10722_v10, 0.0  ;;  %v10733_v10 = vld [vmem:[#allocation235_spill] sm:$0xff] }
 0x3a4   : > { %v4037_v12 = vsub.f32 1.0, %v5108_v27  ;;  %v3267_v0 = vmul.f32 %v3251_v42, %v3091_v7  ;;  %vm3460_vm8 = vcmp.gt.f32.partialorder %v10723_v6, 1e-12  ;;  %v3652_v35 = vmul.f32 %v3636_v1, %v3444_v38  ;;  %v10731_v27 = vld [vmem:[#allocation232_spill] sm:$0xff]  ;;  %v10736_v6 = vld [vmem:[#allocation241_spill] sm:$0xff] }
 0x3a5   : > { %5117 = vpow2.f32 %v4021_v29  ;;  %vm3463_vm9 = vcmp.gt.f32.partialorder %v9016_v30, 1e-12  ;;  %v3254_v26 = vmul.f32 %v3238_v37, %v9070_v31  ;;  %v3492_v47 = vsel %vm3460_vm8, %v10724_v3, 0.0  ;;  %v10732_v29 = vld [vmem:[#allocation236_spill] sm:$0xff]  ;;  %v10735_v30 = vld [vmem:[#allocation223_spill] sm:$0xff]  ;;  %v10737_v3 = vld [vmem:[#allocation233_spill] sm:$0xff] }
 0x3a6   : > { %v4053_v17 = vmul.f32 %v4037_v12, %v3845_v39  ;;  %v2644_v62 = vmul.f32 %v8486_v41, %v2620_v57  ;;  %v5110_v54 = vpop.eup %5109  ;;  %v3447_v24 = vmul.f32 %v8525_v60, %v9033_v43  ;;  %v3283_v20 = vadd.f32 %v3267_v0, %v2866_v33 }
 0x3a7   : > { %v3668_v36 = vmul.f32 %v3652_v35, %v3492_v47  ;;  %vm3861_vm10 = vcmp.gt.f32.partialorder %v10725_v2, 1e-12  ;;  %v5112_v56 = vpop.eup %5111  ;;  %v3094_v51 = vsel %vm3062_vm5, %v9090_v61, 0.0  ;;  %v3639_v31 = vsub.f32 1.0, %v9257_v63 }
 0x3a8   : > { %v3893_v14 = vsel %vm3861_vm10, %v10726_v50, 0.0  ;;  %v2836_v46 = vsub.f32 1.0, %v5110_v54  ;;  %v4166_v23 = vadd.f32 %v4165_v49, %v9082_v13  ;;  %v3045_v9 = vmul.f32 %v8507_v22, %v2620_v57  ;;  %v10728_v49 = vld [vmem:[#allocation179_spill] sm:$0xff] }
 0x3a9   : > { %v3684_v28 = vadd.f32 %v3668_v36, %v3283_v20  ;;  %v4069_v41 = vmul.f32 %v4053_v17, %v3893_v14  ;;  %v5114_v45 = vpop.eup %5113  ;;  %v3685_v48 = vadd.f32 %v9093_v34, %v9099_v15  ;;  %v2869_v55 = vmul.f32 %v2853_v5, %v2693_v18 }
 0x3aa   : > { %v3270_v16 = vmul.f32 %v3254_v26, %v3094_v51  ;;  %v2852_v53 = vmul.f32 %v2836_v46, %v2644_v62  ;;  %vm2660_vm11 = vcmp.gt.f32.partialorder %v8824_v40, 1e-12  ;;  %v3237_v61 = vsub.f32 1.0, %v5114_v45 }
 0x3ab   : > { %v4085_v21 = vadd.f32 %v4069_v41, %v3684_v28  ;;  %v3446_v63 = vmul.f32 %v8525_v60, %v2620_v57  ;;  %v4040_v37 = vsub.f32 1.0, %v5112_v56  ;;  %v3655_v8 = vmul.f32 %v3639_v31, %v3447_v24 }
 0x3ac   : > { %v5116_v4 = vpop.eup %5115  ;;  %v2692_v13 = vsel %vm2660_vm11, %v10727_v32, 0.0  ;;  %vm3061_vm12 = vcmp.gt.f32.partialorder %v10728_v49, 1e-12  ;;  %v3253_v38 = vmul.f32 %v3237_v61, %v3045_v9  ;;  %v3286_v15 = vadd.f32 %v3270_v16, %v2869_v55 }
 0x3ad   : > { %v4167_v22 = vadd.f32 %v4166_v23, %v4085_v21  ;;  %v2868_v11 = vmul.f32 %v2852_v53, %v2692_v13  ;;  %v3638_v34 = vsub.f32 1.0, %v5116_v4  ;;  %v3848_v19 = vmul.f32 %v8534_v59, %v9033_v43 }
 0x3ae   : > { %v3093_v40 = vsel %vm3061_vm12, %v10729_v44, 0.0  ;;  %v3847_v25 = vmul.f32 %v8534_v59, %v2620_v57  ;;  %v3495_v58 = vsel %vm3463_vm9, %v10730_v52, 0.0  ;;  %vm3462_vm13 = vcmp.gt.f32.partialorder %v10731_v27, 1e-12  ;;  %v10734_v59 = vld [vmem:[#allocation237_spill] sm:$0xff] }
 0x3af   : > { %v5118_v60 = vpop.eup %5117  ;;  %v3269_v39 = vmul.f32 %v3253_v38, %v3093_v40  ;;  %v3654_v33 = vmul.f32 %v3638_v34, %v3446_v63  ;;  %v3671_v42 = vmul.f32 %v3655_v8, %v3495_v58  ;;  %v4056_v1 = vmul.f32 %v4040_v37, %v3848_v19 }
 0x3b0   : > { %v3494_v18 = vsel %vm3462_vm13, %v10732_v29, 0.0  ;;  %v4039_v5 = vsub.f32 1.0, %v5118_v60  ;;  %vm3864_vm14 = vcmp.gt.f32.partialorder %v10733_v10, 1e-12  ;;  %v4086_v57 = vadd.f32 %v10734_v59, %v3685_v48 }
 0x3b1   : > { %v3285_v43 = vadd.f32 %v3269_v39, %v2868_v11  ;;  %v3670_v7 = vmul.f32 %v3654_v33, %v3494_v18  ;;  %v3687_v12 = vadd.f32 %v3671_v42, %v3286_v15  ;;  %vm3863_vm15 = vcmp.gt.f32.partialorder %v10735_v30, 1e-12 }
 0x3b2   : > { %v4055_v0 = vmul.f32 %v4039_v5, %v3847_v25  ;;  %v3896_v35 = vsel %vm3864_vm14, %v10736_v6, 0.0  ;;  %v3895_v47 = vsel %vm3863_vm15, %v10737_v3, 0.0  ;;  %v4168_v54 = vadd.f32 %v4167_v22, %v4086_v57 }
 0x3b3   : > { %v3686_v26 = vadd.f32 %v3670_v7, %v3285_v43  ;;  %v4072_v17 = vmul.f32 %v4056_v1, %v3896_v35 }
 0x3b4   : > { %v4071_v62 = vmul.f32 %v4055_v0, %v3895_v47 }
 0x3b5   : > { %v4088_v24 = vadd.f32 %v4072_v17, %v3687_v12 }
 0x3b6   : > { %v4087_v20 = vadd.f32 %v4071_v62, %v3686_v26 }
 0x3b8   : > { %v4169_v36 = vadd.f32 %v4168_v54, %v4087_v20 }
 0x3ba   : > { %v4170_v2 = vadd.f32 %v4169_v36, %v4088_v24 }
 0x3bc   : > { %v4171_v56 = vrot.slane %v4170_v2, 4 }
 0x3be   : > { %v4172_v51 = vadd.f32 %v4171_v56, %v4170_v2 }
 0x3c0   : > { %v4173_v31 = vrot.slane %v4172_v51, 2 }
 0x3c2   : > { %v4174_v50 = vadd.f32 %v4173_v31, %v4172_v51 }
 0x3c4   : > { %v4175_v14 = vrot.slane %v4174_v50, 1 }
 0x3c6   : > { %v4176_v46 = vadd.f32 %v4175_v14, %v4174_v50 }
 0x3c8   : > { %4177 = vst [vmem:[%s220_s3] sm:$0x1] %v4176_v46 }
 0x3c9 PF: > { %s12_s13 = sadd.s32 1, %s5177_s13   ;;  %s10738_s9 = smov %s5169_s11 }
 0x3ca   : > { %p9_p8 = scmp.ge.s32.totalorder %s12_s13, 6   ;;  %s10739_s10 = smov %s5173_s12 }
 0x3cb   : > { %s10740_s11 = smov %s10743_s14  ;;  %s10741_s12 = smov %s10747_s15 }
 0x3cc   :  { %11 = sbr.rel (!%p9_p8) target bundleno = 3 (0x3), region = 69 }

</bundles_post_ra>
